<compile_context>
chip_gen: v6e
topology: v6e:2x2x1
jax: 0.10.0
libtpu: 0.0.40
codegen_flags: <defaults>
</compile_context>

<pallas_src>
import math

import jax
import jax.numpy as jnp
from jax import lax
from jax.experimental import pallas as pl
from jax.experimental.pallas import tpu as pltpu

D_MODEL = 512                 # mlp_dim; the attention Linear(512,128) hard-codes 512
D_INNER = 2 * D_MODEL         # expand = 2
D_STATE = 16
D_CONV = 4
DT_RANK = D_MODEL // 16       # "auto" dt_rank
ATT_D = 128
ATT_K = 1
N_LAYERS = 2                  # Mamba, Mamba2


def _sigmoid(v):
    return 1.0 / (1.0 + jnp.exp(-v))


def _softplus(v):
    return jnp.maximum(v, 0.0) + jnp.log(1.0 + jnp.exp(-jnp.abs(v)))


# ----------------------------------------------------------------------------
# Fused kernel: grid=(2,) over the two Mamba layers; attention weights computed
# on step 0, pooling epilogue on the last step.
# ----------------------------------------------------------------------------
def fused_mamba_attn_kernel(
        # inputs -------------------------------------------------------------
        x_ref,          # (N, d_model) f32                original sequence (resident)
        w_in_q_ref,     # (d_model, 2*d_inner) int8       per-layer (stacked, index l)
        w_in_s_ref,     # (1, 2*d_inner) f32               per-out-channel scale
        conv_w_ref,     # (d_conv, d_inner) f32
        conv_b_ref,     # (1, d_inner) f32
        w_x_ref,        # (d_inner, dt_rank+2*d_state) bf16
        w_dt_ref,       # (dt_rank, d_inner) bf16
        b_dt_ref,       # (1, d_inner) f32
        a_log_ref,      # (d_state, d_inner) f32
        d_ref,          # (1, d_inner) f32
        w_out_q_ref,    # (d_inner, d_model) int8
        w_out_s_ref,    # (1, d_model) f32
        w1_ref,         # (d_model, att_d) bf16            attention MLP (resident)
        b1_ref,         # (1, att_d) f32
        w2_ref,         # (att_k, att_d) f32
        # outputs ------------------------------------------------------------
        out_ref,        # (1, d_model) f32                 Y_prob
        # scratch ------------------------------------------------------------
        feat_ref,       # (N, d_model) f32                 layer input/output carry
        attn_ref):      # (N, 1) f32                       softmax attention weights
    layer = pl.program_id(0)
    n_layers = pl.num_programs(0)
    N = x_ref.shape[0]
    d_inner = conv_b_ref.shape[1]
    d_state = a_log_ref.shape[0]
    dt_rank = w_dt_ref.shape[0]
    d_conv = conv_w_ref.shape[0]

    @pl.when(layer == 0)
    def _init():
        feat_ref[...] = x_ref[...]              # layer-1 input = original sequence
        # Gated-attention softmax weights depend only on x and the shared attention
        # weights -> compute them here so layer-2's weight DMA hides behind step 0.
        xs = x_ref[...]
        hdn = jnp.tanh(jnp.dot(xs.astype(jnp.bfloat16), w1_ref[...],
                               preferred_element_type=jnp.float32)
                       + b1_ref[...])                           # (N, att_d)
        logits = jnp.sum(hdn * w2_ref[...], axis=1, keepdims=True)   # (N, 1)
        logits = logits - jnp.max(logits)                       # softmax over tokens
        p = jnp.exp(logits)
        attn_ref[...] = p / jnp.sum(p)

    seq_in = feat_ref[...]                      # (N, d_model) current layer input

    # ---- in_proj: int8 weight DMA, VPU dequant to bf16 (exact), f32 MXU accum,
    #      per-output-channel scale applied to the small accumulator ----------
    w_in_b = w_in_q_ref[...].astype(jnp.float32).astype(jnp.bfloat16)
    xz = jnp.dot(seq_in.astype(jnp.bfloat16), w_in_b,
                 preferred_element_type=jnp.float32) * w_in_s_ref[...]  # (N, 2*d_inner)
    xin = xz[:, :d_inner]
    z = xz[:, d_inner:]

    # ---- causal depthwise conv1d (kernel=d_conv) + SiLU, on the VPU --------
    cw = conv_w_ref[...]
    row = lax.broadcasted_iota(jnp.int32, (N, d_inner), 0)
    conv = xin * cw[d_conv - 1:d_conv, :]                       # shift-0 tap
    for k in range(d_conv - 1):                                 # static unroll over taps
        shift = d_conv - 1 - k
        rolled = pltpu.roll(xin, shift=shift, axis=0)           # rolled[t] = xin[t-shift]
        conv = conv + jnp.where(row >= shift, rolled, 0.0) * cw[k:k + 1, :]
    conv = conv + conv_b_ref[...]
    xc = conv * _sigmoid(conv)                                  # SiLU -> SSM input u

    # ---- x_proj (dt / B / C) and dt_proj + softplus ------------------------
    dbc = jnp.dot(xc.astype(jnp.bfloat16), w_x_ref[...],
                  preferred_element_type=jnp.float32)           # (N, dt_rank+2*d_state)
    dt_low = dbc[:, :dt_rank]
    dt = _softplus(jnp.dot(dt_low.astype(jnp.bfloat16), w_dt_ref[...],
                           preferred_element_type=jnp.float32)
                   + b_dt_ref[...])                             # (N, d_inner)
    B_b = dbc[:, dt_rank:dt_rank + d_state].astype(jnp.bfloat16)        # (N, d_state)
    C_b = dbc[:, dt_rank + d_state:dt_rank + 2 * d_state].astype(jnp.bfloat16)

    A_T = -jnp.exp(a_log_ref[...])                              # (d_state, d_inner)
    dtx_b = (dt * xc).astype(jnp.bfloat16)                      # (N, d_inner)

    # ---- selective scan: no VMEM scratch round trips; only the (16,1024) h
    #      accumulator is carried.  Per-step dA / dBx / y_t are independent of
    #      h (or off the serial chain) so the LLO scheduler overlaps them with
    #      the previous step's FMA. ------------------------------------------
    h = jnp.zeros((d_state, d_inner), jnp.float32)
    ys = []
    for t in range(N):                                          # static unroll (N tiny)
        dA_t = jnp.exp(dt[t:t + 1, :] * A_T)                    # (d_state, d_inner)
        dBx_t = lax.dot_general(                                # outer(B_t, dt_t*x_t)
            B_b[t:t + 1, :], dtx_b[t:t + 1, :],
            dimension_numbers=(((0,), (0,)), ((), ())),
            preferred_element_type=jnp.float32)                 # (d_state, d_inner)
        h = dA_t * h + dBx_t                                    # serial VPU FMA
        ys.append(jnp.dot(C_b[t:t + 1, :], h.astype(jnp.bfloat16),
                          preferred_element_type=jnp.float32))  # (1, d_inner), off-chain

    # ---- skip, gate, out_proj (int8 dequant + scale, as for in_proj) -------
    y = jnp.concatenate(ys, axis=0) + d_ref[...] * xc           # (N, d_inner)
    y = y * (z * _sigmoid(z))                                   # SiLU gate
    w_out_b = w_out_q_ref[...].astype(jnp.float32).astype(jnp.bfloat16)
    new_feat = jnp.dot(y.astype(jnp.bfloat16), w_out_b,
                       preferred_element_type=jnp.float32) * w_out_s_ref[...]
    feat_ref[...] = new_feat                                    # carry to next layer

    # ---- epilogue on the last layer: attention-weighted pooling ------------
    @pl.when(layer == n_layers - 1)
    def _epilogue():
        out_ref[...] = jnp.sum(attn_ref[...] * new_feat, axis=0, keepdims=True)


# ----------------------------------------------------------------------------
# Wrapper
# ----------------------------------------------------------------------------
def mamba_block_my_forward(x, params):
    """x: (1, N, D_MODEL) f32 -> Y_prob (1, D_MODEL) f32 (mask_enable=False path)."""
    # TODO(synk): masking()/mask_enable=True path (torch.gather token masking) not implemented.
    xs = x[0]
    N = xs.shape[0]
    m1, m2, att = params["mamba1"], params["mamba2"], params["attn"]
    stk = {k: jnp.stack([m1[k], m2[k]]) for k in m1}       # (2, ...) per-layer weights

    def per_layer(bs):
        return pl.BlockSpec((None,) + bs, lambda l: (l, 0, 0))

    def shared(bs):
        return pl.BlockSpec(bs, lambda l: (0, 0))

    grid_spec = pltpu.PrefetchScalarGridSpec(
        num_scalar_prefetch=0,
        grid=(N_LAYERS,),
        in_specs=[
            shared((N, D_MODEL)),                            # x (resident)
            per_layer((D_MODEL, 2 * D_INNER)),               # w_in_q  (int8)
            per_layer((1, 2 * D_INNER)),                     # w_in_s
            per_layer((D_CONV, D_INNER)),                    # conv_w
            per_layer((1, D_INNER)),                         # conv_b
            per_layer((D_INNER, DT_RANK + 2 * D_STATE)),     # w_x     (bf16)
            per_layer((DT_RANK, D_INNER)),                   # w_dt    (bf16)
            per_layer((1, D_INNER)),                         # b_dt
            per_layer((D_STATE, D_INNER)),                   # a_log
            per_layer((1, D_INNER)),                         # d
            per_layer((D_INNER, D_MODEL)),                   # w_out_q (int8)
            per_layer((1, D_MODEL)),                         # w_out_s
            shared((D_MODEL, ATT_D)),                        # attn w1 (bf16)
            shared((1, ATT_D)),                              # attn b1
            shared((ATT_K, ATT_D)),                          # attn w2
        ],
        out_specs=pl.BlockSpec((1, D_MODEL), lambda l: (0, 0)),
        scratch_shapes=[
            pltpu.VMEM((N, D_MODEL), jnp.float32),           # feature carry
            pltpu.VMEM((N, 1), jnp.float32),                 # attention weights
        ],
    )

    inputs = (xs, stk["w_in_q"], stk["w_in_s"], stk["conv_w"], stk["conv_b"],
              stk["w_x"], stk["w_dt"], stk["b_dt"], stk["a_log"], stk["d"],
              stk["w_out_q"], stk["w_out_s"], att["w1"], att["b1"], att["w2"])

    mm_flops = 2 * N * (D_MODEL * 2 * D_INNER + D_INNER * (DT_RANK + 2 * D_STATE)
                        + DT_RANK * D_INNER + 2 * D_STATE * D_INNER
                        + D_INNER * D_MODEL)
    scan_flops = 6 * N * D_STATE * D_INNER + 16 * N * D_INNER
    attn_flops = 2 * N * D_MODEL * ATT_D + 4 * N * (ATT_D + D_MODEL)
    cost = pl.CostEstimate(
        flops=N_LAYERS * (mm_flops + scan_flops) + attn_flops,
        transcendentals=N_LAYERS * (N * D_STATE * D_INNER + 6 * N * D_INNER)
        + N * (ATT_D + 1),
        bytes_accessed=sum(int(a.size) * a.dtype.itemsize for a in inputs)
        + 4 * D_MODEL)

    return pl.pallas_call(
        fused_mamba_attn_kernel,
        out_shape=jax.ShapeDtypeStruct((1, D_MODEL), jnp.float32),
        grid_spec=grid_spec,
        compiler_params=pltpu.CompilerParams(
            dimension_semantics=("arbitrary",),      # layer 2 depends on layer 1
            vmem_limit_bytes=32 * 1024 * 1024),      # explicit budget (v7x-safe)
        cost_estimate=cost,
    )(*inputs)


# ----------------------------------------------------------------------------
# Deterministic parameter init (synthetic; matches module shapes, not a checkpoint)
# ----------------------------------------------------------------------------
def _xavier(key, shape):
    fan_in, fan_out = shape
    std = math.sqrt(2.0 / (fan_in + fan_out))
    return std * jax.random.normal(key, shape, jnp.float32)


def _quant_i8(w):
    """Symmetric per-output-channel int8 quantization: w ≈ q * scale."""
    scale = jnp.maximum(jnp.max(jnp.abs(w), axis=0, keepdims=True) / 127.0, 1e-8)
    q = jnp.clip(jnp.round(w / scale), -127.0, 127.0).astype(jnp.int8)
    return q, scale.astype(jnp.float32)


def init_mamba_params(key):
    k = jax.random.split(key, 5)
    a_col = jnp.arange(1, D_STATE + 1, dtype=jnp.float32)[:, None]
    w_in_q, w_in_s = _quant_i8(_xavier(k[0], (D_MODEL, 2 * D_INNER)))
    w_out_q, w_out_s = _quant_i8(_xavier(k[4], (D_INNER, D_MODEL)))
    return {
        # Dominant MXU weights int8 + per-channel scale (halves weight DMA);
        # small MXU weights bf16; VPU-consumed params f32 (v5e VPU has no bf16).
        "w_in_q": w_in_q, "w_in_s": w_in_s,
        "conv_w": 0.2 * jax.random.normal(k[1], (D_CONV, D_INNER), jnp.float32),
        "conv_b": jnp.zeros((1, D_INNER), jnp.float32),
        "w_x": _xavier(k[2], (D_INNER, DT_RANK + 2 * D_STATE)).astype(jnp.bfloat16),
        "w_dt": _xavier(k[3], (DT_RANK, D_INNER)).astype(jnp.bfloat16),
        "b_dt": jnp.zeros((1, D_INNER), jnp.float32),     # Linear bias zeroed by init
        "a_log": jnp.log(jnp.broadcast_to(a_col, (D_STATE, D_INNER))),  # stored transposed
        "d": jnp.ones((1, D_INNER), jnp.float32),
        "w_out_q": w_out_q, "w_out_s": w_out_s,
    }


def init_attn_params(key):
    k = jax.random.split(key, 2)
    return {
        "w1": _xavier(k[0], (D_MODEL, ATT_D)).astype(jnp.bfloat16),
        "b1": jnp.zeros((1, ATT_D), jnp.float32),
        "w2": (math.sqrt(2.0 / (ATT_D + ATT_K))
               * jax.random.normal(k[1], (ATT_K, ATT_D), jnp.float32)),
    }


# ----------------------------------------------------------------------------
# Pure-JAX references using the kernel's effective (dequantized int8 / bf16)
# weights.  mirror_bf16=True rounds activations to bf16 at exactly the kernel's
# cast points (tight implementation check); mirror_bf16=False keeps f32
# activations (bounds the bf16-activation quantization cost).
# ----------------------------------------------------------------------------
def _q(v):
    return v.astype(jnp.bfloat16).astype(jnp.float32)


def mamba_ref(x, p, mirror_bf16):
    cast = _q if mirror_bf16 else (lambda v: v)
    w_in = p["w_in_q"].astype(jnp.float32) * p["w_in_s"]
    w_x = p["w_x"].astype(jnp.float32)
    w_dt = p["w_dt"].astype(jnp.float32)
    w_out = p["w_out_q"].astype(jnp.float32) * p["w_out_s"]
    N = x.shape[0]
    xz = cast(x) @ w_in
    xin, z = xz[:, :D_INNER], xz[:, D_INNER:]
    xpad = jnp.concatenate([jnp.zeros((D_CONV - 1, D_INNER), jnp.float32), xin], axis=0)
    conv = sum(xpad[k:k + N] * p["conv_w"][k][None, :] for k in range(D_CONV)) + p["conv_b"]
    xc = conv * _sigmoid(conv)
    dbc = cast(xc) @ w_x
    dt_low = dbc[:, :DT_RANK]
    B = dbc[:, DT_RANK:DT_RANK + D_STATE]
    C = dbc[:, DT_RANK + D_STATE:]
    dt = _softplus(cast(dt_low) @ w_dt + p["b_dt"])
    A_T = -jnp.exp(p["a_log"])
    h = jnp.zeros((D_STATE, D_INNER), jnp.float32)
    ys = []
    for t in range(N):
        dA = jnp.exp(dt[t][None, :] * A_T)
        h = dA * h + cast(dt[t] * xc[t])[None, :] * cast(B[t])[:, None]
        ys.append(jnp.sum(cast(h) * cast(C[t])[:, None], axis=0) + p["d"][0] * xc[t])
    y = jnp.stack(ys, axis=0)
    y = y * (z * _sigmoid(z))
    return cast(y) @ w_out


def model_ref(x, params, mirror_bf16):
    cast = _q if mirror_bf16 else (lambda v: v)
    xs = x[0]
    f = mamba_ref(xs, params["mamba1"], mirror_bf16)
    f = mamba_ref(f, params["mamba2"], mirror_bf16)
    att = params["attn"]
    hdn = jnp.tanh(cast(xs) @ att["w1"].astype(jnp.float32) + att["b1"])
    logits = hdn @ att["w2"].T                    # (N, 1)
    a = jax.nn.softmax(logits[:, 0])              # softmax over sequence
    return a[None, :] @ f                         # (1, D_MODEL)


if __name__ == "__main__":
    N = 8                                         # small sequence length (batch = 1)
    key = jax.random.PRNGKey(0)
    kx, k1, k2, ka = jax.random.split(key, 4)
    x = jax.random.normal(kx, (1, N, D_MODEL), jnp.float32)
    params = {
        "mamba1": init_mamba_params(k1),
        "mamba2": init_mamba_params(k2),
        "attn": init_attn_params(ka),
    }

    out = jax.block_until_ready(mamba_block_my_forward(x, params))
    assert out.shape == (1, D_MODEL)

    with jax.default_matmul_precision("float32"):
        ref_mirror = jax.block_until_ready(model_ref(x, params, mirror_bf16=True))
        ref_f32 = jax.block_until_ready(model_ref(x, params, mirror_bf16=False))

    err_impl = float(jnp.max(jnp.abs(out - ref_mirror))
                     / (jnp.max(jnp.abs(ref_mirror)) + 1e-8))
    err_quant = float(jnp.max(jnp.abs(out - ref_f32))
                      / (jnp.max(jnp.abs(ref_f32)) + 1e-8))
    # Tight check (reference rounds activations to bf16 at the same points and uses
    # the same dequantized int8 weights): catches implementation bugs.
    assert err_impl < 5e-3, f"kernel vs mirrored reference mismatch: err = {err_impl}"
    # Loose check vs f32-activation reference: bounds the bf16 activation cost.
    assert err_quant < 5e-2, f"kernel vs f32 reference mismatch: err = {err_quant}"
    print("KERNEL_OK")
</pallas_src>

<mosaic_0001>
module attributes {stable_mosaic.version = 11 : i64} {
  func.func @fused_mamba_attn_kernel(%arg0: i32, %arg1: memref<8x512xf32, #tpu.memory_space<vmem>>, %arg2: memref<1x512x2048xi8, #tpu.memory_space<vmem>>, %arg3: memref<1x1x2048xf32, #tpu.memory_space<vmem>>, %arg4: memref<1x4x1024xf32, #tpu.memory_space<vmem>>, %arg5: memref<1x1x1024xf32, #tpu.memory_space<vmem>>, %arg6: memref<1x1024x64xbf16, #tpu.memory_space<vmem>>, %arg7: memref<1x32x1024xbf16, #tpu.memory_space<vmem>>, %arg8: memref<1x1x1024xf32, #tpu.memory_space<vmem>>, %arg9: memref<1x16x1024xf32, #tpu.memory_space<vmem>>, %arg10: memref<1x1x1024xf32, #tpu.memory_space<vmem>>, %arg11: memref<1x1024x512xi8, #tpu.memory_space<vmem>>, %arg12: memref<1x1x512xf32, #tpu.memory_space<vmem>>, %arg13: memref<512x128xbf16, #tpu.memory_space<vmem>>, %arg14: memref<1x128xf32, #tpu.memory_space<vmem>>, %arg15: memref<1x128xf32, #tpu.memory_space<vmem>>, %arg16: memref<1x512xf32, #tpu.memory_space<vmem>>, %arg17: memref<8x512xf32, #tpu.memory_space<vmem>>, %arg18: memref<8x1xf32, #tpu.memory_space<vmem>>) attributes {dimension_semantics = [#tpu.dimension_semantics<arbitrary>], iteration_bounds = array<i64: 2>, scalar_prefetch = 0 : i64, scratch_operands = 2 : i64, tpu.core_type = #tpu.core_type<tc>, window_params = [{pipeline_mode = #tpu.pipeline_mode<synchronous>, transform_indices = @transform_0, window_bounds = array<i64: 8, 512>}, {transform_indices = @transform_1, window_bounds = array<i64: 1, 512, 2048>}, {transform_indices = @transform_2, window_bounds = array<i64: 1, 1, 2048>}, {transform_indices = @transform_3, window_bounds = array<i64: 1, 4, 1024>}, {transform_indices = @transform_4, window_bounds = array<i64: 1, 1, 1024>}, {transform_indices = @transform_5, window_bounds = array<i64: 1, 1024, 64>}, {transform_indices = @transform_6, window_bounds = array<i64: 1, 32, 1024>}, {transform_indices = @transform_7, window_bounds = array<i64: 1, 1, 1024>}, {transform_indices = @transform_8, window_bounds = array<i64: 1, 16, 1024>}, {transform_indices = @transform_9, window_bounds = array<i64: 1, 1, 1024>}, {transform_indices = @transform_10, window_bounds = array<i64: 1, 1024, 512>}, {transform_indices = @transform_11, window_bounds = array<i64: 1, 1, 512>}, {pipeline_mode = #tpu.pipeline_mode<synchronous>, transform_indices = @transform_12, window_bounds = array<i64: 512, 128>}, {pipeline_mode = #tpu.pipeline_mode<synchronous>, transform_indices = @transform_13, window_bounds = array<i64: 1, 128>}, {pipeline_mode = #tpu.pipeline_mode<synchronous>, transform_indices = @transform_14, window_bounds = array<i64: 1, 128>}, {pipeline_mode = #tpu.pipeline_mode<synchronous>, transform_indices = @transform_15, window_bounds = array<i64: 1, 512>}]} {
    %c0_i32 = arith.constant 0 : i32
    %0 = arith.cmpi eq, %arg0, %c0_i32 : i32
    %1 = arith.extui %0 : i1 to i32
    %c0_i32_0 = arith.constant 0 : i32
    %2 = arith.cmpi ne, %1, %c0_i32_0 : i32
    scf.if %2 {
      %c0_75 = arith.constant 0 : index
      %c0_76 = arith.constant 0 : index
      %221 = vector.load %arg1[%c0_75, %c0_76] : memref<8x512xf32, #tpu.memory_space<vmem>>, vector<8x512xf32>
      %c0_77 = arith.constant 0 : index
      %c0_78 = arith.constant 0 : index
      %222 = vector.load %arg17[%c0_77, %c0_78] : memref<8x512xf32, #tpu.memory_space<vmem>>, vector<8x512xf32>
      tpu.vector_store %arg17[%c0_77, %c0_78], %221 {strides = array<i32>} : memref<8x512xf32, #tpu.memory_space<vmem>>, vector<8x512xf32>,
      %c0_79 = arith.constant 0 : index
      %c0_80 = arith.constant 0 : index
      %223 = vector.load %arg1[%c0_79, %c0_80] : memref<8x512xf32, #tpu.memory_space<vmem>>, vector<8x512xf32>
      %224 = arith.truncf %223 : vector<8x512xf32> to vector<8x512xbf16>
      %c0_81 = arith.constant 0 : index
      %c0_82 = arith.constant 0 : index
      %225 = vector.load %arg13[%c0_81, %c0_82] : memref<512x128xbf16, #tpu.memory_space<vmem>>, vector<512x128xbf16>
      %cst_83 = arith.constant dense<0.000000e+00> : vector<8x128xf32>
      %226 = tpu.matmul %224, %225, %cst_83 {dimension_numbers = #tpu.dot_dimension_numbers<[1], [0], [0], [1], [0, 0, 1, 1], [], []>} : vector<8x512xbf16>, vector<512x128xbf16>, vector<8x128xf32> -> vector<8x128xf32>
      %c0_84 = arith.constant 0 : index
      %c0_85 = arith.constant 0 : index
      %227 = vector.load %arg14[%c0_84, %c0_85] : memref<1x128xf32, #tpu.memory_space<vmem>>, vector<1x128xf32>
      %228 = vector.broadcast %227 : vector<1x128xf32> to vector<8x128xf32>
      %229 = arith.addf %226, %228 : vector<8x128xf32>
      %230 = math.tanh %229 : vector<8x128xf32>
      %c0_86 = arith.constant 0 : index
      %c0_87 = arith.constant 0 : index
      %231 = vector.load %arg15[%c0_86, %c0_87] : memref<1x128xf32, #tpu.memory_space<vmem>>, vector<1x128xf32>
      %232 = vector.broadcast %231 : vector<1x128xf32> to vector<8x128xf32>
      %233 = arith.mulf %230, %232 : vector<8x128xf32>
      %cst_88 = arith.constant dense<0.000000e+00> : vector<8xf32>
      %234 = vector.multi_reduction <add>, %233, %cst_88 [1] : vector<8x128xf32> to vector<8xf32>
      %235 = vector.shape_cast %234 : vector<8xf32> to vector<8x1xf32>
      %236 = vector.shape_cast %235 : vector<8x1xf32> to vector<1x8x1xf32>
      %cst_89 = arith.constant dense<0xFF800000> : vector<1xf32>
      %237 = vector.multi_reduction <maximumf>, %236, %cst_89 [1, 2] : vector<1x8x1xf32> to vector<1xf32>
      %238 = vector.shape_cast %237 : vector<1xf32> to vector<1x1x1xf32>
      %239 = vector.extract %238[0, 0, 0] : f32 from vector<1x1x1xf32>
      %240 = vector.broadcast %239 : f32 to vector<8x1xf32>
      %241 = arith.subf %235, %240 : vector<8x1xf32>
      %242 = math.exp %241 : vector<8x1xf32>
      %243 = vector.shape_cast %242 : vector<8x1xf32> to vector<1x8x1xf32>
      %cst_90 = arith.constant dense<0.000000e+00> : vector<1xf32>
      %244 = vector.multi_reduction <add>, %243, %cst_90 [1, 2] : vector<1x8x1xf32> to vector<1xf32>
      %245 = vector.shape_cast %244 : vector<1xf32> to vector<1x1x1xf32>
      %246 = vector.extract %245[0, 0, 0] : f32 from vector<1x1x1xf32>
      %247 = vector.broadcast %246 : f32 to vector<8x1xf32>
      %248 = arith.divf %242, %247 : vector<8x1xf32>
      %c0_91 = arith.constant 0 : index
      %c0_92 = arith.constant 0 : index
      %249 = vector.load %arg18[%c0_91, %c0_92] : memref<8x1xf32, #tpu.memory_space<vmem>>, vector<8x1xf32>
      tpu.vector_store %arg18[%c0_91, %c0_92], %248 {strides = array<i32>} : memref<8x1xf32, #tpu.memory_space<vmem>>, vector<8x1xf32>,
    } else {
    }
    %c0 = arith.constant 0 : index
    %c0_1 = arith.constant 0 : index
    %3 = vector.load %arg17[%c0, %c0_1] : memref<8x512xf32, #tpu.memory_space<vmem>>, vector<8x512xf32>
    %c0_2 = arith.constant 0 : index
    %c0_3 = arith.constant 0 : index
    %c0_4 = arith.constant 0 : index
    %4 = vector.load %arg2[%c0_2, %c0_3, %c0_4] : memref<1x512x2048xi8, #tpu.memory_space<vmem>>, vector<1x512x2048xi8>
    %5 = vector.shape_cast %4 : vector<1x512x2048xi8> to vector<512x2048xi8>
    %6 = arith.sitofp %5 : vector<512x2048xi8> to vector<512x2048xf32>
    %7 = arith.truncf %6 : vector<512x2048xf32> to vector<512x2048xbf16>
    %8 = arith.truncf %3 : vector<8x512xf32> to vector<8x512xbf16>
    %cst = arith.constant dense<0.000000e+00> : vector<8x2048xf32>
    %9 = tpu.matmul %8, %7, %cst {dimension_numbers = #tpu.dot_dimension_numbers<[1], [0], [0], [1], [0, 0, 1, 1], [], []>} : vector<8x512xbf16>, vector<512x2048xbf16>, vector<8x2048xf32> -> vector<8x2048xf32>
    %c0_5 = arith.constant 0 : index
    %c0_6 = arith.constant 0 : index
    %c0_7 = arith.constant 0 : index
    %10 = vector.load %arg3[%c0_5, %c0_6, %c0_7] : memref<1x1x2048xf32, #tpu.memory_space<vmem>>, vector<1x1x2048xf32>
    %11 = vector.shape_cast %10 : vector<1x1x2048xf32> to vector<1x2048xf32>
    %12 = vector.broadcast %11 : vector<1x2048xf32> to vector<8x2048xf32>
    %13 = arith.mulf %9, %12 : vector<8x2048xf32>
    %14 = vector.extract_strided_slice %13 {offsets = [0, 0], sizes = [8, 1024], strides = [1, 1]} : vector<8x2048xf32> to vector<8x1024xf32>
    %15 = vector.extract_strided_slice %13 {offsets = [0, 1024], sizes = [8, 1024], strides = [1, 1]} : vector<8x2048xf32> to vector<8x1024xf32>
    %c0_8 = arith.constant 0 : index
    %c0_9 = arith.constant 0 : index
    %c0_10 = arith.constant 0 : index
    %16 = vector.load %arg4[%c0_8, %c0_9, %c0_10] : memref<1x4x1024xf32, #tpu.memory_space<vmem>>, vector<1x4x1024xf32>
    %17 = vector.shape_cast %16 : vector<1x4x1024xf32> to vector<4x1024xf32>
    %18 = tpu.iota {dimensions = array<i32: 0>} : vector<8x1024xi32>
    %19 = vector.extract_strided_slice %17 {offsets = [3, 0], sizes = [1, 1024], strides = [1, 1]} : vector<4x1024xf32> to vector<1x1024xf32>
    %20 = vector.broadcast %19 : vector<1x1024xf32> to vector<8x1024xf32>
    %21 = arith.mulf %14, %20 : vector<8x1024xf32>
    %c3_i32 = arith.constant 3 : i32
    %22 = tpu.dynamic_rotate %14 by %c3_i32 dim 0 : vector<8x1024xf32>, i32 -> vector<8x1024xf32>
    %c3_i32_11 = arith.constant 3 : i32
    %23 = vector.broadcast %c3_i32_11 : i32 to vector<8x1024xi32>
    %24 = arith.cmpi sge, %18, %23 : vector<8x1024xi32>
    %cst_12 = arith.constant 0.000000e+00 : f32
    %25 = vector.broadcast %cst_12 : f32 to vector<8x1024xf32>
    %26 = arith.select %24, %22, %25 : vector<8x1024xi1>, vector<8x1024xf32>
    %27 = vector.extract_strided_slice %17 {offsets = [0, 0], sizes = [1, 1024], strides = [1, 1]} : vector<4x1024xf32> to vector<1x1024xf32>
    %28 = vector.broadcast %27 : vector<1x1024xf32> to vector<8x1024xf32>
    %29 = arith.mulf %26, %28 : vector<8x1024xf32>
    %30 = arith.addf %21, %29 : vector<8x1024xf32>
    %c2_i32 = arith.constant 2 : i32
    %31 = tpu.dynamic_rotate %14 by %c2_i32 dim 0 : vector<8x1024xf32>, i32 -> vector<8x1024xf32>
    %c2_i32_13 = arith.constant 2 : i32
    %32 = vector.broadcast %c2_i32_13 : i32 to vector<8x1024xi32>
    %33 = arith.cmpi sge, %18, %32 : vector<8x1024xi32>
    %cst_14 = arith.constant 0.000000e+00 : f32
    %34 = vector.broadcast %cst_14 : f32 to vector<8x1024xf32>
    %35 = arith.select %33, %31, %34 : vector<8x1024xi1>, vector<8x1024xf32>
    %36 = vector.extract_strided_slice %17 {offsets = [1, 0], sizes = [1, 1024], strides = [1, 1]} : vector<4x1024xf32> to vector<1x1024xf32>
    %37 = vector.broadcast %36 : vector<1x1024xf32> to vector<8x1024xf32>
    %38 = arith.mulf %35, %37 : vector<8x1024xf32>
    %39 = arith.addf %30, %38 : vector<8x1024xf32>
    %c1_i32 = arith.constant 1 : i32
    %40 = tpu.dynamic_rotate %14 by %c1_i32 dim 0 : vector<8x1024xf32>, i32 -> vector<8x1024xf32>
    %c1_i32_15 = arith.constant 1 : i32
    %41 = vector.broadcast %c1_i32_15 : i32 to vector<8x1024xi32>
    %42 = arith.cmpi sge, %18, %41 : vector<8x1024xi32>
    %cst_16 = arith.constant 0.000000e+00 : f32
    %43 = vector.broadcast %cst_16 : f32 to vector<8x1024xf32>
    %44 = arith.select %42, %40, %43 : vector<8x1024xi1>, vector<8x1024xf32>
    %45 = vector.extract_strided_slice %17 {offsets = [2, 0], sizes = [1, 1024], strides = [1, 1]} : vector<4x1024xf32> to vector<1x1024xf32>
    %46 = vector.broadcast %45 : vector<1x1024xf32> to vector<8x1024xf32>
    %47 = arith.mulf %44, %46 : vector<8x1024xf32>
    %48 = arith.addf %39, %47 : vector<8x1024xf32>
    %c0_17 = arith.constant 0 : index
    %c0_18 = arith.constant 0 : index
    %c0_19 = arith.constant 0 : index
    %49 = vector.load %arg5[%c0_17, %c0_18, %c0_19] : memref<1x1x1024xf32, #tpu.memory_space<vmem>>, vector<1x1x1024xf32>
    %50 = vector.shape_cast %49 : vector<1x1x1024xf32> to vector<1x1024xf32>
    %51 = vector.broadcast %50 : vector<1x1024xf32> to vector<8x1024xf32>
    %52 = arith.addf %48, %51 : vector<8x1024xf32>
    %cst_20 = arith.constant 0.000000e+00 : f32
    %53 = vector.broadcast %cst_20 : f32 to vector<8x1024xf32>
    %54 = arith.subf %53, %52 : vector<8x1024xf32>
    %55 = math.exp %54 : vector<8x1024xf32>
    %cst_21 = arith.constant 1.000000e+00 : f32
    %56 = vector.broadcast %cst_21 : f32 to vector<8x1024xf32>
    %57 = arith.addf %56, %55 : vector<8x1024xf32>
    %cst_22 = arith.constant 1.000000e+00 : f32
    %58 = vector.broadcast %cst_22 : f32 to vector<8x1024xf32>
    %59 = arith.divf %58, %57 : vector<8x1024xf32>
    %60 = arith.mulf %52, %59 : vector<8x1024xf32>
    %61 = arith.truncf %60 : vector<8x1024xf32> to vector<8x1024xbf16>
    %c0_23 = arith.constant 0 : index
    %c0_24 = arith.constant 0 : index
    %c0_25 = arith.constant 0 : index
    %62 = vector.load %arg6[%c0_23, %c0_24, %c0_25] : memref<1x1024x64xbf16, #tpu.memory_space<vmem>>, vector<1x1024x64xbf16>
    %63 = vector.shape_cast %62 : vector<1x1024x64xbf16> to vector<1024x64xbf16>
    %cst_26 = arith.constant dense<0.000000e+00> : vector<8x64xf32>
    %64 = tpu.matmul %61, %63, %cst_26 {dimension_numbers = #tpu.dot_dimension_numbers<[1], [0], [0], [1], [0, 0, 1, 1], [], []>} : vector<8x1024xbf16>, vector<1024x64xbf16>, vector<8x64xf32> -> vector<8x64xf32>
    %65 = vector.extract_strided_slice %64 {offsets = [0, 0], sizes = [8, 32], strides = [1, 1]} : vector<8x64xf32> to vector<8x32xf32>
    %66 = arith.truncf %65 : vector<8x32xf32> to vector<8x32xbf16>
    %c0_27 = arith.constant 0 : index
    %c0_28 = arith.constant 0 : index
    %c0_29 = arith.constant 0 : index
    %67 = vector.load %arg7[%c0_27, %c0_28, %c0_29] : memref<1x32x1024xbf16, #tpu.memory_space<vmem>>, vector<1x32x1024xbf16>
    %68 = vector.shape_cast %67 : vector<1x32x1024xbf16> to vector<32x1024xbf16>
    %cst_30 = arith.constant dense<0.000000e+00> : vector<8x1024xf32>
    %69 = tpu.matmul %66, %68, %cst_30 {dimension_numbers = #tpu.dot_dimension_numbers<[1], [0], [0], [1], [0, 0, 1, 1], [], []>} : vector<8x32xbf16>, vector<32x1024xbf16>, vector<8x1024xf32> -> vector<8x1024xf32>
    %c0_31 = arith.constant 0 : index
    %c0_32 = arith.constant 0 : index
    %c0_33 = arith.constant 0 : index
    %70 = vector.load %arg8[%c0_31, %c0_32, %c0_33] : memref<1x1x1024xf32, #tpu.memory_space<vmem>>, vector<1x1x1024xf32>
    %71 = vector.shape_cast %70 : vector<1x1x1024xf32> to vector<1x1024xf32>
    %72 = vector.broadcast %71 : vector<1x1024xf32> to vector<8x1024xf32>
    %73 = arith.addf %69, %72 : vector<8x1024xf32>
    %cst_34 = arith.constant 0.000000e+00 : f32
    %74 = vector.broadcast %cst_34 : f32 to vector<8x1024xf32>
    %75 = arith.maximumf %73, %74 : vector<8x1024xf32>
    %76 = math.absf %73 : vector<8x1024xf32>
    %cst_35 = arith.constant 0.000000e+00 : f32
    %77 = vector.broadcast %cst_35 : f32 to vector<8x1024xf32>
    %78 = arith.subf %77, %76 : vector<8x1024xf32>
    %79 = math.exp %78 : vector<8x1024xf32>
    %cst_36 = arith.constant 1.000000e+00 : f32
    %80 = vector.broadcast %cst_36 : f32 to vector<8x1024xf32>
    %81 = arith.addf %80, %79 : vector<8x1024xf32>
    %82 = math.log %81 : vector<8x1024xf32>
    %83 = arith.addf %75, %82 : vector<8x1024xf32>
    %84 = vector.extract_strided_slice %64 {offsets = [0, 32], sizes = [8, 16], strides = [1, 1]} : vector<8x64xf32> to vector<8x16xf32>
    %85 = arith.truncf %84 : vector<8x16xf32> to vector<8x16xbf16>
    %86 = vector.extract_strided_slice %64 {offsets = [0, 48], sizes = [8, 16], strides = [1, 1]} : vector<8x64xf32> to vector<8x16xf32>
    %87 = arith.truncf %86 : vector<8x16xf32> to vector<8x16xbf16>
    %c0_37 = arith.constant 0 : index
    %c0_38 = arith.constant 0 : index
    %c0_39 = arith.constant 0 : index
    %88 = vector.load %arg9[%c0_37, %c0_38, %c0_39] : memref<1x16x1024xf32, #tpu.memory_space<vmem>>, vector<1x16x1024xf32>
    %89 = vector.shape_cast %88 : vector<1x16x1024xf32> to vector<16x1024xf32>
    %90 = math.exp %89 : vector<16x1024xf32>
    %cst_40 = arith.constant 0.000000e+00 : f32
    %91 = vector.broadcast %cst_40 : f32 to vector<16x1024xf32>
    %92 = arith.subf %91, %90 : vector<16x1024xf32>
    %93 = arith.mulf %83, %60 : vector<8x1024xf32>
    %94 = arith.truncf %93 : vector<8x1024xf32> to vector<8x1024xbf16>
    %cst_41 = arith.constant 0.000000e+00 : f32
    %95 = vector.broadcast %cst_41 : f32 to vector<16x1024xf32>
    %96 = vector.extract_strided_slice %83 {offsets = [0, 0], sizes = [1, 1024], strides = [1, 1]} : vector<8x1024xf32> to vector<1x1024xf32>
    %97 = vector.broadcast %96 : vector<1x1024xf32> to vector<16x1024xf32>
    %98 = arith.mulf %97, %92 : vector<16x1024xf32>
    %99 = math.exp %98 : vector<16x1024xf32>
    %100 = vector.extract_strided_slice %85 {offsets = [0, 0], sizes = [1, 16], strides = [1, 1]} : vector<8x16xbf16> to vector<1x16xbf16>
    %101 = vector.extract_strided_slice %94 {offsets = [0, 0], sizes = [1, 1024], strides = [1, 1]} : vector<8x1024xbf16> to vector<1x1024xbf16>
    %cst_42 = arith.constant dense<0.000000e+00> : vector<16x1024xf32>
    %102 = tpu.matmul %100, %101, %cst_42 {dimension_numbers = #tpu.dot_dimension_numbers<[0], [0], [1], [1], [0, 1, 1, 1], [], []>} : vector<1x16xbf16>, vector<1x1024xbf16>, vector<16x1024xf32> -> vector<16x1024xf32>
    %103 = arith.mulf %99, %95 : vector<16x1024xf32>
    %104 = arith.addf %103, %102 : vector<16x1024xf32>
    %105 = vector.extract_strided_slice %87 {offsets = [0, 0], sizes = [1, 16], strides = [1, 1]} : vector<8x16xbf16> to vector<1x16xbf16>
    %106 = arith.truncf %104 : vector<16x1024xf32> to vector<16x1024xbf16>
    %cst_43 = arith.constant dense<0.000000e+00> : vector<1x1024xf32>
    %107 = tpu.matmul %105, %106, %cst_43 {dimension_numbers = #tpu.dot_dimension_numbers<[1], [0], [0], [1], [0, 0, 1, 1], [], []>} : vector<1x16xbf16>, vector<16x1024xbf16>, vector<1x1024xf32> -> vector<1x1024xf32>
    %108 = vector.extract_strided_slice %83 {offsets = [1, 0], sizes = [1, 1024], strides = [1, 1]} : vector<8x1024xf32> to vector<1x1024xf32>
    %109 = vector.broadcast %108 : vector<1x1024xf32> to vector<16x1024xf32>
    %110 = arith.mulf %109, %92 : vector<16x1024xf32>
    %111 = math.exp %110 : vector<16x1024xf32>
    %112 = vector.extract_strided_slice %85 {offsets = [1, 0], sizes = [1, 16], strides = [1, 1]} : vector<8x16xbf16> to vector<1x16xbf16>
    %113 = vector.extract_strided_slice %94 {offsets = [1, 0], sizes = [1, 1024], strides = [1, 1]} : vector<8x1024xbf16> to vector<1x1024xbf16>
    %cst_44 = arith.constant dense<0.000000e+00> : vector<16x1024xf32>
    %114 = tpu.matmul %112, %113, %cst_44 {dimension_numbers = #tpu.dot_dimension_numbers<[0], [0], [1], [1], [0, 1, 1, 1], [], []>} : vector<1x16xbf16>, vector<1x1024xbf16>, vector<16x1024xf32> -> vector<16x1024xf32>
    %115 = arith.mulf %111, %104 : vector<16x1024xf32>
    %116 = arith.addf %115, %114 : vector<16x1024xf32>
    %117 = vector.extract_strided_slice %87 {offsets = [1, 0], sizes = [1, 16], strides = [1, 1]} : vector<8x16xbf16> to vector<1x16xbf16>
    %118 = arith.truncf %116 : vector<16x1024xf32> to vector<16x1024xbf16>
    %cst_45 = arith.constant dense<0.000000e+00> : vector<1x1024xf32>
    %119 = tpu.matmul %117, %118, %cst_45 {dimension_numbers = #tpu.dot_dimension_numbers<[1], [0], [0], [1], [0, 0, 1, 1], [], []>} : vector<1x16xbf16>, vector<16x1024xbf16>, vector<1x1024xf32> -> vector<1x1024xf32>
    %120 = vector.extract_strided_slice %83 {offsets = [2, 0], sizes = [1, 1024], strides = [1, 1]} : vector<8x1024xf32> to vector<1x1024xf32>
    %121 = vector.broadcast %120 : vector<1x1024xf32> to vector<16x1024xf32>
    %122 = arith.mulf %121, %92 : vector<16x1024xf32>
    %123 = math.exp %122 : vector<16x1024xf32>
    %124 = vector.extract_strided_slice %85 {offsets = [2, 0], sizes = [1, 16], strides = [1, 1]} : vector<8x16xbf16> to vector<1x16xbf16>
    %125 = vector.extract_strided_slice %94 {offsets = [2, 0], sizes = [1, 1024], strides = [1, 1]} : vector<8x1024xbf16> to vector<1x1024xbf16>
    %cst_46 = arith.constant dense<0.000000e+00> : vector<16x1024xf32>
    %126 = tpu.matmul %124, %125, %cst_46 {dimension_numbers = #tpu.dot_dimension_numbers<[0], [0], [1], [1], [0, 1, 1, 1], [], []>} : vector<1x16xbf16>, vector<1x1024xbf16>, vector<16x1024xf32> -> vector<16x1024xf32>
    %127 = arith.mulf %123, %116 : vector<16x1024xf32>
    %128 = arith.addf %127, %126 : vector<16x1024xf32>
    %129 = vector.extract_strided_slice %87 {offsets = [2, 0], sizes = [1, 16], strides = [1, 1]} : vector<8x16xbf16> to vector<1x16xbf16>
    %130 = arith.truncf %128 : vector<16x1024xf32> to vector<16x1024xbf16>
    %cst_47 = arith.constant dense<0.000000e+00> : vector<1x1024xf32>
    %131 = tpu.matmul %129, %130, %cst_47 {dimension_numbers = #tpu.dot_dimension_numbers<[1], [0], [0], [1], [0, 0, 1, 1], [], []>} : vector<1x16xbf16>, vector<16x1024xbf16>, vector<1x1024xf32> -> vector<1x1024xf32>
    %132 = vector.extract_strided_slice %83 {offsets = [3, 0], sizes = [1, 1024], strides = [1, 1]} : vector<8x1024xf32> to vector<1x1024xf32>
    %133 = vector.broadcast %132 : vector<1x1024xf32> to vector<16x1024xf32>
    %134 = arith.mulf %133, %92 : vector<16x1024xf32>
    %135 = math.exp %134 : vector<16x1024xf32>
    %136 = vector.extract_strided_slice %85 {offsets = [3, 0], sizes = [1, 16], strides = [1, 1]} : vector<8x16xbf16> to vector<1x16xbf16>
    %137 = vector.extract_strided_slice %94 {offsets = [3, 0], sizes = [1, 1024], strides = [1, 1]} : vector<8x1024xbf16> to vector<1x1024xbf16>
    %cst_48 = arith.constant dense<0.000000e+00> : vector<16x1024xf32>
    %138 = tpu.matmul %136, %137, %cst_48 {dimension_numbers = #tpu.dot_dimension_numbers<[0], [0], [1], [1], [0, 1, 1, 1], [], []>} : vector<1x16xbf16>, vector<1x1024xbf16>, vector<16x1024xf32> -> vector<16x1024xf32>
    %139 = arith.mulf %135, %128 : vector<16x1024xf32>
    %140 = arith.addf %139, %138 : vector<16x1024xf32>
    %141 = vector.extract_strided_slice %87 {offsets = [3, 0], sizes = [1, 16], strides = [1, 1]} : vector<8x16xbf16> to vector<1x16xbf16>
    %142 = arith.truncf %140 : vector<16x1024xf32> to vector<16x1024xbf16>
    %cst_49 = arith.constant dense<0.000000e+00> : vector<1x1024xf32>
    %143 = tpu.matmul %141, %142, %cst_49 {dimension_numbers = #tpu.dot_dimension_numbers<[1], [0], [0], [1], [0, 0, 1, 1], [], []>} : vector<1x16xbf16>, vector<16x1024xbf16>, vector<1x1024xf32> -> vector<1x1024xf32>
    %144 = vector.extract_strided_slice %83 {offsets = [4, 0], sizes = [1, 1024], strides = [1, 1]} : vector<8x1024xf32> to vector<1x1024xf32>
    %145 = vector.broadcast %144 : vector<1x1024xf32> to vector<16x1024xf32>
    %146 = arith.mulf %145, %92 : vector<16x1024xf32>
    %147 = math.exp %146 : vector<16x1024xf32>
    %148 = vector.extract_strided_slice %85 {offsets = [4, 0], sizes = [1, 16], strides = [1, 1]} : vector<8x16xbf16> to vector<1x16xbf16>
    %149 = vector.extract_strided_slice %94 {offsets = [4, 0], sizes = [1, 1024], strides = [1, 1]} : vector<8x1024xbf16> to vector<1x1024xbf16>
    %cst_50 = arith.constant dense<0.000000e+00> : vector<16x1024xf32>
    %150 = tpu.matmul %148, %149, %cst_50 {dimension_numbers = #tpu.dot_dimension_numbers<[0], [0], [1], [1], [0, 1, 1, 1], [], []>} : vector<1x16xbf16>, vector<1x1024xbf16>, vector<16x1024xf32> -> vector<16x1024xf32>
    %151 = arith.mulf %147, %140 : vector<16x1024xf32>
    %152 = arith.addf %151, %150 : vector<16x1024xf32>
    %153 = vector.extract_strided_slice %87 {offsets = [4, 0], sizes = [1, 16], strides = [1, 1]} : vector<8x16xbf16> to vector<1x16xbf16>
    %154 = arith.truncf %152 : vector<16x1024xf32> to vector<16x1024xbf16>
    %cst_51 = arith.constant dense<0.000000e+00> : vector<1x1024xf32>
    %155 = tpu.matmul %153, %154, %cst_51 {dimension_numbers = #tpu.dot_dimension_numbers<[1], [0], [0], [1], [0, 0, 1, 1], [], []>} : vector<1x16xbf16>, vector<16x1024xbf16>, vector<1x1024xf32> -> vector<1x1024xf32>
    %156 = vector.extract_strided_slice %83 {offsets = [5, 0], sizes = [1, 1024], strides = [1, 1]} : vector<8x1024xf32> to vector<1x1024xf32>
    %157 = vector.broadcast %156 : vector<1x1024xf32> to vector<16x1024xf32>
    %158 = arith.mulf %157, %92 : vector<16x1024xf32>
    %159 = math.exp %158 : vector<16x1024xf32>
    %160 = vector.extract_strided_slice %85 {offsets = [5, 0], sizes = [1, 16], strides = [1, 1]} : vector<8x16xbf16> to vector<1x16xbf16>
    %161 = vector.extract_strided_slice %94 {offsets = [5, 0], sizes = [1, 1024], strides = [1, 1]} : vector<8x1024xbf16> to vector<1x1024xbf16>
    %cst_52 = arith.constant dense<0.000000e+00> : vector<16x1024xf32>
    %162 = tpu.matmul %160, %161, %cst_52 {dimension_numbers = #tpu.dot_dimension_numbers<[0], [0], [1], [1], [0, 1, 1, 1], [], []>} : vector<1x16xbf16>, vector<1x1024xbf16>, vector<16x1024xf32> -> vector<16x1024xf32>
    %163 = arith.mulf %159, %152 : vector<16x1024xf32>
    %164 = arith.addf %163, %162 : vector<16x1024xf32>
    %165 = vector.extract_strided_slice %87 {offsets = [5, 0], sizes = [1, 16], strides = [1, 1]} : vector<8x16xbf16> to vector<1x16xbf16>
    %166 = arith.truncf %164 : vector<16x1024xf32> to vector<16x1024xbf16>
    %cst_53 = arith.constant dense<0.000000e+00> : vector<1x1024xf32>
    %167 = tpu.matmul %165, %166, %cst_53 {dimension_numbers = #tpu.dot_dimension_numbers<[1], [0], [0], [1], [0, 0, 1, 1], [], []>} : vector<1x16xbf16>, vector<16x1024xbf16>, vector<1x1024xf32> -> vector<1x1024xf32>
    %168 = vector.extract_strided_slice %83 {offsets = [6, 0], sizes = [1, 1024], strides = [1, 1]} : vector<8x1024xf32> to vector<1x1024xf32>
    %169 = vector.broadcast %168 : vector<1x1024xf32> to vector<16x1024xf32>
    %170 = arith.mulf %169, %92 : vector<16x1024xf32>
    %171 = math.exp %170 : vector<16x1024xf32>
    %172 = vector.extract_strided_slice %85 {offsets = [6, 0], sizes = [1, 16], strides = [1, 1]} : vector<8x16xbf16> to vector<1x16xbf16>
    %173 = vector.extract_strided_slice %94 {offsets = [6, 0], sizes = [1, 1024], strides = [1, 1]} : vector<8x1024xbf16> to vector<1x1024xbf16>
    %cst_54 = arith.constant dense<0.000000e+00> : vector<16x1024xf32>
    %174 = tpu.matmul %172, %173, %cst_54 {dimension_numbers = #tpu.dot_dimension_numbers<[0], [0], [1], [1], [0, 1, 1, 1], [], []>} : vector<1x16xbf16>, vector<1x1024xbf16>, vector<16x1024xf32> -> vector<16x1024xf32>
    %175 = arith.mulf %171, %164 : vector<16x1024xf32>
    %176 = arith.addf %175, %174 : vector<16x1024xf32>
    %177 = vector.extract_strided_slice %87 {offsets = [6, 0], sizes = [1, 16], strides = [1, 1]} : vector<8x16xbf16> to vector<1x16xbf16>
    %178 = arith.truncf %176 : vector<16x1024xf32> to vector<16x1024xbf16>
    %cst_55 = arith.constant dense<0.000000e+00> : vector<1x1024xf32>
    %179 = tpu.matmul %177, %178, %cst_55 {dimension_numbers = #tpu.dot_dimension_numbers<[1], [0], [0], [1], [0, 0, 1, 1], [], []>} : vector<1x16xbf16>, vector<16x1024xbf16>, vector<1x1024xf32> -> vector<1x1024xf32>
    %180 = vector.extract_strided_slice %83 {offsets = [7, 0], sizes = [1, 1024], strides = [1, 1]} : vector<8x1024xf32> to vector<1x1024xf32>
    %181 = vector.broadcast %180 : vector<1x1024xf32> to vector<16x1024xf32>
    %182 = arith.mulf %181, %92 : vector<16x1024xf32>
    %183 = math.exp %182 : vector<16x1024xf32>
    %184 = vector.extract_strided_slice %85 {offsets = [7, 0], sizes = [1, 16], strides = [1, 1]} : vector<8x16xbf16> to vector<1x16xbf16>
    %185 = vector.extract_strided_slice %94 {offsets = [7, 0], sizes = [1, 1024], strides = [1, 1]} : vector<8x1024xbf16> to vector<1x1024xbf16>
    %cst_56 = arith.constant dense<0.000000e+00> : vector<16x1024xf32>
    %186 = tpu.matmul %184, %185, %cst_56 {dimension_numbers = #tpu.dot_dimension_numbers<[0], [0], [1], [1], [0, 1, 1, 1], [], []>} : vector<1x16xbf16>, vector<1x1024xbf16>, vector<16x1024xf32> -> vector<16x1024xf32>
    %187 = arith.mulf %183, %176 : vector<16x1024xf32>
    %188 = arith.addf %187, %186 : vector<16x1024xf32>
    %189 = vector.extract_strided_slice %87 {offsets = [7, 0], sizes = [1, 16], strides = [1, 1]} : vector<8x16xbf16> to vector<1x16xbf16>
    %190 = arith.truncf %188 : vector<16x1024xf32> to vector<16x1024xbf16>
    %cst_57 = arith.constant dense<0.000000e+00> : vector<1x1024xf32>
    %191 = tpu.matmul %189, %190, %cst_57 {dimension_numbers = #tpu.dot_dimension_numbers<[1], [0], [0], [1], [0, 0, 1, 1], [], []>} : vector<1x16xbf16>, vector<16x1024xbf16>, vector<1x1024xf32> -> vector<1x1024xf32>
    %192 = tpu.concatenate %107, %119, %131, %143, %155, %167, %179, %191 in 0 : vector<1x1024xf32>, vector<1x1024xf32>, vector<1x1024xf32>, vector<1x1024xf32>, vector<1x1024xf32>, vector<1x1024xf32>, vector<1x1024xf32>, vector<1x1024xf32> -> vector<8x1024xf32>
    %c0_58 = arith.constant 0 : index
    %c0_59 = arith.constant 0 : index
    %c0_60 = arith.constant 0 : index
    %193 = vector.load %arg10[%c0_58, %c0_59, %c0_60] : memref<1x1x1024xf32, #tpu.memory_space<vmem>>, vector<1x1x1024xf32>
    %194 = vector.shape_cast %193 : vector<1x1x1024xf32> to vector<1x1024xf32>
    %195 = vector.broadcast %194 : vector<1x1024xf32> to vector<8x1024xf32>
    %196 = arith.mulf %195, %60 : vector<8x1024xf32>
    %197 = arith.addf %192, %196 : vector<8x1024xf32>
    %cst_61 = arith.constant 0.000000e+00 : f32
    %198 = vector.broadcast %cst_61 : f32 to vector<8x1024xf32>
    %199 = arith.subf %198, %15 : vector<8x1024xf32>
    %200 = math.exp %199 : vector<8x1024xf32>
    %cst_62 = arith.constant 1.000000e+00 : f32
    %201 = vector.broadcast %cst_62 : f32 to vector<8x1024xf32>
    %202 = arith.addf %201, %200 : vector<8x1024xf32>
    %cst_63 = arith.constant 1.000000e+00 : f32
    %203 = vector.broadcast %cst_63 : f32 to vector<8x1024xf32>
    %204 = arith.divf %203, %202 : vector<8x1024xf32>
    %205 = arith.mulf %15, %204 : vector<8x1024xf32>
    %206 = arith.mulf %197, %205 : vector<8x1024xf32>
    %c0_64 = arith.constant 0 : index
    %c0_65 = arith.constant 0 : index
    %c0_66 = arith.constant 0 : index
    %207 = vector.load %arg11[%c0_64, %c0_65, %c0_66] : memref<1x1024x512xi8, #tpu.memory_space<vmem>>, vector<1x1024x512xi8>
    %208 = vector.shape_cast %207 : vector<1x1024x512xi8> to vector<1024x512xi8>
    %209 = arith.sitofp %208 : vector<1024x512xi8> to vector<1024x512xf32>
    %210 = arith.truncf %209 : vector<1024x512xf32> to vector<1024x512xbf16>
    %211 = arith.truncf %206 : vector<8x1024xf32> to vector<8x1024xbf16>
    %cst_67 = arith.constant dense<0.000000e+00> : vector<8x512xf32>
    %212 = tpu.matmul %211, %210, %cst_67 {dimension_numbers = #tpu.dot_dimension_numbers<[1], [0], [0], [1], [0, 0, 1, 1], [], []>} : vector<8x1024xbf16>, vector<1024x512xbf16>, vector<8x512xf32> -> vector<8x512xf32>
    %c0_68 = arith.constant 0 : index
    %c0_69 = arith.constant 0 : index
    %c0_70 = arith.constant 0 : index
    %213 = vector.load %arg12[%c0_68, %c0_69, %c0_70] : memref<1x1x512xf32, #tpu.memory_space<vmem>>, vector<1x1x512xf32>
    %214 = vector.shape_cast %213 : vector<1x1x512xf32> to vector<1x512xf32>
    %215 = vector.broadcast %214 : vector<1x512xf32> to vector<8x512xf32>
    %216 = arith.mulf %212, %215 : vector<8x512xf32>
    %c0_71 = arith.constant 0 : index
    %c0_72 = arith.constant 0 : index
    %217 = vector.load %arg17[%c0_71, %c0_72] : memref<8x512xf32, #tpu.memory_space<vmem>>, vector<8x512xf32>
    tpu.vector_store %arg17[%c0_71, %c0_72], %216 {strides = array<i32>} : memref<8x512xf32, #tpu.memory_space<vmem>>, vector<8x512xf32>,
    %c1_i32_73 = arith.constant 1 : i32
    %218 = arith.cmpi eq, %arg0, %c1_i32_73 : i32
    %219 = arith.extui %218 : i1 to i32
    %c0_i32_74 = arith.constant 0 : i32
    %220 = arith.cmpi ne, %219, %c0_i32_74 : i32
    scf.if %220 {
      %c0_75 = arith.constant 0 : index
      %c0_76 = arith.constant 0 : index
      %221 = vector.load %arg18[%c0_75, %c0_76] : memref<8x1xf32, #tpu.memory_space<vmem>>, vector<8x1xf32>
      %222 = vector.broadcast %221 : vector<8x1xf32> to vector<8x512xf32>
      %223 = arith.mulf %222, %216 : vector<8x512xf32>
      %cst_77 = arith.constant dense<0.000000e+00> : vector<512xf32>
      %224 = vector.multi_reduction <add>, %223, %cst_77 [0] : vector<8x512xf32> to vector<512xf32>
      %225 = vector.shape_cast %224 : vector<512xf32> to vector<1x512xf32>
      %c0_78 = arith.constant 0 : index
      %c0_79 = arith.constant 0 : index
      %226 = vector.load %arg16[%c0_78, %c0_79] : memref<1x512xf32, #tpu.memory_space<vmem>>, vector<1x512xf32>
      tpu.vector_store %arg16[%c0_78, %c0_79], %225 {strides = array<i32>} : memref<1x512xf32, #tpu.memory_space<vmem>>, vector<1x512xf32>,
    } else {
    }
    return
  }
  func.func @transform_0(%arg0: i32) -> (i32, i32) {
    %c0_i32 = arith.constant 0 : i32
    %c0_i32_0 = arith.constant 0 : i32
    %c0_i32_1 = arith.constant 0 : i32
    return %c0_i32, %c0_i32_0 : i32, i32
  }
  func.func @transform_1(%arg0: i32) -> (i32, i32, i32) {
    %c0_i32 = arith.constant 0 : i32
    %c0_i32_0 = arith.constant 0 : i32
    %c0_i32_1 = arith.constant 0 : i32
    return %arg0, %c0_i32, %c0_i32_0 : i32, i32, i32
  }
  func.func @transform_2(%arg0: i32) -> (i32, i32, i32) {
    %c0_i32 = arith.constant 0 : i32
    %c0_i32_0 = arith.constant 0 : i32
    %c0_i32_1 = arith.constant 0 : i32
    return %arg0, %c0_i32, %c0_i32_0 : i32, i32, i32
  }
  func.func @transform_3(%arg0: i32) -> (i32, i32, i32) {
    %c0_i32 = arith.constant 0 : i32
    %c0_i32_0 = arith.constant 0 : i32
    %c0_i32_1 = arith.constant 0 : i32
    return %arg0, %c0_i32, %c0_i32_0 : i32, i32, i32
  }
  func.func @transform_4(%arg0: i32) -> (i32, i32, i32) {
    %c0_i32 = arith.constant 0 : i32
    %c0_i32_0 = arith.constant 0 : i32
    %c0_i32_1 = arith.constant 0 : i32
    return %arg0, %c0_i32, %c0_i32_0 : i32, i32, i32
  }
  func.func @transform_5(%arg0: i32) -> (i32, i32, i32) {
    %c0_i32 = arith.constant 0 : i32
    %c0_i32_0 = arith.constant 0 : i32
    %c0_i32_1 = arith.constant 0 : i32
    return %arg0, %c0_i32, %c0_i32_0 : i32, i32, i32
  }
  func.func @transform_6(%arg0: i32) -> (i32, i32, i32) {
    %c0_i32 = arith.constant 0 : i32
    %c0_i32_0 = arith.constant 0 : i32
    %c0_i32_1 = arith.constant 0 : i32
    return %arg0, %c0_i32, %c0_i32_0 : i32, i32, i32
  }
  func.func @transform_7(%arg0: i32) -> (i32, i32, i32) {
    %c0_i32 = arith.constant 0 : i32
    %c0_i32_0 = arith.constant 0 : i32
    %c0_i32_1 = arith.constant 0 : i32
    return %arg0, %c0_i32, %c0_i32_0 : i32, i32, i32
  }
  func.func @transform_8(%arg0: i32) -> (i32, i32, i32) {
    %c0_i32 = arith.constant 0 : i32
    %c0_i32_0 = arith.constant 0 : i32
    %c0_i32_1 = arith.constant 0 : i32
    return %arg0, %c0_i32, %c0_i32_0 : i32, i32, i32
  }
  func.func @transform_9(%arg0: i32) -> (i32, i32, i32) {
    %c0_i32 = arith.constant 0 : i32
    %c0_i32_0 = arith.constant 0 : i32
    %c0_i32_1 = arith.constant 0 : i32
    return %arg0, %c0_i32, %c0_i32_0 : i32, i32, i32
  }
  func.func @transform_10(%arg0: i32) -> (i32, i32, i32) {
    %c0_i32 = arith.constant 0 : i32
    %c0_i32_0 = arith.constant 0 : i32
    %c0_i32_1 = arith.constant 0 : i32
    return %arg0, %c0_i32, %c0_i32_0 : i32, i32, i32
  }
  func.func @transform_11(%arg0: i32) -> (i32, i32, i32) {
    %c0_i32 = arith.constant 0 : i32
    %c0_i32_0 = arith.constant 0 : i32
    %c0_i32_1 = arith.constant 0 : i32
    return %arg0, %c0_i32, %c0_i32_0 : i32, i32, i32
  }
  func.func @transform_12(%arg0: i32) -> (i32, i32) {
    %c0_i32 = arith.constant 0 : i32
    %c0_i32_0 = arith.constant 0 : i32
    %c0_i32_1 = arith.constant 0 : i32
    return %c0_i32, %c0_i32_0 : i32, i32
  }
  func.func @transform_13(%arg0: i32) -> (i32, i32) {
    %c0_i32 = arith.constant 0 : i32
    %c0_i32_0 = arith.constant 0 : i32
    %c0_i32_1 = arith.constant 0 : i32
    return %c0_i32, %c0_i32_0 : i32, i32
  }
  func.func @transform_14(%arg0: i32) -> (i32, i32) {
    %c0_i32 = arith.constant 0 : i32
    %c0_i32_0 = arith.constant 0 : i32
    %c0_i32_1 = arith.constant 0 : i32
    return %c0_i32, %c0_i32_0 : i32, i32
  }
  func.func @transform_15(%arg0: i32) -> (i32, i32) {
    %c0_i32 = arith.constant 0 : i32
    %c0_i32_0 = arith.constant 0 : i32
    %c0_i32_1 = arith.constant 0 : i32
    return %c0_i32, %c0_i32_0 : i32, i32
  }
}

</mosaic_0001>

<bundles_post_ra>
// kernel: tpu_custom_call.1
= control target key start
LH: loop header
LB: loop body
LE: loop exit
PB: predicated region body
PF: predicated region fallthrough
CT: control target
= control target key end

     0   :  { %s14797_s0 = inlined_call_operand.hbm [shape: f32[8,512], index: 0, kind: input, shape index: {}]   ;;  %s14798_s1 = inlined_call_operand.hbm [shape: s8[2,512,2048], index: 1, kind: input, shape index: {}]   ;;  %s14799_s2 = inlined_call_operand.hbm [shape: f32[2,1,2048], index: 2, kind: input, shape index: {}]   ;;  %s14800_s3 = inlined_call_operand.hbm [shape: f32[2,4,1024], index: 3, kind: input, shape index: {}]   ;;  %s14801_s4 = inlined_call_operand.hbm [shape: f32[2,1,1024], index: 4, kind: input, shape index: {}]   ;;  %s14802_s5 = inlined_call_operand.vmem [shape: bf16[2,1024,64], index: 5, kind: input, shape index: {}]   ;;  %s14803_s6 = inlined_call_operand.hbm [shape: bf16[2,32,1024], index: 6, kind: input, shape index: {}]   ;;  %s14804_s7 = inlined_call_operand.hbm [shape: f32[2,1,1024], index: 7, kind: input, shape index: {}]   ;;  %s14805_s8 = inlined_call_operand.hbm [shape: f32[2,16,1024], index: 8, kind: input, shape index: {}]   ;;  %s14806_s9 = inlined_call_operand.hbm [shape: f32[2,1,1024], index: 9, kind: input, shape index: {}]   ;;  %s14807_s10 = inlined_call_operand.hbm [shape: s8[2,1024,512], index: 10, kind: input, shape index: {}]   ;;  %s14808_s11 = inlined_call_operand.hbm [shape: f32[2,1,512], index: 11, kind: input, shape index: {}]   ;;  %s14809_s12 = inlined_call_operand.hbm [shape: bf16[512,128], index: 12, kind: input, shape index: {}]   ;;  %s14810_s13 = inlined_call_operand.hbm [shape: f32[1,128], index: 13, kind: input, shape index: {}]   ;;  %s14811_s14 = inlined_call_operand.hbm [shape: f32[1,128], index: 14, kind: input, shape index: {}]   ;;  %s14812_s15 = inlined_call_operand.hbm [shape: f32[1,512], index: 15, kind: output, shape index: {}]  }
   0x1   :  { %14971 = sst [smem:[#allocation124_spill]] %s14797_s0 }
   0x2   :  { %14972 = sst [smem:[#allocation125_spill]] %s14798_s1 }
   0x3   :  { %14973 = sst [smem:[#allocation126_spill]] %s14799_s2 }
   0x4   :  { %14974 = sst [smem:[#allocation127_spill]] %s14800_s3 }
   0x5   :  { %14975 = sst [smem:[#allocation128_spill]] %s14802_s5 }
   0x6   :  { %14976 = sst [smem:[#allocation129_spill]] %s14806_s9 }
   0x7   :  { %14977 = sst [smem:[#allocation130_spill]] %s14808_s11 }
   0x8   :  { %14978 = sst [smem:[#allocation131_spill]] %s14812_s15 }
   0x9   :  { %20 = vsyncpa [#allocation5], 0 }
   0xa   :  { %21 = vsyncpa [#allocation8], 0 }
   0xb   :  { %23 = vsyncpa [#allocation8 + $0x1], 0 }
   0xc   :  { %24 = vsyncpa [#allocation11], 0 }
   0xd   :  { %26 = vsyncpa [#allocation11 + $0x1], 0 }
   0xe   :  { %27 = vsyncpa [#allocation14], 0 }
   0xf   :  { %29 = vsyncpa [#allocation14 + $0x1], 0 }
  0x10   :  { %30 = vsyncpa [#allocation17], 0 }
  0x11   :  { %32 = vsyncpa [#allocation17 + $0x1], 0 }
  0x12   :  { %33 = vsyncpa [#allocation20], 0 }
  0x13   :  { %35 = vsyncpa [#allocation20 + $0x1], 0 }
  0x14   :  { %36 = vsyncpa [#allocation23], 0 }
  0x15   :  { %37 = vsyncpa [#allocation26], 0 }
  0x16   :  { %38 = vsyncpa [#allocation6], 0  ;;  %s11711_s18 = smov 0   ;;  %s11713_s19 = smov 0  }
  0x17   :  { %s11715_s20 = smov 0   ;;  %s11717_s21 = smov 0  }
  0x18 LB: > { %14979 = sst [smem:[#allocation37_spill]] %s11594_s19  ;;  %s11730_s22 = sadd.s32 4294967295, %s11602_s21   ;;  %s11602_s21 = sphi %s11717_s21, %s15288_s21   ;;  %s11598_s20 = sphi %s11715_s20, %s15291_s20   ;;  %s11594_s19 = sphi %s11713_s19, %s15290_s19   ;;  %s11590_s18 = sphi %s11711_s18, %s15289_s18  }
  0x19   : > { %14980 = sst [smem:[#allocation38_spill]] %s11598_s20  ;;  %s11733_s23 = sadd.s32 1, %s11602_s21  }
  0x1a   : > { %14981 = sst [smem:[#allocation39_spill]] %s11730_s22  ;;  %s69_s24 = ssub.s32 %s11602_s21, %s11733_s23 }
  0x1b   : > { %14982 = sst [smem:[#allocation40_spill]] %s11733_s23  ;;  %s72_s25 = sadd.s32 1, %s11598_s20 }
  0x1c   : > { %p70_p0 = scmp.eq.s32.totalorder %s69_s24, 0  ;;  %p79_p1 = scmp.ne.s32.totalorder %s11598_s20, %s11594_s19 }
  0x1d   : > { %p80_p2 = scmp.eq.s32.totalorder %s11602_s21, 0  ;;  %p85_p3 = scmp.ne.s32.totalorder %s11594_s19, %s11590_s18 }
  0x1e   : > { %s11743_s26 = scalar_select %p70_p0, %s11598_s20, %s72_s25  }
  0x1f   : > { %p11745_p4 = por %p80_p2, %p79_p1  ;;  %p14813_p5 = scmp.eq.s32.totalorder %s11730_s22, 0 }
  0x20   : > { %14983 = sst [smem:[#allocation41_spill]] %s11743_s26  ;;  %p10109_p6 = scmp.ge.s32.totalorder %s11602_s21, 1 }
  0x21   : > { %p440_p7 = scmp.lt.s32.totalorder %s11602_s21, 3  ;;  %p11754_p8 = por %p14813_p5, %p85_p3 }
  0x22   : > { %s11604_s30 = smov [#allocation22]   ;;  %p10585_p13 = scmp.lt.s32.totalorder %s11602_s21, 2 }
  0x23   : > { %s14985_s28 = scalar_select %p11754_p8, 1, 0 }
  0x24   : > { %p11759_p10 = pnand %p10109_p6, %p440_p7  ;;  %s463_s16 = sshll.u32 %s11604_s30, 4  ;;  %s464_s16 = int_to_ptr.vmem [resolvable:$true] %s463_s16 }
  0x25   : > { %14986 = sst [smem:[#allocation42_spill]] %s14985_s28  ;;  %s11773_s18 = sand.u32 1, %s11602_s21  }
  0x26   : > { %s14987_s29 = scalar_select %p11759_p10, 1, 0 }
  0x27   : > { %p10537_p11 = pneg %p11759_p10  ;;  %s11776_s24 = sand.u32 1, %s11598_s20  }
  0x28   : > { %14988 = sst [smem:[#allocation43_spill]] %s14987_s29  ;;  %p11780_p0 = pnand %p10585_p13, %p11745_p4 }
  0x29   : > { %p11767_p12 = pnand %p10537_p11, %p14813_p5  ;;  %s11139_s30 = scalar_lea.vmem %s464_s16, 4096 }
  0x2a   : > { %p11140_p2 = scmp.ne.s32.totalorder %s464_s16, %s11139_s30  ;;  %p11147_p7 = scmp.lt.s32.totalorder %s464_s16, %s464_s16 }
  0x2b   : > { %s14989_s17 = scalar_select %p11767_p12, 1, 0 }
  0x2c   : > { %p14826_p1 = pneg %p11767_p12  ;;  %p11148_p11 = scmp.lt.s32.totalorder %s11139_s30, %s11139_s30 }
  0x2e   : > { %p11142_p3 = pnand %p11140_p2, %p14826_p1  ;;  %p11149_p9 = por %p11148_p11, %p11147_p7 }
  0x30   : > { %p11143_p6 = pneg %p11142_p3 }
  0x32   : > { %p11150_p5 = pnand %p11149_p9, %p11143_p6 }
  0x34   : > { %11153 = shalt.err (!%p11150_p5)
}
  0x35   : > { %s14831_s26 = smov 64   ;;  %s11606_s27 = smov 4  }
  0x36   : > { %10543 = dma.hbm_to_vmem [thread:$0]  (!%p11767_p12), %s14809_s12, 4096, %s464_s16, [#allocation23], %s14831_s26, %s14831_s26, %s11606_s27  }
  0x37   : > { %s10115_s15 = sshll.u32 %s11776_s24, 11  ;;  %s10350_s5 = sshll.u32 %s11602_s21, 15 }
  0x38   : > { %s14991_s1 = sld [smem:[#allocation125_spill]]  ;;  %s503_s22 = scalar_lea.vmem [#allocation7], %s10115_s15 }
  0x39   : > { %s510_s29 = sshll.u32 %s503_s22, 4  ;;  %s14833_s11 = scalar_lea.sflag [#allocation8], %s11773_s18  ;;  %s11803_s29 = int_to_ptr.vmem [resolvable:$true] %s510_s29 }
  0x3a   : > { %p11810_p5 = pneg %p11780_p0 }
  0x3e   : > { %s11801_s19 = scalar_lea.hbm %s14991_s1, %s10350_s5  ;;  %s11159_s28 = scalar_lea.hbm %s14991_s1, 65536 }
  0x3f   : > { %s11154_s9 = scalar_lea.hbm %s11801_s19, 32768  ;;  %p11160_p2 = scmp.lt.s32.totalorder %s11801_s19, %s14991_s1 }
  0x40   : > { %p11155_p4 = scmp.ne.s32.totalorder %s11801_s19, %s11154_s9  ;;  %p11161_p3 = scmp.lt.s32.totalorder %s11159_s28, %s11154_s9 }
  0x42   : > { %p11157_p9 = pnand %p11810_p5, %p11155_p4  ;;  %p11162_p6 = por %p11161_p3, %p11160_p2 }
  0x44   : > { %p11158_p13 = pneg %p11157_p9 }
  0x46   : > { %p11163_p7 = pnand %p11162_p6, %p11158_p13 }
  0x48   : > { %11166 = shalt.err (!%p11163_p7)
}
  0x49   : > { %s11167_s16 = scalar_lea.vmem %s11803_s29, 32768  ;;  %s11607_s27 = smov [#allocation7]  }
  0x4a   : > { %p11168_p11 = scmp.ne.s32.totalorder %s11803_s29, %s11167_s16  ;;  %s11172_s30 = sshll.u32 %s11607_s27, 4  ;;  %s11173_s30 = int_to_ptr.vmem [resolvable:$false] %s11172_s30 }
  0x4b   : > { %s11174_s5 = scalar_lea.vmem %s11173_s30, 65536  ;;  %p11175_p1 = scmp.lt.s32.totalorder %s11803_s29, %s11173_s30 }
  0x4c   : > { %p11170_p4 = pnand %p11168_p11, %p11810_p5  ;;  %p11176_p8 = scmp.lt.s32.totalorder %s11174_s5, %s11167_s16 }
  0x4e   : > { %p11171_p9 = pneg %p11170_p4  ;;  %p11177_p10 = por %p11176_p8, %p11175_p1 }
  0x50   : > { %p11178_p12 = pnand %p11177_p10, %p11171_p9 }
  0x52   : > { %11181 = shalt.err (!%p11178_p12)
}
  0x53   : > { %s11608_s9 = smov 2048   ;;  %s11609_s23 = smov 128  }
  0x54   : > { %10553 = dma.hbm_to_vmem [thread:$0]  (!%p11780_p0), %s11801_s19, 32768, %s11803_s29, %s14833_s11, %s11608_s9, %s11608_s9, %s11609_s23  }
  0x55   : > { %s10121_s28 = sshll.u32 %s11776_s24, 5  ;;  %s10352_s15 = sshll.u32 %s11602_s21, 9 }
  0x56   : > { %s14993_s3 = sld [smem:[#allocation127_spill]]  ;;  %s543_s30 = scalar_lea.vmem [#allocation10], %s10121_s28 }
  0x57   : > { %s551_s5 = sshll.u32 %s543_s30, 4  ;;  %s14832_s26 = scalar_lea.sflag [#allocation11], %s11773_s18  ;;  %s552_s5 = int_to_ptr.vmem [resolvable:$true] %s551_s5 }
  0x5c   : > { %s11839_s27 = scalar_lea.hbm %s14993_s3, %s10352_s15  ;;  %s11187_s9 = scalar_lea.hbm %s14993_s3, 1024 }
  0x5d   : > { %s11182_s1 = scalar_lea.hbm %s11839_s27, 512  ;;  %p11188_p1 = scmp.lt.s32.totalorder %s11839_s27, %s14993_s3 }
  0x5e   : > { %p11183_p8 = scmp.ne.s32.totalorder %s11839_s27, %s11182_s1  ;;  %p11189_p13 = scmp.lt.s32.totalorder %s11187_s9, %s11182_s1 }
  0x60   : > { %p11185_p10 = pnand %p11183_p8, %p11810_p5  ;;  %p11190_p2 = por %p11189_p13, %p11188_p1 }
  0x62   : > { %p11186_p12 = pneg %p11185_p10 }
  0x64   : > { %p11191_p3 = pnand %p11190_p2, %p11186_p12 }
  0x66   : > { %11194 = shalt.err (!%p11191_p3)
}
  0x67   : > { %s11195_s28 = scalar_lea.vmem %s552_s5, 512  ;;  %s11610_s15 = smov [#allocation10]  }
  0x68   : > { %p11196_p6 = scmp.ne.s32.totalorder %s552_s5, %s11195_s28  ;;  %s11200_s16 = sshll.u32 %s11610_s15, 4  ;;  %s11201_s16 = int_to_ptr.vmem [resolvable:$false] %s11200_s16 }
  0x69   : > { %s11202_s30 = scalar_lea.vmem %s11201_s16, 1024  ;;  %p11203_p4 = scmp.lt.s32.totalorder %s552_s5, %s11201_s16 }
  0x6a   : > { %p11198_p7 = pnand %p11196_p6, %p11810_p5  ;;  %p11204_p9 = scmp.lt.s32.totalorder %s11202_s30, %s11195_s28 }
  0x6c   : > { %p11199_p11 = pneg %p11198_p7  ;;  %p11205_p8 = por %p11204_p9, %p11203_p4 }
  0x6e   : > { %p11206_p10 = pnand %p11205_p8, %p11199_p11 }
  0x70   : > { %11209 = shalt.err (!%p11206_p10)
}
  0x71   : > { %10559 = dma.hbm_to_vmem [thread:$0]  (!%p11780_p0), %s11839_s27, 512, %s552_s5, %s14832_s26  }
  0x72   : > { %s10127_s1 = sshll.u32 %s11776_s24, 7  ;;  %s10354_s19 = sshll.u32 %s11602_s21, 11 }
  0x73   : > { %s11867_s23 = scalar_lea.hbm %s14803_s6, %s10354_s19  ;;  %s589_s22 = scalar_lea.vmem [#allocation13], %s10127_s1 }
  0x74   : > { %s596_s28 = sshll.u32 %s589_s22, 4  ;;  %s14834_s15 = scalar_lea.sflag [#allocation14], %s11773_s18  ;;  %s11871_s28 = int_to_ptr.vmem [resolvable:$true] %s596_s28 }
  0x75   : > { %s11210_s16 = scalar_lea.hbm %s11867_s23, 2048  ;;  %s11215_s30 = scalar_lea.hbm %s14803_s6, 4096 }
  0x76   : > { %p11211_p12 = scmp.ne.s32.totalorder %s11867_s23, %s11210_s16  ;;  %p11216_p2 = scmp.lt.s32.totalorder %s11867_s23, %s14803_s6 }
  0x77   : > { %p11217_p3 = scmp.lt.s32.totalorder %s11215_s30, %s11210_s16 }
  0x78   : > { %p11213_p1 = pnand %p11211_p12, %p11810_p5 }
  0x79   : > { %p11218_p6 = por %p11217_p3, %p11216_p2 }
  0x7a   : > { %p11214_p13 = pneg %p11213_p1 }
  0x7c   : > { %p11219_p7 = pnand %p11218_p6, %p11214_p13 }
  0x7e   : > { %11222 = shalt.err (!%p11219_p7)
}
  0x7f   : > { %s11223_s22 = scalar_lea.vmem %s11871_s28, 2048  ;;  %s11611_s26 = smov [#allocation13]  }
  0x80   : > { %p11224_p11 = scmp.ne.s32.totalorder %s11871_s28, %s11223_s22  ;;  %s11228_s27 = sshll.u32 %s11611_s26, 4  ;;  %s11229_s27 = int_to_ptr.vmem [resolvable:$false] %s11228_s27 }
  0x81   : > { %s11230_s5 = scalar_lea.vmem %s11229_s27, 4096  ;;  %p11231_p8 = scmp.lt.s32.totalorder %s11871_s28, %s11229_s27 }
  0x82   : > { %p11226_p4 = pnand %p11224_p11, %p11810_p5  ;;  %p11232_p10 = scmp.lt.s32.totalorder %s11230_s5, %s11223_s22 }
  0x84   : > { %p11227_p9 = pneg %p11226_p4  ;;  %p11233_p12 = por %p11232_p10, %p11231_p8 }
  0x86   : > { %p11234_p1 = pnand %p11233_p12, %p11227_p9 }
  0x88   : > { %11237 = shalt.err (!%p11234_p1)
}
  0x89   : > { %s14835_s16 = smov 512   ;;  %s14836_s30 = smov 32  }
  0x8a   : > { %10565 = dma.hbm_to_vmem [thread:$0]  (!%p11780_p0), %s11867_s23, 2048, %s11871_s28, %s14834_s15, %s14835_s16, %s14835_s16, %s14836_s30  }
  0x8b   : > { %s11904_s9 = scalar_lea.hbm %s14805_s8, %s10354_s19  ;;  %s629_s22 = scalar_lea.vmem [#allocation16], %s10127_s1 }
  0x8c   : > { %s636_s27 = sshll.u32 %s629_s22, 4  ;;  %s14838_s5 = scalar_lea.sflag [#allocation17], %s11773_s18  ;;  %s11908_s27 = int_to_ptr.vmem [resolvable:$true] %s636_s27 }
  0x8d   : > { %s11238_s11 = scalar_lea.hbm %s11904_s9, 2048  ;;  %s11243_s26 = scalar_lea.hbm %s14805_s8, 4096 }
  0x8e   : > { %p11239_p13 = scmp.ne.s32.totalorder %s11904_s9, %s11238_s11  ;;  %p11244_p6 = scmp.lt.s32.totalorder %s11904_s9, %s14805_s8 }
  0x8f   : > { %p11245_p7 = scmp.lt.s32.totalorder %s11243_s26, %s11238_s11 }
  0x90   : > { %p11241_p2 = pnand %p11239_p13, %p11810_p5 }
  0x91   : > { %p11246_p11 = por %p11245_p7, %p11244_p6 }
  0x92   : > { %p11242_p3 = pneg %p11241_p2 }
  0x94   : > { %p11247_p4 = pnand %p11246_p11, %p11242_p3 }
  0x96   : > { %11250 = shalt.err (!%p11247_p4)
}
  0x97   : > { %s11251_s1 = scalar_lea.vmem %s11908_s27, 2048  ;;  %s11614_s22 = smov [#allocation16]  }
  0x98   : > { %p11252_p9 = scmp.ne.s32.totalorder %s11908_s27, %s11251_s1  ;;  %s11256_s23 = sshll.u32 %s11614_s22, 4  ;;  %s11257_s23 = int_to_ptr.vmem [resolvable:$false] %s11256_s23 }
  0x99   : > { %s11258_s28 = scalar_lea.vmem %s11257_s23, 4096  ;;  %p11259_p12 = scmp.lt.s32.totalorder %s11908_s27, %s11257_s23 }
  0x9a   : > { %p11254_p8 = pnand %p11252_p9, %p11810_p5  ;;  %p11260_p1 = scmp.lt.s32.totalorder %s11258_s28, %s11251_s1 }
  0x9c   : > { %p11255_p10 = pneg %p11254_p8  ;;  %p11261_p13 = por %p11260_p1, %p11259_p12 }
  0x9e   : > { %p11262_p2 = pnand %p11261_p13, %p11255_p10 }
  0xa0   : > { %11265 = shalt.err (!%p11262_p2)
}
  0xa1   : > { %s11615_s11 = smov 1024   ;;  %s14994_s26 = smov 64  }
  0xa2   : > { %10571 = dma.hbm_to_vmem [thread:$0]  (!%p11780_p0), %s11904_s9, 2048, %s11908_s27, %s14838_s5, %s11615_s11, %s11615_s11, %s14994_s26  }
  0xa3   : > { %s10139_s19 = sshll.u32 %s11776_s24, 10  ;;  %s10358_s29 = sshll.u32 %s11602_s21, 14 }
  0xa4   : > { %s11939_s23 = scalar_lea.hbm %s14807_s10, %s10358_s29  ;;  %s669_s28 = scalar_lea.vmem [#allocation19], %s10139_s19 }
  0xa5   : > { %s676_s15 = sshll.u32 %s669_s28, 4  ;;  %s14837_s16 = scalar_lea.sflag [#allocation20], %s11773_s18  ;;  %s11941_s15 = int_to_ptr.vmem [resolvable:$true] %s676_s15 }
  0xa6   : > { %s11266_s30 = scalar_lea.hbm %s11939_s23, 16384  ;;  %s11271_s11 = scalar_lea.hbm %s14807_s10, 32768 }
  0xa7   : > { %p11267_p3 = scmp.ne.s32.totalorder %s11939_s23, %s11266_s30  ;;  %p11272_p11 = scmp.lt.s32.totalorder %s11939_s23, %s14807_s10 }
  0xa8   : > { %p11273_p4 = scmp.lt.s32.totalorder %s11271_s11, %s11266_s30 }
  0xa9   : > { %p11269_p6 = pnand %p11267_p3, %p11810_p5 }
  0xaa   : > { %p11274_p9 = por %p11273_p4, %p11272_p11 }
  0xab   : > { %p11270_p7 = pneg %p11269_p6 }
  0xad   : > { %p11275_p8 = pnand %p11274_p9, %p11270_p7 }
  0xaf   : > { %11278 = shalt.err (!%p11275_p8)
}
  0xb0   : > { %s11279_s19 = scalar_lea.vmem %s11941_s15, 16384  ;;  %s11616_s22 = smov [#allocation19]  }
  0xb1   : > { %p11280_p10 = scmp.ne.s32.totalorder %s11941_s15, %s11279_s19  ;;  %s11284_s1 = sshll.u32 %s11616_s22, 4  ;;  %s11285_s1 = int_to_ptr.vmem [resolvable:$false] %s11284_s1 }
  0xb2   : > { %s11286_s28 = scalar_lea.vmem %s11285_s1, 32768  ;;  %p11287_p13 = scmp.lt.s32.totalorder %s11941_s15, %s11285_s1 }
  0xb3   : > { %p11282_p12 = pnand %p11280_p10, %p11810_p5  ;;  %p11288_p2 = scmp.lt.s32.totalorder %s11286_s28, %s11279_s19 }
  0xb5   : > { %p11283_p1 = pneg %p11282_p12  ;;  %p11289_p3 = por %p11288_p2, %p11287_p13 }
  0xb7   : > { %p11290_p6 = pnand %p11289_p3, %p11283_p1 }
  0xb9   : > { %11293 = shalt.err (!%p11290_p6)
}
  0xba   : > { %s14995_s30 = smov 32   ;;  %s14996_s9 = smov 512  }
  0xbb   : > { %10577 = dma.hbm_to_vmem [thread:$0]  (!%p11780_p0), %s11939_s23, 16384, %s11941_s15, %s14837_s16, %s14996_s9, %s14996_s9, %s14995_s30  }
  0xbc   : > { %s11617_s27 = smov [#allocation4]   ;;  %s11618_s26 = smov [#allocation24]  }
  0xbd   : > { %s453_s11 = sshll.u32 %s11617_s27, 4  ;;  %s477_s29 = sshll.u32 %s11618_s26, 4  ;;  %s454_s11 = int_to_ptr.vmem [resolvable:$true] %s453_s11  ;;  %s478_s29 = int_to_ptr.vmem [resolvable:$true] %s477_s29 }
  0xbe   : > { %s11305_s19 = scalar_lea.vmem %s454_s11, 512  ;;  %p14997_p11 = scmp.ne.s32.totalorder %s14989_s17, 0 }
  0xbf   : > { %p11306_p7 = scmp.ne.s32.totalorder %s454_s11, %s11305_s19  ;;  %p11313_p10 = scmp.lt.s32.totalorder %s454_s11, %s454_s11 }
  0xc0   : > { %p14998_p4 = pneg %p14997_p11  ;;  %p11314_p12 = scmp.lt.s32.totalorder %s11305_s19, %s11305_s19 }
  0xc2   : > { %p11308_p9 = pnand %p11306_p7, %p14998_p4  ;;  %p11315_p1 = por %p11314_p12, %p11313_p10 }
  0xc4   : > { %p11309_p8 = pneg %p11308_p9 }
  0xc6   : > { %p11316_p13 = pnand %p11315_p1, %p11309_p8 }
  0xc8   : > { %11319 = shalt.err (!%p11316_p13)
}
  0xc9   : > { %s14999_s0 = sld [smem:[#allocation124_spill]]  ;;  %s11331_s23 = scalar_lea.vmem %s478_s29, 16 }
  0xca   : > { %p11332_p2 = scmp.ne.s32.totalorder %s478_s29, %s11331_s23  ;;  %p15000_p3 = pmov %p14998_p4 }
  0xcb   : > { %s11338_s1 = scalar_lea.vmem %s478_s29, 32  ;;  %p11339_p4 = scmp.lt.s32.totalorder %s478_s29, %s478_s29 }
  0xcc   : > { %p11334_p6 = pnand %p11332_p2, %p15000_p3  ;;  %p11340_p9 = scmp.lt.s32.totalorder %s11338_s1, %s11331_s23 }
  0xce   : > { %p11335_p7 = pneg %p11334_p6  ;;  %p11341_p10 = por %p11340_p9, %p11339_p4 }
  0xcf   : > { %10540 = dma.hbm_to_vmem [thread:$0]  (!%p14997_p11), %s14999_s0, 512, %s454_s11, [#allocation5]  }
  0xd0   : > { %p11342_p8 = pnand %p11341_p10, %p11335_p7 }
  0xd2   : > { %11345 = shalt.err (!%p11342_p8)
}
  0xd3   : > { %10546 = dma.hbm_to_vmem [thread:$0]  (!%p14997_p11), %s14810_s13, 16, %s478_s29, [#allocation23]  }
  0xd4   : > { %s11619_s9 = smov [#allocation25]   ;;  %s10118_s11 = sshll.u32 %s11776_s24, 4 }
  0xd5   : > { %s488_s27 = sshll.u32 %s11619_s9, 4  ;;  %p15001_p1 = pmov %p15000_p3  ;;  %s489_s27 = int_to_ptr.vmem [resolvable:$true] %s488_s27 }
  0xd6   : > { %s11357_s26 = scalar_lea.vmem %s489_s27, 16  ;;  %s11364_s19 = scalar_lea.vmem %s489_s27, 32 }
  0xd7   : > { %p11358_p12 = scmp.ne.s32.totalorder %s489_s27, %s11357_s26  ;;  %p11365_p3 = scmp.lt.s32.totalorder %s489_s27, %s489_s27 }
  0xd8   : > { %p11366_p6 = scmp.lt.s32.totalorder %s11364_s19, %s11357_s26 }
  0xd9   : > { %p11360_p13 = pnand %p11358_p12, %p15001_p1 }
  0xda   : > { %p11367_p7 = por %p11366_p6, %p11365_p3 }
  0xdb   : > { %p11361_p2 = pneg %p11360_p13 }
  0xdd   : > { %p11368_p4 = pnand %p11367_p7, %p11361_p2 }
  0xdf   : > { %11371 = shalt.err (!%p11368_p4)
}
  0xe0   : > { %10549 = dma.hbm_to_vmem [thread:$0]  (!%p14997_p11), %s14811_s14, 16, %s489_s27, [#allocation26]  }
  0xe1   : > { %s10351_s15 = sshll.u32 %s11602_s21, 8  ;;  %s524_s23 = scalar_lea.vmem [#allocation9], %s10118_s11 }
  0xe2   : > { %s532_s1 = sshll.u32 %s524_s23, 4  ;;  %s15002_s2 = sld [smem:[#allocation126_spill]]  ;;  %s533_s1 = int_to_ptr.vmem [resolvable:$true] %s532_s1 }
  0xe8   : > { %s530_s9 = scalar_lea.hbm %s15002_s2, %s10351_s15  ;;  %s11377_s22 = scalar_lea.hbm %s15002_s2, 512 }
  0xe9   : > { %s11372_s26 = scalar_lea.hbm %s530_s9, 256  ;;  %p11378_p11 = scmp.lt.s32.totalorder %s530_s9, %s15002_s2 }
  0xea   : > { %p11373_p9 = scmp.ne.s32.totalorder %s530_s9, %s11372_s26  ;;  %p11379_p12 = scmp.lt.s32.totalorder %s11377_s22, %s11372_s26 }
  0xec   : > { %p11375_p10 = pnand %p11373_p9, %p11810_p5  ;;  %p11380_p1 = por %p11379_p12, %p11378_p11 }
  0xee   : > { %p11376_p8 = pneg %p11375_p10 }
  0xf0   : > { %p11381_p13 = pnand %p11380_p1, %p11376_p8 }
  0xf2   : > { %11384 = shalt.err (!%p11381_p13)
}
  0xf3   : > { %s11385_s27 = scalar_lea.vmem %s533_s1, 256  ;;  %s11620_s11 = smov [#allocation9]  }
  0xf4   : > { %p11386_p2 = scmp.ne.s32.totalorder %s533_s1, %s11385_s27  ;;  %s11390_s15 = sshll.u32 %s11620_s11, 4  ;;  %s11391_s15 = int_to_ptr.vmem [resolvable:$false] %s11390_s15 }
  0xf5   : > { %s11392_s23 = scalar_lea.vmem %s11391_s15, 512  ;;  %p11393_p7 = scmp.lt.s32.totalorder %s533_s1, %s11391_s15 }
  0xf6   : > { %p11388_p3 = pnand %p11386_p2, %p11810_p5  ;;  %p11394_p4 = scmp.lt.s32.totalorder %s11392_s23, %s11385_s27 }
  0xf8   : > { %p11389_p6 = pneg %p11388_p3  ;;  %p11395_p9 = por %p11394_p4, %p11393_p7 }
  0xfa   : > { %p11396_p10 = pnand %p11395_p9, %p11389_p6 }
  0xfc   : > { %11399 = shalt.err (!%p11396_p10)
}
  0xfd   : > { %s15003_s16 = scalar_lea.sflag [#allocation8], %s11773_s18  ;;  %s12013_s28 = sshll.u32 %s11776_s24, 3 }
  0xfe   : > { %10556 = dma.hbm_to_vmem [thread:$0]  (!%p11780_p0), %s530_s9, 256, %s533_s1, %s15003_s16  }
  0xff   : > { %s12016_s30 = sshll.u32 %s11602_s21, 7  ;;  %s562_s22 = scalar_lea.vmem [#allocation12], %s12013_s28 }
 0x100   : > { %s12022_s19 = scalar_lea.hbm %s14801_s4, %s12016_s30  ;;  %s570_s29 = sshll.u32 %s562_s22, 4  ;;  %s571_s29 = int_to_ptr.vmem [resolvable:$true] %s570_s29 }
 0x101   : > { %s12029_s9 = scalar_lea.hbm %s14804_s7, %s12016_s30  ;;  %s11400_s11 = scalar_lea.hbm %s12022_s19, 128 }
 0x102   : > { %p11401_p8 = scmp.ne.s32.totalorder %s12022_s19, %s11400_s11  ;;  %s11405_s16 = scalar_lea.hbm %s14801_s4, 256 }
 0x103   : > { %p11406_p1 = scmp.lt.s32.totalorder %s12022_s19, %s14801_s4  ;;  %p11407_p13 = scmp.lt.s32.totalorder %s11405_s16, %s11400_s11 }
 0x104   : > { %p11403_p11 = pnand %p11401_p8, %p11810_p5 }
 0x105   : > { %p11408_p2 = por %p11407_p13, %p11406_p1 }
 0x106   : > { %p11404_p12 = pneg %p11403_p11 }
 0x108   : > { %p11409_p3 = pnand %p11408_p2, %p11404_p12 }
 0x10a   : > { %11412 = shalt.err (!%p11409_p3)
}
 0x10b   : > { %s11413_s22 = scalar_lea.vmem %s571_s29, 128  ;;  %s11621_s27 = smov [#allocation12]  }
 0x10c   : > { %p11414_p6 = scmp.ne.s32.totalorder %s571_s29, %s11413_s22  ;;  %s11418_s1 = sshll.u32 %s11621_s27, 4  ;;  %s11419_s1 = int_to_ptr.vmem [resolvable:$false] %s11418_s1 }
 0x10d   : > { %s11420_s5 = scalar_lea.vmem %s11419_s1, 256  ;;  %p11421_p9 = scmp.lt.s32.totalorder %s571_s29, %s11419_s1 }
 0x10e   : > { %p11416_p7 = pnand %p11414_p6, %p11810_p5  ;;  %p11422_p10 = scmp.lt.s32.totalorder %s11420_s5, %s11413_s22 }
 0x110   : > { %p11417_p4 = pneg %p11416_p7  ;;  %p11423_p8 = por %p11422_p10, %p11421_p9 }
 0x112   : > { %p11424_p11 = pnand %p11423_p8, %p11417_p4 }
 0x114   : > { %11427 = shalt.err (!%p11424_p11)
}
 0x115   : > { %s15004_s11 = scalar_lea.sflag [#allocation11], %s11773_s18  ;;  %s610_s15 = scalar_lea.vmem [#allocation15], %s12013_s28 }
 0x116   : > { %10562 = dma.hbm_to_vmem [thread:$0]  (!%p11780_p0), %s12022_s19, 128, %s571_s29, %s15004_s11  }
 0x117   : > { %s618_s23 = sshll.u32 %s610_s15, 4  ;;  %s15005_s26 = sld [smem:[#allocation129_spill]]  ;;  %s619_s23 = int_to_ptr.vmem [resolvable:$true] %s618_s23 }
 0x118   : > { %s11428_s22 = scalar_lea.hbm %s12029_s9, 128  ;;  %s11433_s0 = scalar_lea.hbm %s14804_s7, 256 }
 0x119   : > { %p11429_p12 = scmp.ne.s32.totalorder %s12029_s9, %s11428_s22  ;;  %p11434_p2 = scmp.lt.s32.totalorder %s12029_s9, %s14804_s7 }
 0x11a   : > { %p11435_p3 = scmp.lt.s32.totalorder %s11433_s0, %s11428_s22 }
 0x11b   : > { %p11431_p1 = pnand %p11429_p12, %p11810_p5 }
 0x11c   : > { %p11436_p6 = por %p11435_p3, %p11434_p2 }
 0x11d   : > { %s12054_s17 = scalar_lea.hbm %s15005_s26, %s12016_s30  ;;  %p11432_p13 = pneg %p11431_p1 }
 0x11f   : > { %p11437_p7 = pnand %p11436_p6, %p11432_p13 }
 0x121   : > { %11440 = shalt.err (!%p11437_p7)
}
 0x122   : > { %s11441_s19 = scalar_lea.vmem %s619_s23, 128  ;;  %s11622_s30 = smov [#allocation15]  }
 0x123   : > { %p11442_p4 = scmp.ne.s32.totalorder %s619_s23, %s11441_s19  ;;  %s11446_s29 = sshll.u32 %s11622_s30, 4  ;;  %s11447_s29 = int_to_ptr.vmem [resolvable:$false] %s11446_s29 }
 0x124   : > { %s11448_s11 = scalar_lea.vmem %s11447_s29, 256  ;;  %p11449_p8 = scmp.lt.s32.totalorder %s619_s23, %s11447_s29 }
 0x125   : > { %p11444_p9 = pnand %p11442_p4, %p11810_p5  ;;  %p11450_p11 = scmp.lt.s32.totalorder %s11448_s11, %s11441_s19 }
 0x127   : > { %p11445_p10 = pneg %p11444_p9  ;;  %p11451_p12 = por %p11450_p11, %p11449_p8 }
 0x129   : > { %p11452_p1 = pnand %p11451_p12, %p11445_p10 }
 0x12b   : > { %11455 = shalt.err (!%p11452_p1)
}
 0x12c   : > { %s15006_s0 = scalar_lea.sflag [#allocation14], %s11773_s18  ;;  %s650_s2 = scalar_lea.vmem [#allocation18], %s12013_s28 }
 0x12d   : > { %10568 = dma.hbm_to_vmem [thread:$0]  (!%p11780_p0), %s12029_s9, 128, %s619_s23, %s15006_s0  }
 0x12e   : > { %s658_s3 = sshll.u32 %s650_s2, 4  ;;  %s10142_s15 = sshll.u32 %s11776_s24, 2  ;;  %s659_s3 = int_to_ptr.vmem [resolvable:$true] %s658_s3 }
 0x12f   : > { %s11456_s16 = scalar_lea.hbm %s12054_s17, 128  ;;  %s11461_s27 = scalar_lea.hbm %s15005_s26, 256 }
 0x130   : > { %p11457_p13 = scmp.ne.s32.totalorder %s12054_s17, %s11456_s16  ;;  %p11462_p6 = scmp.lt.s32.totalorder %s12054_s17, %s15005_s26 }
 0x131   : > { %p11463_p7 = scmp.lt.s32.totalorder %s11461_s27, %s11456_s16 }
 0x132   : > { %p11459_p2 = pnand %p11457_p13, %p11810_p5 }
 0x133   : > { %p11464_p4 = por %p11463_p7, %p11462_p6 }
 0x134   : > { %p11460_p3 = pneg %p11459_p2 }
 0x136   : > { %p11465_p9 = pnand %p11464_p4, %p11460_p3 }
 0x138   : > { %11468 = shalt.err (!%p11465_p9)
}
 0x139   : > { %s11469_s28 = scalar_lea.vmem %s659_s3, 128  ;;  %s11623_s24 = smov [#allocation18]  }
 0x13a   : > { %p11470_p10 = scmp.ne.s32.totalorder %s659_s3, %s11469_s28  ;;  %s11474_s9 = sshll.u32 %s11623_s24, 4  ;;  %s11475_s9 = int_to_ptr.vmem [resolvable:$false] %s11474_s9 }
 0x13b   : > { %s11476_s23 = scalar_lea.vmem %s11475_s9, 256  ;;  %p11477_p12 = scmp.lt.s32.totalorder %s659_s3, %s11475_s9 }
 0x13c   : > { %p11472_p8 = pnand %p11470_p10, %p11810_p5  ;;  %p11478_p1 = scmp.lt.s32.totalorder %s11476_s23, %s11469_s28 }
 0x13e   : > { %p11473_p11 = pneg %p11472_p8  ;;  %p11479_p13 = por %p11478_p1, %p11477_p12 }
 0x140   : > { %p11480_p2 = pnand %p11479_p13, %p11473_p11 }
 0x142   : > { %11483 = shalt.err (!%p11480_p2)
}
 0x143   : > { %s15007_s30 = scalar_lea.sflag [#allocation17], %s11773_s18  ;;  %s10359_s29 = sshll.u32 %s11602_s21, 6 }
 0x144   : > { %10574 = dma.hbm_to_vmem [thread:$0]  (!%p11780_p0), %s12054_s17, 128, %s659_s3, %s15007_s30  }
 0x145   : > { %s690_s11 = scalar_lea.vmem [#allocation21], %s10142_s15  ;;  %s15008_s5 = sld [smem:[#allocation130_spill]] }
 0x146   : > { %s698_s0 = sshll.u32 %s690_s11, 4  ;;  %s699_s0 = int_to_ptr.vmem [resolvable:$true] %s698_s0 }
 0x14b   : > { %s696_s22 = scalar_lea.hbm %s15008_s5, %s10359_s29  ;;  %s11489_s28 = scalar_lea.hbm %s15008_s5, 128 }
 0x14c   : > { %s11484_s27 = scalar_lea.hbm %s696_s22, 64  ;;  %p11490_p4 = scmp.lt.s32.totalorder %s696_s22, %s15008_s5 }
 0x14d   : > { %p11485_p3 = scmp.ne.s32.totalorder %s696_s22, %s11484_s27  ;;  %p11491_p9 = scmp.lt.s32.totalorder %s11489_s28, %s11484_s27 }
 0x14f   : > { %p11487_p6 = pnand %p11485_p3, %p11810_p5  ;;  %p11492_p10 = por %p11491_p9, %p11490_p4 }
 0x151   : > { %p11488_p7 = pneg %p11487_p6 }
 0x153   : > { %p11493_p8 = pnand %p11492_p10, %p11488_p7 }
 0x155   : > { %11496 = shalt.err (!%p11493_p8)
}
 0x156   : > { %s11497_s21 = scalar_lea.vmem %s699_s0, 64  ;;  %s11624_s17 = smov [#allocation21]  }
 0x157   : > { %p11498_p11 = scmp.ne.s32.totalorder %s699_s0, %s11497_s21  ;;  %s11502_s3 = sshll.u32 %s11624_s17, 4  ;;  %s11503_s3 = int_to_ptr.vmem [resolvable:$false] %s11502_s3 }
 0x158   : > { %s11504_s15 = scalar_lea.vmem %s11503_s3, 128  ;;  %p11505_p13 = scmp.lt.s32.totalorder %s699_s0, %s11503_s3 }
 0x159   : > { %p11500_p12 = pnand %p11498_p11, %p11810_p5  ;;  %p11506_p2 = scmp.lt.s32.totalorder %s11504_s15, %s11497_s21 }
 0x15b   : > { %p11501_p1 = pneg %p11500_p12  ;;  %p11507_p3 = por %p11506_p2, %p11505_p13 }
 0x15d   : > { %p11508_p6 = pnand %p11507_p3, %p11501_p1 }
 0x15f   : > { %11511 = shalt.err (!%p11508_p6)
}
 0x160   : > { %s15009_s23 = scalar_lea.sflag [#allocation20], %s11773_s18  ;;  %s15010_s30 = sld [smem:[#allocation43_spill]] }
 0x161   : > { %10580 = dma.hbm_to_vmem [thread:$0]  (!%p11780_p0), %s696_s22, 64, %s699_s0, %s15009_s23  }
 0x166   : > { %p15011_p7 = scmp.ne.s32.totalorder %s15010_s30, 0 }
 0x168   : > { %707 = sbr.rel (%p15011_p7) target bundleno = 4672 (0x1240), region = 80 }
 0x16d   : > { %s15012_s20 = sld [smem:[#allocation39_spill]] }
 0x173   : > { %p15013_p5 = scmp.eq.s32.totalorder %s15012_s20, 0 }
 0x175   : > { %11553 = dma.done.wait (%p15013_p5), [#allocation5], 512   ;;  %p15014_p4 = pmov %p15013_p5 }
 0x176   : > { %s15015_s29 = sld [smem:[#allocation37_spill]]  ;;  %s12119_s2 = sand.u32 1, %s15012_s20  }
 0x177   : > { %11555 = vsyncadd (%p15014_p4), [#allocation5], 4294966784  ;;  %s15016_s11 = sld [smem:[#allocation42_spill]]  ;;  %s714_s25 = scalar_lea.sflag [#allocation8], %s12119_s2 }
 0x17c   : > { %s12122_s16 = sand.u32 1, %s15015_s29  }
 0x17d   : > { %s10147_s18 = sshll.u32 %s12122_s16, 11  ;;  %p15017_p0 = scmp.ne.s32.totalorder %s15016_s11, 0 }
 0x17e   : > { %s12126_s0 = scalar_lea.vmem [#allocation7], %s10147_s18 }
 0x17f   : > { %11557 = dma.done.wait (%p15017_p0), %s714_s25, 33024  }
 0x180   : > { %11559 = vsyncadd (%p15017_p0), %s714_s25, 4294934272  ;;  %s10148_s22 = sshll.u32 %s12122_s16, 4  ;;  %s10149_s27 = sshll.u32 %s12122_s16, 5 }
 0x181   : > { %s12134_s1 = scalar_lea.vmem [#allocation9], %s10148_s22  ;;  %s732_s19 = scalar_lea.sflag [#allocation11], %s12119_s2 }
 0x182   : > { %s12137_s28 = scalar_lea.vmem [#allocation10], %s10149_s27 }
 0x183   : > { %11561 = dma.done.wait (%p15017_p0), %s732_s19, 640  }
 0x184   : > { %11563 = vsyncadd (%p15017_p0), %s732_s19, 4294966656  ;;  %s12144_s24 = sshll.u32 %s12122_s16, 3  ;;  %s10151_s9 = sshll.u32 %s12122_s16, 7 }
 0x185   : > { %s744_s21 = scalar_lea.vmem [#allocation12], %s12144_s24  ;;  %s750_s17 = scalar_lea.sflag [#allocation14], %s12119_s2 }
 0x186   : > { %s12149_s3 = scalar_lea.vmem [#allocation13], %s10151_s9 }
 0x187   : > { %11565 = dma.done.wait (%p15017_p0), %s750_s17, 2176  }
 0x188   : > { %11567 = vsyncadd (%p15017_p0), %s750_s17, 4294965120  ;;  %s762_s15 = scalar_lea.vmem [#allocation15], %s12144_s24  ;;  %s768_s23 = scalar_lea.sflag [#allocation17], %s12119_s2 }
 0x189   : > { %s12157_s30 = scalar_lea.vmem [#allocation16], %s10151_s9 }
 0x18a   : > { %11569 = dma.done.wait (%p15017_p0), %s768_s23, 2176  }
 0x18b   : > { %11571 = vsyncadd (%p15017_p0), %s768_s23, 4294965120  ;;  %s10155_s29 = sshll.u32 %s12122_s16, 10  ;;  %s780_s18 = scalar_lea.vmem [#allocation18], %s12144_s24 }
 0x18c   : > { %s786_s25 = scalar_lea.sflag [#allocation20], %s12119_s2  ;;  %s12166_s22 = scalar_lea.vmem [#allocation19], %s10155_s29 }
 0x18d   : > { %11573 = dma.done.wait (%p15017_p0), %s786_s25, 16448  }
 0x18e   : > { %11575 = vsyncadd (%p15017_p0), %s786_s25, 4294950848  ;;  %s10156_s27 = sshll.u32 %s12122_s16, 2  ;;  %p15018_p9 = pmov %p15014_p4 }
 0x18f   : > { %s12173_s19 = scalar_lea.vmem [#allocation21], %s10156_s27 }
 0x190   : > { %11577 = dma.done.wait (%p15018_p9), [#allocation23], 4112   ;;  %p15019_p10 = pmov %p15014_p4 }
 0x191   : > { %p15020_p8 = pmov %p15014_p4 }
 0x192   : > { %11579 = vsyncadd (%p15019_p10), [#allocation23], 4294963184 }
 0x193   : > { %11581 = dma.done.wait (%p15020_p8), [#allocation26], 16   ;;  %p15021_p11 = pmov %p15014_p4 }
 0x194   : > { %p902_p12 = scmp.lt.s32.totalorder %s15012_s20, 1  ;;  %s15022_s17 = sld [smem:[#allocation128_spill]] }
 0x195   : > { %11583 = vsyncadd (%p15021_p11), [#allocation26], 4294967280  ;;  %p15023_p1 = scmp.ne.s32.totalorder %s15012_s20, 0 }
 0x196   : > { %s903_s11 = scalar_select %p902_p12, %s15012_s20, 1 }
 0x197   : > { %911 = sbr.rel (%p15023_p1) target bundleno = 1102 (0x44e), region = 140 }
 0x198   : > { %s10360_s2 = sshll.u32 %s903_s11, 9 }
 0x19a   : > { %s12188_s23 = scalar_lea.vmem %s15022_s17, %s10360_s2 }
 0x19c   : > { %v12192_v0 = vld [vmem:[#allocation4] sm:$0xff]  ;;  %v913_v1 = vld [vmem:[#allocation4 + $0x8] sm:$0xff]  ;;  %v12194_v2 = vld [vmem:[#allocation4 + $0x10] sm:$0xff]  ;;  %vm1293_vm0 = vcmask 7168  }
 0x19d   : > { %v915_v3 = vld [vmem:[#allocation4 + $0x18] sm:$0xff]  ;;  %916 = vst [vmem:[#allocation2 + $0x10] sm:$0xff] %v12192_v0  ;;  %917 = vst [vmem:[#allocation2] sm:$0xff] %v913_v1  ;;  %v925_v4 = vpack.c.bf16 %v913_v1, %v913_v1  ;;  %v10641_v5 = vld [vmem:[#allocation22 + $0x78] sm:$0xff]   ;;  %v924_v38 = vpack.c.bf16 %v12192_v0, %v12192_v0  ;;  %v926_v39 = vpack.c.bf16 %v12194_v2, %v12194_v2 }
 0x19e   : > { %918 = vst [vmem:[#allocation2 + $0x18] sm:$0xff] %v12194_v2  ;;  %919 = vst [vmem:[#allocation2 + $0x8] sm:$0xff] %v915_v3  ;;  %v927_v6 = vpack.c.bf16 %v915_v3, %v915_v3  ;;  %v10642_v7 = vld [vmem:[#allocation22 + $0xf8] sm:$0xff]   ;;  %10361 = vmatprep.subr.bf16.mxu0 %v10641_v5  ;;  %v10645_v10 = vld [vmem:[#allocation22 + $0x70] sm:$0xff]  }
 0x19f   : > { %1223 = vmatprep.mubr.bf16.mxu0 %v925_v4  ;;  %v10643_v8 = vld [vmem:[#allocation22 + $0x38] sm:$0xff]   ;;  %10383 = vmatprep.subr.bf16.mxu1 %v10642_v7  ;;  %v10646_v11 = vld [vmem:[#allocation22 + $0xf0] sm:$0xff]   ;;  %v10649_v14 = vld [vmem:[#allocation22 + $0x68] sm:$0xff]  }
 0x1a0   : > { %1263 = vmatprep.mubr.bf16.mxu1 %v927_v6  ;;  %v10644_v9 = vld [vmem:[#allocation22 + $0xb8] sm:$0xff]   ;;  %10362 = vmatpush3.bf16.msra.mxu0 %v10643_v8  ;;  %v10647_v12 = vld [vmem:[#allocation22 + $0x30] sm:$0xff]   ;;  %v10650_v15 = vld [vmem:[#allocation22 + $0xe8] sm:$0xff]  }
 0x1a1   : > { %10384 = vmatpush3.bf16.msra.mxu1 %v10644_v9  ;;  %10363 = vmatprep.subr.bf16.mxu0 %v10645_v10  ;;  %v10648_v13 = vld [vmem:[#allocation22 + $0xb0] sm:$0xff]   ;;  %v10651_v16 = vld [vmem:[#allocation22 + $0x28] sm:$0xff]   ;;  %v10653_v18 = vld [vmem:[#allocation22 + $0x60] sm:$0xff]  }
 0x1a2   : > { %10385 = vmatprep.subr.bf16.mxu1 %v10646_v11  ;;  %v10652_v17 = vld [vmem:[#allocation22 + $0xa8] sm:$0xff]   ;;  %v10654_v19 = vld [vmem:[#allocation22 + $0xe0] sm:$0xff]   ;;  %v10657_v22 = vld [vmem:[#allocation22 + $0x58] sm:$0xff]  }
 0x1a3   : > { %v10655_v20 = vld [vmem:[#allocation22 + $0x20] sm:$0xff]   ;;  %v10658_v23 = vld [vmem:[#allocation22 + $0xd8] sm:$0xff]   ;;  %v10661_v26 = vld [vmem:[#allocation22 + $0x50] sm:$0xff]  }
 0x1a4   : > { %10364 = vmatpush3.bf16.msra.mxu0 %v10647_v12  ;;  %v10656_v21 = vld [vmem:[#allocation22 + $0xa0] sm:$0xff]   ;;  %v10659_v24 = vld [vmem:[#allocation22 + $0x18] sm:$0xff]   ;;  %v10662_v27 = vld [vmem:[#allocation22 + $0xd0] sm:$0xff]  }
 0x1a5   : > { %10386 = vmatpush3.bf16.msra.mxu1 %v10648_v13  ;;  %10365 = vmatprep.subr.bf16.mxu0 %v10649_v14  ;;  %v10660_v25 = vld [vmem:[#allocation22 + $0x98] sm:$0xff]   ;;  %v10663_v28 = vld [vmem:[#allocation22 + $0x10] sm:$0xff]   ;;  %v10665_v30 = vld [vmem:[#allocation22 + $0x48] sm:$0xff]  }
 0x1a6   : > { %10387 = vmatprep.subr.bf16.mxu1 %v10650_v15  ;;  %v10664_v29 = vld [vmem:[#allocation22 + $0x90] sm:$0xff]   ;;  %v10666_v31 = vld [vmem:[#allocation22 + $0xc8] sm:$0xff]   ;;  %v10669_v34 = vld [vmem:[#allocation22 + $0x40] sm:$0xff]  }
 0x1a7   : > { %v10667_v32 = vld [vmem:[#allocation22 + $0x8] sm:$0xff]   ;;  %v10670_v35 = vld [vmem:[#allocation22 + $0xc0] sm:$0xff]  }
 0x1a8   : > { %10366 = vmatpush3.bf16.msra.mxu0 %v10651_v16  ;;  %v10668_v33 = vld [vmem:[#allocation22 + $0x88] sm:$0xff]   ;;  %v10671_v36 = vld [vmem:[#allocation22] sm:$0xff]  }
 0x1a9   : > { %10388 = vmatpush3.bf16.msra.mxu1 %v10652_v17  ;;  %10367 = vmatprep.subr.bf16.mxu0 %v10653_v18  ;;  %v10672_v37 = vld [vmem:[#allocation22 + $0x80] sm:$0xff]  }
 0x1aa   : > { %10389 = vmatprep.subr.bf16.mxu1 %v10654_v19  ;;  %v10163_v42 = vld [vmem:[#allocation24] ss:$0 sm:$0xff]  ;;  %v10196_v53 = vld [vmem:[#allocation25] ss:$0 sm:$0xff] }
 0x1ac   : > { %10368 = vmatpush3.bf16.msra.mxu0 %v10655_v20 }
 0x1ad   : > { %10390 = vmatpush3.bf16.msra.mxu1 %v10656_v21  ;;  %10369 = vmatprep.subr.bf16.mxu0 %v10657_v22 }
 0x1ae   : > { %10391 = vmatprep.subr.bf16.mxu1 %v10658_v23 }
 0x1b0   : > { %10370 = vmatpush3.bf16.msra.mxu0 %v10659_v24 }
 0x1b1   : > { %10392 = vmatpush3.bf16.msra.mxu1 %v10660_v25  ;;  %10371 = vmatprep.subr.bf16.mxu0 %v10661_v26 }
 0x1b2   : > { %10393 = vmatprep.subr.bf16.mxu1 %v10662_v27 }
 0x1b4   : > { %10372 = vmatpush3.bf16.msra.mxu0 %v10663_v28 }
 0x1b5   : > { %10394 = vmatpush3.bf16.msra.mxu1 %v10664_v29  ;;  %10373 = vmatprep.subr.bf16.mxu0 %v10665_v30 }
 0x1b6   : > { %10395 = vmatprep.subr.bf16.mxu1 %v10666_v31 }
 0x1b8   : > { %10374 = vmatpush3.bf16.msra.mxu0 %v10667_v32 }
 0x1b9   : > { %10396 = vmatpush3.bf16.msra.mxu1 %v10668_v33  ;;  %10375 = vmatprep.subr.bf16.mxu0 %v10669_v34 }
 0x1ba   : > { %10397 = vmatprep.subr.bf16.mxu1 %v10670_v35 }
 0x1bc   : > { %10376 = vmatpush3.bf16.msra.mxu0 %v10671_v36 }
 0x1bd   : > { %10398 = vmatpush3.bf16.msra.mxu1 %v10672_v37 }
 0x1bf   : > { %1224 = vmatmul.mubr.bf16.vlgmr.msra.gmra.mxu0 %v924_v38 }
 0x1c0   : > { %1264 = vmatmul.mubr.bf16.vlgmr.msra.gmra.mxu1 %v926_v39 }
 0x27f   : > { %v10377_v40 = vpop.f32.mrf.mxu0 }
 0x280   : > { %v10399_v41 = vpop.f32.mrf.mxu1 }
 0x281   : > { %v10378_v43 = vpop.f32.mrf.mxu0 }
 0x282   : > { %v10379_v44 = vadd.f32 %v10378_v43, %v10377_v40  ;;  %v10400_v45 = vpop.f32.mrf.mxu1 }
 0x283   : > { %v10380_v46 = vpop.f32.mrf.mxu0  ;;  %v10401_v48 = vadd.f32 %v10400_v45, %v10399_v41 }
 0x284   : > { %v1226_v47 = vadd.f32 %v10379_v44, %v10163_v42  ;;  %v10402_v49 = vpop.f32.mrf.mxu1 }
 0x285   : > { %v10381_v50 = vpop.f32.mrf.mxu0 }
 0x286   : > { %v1266_v51 = vadd.f32 %v10401_v48, %v1226_v47  ;;  %v10403_v52 = vpop.f32.mrf.mxu1 }
 0x288   : > { %10673 = vtanh.f32 %v1266_v51 }
 0x295   : > { %v10674_v54 = vpop.eup %10673 }
 0x296   : > { %v1279_v55 = vmul.f32 %v10674_v54, %v10196_v53 }
 0x298   : > { %1280 = vadd.xlane.f32.xlu0 %v1279_v55 }
 0x321   : > { %v1281_v56 = vpop.xlane.xlu0 %1280 }
 0x322   : > { %v1282_v57 = vrot.slane %v1281_v56, 4 }
 0x324   : > { %v1283_v58 = vmax.f32 %v1281_v56, %v1282_v57 }
 0x326   : > { %v1284_v59 = vrot.slane %v1283_v58, 2 }
 0x328   : > { %v1285_v60 = vmax.f32 %v1283_v58, %v1284_v59 }
 0x32a   : > { %v1286_v61 = vrot.slane %v1285_v60, 1 }
 0x32c   : > { %v1287_v62 = vmax.f32 %v1285_v60, %v1286_v61 }
 0x32e   : > { %10493 = vpush %v1287_v62 }
 0x35f   : > { %s10494_s20 = spop %10493 }
 0x360   : > { %v1289_v63 = vstv %s10494_s20 }
 0x361   : > { %v1290_v0 = vsub.f32 %v1281_v56, %v1289_v63 }
 0x363   : > { %v1291_v1 = vmul.f32 1.442695, %v1290_v0 }
 0x365   : > { %10675 = vpow2.f32 %v1291_v1 }
 0x372   : > { %v10676_v2 = vpop.eup %10675 }
 0x373   : > { %v1294_v3 = vsel %vm1293_vm0, %v10676_v2, 0.0 }
 0x374   : > { %1295 = vadd.xlane.f32.xlu0 %v1294_v3 }
 0x3fd   : > { %v1296_v4 = vpop.xlane.xlu0 %1295 }
 0x3fe   : > { %v1297_v5 = vrot.slane %v1296_v4, 4 }
 0x400   : > { %v1298_v6 = vadd.f32 %v1297_v5, %v1296_v4 }
 0x402   : > { %v1299_v7 = vrot.slane %v1298_v6, 2 }
 0x404   : > { %v1300_v8 = vadd.f32 %v1299_v7, %v1298_v6 }
 0x406   : > { %v1301_v9 = vrot.slane %v1300_v8, 1 }
 0x408   : > { %v1302_v10 = vadd.f32 %v1301_v9, %v1300_v8 }
 0x40a   : > { %10495 = vpush %v1302_v10 }
 0x43b   : > { %s10496_s29 = spop %10495 }
 0x43c   : > { %v1304_v11 = vstv %s10496_s29 }
 0x43d   : > { %10677 = vrcp.f32 %v1304_v11 }
 0x44a   : > { %v10678_v12 = vpop.eup %10677 }
 0x44b   : > { %v1306_v13 = vmul.f32 %v10678_v12, %v10676_v2 }
 0x44d   : > { %1307 = vst.msk [vmem:[#allocation3] sm:$0xff] %vm1293_vm0, %v1306_v13 }
 0x44e PF: > { %v1361_v14 = vld [vmem:[%s12126_s0 + $0x188] sm:$0xff]  ;;  %v1360_v16 = vld [vmem:[%s12126_s0 + $0x180] sm:$0xff]  ;;  %v1309_v44 = vld [vmem:[#allocation2] sm:$0xff]  ;;  %vm4170_vm4 = vcmask 261120   ;;  %vm4594_vm5 = vcmask 1040384   ;;  %vm4590_vm6 = vcmask 7168  }
 0x44f   : > { %v1489_v15 = vld [vmem:[%s12126_s0 + $0x588] sm:$0xff]  ;;  %v1665_v17 = vunpack.c.l.s8.bf16 %v1361_v14  ;;  %v1681_v18 = vunpack.c.h.s8.bf16 %v1361_v14  ;;  %v1488_v21 = vld [vmem:[%s12126_s0 + $0x580] sm:$0xff]  ;;  %v1680_v22 = vunpack.c.h.s8.bf16 %v1360_v16  ;;  %v1664_v26 = vunpack.c.l.s8.bf16 %v1360_v16 }
 0x450   : > { %v1921_v19 = vunpack.c.l.s8.bf16 %v1489_v15  ;;  %v1937_v20 = vunpack.c.h.s8.bf16 %v1489_v15  ;;  %v1936_v23 = vunpack.c.h.s8.bf16 %v1488_v21  ;;  %v1345_v24 = vld [vmem:[%s12126_s0 + $0x108] sm:$0xff]  ;;  %v1920_v27 = vunpack.c.l.s8.bf16 %v1488_v21  ;;  %v1344_v30 = vld [vmem:[%s12126_s0 + $0x100] sm:$0xff] }
 0x451   : > { %v1473_v25 = vld [vmem:[%s12126_s0 + $0x508] sm:$0xff]  ;;  %2084 = vmatprep.subr.bf16.mxu0 %v1681_v18  ;;  %v1649_v28 = vunpack.c.h.s8.bf16 %v1345_v24  ;;  %v1472_v31 = vld [vmem:[%s12126_s0 + $0x500] sm:$0xff]  ;;  %v1648_v32 = vunpack.c.h.s8.bf16 %v1344_v30  ;;  %v1633_v34 = vunpack.c.l.s8.bf16 %v1345_v24  ;;  %v1632_v38 = vunpack.c.l.s8.bf16 %v1344_v30 }
 0x452   : > { %2125 = vmatprep.subr.bf16.mxu1 %v1937_v20  ;;  %2085 = vmatpush1.bf16.msra.mxu0 %v1680_v22  ;;  %v1905_v29 = vunpack.c.h.s8.bf16 %v1473_v25  ;;  %v1904_v33 = vunpack.c.h.s8.bf16 %v1472_v31  ;;  %v1889_v35 = vunpack.c.l.s8.bf16 %v1473_v25  ;;  %v1329_v36 = vld [vmem:[%s12126_s0 + $0x88] sm:$0xff]  ;;  %v1888_v39 = vunpack.c.l.s8.bf16 %v1472_v31  ;;  %v1328_v42 = vld [vmem:[%s12126_s0 + $0x80] sm:$0xff] }
 0x453   : > { %2126 = vmatpush1.bf16.msra.mxu1 %v1936_v23  ;;  %2086 = vmatprep.subr.bf16.mxu0 %v1665_v17  ;;  %v1457_v37 = vld [vmem:[%s12126_s0 + $0x488] sm:$0xff]  ;;  %v1617_v40 = vunpack.c.h.s8.bf16 %v1329_v36  ;;  %v1456_v43 = vld [vmem:[%s12126_s0 + $0x480] sm:$0xff]  ;;  %v1616_v46 = vunpack.c.h.s8.bf16 %v1328_v42  ;;  %v1601_v48 = vunpack.c.l.s8.bf16 %v1329_v36  ;;  %v12216_v50 = vpack.c.bf16 %v1309_v44, %v1309_v44 }
 0x454   : > { %2127 = vmatprep.subr.bf16.mxu1 %v1921_v19  ;;  %v1873_v41 = vunpack.c.h.s8.bf16 %v1457_v37  ;;  %v1311_v45 = vld [vmem:[#allocation2 + $0x8] sm:$0xff]  ;;  %v1872_v47 = vunpack.c.h.s8.bf16 %v1456_v43  ;;  %v1857_v49 = vunpack.c.l.s8.bf16 %v1457_v37  ;;  %v1313_v52 = vld [vmem:[%s12126_s0 + $0x8] sm:$0xff]  ;;  %v1600_v54 = vunpack.c.l.s8.bf16 %v1328_v42 }
 0x455   : > { %v12218_v51 = vpack.c.bf16 %v1311_v45, %v1311_v45  ;;  %v1441_v53 = vld [vmem:[%s12126_s0 + $0x408] sm:$0xff]  ;;  %2116 = vmatprep.mubr.bf16.mxu0 %v12216_v50  ;;  %v1856_v55 = vunpack.c.l.s8.bf16 %v1456_v43  ;;  %v1585_v56 = vunpack.c.h.s8.bf16 %v1313_v52  ;;  %v1312_v58 = vld [vmem:[%s12126_s0] sm:$0xff]  ;;  %v1569_v62 = vunpack.c.l.s8.bf16 %v1313_v52 }
 0x456   : > { %2087 = vmatpush1.bf16.msra.mxu0 %v1664_v26  ;;  %v1841_v57 = vunpack.c.h.s8.bf16 %v1441_v53  ;;  %v1440_v59 = vld [vmem:[%s12126_s0 + $0x400] sm:$0xff]  ;;  %v1584_v60 = vunpack.c.h.s8.bf16 %v1312_v58  ;;  %v1825_v63 = vunpack.c.l.s8.bf16 %v1441_v53  ;;  %v1425_v0 = vld [vmem:[%s12126_s0 + $0x388] sm:$0xff]  ;;  %v1568_v4 = vunpack.c.l.s8.bf16 %v1312_v58  ;;  %v1310_v53 = vld [vmem:[#allocation2 + $0x18] sm:$0xff] }
 0x457   : > { %2128 = vmatpush1.bf16.msra.mxu1 %v1920_v27  ;;  %2088 = vmatprep.subr.bf16.mxu0 %v1649_v28  ;;  %v1840_v61 = vunpack.c.h.s8.bf16 %v1440_v59  ;;  %v1553_v1 = vld [vmem:[%s12126_s0 + $0x788] sm:$0xff]  ;;  %v1424_v2 = vld [vmem:[%s12126_s0 + $0x380] sm:$0xff]  ;;  %v1824_v5 = vunpack.c.l.s8.bf16 %v1440_v59  ;;  %v1809_v6 = vunpack.c.h.s8.bf16 %v1425_v0  ;;  %v1793_v10 = vunpack.c.l.s8.bf16 %v1425_v0 }
 0x458   : > { %2129 = vmatprep.subr.bf16.mxu1 %v1905_v29  ;;  %2157 = vmatprep.mubr.bf16.mxu1 %v12218_v51  ;;  %v1552_v3 = vld [vmem:[%s12126_s0 + $0x780] sm:$0xff]  ;;  %v2065_v7 = vunpack.c.h.s8.bf16 %v1553_v1  ;;  %v1808_v8 = vunpack.c.h.s8.bf16 %v1424_v2  ;;  %v2049_v11 = vunpack.c.l.s8.bf16 %v1553_v1  ;;  %v1409_v12 = vld [vmem:[%s12126_s0 + $0x308] sm:$0xff]  ;;  %v1792_v16 = vunpack.c.l.s8.bf16 %v1424_v2  ;;  %v1347_v2 = vld [vmem:[%s12126_s0 + $0x118] sm:$0xff] }
 0x459   : > { %v2064_v9 = vunpack.c.h.s8.bf16 %v1552_v3  ;;  %v1537_v13 = vld [vmem:[%s12126_s0 + $0x708] sm:$0xff]  ;;  %v1408_v14 = vld [vmem:[%s12126_s0 + $0x300] sm:$0xff]  ;;  %v2048_v17 = vunpack.c.l.s8.bf16 %v1552_v3  ;;  %v1777_v18 = vunpack.c.h.s8.bf16 %v1409_v12  ;;  %v1761_v22 = vunpack.c.l.s8.bf16 %v1409_v12  ;;  %v1475_v3 = vld [vmem:[%s12126_s0 + $0x518] sm:$0xff] }
 0x45a   : > { %2089 = vmatpush1.bf16.msra.mxu0 %v1648_v32  ;;  %v1536_v15 = vld [vmem:[%s12126_s0 + $0x700] sm:$0xff]  ;;  %v2033_v19 = vunpack.c.h.s8.bf16 %v1537_v13  ;;  %v1776_v20 = vunpack.c.h.s8.bf16 %v1408_v14  ;;  %v2017_v23 = vunpack.c.l.s8.bf16 %v1537_v13  ;;  %v1393_v24 = vld [vmem:[%s12126_s0 + $0x288] sm:$0xff]  ;;  %v1760_v28 = vunpack.c.l.s8.bf16 %v1408_v14  ;;  %v1331_v14 = vld [vmem:[%s12126_s0 + $0x98] sm:$0xff] }
 0x45b   : > { %2130 = vmatpush1.bf16.msra.mxu1 %v1904_v33  ;;  %2090 = vmatprep.subr.bf16.mxu0 %v1633_v34  ;;  %v2032_v21 = vunpack.c.h.s8.bf16 %v1536_v15  ;;  %v1521_v25 = vld [vmem:[%s12126_s0 + $0x688] sm:$0xff]  ;;  %v1392_v26 = vld [vmem:[%s12126_s0 + $0x280] sm:$0xff]  ;;  %v2016_v29 = vunpack.c.l.s8.bf16 %v1536_v15  ;;  %v1745_v30 = vunpack.c.h.s8.bf16 %v1393_v24  ;;  %v1729_v34 = vunpack.c.l.s8.bf16 %v1393_v24  ;;  %v1459_v15 = vld [vmem:[%s12126_s0 + $0x498] sm:$0xff] }
 0x45c   : > { %2131 = vmatprep.subr.bf16.mxu1 %v1889_v35  ;;  %v1520_v27 = vld [vmem:[%s12126_s0 + $0x680] sm:$0xff]  ;;  %v2001_v31 = vunpack.c.h.s8.bf16 %v1521_v25  ;;  %v1744_v32 = vunpack.c.h.s8.bf16 %v1392_v26  ;;  %v1985_v35 = vunpack.c.l.s8.bf16 %v1521_v25  ;;  %v1377_v36 = vld [vmem:[%s12126_s0 + $0x208] sm:$0xff]  ;;  %v1635_v12 = vunpack.c.l.s8.bf16 %v1347_v2 }
 0x45d   : > { %v2000_v33 = vunpack.c.h.s8.bf16 %v1520_v27  ;;  %v1505_v37 = vld [vmem:[%s12126_s0 + $0x608] sm:$0xff]  ;;  %v1713_v42 = vunpack.c.h.s8.bf16 %v1377_v36  ;;  %v1891_v13 = vunpack.c.l.s8.bf16 %v1475_v3  ;;  %v1603_v24 = vunpack.c.l.s8.bf16 %v1331_v14 }
 0x45e   : > { %2091 = vmatpush1.bf16.msra.mxu0 %v1632_v38  ;;  %v1376_v38 = vld [vmem:[%s12126_s0 + $0x200] sm:$0xff]  ;;  %v1969_v43 = vunpack.c.h.s8.bf16 %v1505_v37  ;;  %v1308_v52 = vld [vmem:[#allocation2 + $0x10] sm:$0xff]  ;;  %v1859_v25 = vunpack.c.l.s8.bf16 %v1459_v15  ;;  %vm4835_vm7 = vcmask 130048   ;;  %vm8808_vm8 = vcmask 1041408  }
 0x45f   : > { %2132 = vmatpush1.bf16.msra.mxu1 %v1888_v39  ;;  %2092 = vmatprep.subr.bf16.mxu0 %v1617_v40  ;;  %v1504_v39 = vld [vmem:[%s12126_s0 + $0x600] sm:$0xff]  ;;  %v1728_v40 = vunpack.c.l.s8.bf16 %v1392_v26  ;;  %v1712_v44 = vunpack.c.h.s8.bf16 %v1376_v38  ;;  %v1315_v26 = vld [vmem:[%s12126_s0 + $0x18] sm:$0xff]  ;;  %vm8817_vm9 = vcmask 1042432   ;;  %vm8826_vm10 = vcmask 1043456  }
 0x460   : > { %2133 = vmatprep.subr.bf16.mxu1 %v1873_v41  ;;  %v1984_v41 = vunpack.c.l.s8.bf16 %v1520_v27  ;;  %v1968_v45 = vunpack.c.h.s8.bf16 %v1504_v39  ;;  %v1443_v27 = vld [vmem:[%s12126_s0 + $0x418] sm:$0xff]  ;;  %vm8835_vm11 = vcmask 1044480   ;;  %vm8844_vm12 = vcmask 1045504  }
 0x461   : > { %vm8853_vm13 = vcmask 1046528  }
 0x462   : > { %2093 = vmatpush1.bf16.msra.mxu0 %v1616_v46  ;;  %v1697_v46 = vunpack.c.l.s8.bf16 %v1377_v36  ;;  %v1571_v36 = vunpack.c.l.s8.bf16 %v1315_v26 }
 0x463   : > { %2134 = vmatpush1.bf16.msra.mxu1 %v1872_v47  ;;  %2094 = vmatprep.subr.bf16.mxu0 %v1601_v48  ;;  %v1953_v47 = vunpack.c.l.s8.bf16 %v1505_v37  ;;  %v1363_v48 = vld [vmem:[%s12126_s0 + $0x198] sm:$0xff]  ;;  %v1827_v37 = vunpack.c.l.s8.bf16 %v1443_v27 }
 0x464   : > { %2135 = vmatprep.subr.bf16.mxu1 %v1857_v49  ;;  %v1491_v49 = vld [vmem:[%s12126_s0 + $0x598] sm:$0xff]  ;;  %v1683_v58 = vunpack.c.h.s8.bf16 %v1363_v48  ;;  %v1667_v0 = vunpack.c.l.s8.bf16 %v1363_v48 }
 0x465   : > { %v1939_v59 = vunpack.c.h.s8.bf16 %v1491_v49  ;;  %v1923_v1 = vunpack.c.l.s8.bf16 %v1491_v49 }
 0x466   : > { %2095 = vmatpush1.bf16.msra.mxu0 %v1600_v54  ;;  %v1362_v54 = vld [vmem:[%s12126_s0 + $0x190] sm:$0xff] }
 0x467   : > { %2136 = vmatpush1.bf16.msra.mxu1 %v1856_v55  ;;  %2096 = vmatprep.subr.bf16.mxu0 %v1585_v56  ;;  %v1490_v55 = vld [vmem:[%s12126_s0 + $0x590] sm:$0xff]  ;;  %v1696_v56 = vunpack.c.l.s8.bf16 %v1376_v38  ;;  %v1427_v38 = vld [vmem:[%s12126_s0 + $0x398] sm:$0xff] }
 0x468   : > { %2137 = vmatprep.subr.bf16.mxu1 %v1841_v57  ;;  %v1952_v57 = vunpack.c.l.s8.bf16 %v1504_v39  ;;  %v1555_v39 = vld [vmem:[%s12126_s0 + $0x798] sm:$0xff]  ;;  %v1795_v48 = vunpack.c.l.s8.bf16 %v1427_v38 }
 0x469   : > { %v2051_v49 = vunpack.c.l.s8.bf16 %v1555_v39 }
 0x46a   : > { %2097 = vmatpush1.bf16.msra.mxu0 %v1584_v60  ;;  %v12246_v60 = vpack.c.bf16 %v1308_v52, %v1308_v52  ;;  %v1411_v52 = vld [vmem:[%s12126_s0 + $0x318] sm:$0xff] }
 0x46b   : > { %2138 = vmatpush1.bf16.msra.mxu1 %v1840_v61  ;;  %2098 = vmatprep.subr.bf16.mxu0 %v1569_v62  ;;  %v12248_v61 = vpack.c.bf16 %v1310_v53, %v1310_v53  ;;  %v1682_v62 = vunpack.c.h.s8.bf16 %v1362_v54  ;;  %v1539_v53 = vld [vmem:[%s12126_s0 + $0x718] sm:$0xff] }
 0x46c   : > { %2139 = vmatprep.subr.bf16.mxu1 %v1825_v63  ;;  %v1938_v63 = vunpack.c.h.s8.bf16 %v1490_v55 }
 0x46e   : > { %2099 = vmatpush1.bf16.msra.mxu0 %v1568_v4  ;;  %v1346_v4 = vld [vmem:[%s12126_s0 + $0x110] sm:$0xff] }
 0x46f   : > { %2140 = vmatpush1.bf16.msra.mxu1 %v1824_v5  ;;  %2100 = vmatprep.subr.bf16.mxu0 %v1809_v6  ;;  %v1474_v5 = vld [vmem:[%s12126_s0 + $0x510] sm:$0xff]  ;;  %v1666_v6 = vunpack.c.l.s8.bf16 %v1362_v54 }
 0x470   : > { %2141 = vmatprep.subr.bf16.mxu1 %v2065_v7  ;;  %v1922_v7 = vunpack.c.l.s8.bf16 %v1490_v55 }
 0x472   : > { %2101 = vmatpush2.bf16.msra.mxu0 %v1808_v8  ;;  %v1651_v8 = vunpack.c.h.s8.bf16 %v1347_v2  ;;  %v1395_v2 = vld [vmem:[%s12126_s0 + $0x298] sm:$0xff] }
 0x473   : > { %2142 = vmatpush2.bf16.msra.mxu1 %v2064_v9  ;;  %2102 = vmatprep.subr.bf16.mxu0 %v1793_v10  ;;  %v1907_v9 = vunpack.c.h.s8.bf16 %v1475_v3  ;;  %v1650_v10 = vunpack.c.h.s8.bf16 %v1346_v4  ;;  %v1523_v3 = vld [vmem:[%s12126_s0 + $0x698] sm:$0xff] }
 0x474   : > { %2143 = vmatprep.subr.bf16.mxu1 %v2049_v11  ;;  %v1906_v11 = vunpack.c.h.s8.bf16 %v1474_v5 }
 0x476   : > { %2103 = vmatpush2.bf16.msra.mxu0 %v1792_v16  ;;  %v1330_v16 = vld [vmem:[%s12126_s0 + $0x90] sm:$0xff] }
 0x477   : > { %2144 = vmatpush2.bf16.msra.mxu1 %v2048_v17  ;;  %2104 = vmatprep.subr.bf16.mxu0 %v1777_v18  ;;  %v1458_v17 = vld [vmem:[%s12126_s0 + $0x490] sm:$0xff]  ;;  %v1634_v18 = vunpack.c.l.s8.bf16 %v1346_v4 }
 0x478   : > { %2145 = vmatprep.subr.bf16.mxu1 %v2033_v19  ;;  %v1890_v19 = vunpack.c.l.s8.bf16 %v1474_v5 }
 0x47a   : > { %2105 = vmatpush2.bf16.msra.mxu0 %v1776_v20  ;;  %v1619_v20 = vunpack.c.h.s8.bf16 %v1331_v14  ;;  %v1379_v14 = vld [vmem:[%s12126_s0 + $0x218] sm:$0xff] }
 0x47b   : > { %2146 = vmatpush2.bf16.msra.mxu1 %v2032_v21  ;;  %2106 = vmatprep.subr.bf16.mxu0 %v1761_v22  ;;  %v1875_v21 = vunpack.c.h.s8.bf16 %v1459_v15  ;;  %v1618_v22 = vunpack.c.h.s8.bf16 %v1330_v16  ;;  %v1507_v15 = vld [vmem:[%s12126_s0 + $0x618] sm:$0xff] }
 0x47c   : > { %2147 = vmatprep.subr.bf16.mxu1 %v2017_v23  ;;  %v1874_v23 = vunpack.c.h.s8.bf16 %v1458_v17 }
 0x47e   : > { %2107 = vmatpush2.bf16.msra.mxu0 %v1760_v28  ;;  %v1602_v28 = vunpack.c.l.s8.bf16 %v1330_v16 }
 0x47f   : > { %2148 = vmatpush2.bf16.msra.mxu1 %v2016_v29  ;;  %2108 = vmatprep.subr.bf16.mxu0 %v1745_v30  ;;  %v1858_v29 = vunpack.c.l.s8.bf16 %v1458_v17  ;;  %v1587_v30 = vunpack.c.h.s8.bf16 %v1315_v26  ;;  %v1365_v26 = vld [vmem:[%s12126_s0 + $0x1a8] sm:$0xff] }
 0x480   : > { %2149 = vmatprep.subr.bf16.mxu1 %v2001_v31  ;;  %v1843_v31 = vunpack.c.h.s8.bf16 %v1443_v27  ;;  %v1493_v27 = vld [vmem:[%s12126_s0 + $0x5a8] sm:$0xff] }
 0x482   : > { %2109 = vmatpush2.bf16.msra.mxu0 %v1744_v32  ;;  %v1314_v32 = vld [vmem:[%s12126_s0 + $0x10] sm:$0xff] }
 0x483   : > { %2150 = vmatpush2.bf16.msra.mxu1 %v2000_v33  ;;  %2110 = vmatprep.subr.bf16.mxu0 %v1729_v34  ;;  %v1442_v33 = vld [vmem:[%s12126_s0 + $0x410] sm:$0xff]  ;;  %v1586_v34 = vunpack.c.h.s8.bf16 %v1314_v32 }
 0x484   : > { %2151 = vmatprep.subr.bf16.mxu1 %v1985_v35  ;;  %v1842_v35 = vunpack.c.h.s8.bf16 %v1442_v33 }
 0x486   : > { %2111 = vmatpush2.bf16.msra.mxu0 %v1728_v40  ;;  %v1570_v40 = vunpack.c.l.s8.bf16 %v1314_v32  ;;  %v1364_v32 = vld [vmem:[%s12126_s0 + $0x1a0] sm:$0xff] }
 0x487   : > { %2152 = vmatpush2.bf16.msra.mxu1 %v1984_v41  ;;  %2112 = vmatprep.subr.bf16.mxu0 %v1713_v42  ;;  %v1826_v41 = vunpack.c.l.s8.bf16 %v1442_v33  ;;  %v1811_v42 = vunpack.c.h.s8.bf16 %v1427_v38  ;;  %v1492_v33 = vld [vmem:[%s12126_s0 + $0x5a0] sm:$0xff]  ;;  %v1349_v38 = vld [vmem:[%s12126_s0 + $0x128] sm:$0xff] }
 0x488   : > { %2153 = vmatprep.subr.bf16.mxu1 %v1969_v43  ;;  %v2067_v43 = vunpack.c.h.s8.bf16 %v1555_v39  ;;  %v1477_v39 = vld [vmem:[%s12126_s0 + $0x528] sm:$0xff] }
 0x48a   : > { %2113 = vmatpush2.bf16.msra.mxu0 %v1712_v44  ;;  %v1426_v44 = vld [vmem:[%s12126_s0 + $0x390] sm:$0xff] }
 0x48b   : > { %2154 = vmatpush2.bf16.msra.mxu1 %v1968_v45  ;;  %2114 = vmatprep.subr.bf16.mxu0 %v1697_v46  ;;  %v1554_v45 = vld [vmem:[%s12126_s0 + $0x790] sm:$0xff]  ;;  %v1810_v46 = vunpack.c.h.s8.bf16 %v1426_v44  ;;  %v1794_v54 = vunpack.c.l.s8.bf16 %v1426_v44  ;;  %v1348_v44 = vld [vmem:[%s12126_s0 + $0x120] sm:$0xff] }
 0x48c   : > { %2155 = vmatprep.subr.bf16.mxu1 %v1953_v47  ;;  %v2066_v47 = vunpack.c.h.s8.bf16 %v1554_v45  ;;  %v2050_v55 = vunpack.c.l.s8.bf16 %v1554_v45  ;;  %v1476_v45 = vld [vmem:[%s12126_s0 + $0x520] sm:$0xff] }
 0x48e   : > { %2115 = vmatpush2.bf16.msra.mxu0 %v1696_v56  ;;  %v1779_v56 = vunpack.c.h.s8.bf16 %v1411_v52 }
 0x48f   : > { %2156 = vmatpush2.bf16.msra.mxu1 %v1952_v57  ;;  %2166 = vmatprep.subr.bf16.mxu0 %v1683_v58  ;;  %v2035_v57 = vunpack.c.h.s8.bf16 %v1539_v53  ;;  %v1410_v58 = vld [vmem:[%s12126_s0 + $0x310] sm:$0xff] }
 0x490   : > { %2207 = vmatprep.subr.bf16.mxu1 %v1939_v59  ;;  %v1538_v59 = vld [vmem:[%s12126_s0 + $0x710] sm:$0xff]  ;;  %v1762_v4 = vunpack.c.l.s8.bf16 %v1410_v58 }
 0x491   : > { %2117 = vmatmul.mubr.bf16.vlgmr.msra.gmra.mxu0 %v12246_v60  ;;  %v2018_v5 = vunpack.c.l.s8.bf16 %v1538_v59 }
 0x492   : > { %2158 = vmatmul.mubr.bf16.vlgmr.msra.gmra.mxu1 %v12248_v61  ;;  %2167 = vmatpush1.bf16.msra.mxu0 %v1682_v62  ;;  %v1778_v62 = vunpack.c.h.s8.bf16 %v1410_v58  ;;  %v1332_v58 = vld [vmem:[%s12126_s0 + $0xa0] sm:$0xff] }
 0x493   : > { %2208 = vmatpush1.bf16.msra.mxu1 %v1938_v63  ;;  %2168 = vmatprep.subr.bf16.mxu0 %v1667_v0  ;;  %v2034_v63 = vunpack.c.h.s8.bf16 %v1538_v59  ;;  %v1763_v0 = vunpack.c.l.s8.bf16 %v1411_v52  ;;  %v1333_v52 = vld [vmem:[%s12126_s0 + $0xa8] sm:$0xff]  ;;  %v1460_v59 = vld [vmem:[%s12126_s0 + $0x4a0] sm:$0xff] }
 0x494   : > { %2209 = vmatprep.subr.bf16.mxu1 %v1923_v1  ;;  %2198 = vmatprep.mubr.bf16.mxu0 %v12216_v50  ;;  %v2019_v1 = vunpack.c.l.s8.bf16 %v1539_v53  ;;  %v1461_v53 = vld [vmem:[%s12126_s0 + $0x4a8] sm:$0xff] }
 0x495   : > { %2239 = vmatprep.mubr.bf16.mxu1 %v12218_v51 }
 0x496   : > { %2169 = vmatpush1.bf16.msra.mxu0 %v1666_v6  ;;  %v1747_v6 = vunpack.c.h.s8.bf16 %v1395_v2 }
 0x497   : > { %2210 = vmatpush1.bf16.msra.mxu1 %v1922_v7  ;;  %2170 = vmatprep.subr.bf16.mxu0 %v1651_v8  ;;  %v2003_v7 = vunpack.c.h.s8.bf16 %v1523_v3  ;;  %v1394_v8 = vld [vmem:[%s12126_s0 + $0x290] sm:$0xff] }
 0x498   : > { %2211 = vmatprep.subr.bf16.mxu1 %v1907_v9  ;;  %v1522_v9 = vld [vmem:[%s12126_s0 + $0x690] sm:$0xff]  ;;  %v1730_v16 = vunpack.c.l.s8.bf16 %v1394_v8 }
 0x499   : > { %v1986_v17 = vunpack.c.l.s8.bf16 %v1522_v9 }
 0x49a   : > { %2171 = vmatpush1.bf16.msra.mxu0 %v1650_v10  ;;  %v1746_v10 = vunpack.c.h.s8.bf16 %v1394_v8  ;;  %v1316_v8 = vld [vmem:[%s12126_s0 + $0x20] sm:$0xff] }
 0x49b   : > { %2212 = vmatpush1.bf16.msra.mxu1 %v1906_v11  ;;  %2172 = vmatprep.subr.bf16.mxu0 %v1635_v12  ;;  %v2002_v11 = vunpack.c.h.s8.bf16 %v1522_v9  ;;  %v1731_v12 = vunpack.c.l.s8.bf16 %v1395_v2  ;;  %v1317_v2 = vld [vmem:[%s12126_s0 + $0x28] sm:$0xff]  ;;  %v1444_v9 = vld [vmem:[%s12126_s0 + $0x420] sm:$0xff] }
 0x49c   : > { %2213 = vmatprep.subr.bf16.mxu1 %v1891_v13  ;;  %v1987_v13 = vunpack.c.l.s8.bf16 %v1523_v3  ;;  %v1445_v3 = vld [vmem:[%s12126_s0 + $0x428] sm:$0xff] }
 0x49e   : > { %2173 = vmatpush1.bf16.msra.mxu0 %v1634_v18  ;;  %v1715_v18 = vunpack.c.h.s8.bf16 %v1379_v14 }
 0x49f   : > { %2214 = vmatpush1.bf16.msra.mxu1 %v1890_v19  ;;  %2174 = vmatprep.subr.bf16.mxu0 %v1619_v20  ;;  %v1971_v19 = vunpack.c.h.s8.bf16 %v1507_v15  ;;  %v1378_v20 = vld [vmem:[%s12126_s0 + $0x210] sm:$0xff] }
 0x4a0   : > { %2215 = vmatprep.subr.bf16.mxu1 %v1875_v21  ;;  %v1506_v21 = vld [vmem:[%s12126_s0 + $0x610] sm:$0xff] }
 0x4a2   : > { %2175 = vmatpush1.bf16.msra.mxu0 %v1618_v22  ;;  %v1714_v22 = vunpack.c.h.s8.bf16 %v1378_v20 }
 0x4a3   : > { %2216 = vmatpush1.bf16.msra.mxu1 %v1874_v23  ;;  %2176 = vmatprep.subr.bf16.mxu0 %v1603_v24  ;;  %v1970_v23 = vunpack.c.h.s8.bf16 %v1506_v21  ;;  %v1699_v24 = vunpack.c.l.s8.bf16 %v1379_v14  ;;  %v1429_v14 = vld [vmem:[%s12126_s0 + $0x3a8] sm:$0xff] }
 0x4a4   : > { %2217 = vmatprep.subr.bf16.mxu1 %v1859_v25  ;;  %v1955_v25 = vunpack.c.l.s8.bf16 %v1507_v15  ;;  %v1557_v15 = vld [vmem:[%s12126_s0 + $0x7a8] sm:$0xff] }
 0x4a6   : > { %2177 = vmatpush1.bf16.msra.mxu0 %v1602_v28  ;;  %v1698_v28 = vunpack.c.l.s8.bf16 %v1378_v20  ;;  %v1428_v20 = vld [vmem:[%s12126_s0 + $0x3a0] sm:$0xff] }
 0x4a7   : > { %2218 = vmatpush1.bf16.msra.mxu1 %v1858_v29  ;;  %2178 = vmatprep.subr.bf16.mxu0 %v1587_v30  ;;  %v1954_v29 = vunpack.c.l.s8.bf16 %v1506_v21  ;;  %v1685_v30 = vunpack.c.h.s8.bf16 %v1365_v26  ;;  %v1556_v21 = vld [vmem:[%s12126_s0 + $0x7a0] sm:$0xff] }
 0x4a8   : > { %2219 = vmatprep.subr.bf16.mxu1 %v1843_v31  ;;  %v1941_v31 = vunpack.c.h.s8.bf16 %v1493_v27 }
 0x4aa   : > { %2179 = vmatpush1.bf16.msra.mxu0 %v1586_v34  ;;  %v1684_v34 = vunpack.c.h.s8.bf16 %v1364_v32 }
 0x4ab   : > { %2220 = vmatpush1.bf16.msra.mxu1 %v1842_v35  ;;  %2180 = vmatprep.subr.bf16.mxu0 %v1571_v36  ;;  %v1940_v35 = vunpack.c.h.s8.bf16 %v1492_v33  ;;  %v1669_v36 = vunpack.c.l.s8.bf16 %v1365_v26  ;;  %v1413_v26 = vld [vmem:[%s12126_s0 + $0x328] sm:$0xff] }
 0x4ac   : > { %2221 = vmatprep.subr.bf16.mxu1 %v1827_v37  ;;  %v1925_v37 = vunpack.c.l.s8.bf16 %v1493_v27  ;;  %v1541_v27 = vld [vmem:[%s12126_s0 + $0x728] sm:$0xff] }
 0x4ae   : > { %2181 = vmatpush1.bf16.msra.mxu0 %v1570_v40  ;;  %v1668_v40 = vunpack.c.l.s8.bf16 %v1364_v32  ;;  %v1412_v32 = vld [vmem:[%s12126_s0 + $0x320] sm:$0xff] }
 0x4af   : > { %2222 = vmatpush1.bf16.msra.mxu1 %v1826_v41  ;;  %2182 = vmatprep.subr.bf16.mxu0 %v1811_v42  ;;  %v1924_v41 = vunpack.c.l.s8.bf16 %v1492_v33  ;;  %v1653_v42 = vunpack.c.h.s8.bf16 %v1349_v38  ;;  %v1540_v33 = vld [vmem:[%s12126_s0 + $0x720] sm:$0xff] }
 0x4b0   : > { %2223 = vmatprep.subr.bf16.mxu1 %v2067_v43  ;;  %v1909_v43 = vunpack.c.h.s8.bf16 %v1477_v39 }
 0x4b2   : > { %2183 = vmatpush2.bf16.msra.mxu0 %v1810_v46  ;;  %v1652_v46 = vunpack.c.h.s8.bf16 %v1348_v44 }
 0x4b3   : > { %2224 = vmatpush2.bf16.msra.mxu1 %v2066_v47  ;;  %2184 = vmatprep.subr.bf16.mxu0 %v1795_v48  ;;  %v1908_v47 = vunpack.c.h.s8.bf16 %v1476_v45  ;;  %v1637_v48 = vunpack.c.l.s8.bf16 %v1349_v38  ;;  %v1397_v38 = vld [vmem:[%s12126_s0 + $0x2a8] sm:$0xff] }
 0x4b4   : > { %2225 = vmatprep.subr.bf16.mxu1 %v2051_v49  ;;  %v1893_v49 = vunpack.c.l.s8.bf16 %v1477_v39  ;;  %v1525_v39 = vld [vmem:[%s12126_s0 + $0x6a8] sm:$0xff] }
 0x4b6   : > { %2185 = vmatpush2.bf16.msra.mxu0 %v1794_v54  ;;  %v1636_v54 = vunpack.c.l.s8.bf16 %v1348_v44  ;;  %v1396_v44 = vld [vmem:[%s12126_s0 + $0x2a0] sm:$0xff] }
 0x4b7   : > { %2226 = vmatpush2.bf16.msra.mxu1 %v2050_v55  ;;  %2186 = vmatprep.subr.bf16.mxu0 %v1779_v56  ;;  %v1892_v55 = vunpack.c.l.s8.bf16 %v1476_v45  ;;  %v1621_v56 = vunpack.c.h.s8.bf16 %v1333_v52  ;;  %v1524_v45 = vld [vmem:[%s12126_s0 + $0x6a0] sm:$0xff] }
 0x4b8   : > { %2227 = vmatprep.subr.bf16.mxu1 %v2035_v57  ;;  %v1877_v57 = vunpack.c.h.s8.bf16 %v1461_v53 }
 0x4ba   : > { %2187 = vmatpush2.bf16.msra.mxu0 %v1778_v62  ;;  %v1620_v62 = vunpack.c.h.s8.bf16 %v1332_v58 }
 0x4bb   : > { %2228 = vmatpush2.bf16.msra.mxu1 %v2034_v63  ;;  %2188 = vmatprep.subr.bf16.mxu0 %v1763_v0  ;;  %v1876_v63 = vunpack.c.h.s8.bf16 %v1460_v59  ;;  %v1605_v0 = vunpack.c.l.s8.bf16 %v1333_v52  ;;  %v1381_v52 = vld [vmem:[%s12126_s0 + $0x228] sm:$0xff] }
 0x4bc   : > { %2229 = vmatprep.subr.bf16.mxu1 %v2019_v1  ;;  %v1861_v1 = vunpack.c.l.s8.bf16 %v1461_v53  ;;  %v1509_v53 = vld [vmem:[%s12126_s0 + $0x628] sm:$0xff] }
 0x4be   : > { %2189 = vmatpush2.bf16.msra.mxu0 %v1762_v4  ;;  %v1604_v4 = vunpack.c.l.s8.bf16 %v1332_v58  ;;  %v1380_v58 = vld [vmem:[%s12126_s0 + $0x220] sm:$0xff] }
 0x4bf   : > { %2230 = vmatpush2.bf16.msra.mxu1 %v2018_v5  ;;  %2190 = vmatprep.subr.bf16.mxu0 %v1747_v6  ;;  %v1860_v5 = vunpack.c.l.s8.bf16 %v1460_v59  ;;  %v1589_v6 = vunpack.c.h.s8.bf16 %v1317_v2  ;;  %v1508_v59 = vld [vmem:[%s12126_s0 + $0x620] sm:$0xff] }
 0x4c0   : > { %2231 = vmatprep.subr.bf16.mxu1 %v2003_v7  ;;  %v1845_v7 = vunpack.c.h.s8.bf16 %v1445_v3 }
 0x4c2   : > { %2191 = vmatpush2.bf16.msra.mxu0 %v1746_v10  ;;  %v1588_v10 = vunpack.c.h.s8.bf16 %v1316_v8 }
 0x4c3   : > { %2232 = vmatpush2.bf16.msra.mxu1 %v2002_v11  ;;  %2192 = vmatprep.subr.bf16.mxu0 %v1731_v12  ;;  %v1844_v11 = vunpack.c.h.s8.bf16 %v1444_v9  ;;  %v1573_v12 = vunpack.c.l.s8.bf16 %v1317_v2  ;;  %v1367_v2 = vld [vmem:[%s12126_s0 + $0x1b8] sm:$0xff] }
 0x4c4   : > { %2233 = vmatprep.subr.bf16.mxu1 %v1987_v13  ;;  %v1829_v13 = vunpack.c.l.s8.bf16 %v1445_v3  ;;  %v1495_v3 = vld [vmem:[%s12126_s0 + $0x5b8] sm:$0xff] }
 0x4c6   : > { %2193 = vmatpush2.bf16.msra.mxu0 %v1730_v16  ;;  %v1572_v16 = vunpack.c.l.s8.bf16 %v1316_v8  ;;  %v1366_v8 = vld [vmem:[%s12126_s0 + $0x1b0] sm:$0xff] }
 0x4c7   : > { %2234 = vmatpush2.bf16.msra.mxu1 %v1986_v17  ;;  %2194 = vmatprep.subr.bf16.mxu0 %v1715_v18  ;;  %v1828_v17 = vunpack.c.l.s8.bf16 %v1444_v9  ;;  %v1813_v18 = vunpack.c.h.s8.bf16 %v1429_v14  ;;  %v1494_v9 = vld [vmem:[%s12126_s0 + $0x5b0] sm:$0xff] }
 0x4c8   : > { %2235 = vmatprep.subr.bf16.mxu1 %v1971_v19  ;;  %v2069_v19 = vunpack.c.h.s8.bf16 %v1557_v15 }
 0x4ca   : > { %2195 = vmatpush2.bf16.msra.mxu0 %v1714_v22  ;;  %v1812_v22 = vunpack.c.h.s8.bf16 %v1428_v20 }
 0x4cb   : > { %2236 = vmatpush2.bf16.msra.mxu1 %v1970_v23  ;;  %2196 = vmatprep.subr.bf16.mxu0 %v1699_v24  ;;  %v2068_v23 = vunpack.c.h.s8.bf16 %v1556_v21  ;;  %v1797_v24 = vunpack.c.l.s8.bf16 %v1429_v14  ;;  %v1351_v14 = vld [vmem:[%s12126_s0 + $0x138] sm:$0xff] }
 0x4cc   : > { %2237 = vmatprep.subr.bf16.mxu1 %v1955_v25  ;;  %v2053_v25 = vunpack.c.l.s8.bf16 %v1557_v15  ;;  %v1479_v15 = vld [vmem:[%s12126_s0 + $0x538] sm:$0xff] }
 0x4ce   : > { %2197 = vmatpush2.bf16.msra.mxu0 %v1698_v28  ;;  %v1796_v28 = vunpack.c.l.s8.bf16 %v1428_v20  ;;  %v1350_v20 = vld [vmem:[%s12126_s0 + $0x130] sm:$0xff] }
 0x4cf   : > { %2238 = vmatpush2.bf16.msra.mxu1 %v1954_v29  ;;  %2248 = vmatprep.subr.bf16.mxu0 %v1685_v30  ;;  %v2052_v29 = vunpack.c.l.s8.bf16 %v1556_v21  ;;  %v1781_v30 = vunpack.c.h.s8.bf16 %v1413_v26  ;;  %v1478_v21 = vld [vmem:[%s12126_s0 + $0x530] sm:$0xff] }
 0x4d0   : > { %2289 = vmatprep.subr.bf16.mxu1 %v1941_v31  ;;  %v2037_v31 = vunpack.c.h.s8.bf16 %v1541_v27 }
 0x4d1   : > { %2199 = vmatmul.mubr.bf16.vlgmr.msra.gmra.mxu0 %v12246_v60 }
 0x4d2   : > { %2240 = vmatmul.mubr.bf16.vlgmr.msra.gmra.mxu1 %v12248_v61  ;;  %2249 = vmatpush1.bf16.msra.mxu0 %v1684_v34  ;;  %v1780_v34 = vunpack.c.h.s8.bf16 %v1412_v32 }
 0x4d3   : > { %2290 = vmatpush1.bf16.msra.mxu1 %v1940_v35  ;;  %2250 = vmatprep.subr.bf16.mxu0 %v1669_v36  ;;  %v2036_v35 = vunpack.c.h.s8.bf16 %v1540_v33  ;;  %v1765_v36 = vunpack.c.l.s8.bf16 %v1413_v26  ;;  %v1335_v26 = vld [vmem:[%s12126_s0 + $0xb8] sm:$0xff] }
 0x4d4   : > { %2291 = vmatprep.subr.bf16.mxu1 %v1925_v37  ;;  %2280 = vmatprep.mubr.bf16.mxu0 %v12216_v50  ;;  %v2021_v37 = vunpack.c.l.s8.bf16 %v1541_v27  ;;  %v1463_v27 = vld [vmem:[%s12126_s0 + $0x4b8] sm:$0xff] }
 0x4d5   : > { %2321 = vmatprep.mubr.bf16.mxu1 %v12218_v51 }
 0x4d6   : > { %2251 = vmatpush1.bf16.msra.mxu0 %v1668_v40  ;;  %v1764_v40 = vunpack.c.l.s8.bf16 %v1412_v32  ;;  %v1334_v32 = vld [vmem:[%s12126_s0 + $0xb0] sm:$0xff] }
 0x4d7   : > { %2292 = vmatpush1.bf16.msra.mxu1 %v1924_v41  ;;  %2252 = vmatprep.subr.bf16.mxu0 %v1653_v42  ;;  %v2020_v41 = vunpack.c.l.s8.bf16 %v1540_v33  ;;  %v1749_v42 = vunpack.c.h.s8.bf16 %v1397_v38  ;;  %v1462_v33 = vld [vmem:[%s12126_s0 + $0x4b0] sm:$0xff] }
 0x4d8   : > { %2293 = vmatprep.subr.bf16.mxu1 %v1909_v43  ;;  %v2005_v43 = vunpack.c.h.s8.bf16 %v1525_v39 }
 0x4da   : > { %2253 = vmatpush1.bf16.msra.mxu0 %v1652_v46  ;;  %v1748_v46 = vunpack.c.h.s8.bf16 %v1396_v44 }
 0x4db   : > { %2294 = vmatpush1.bf16.msra.mxu1 %v1908_v47  ;;  %2254 = vmatprep.subr.bf16.mxu0 %v1637_v48  ;;  %v2004_v47 = vunpack.c.h.s8.bf16 %v1524_v45  ;;  %v1733_v48 = vunpack.c.l.s8.bf16 %v1397_v38  ;;  %v1319_v38 = vld [vmem:[%s12126_s0 + $0x38] sm:$0xff] }
 0x4dc   : > { %2295 = vmatprep.subr.bf16.mxu1 %v1893_v49  ;;  %v1989_v49 = vunpack.c.l.s8.bf16 %v1525_v39  ;;  %v1447_v39 = vld [vmem:[%s12126_s0 + $0x438] sm:$0xff] }
 0x4de   : > { %2255 = vmatpush1.bf16.msra.mxu0 %v1636_v54  ;;  %v1732_v54 = vunpack.c.l.s8.bf16 %v1396_v44  ;;  %v1318_v44 = vld [vmem:[%s12126_s0 + $0x30] sm:$0xff] }
 0x4df   : > { %2296 = vmatpush1.bf16.msra.mxu1 %v1892_v55  ;;  %2256 = vmatprep.subr.bf16.mxu0 %v1621_v56  ;;  %v1988_v55 = vunpack.c.l.s8.bf16 %v1524_v45  ;;  %v1717_v56 = vunpack.c.h.s8.bf16 %v1381_v52  ;;  %v1446_v45 = vld [vmem:[%s12126_s0 + $0x430] sm:$0xff] }
 0x4e0   : > { %2297 = vmatprep.subr.bf16.mxu1 %v1877_v57  ;;  %v1973_v57 = vunpack.c.h.s8.bf16 %v1509_v53 }
 0x4e2   : > { %2257 = vmatpush1.bf16.msra.mxu0 %v1620_v62  ;;  %v1716_v62 = vunpack.c.h.s8.bf16 %v1380_v58 }
 0x4e3   : > { %2298 = vmatpush1.bf16.msra.mxu1 %v1876_v63  ;;  %2258 = vmatprep.subr.bf16.mxu0 %v1605_v0  ;;  %v1972_v63 = vunpack.c.h.s8.bf16 %v1508_v59  ;;  %v1701_v0 = vunpack.c.l.s8.bf16 %v1381_v52  ;;  %v1431_v52 = vld [vmem:[%s12126_s0 + $0x3b8] sm:$0xff] }
 0x4e4   : > { %2299 = vmatprep.subr.bf16.mxu1 %v1861_v1  ;;  %v1957_v1 = vunpack.c.l.s8.bf16 %v1509_v53  ;;  %v1559_v53 = vld [vmem:[%s12126_s0 + $0x7b8] sm:$0xff] }
 0x4e6   : > { %2259 = vmatpush1.bf16.msra.mxu0 %v1604_v4  ;;  %v1700_v4 = vunpack.c.l.s8.bf16 %v1380_v58  ;;  %v1430_v58 = vld [vmem:[%s12126_s0 + $0x3b0] sm:$0xff] }
 0x4e7   : > { %2300 = vmatpush1.bf16.msra.mxu1 %v1860_v5  ;;  %2260 = vmatprep.subr.bf16.mxu0 %v1589_v6  ;;  %v1956_v5 = vunpack.c.l.s8.bf16 %v1508_v59  ;;  %v1687_v6 = vunpack.c.h.s8.bf16 %v1367_v2  ;;  %v1558_v59 = vld [vmem:[%s12126_s0 + $0x7b0] sm:$0xff] }
 0x4e8   : > { %2301 = vmatprep.subr.bf16.mxu1 %v1845_v7  ;;  %v1943_v7 = vunpack.c.h.s8.bf16 %v1495_v3 }
 0x4ea   : > { %2261 = vmatpush1.bf16.msra.mxu0 %v1588_v10  ;;  %v1686_v10 = vunpack.c.h.s8.bf16 %v1366_v8 }
 0x4eb   : > { %2302 = vmatpush1.bf16.msra.mxu1 %v1844_v11  ;;  %2262 = vmatprep.subr.bf16.mxu0 %v1573_v12  ;;  %v1942_v11 = vunpack.c.h.s8.bf16 %v1494_v9  ;;  %v1671_v12 = vunpack.c.l.s8.bf16 %v1367_v2  ;;  %v1415_v2 = vld [vmem:[%s12126_s0 + $0x338] sm:$0xff] }
 0x4ec   : > { %2303 = vmatprep.subr.bf16.mxu1 %v1829_v13  ;;  %v1927_v13 = vunpack.c.l.s8.bf16 %v1495_v3  ;;  %v1543_v3 = vld [vmem:[%s12126_s0 + $0x738] sm:$0xff] }
 0x4ee   : > { %2263 = vmatpush1.bf16.msra.mxu0 %v1572_v16  ;;  %v1670_v16 = vunpack.c.l.s8.bf16 %v1366_v8  ;;  %v1414_v8 = vld [vmem:[%s12126_s0 + $0x330] sm:$0xff] }
 0x4ef   : > { %2304 = vmatpush1.bf16.msra.mxu1 %v1828_v17  ;;  %2264 = vmatprep.subr.bf16.mxu0 %v1813_v18  ;;  %v1926_v17 = vunpack.c.l.s8.bf16 %v1494_v9  ;;  %v1655_v18 = vunpack.c.h.s8.bf16 %v1351_v14  ;;  %v1542_v9 = vld [vmem:[%s12126_s0 + $0x730] sm:$0xff] }
 0x4f0   : > { %2305 = vmatprep.subr.bf16.mxu1 %v2069_v19  ;;  %v1911_v19 = vunpack.c.h.s8.bf16 %v1479_v15 }
 0x4f2   : > { %2265 = vmatpush2.bf16.msra.mxu0 %v1812_v22  ;;  %v1654_v22 = vunpack.c.h.s8.bf16 %v1350_v20 }
 0x4f3   : > { %2306 = vmatpush2.bf16.msra.mxu1 %v2068_v23  ;;  %2266 = vmatprep.subr.bf16.mxu0 %v1797_v24  ;;  %v1910_v23 = vunpack.c.h.s8.bf16 %v1478_v21  ;;  %v1639_v24 = vunpack.c.l.s8.bf16 %v1351_v14  ;;  %v1399_v14 = vld [vmem:[%s12126_s0 + $0x2b8] sm:$0xff] }
 0x4f4   : > { %2307 = vmatprep.subr.bf16.mxu1 %v2053_v25  ;;  %v1895_v25 = vunpack.c.l.s8.bf16 %v1479_v15  ;;  %v1527_v15 = vld [vmem:[%s12126_s0 + $0x6b8] sm:$0xff] }
 0x4f6   : > { %2267 = vmatpush2.bf16.msra.mxu0 %v1796_v28  ;;  %v1638_v28 = vunpack.c.l.s8.bf16 %v1350_v20  ;;  %v1398_v20 = vld [vmem:[%s12126_s0 + $0x2b0] sm:$0xff] }
 0x4f7   : > { %2308 = vmatpush2.bf16.msra.mxu1 %v2052_v29  ;;  %2268 = vmatprep.subr.bf16.mxu0 %v1781_v30  ;;  %v1894_v29 = vunpack.c.l.s8.bf16 %v1478_v21  ;;  %v1623_v30 = vunpack.c.h.s8.bf16 %v1335_v26  ;;  %v1526_v21 = vld [vmem:[%s12126_s0 + $0x6b0] sm:$0xff] }
 0x4f8   : > { %2309 = vmatprep.subr.bf16.mxu1 %v2037_v31  ;;  %v1879_v31 = vunpack.c.h.s8.bf16 %v1463_v27 }
 0x4fa   : > { %2269 = vmatpush2.bf16.msra.mxu0 %v1780_v34  ;;  %v1622_v34 = vunpack.c.h.s8.bf16 %v1334_v32 }
 0x4fb   : > { %2310 = vmatpush2.bf16.msra.mxu1 %v2036_v35  ;;  %2270 = vmatprep.subr.bf16.mxu0 %v1765_v36  ;;  %v1878_v35 = vunpack.c.h.s8.bf16 %v1462_v33  ;;  %v1607_v36 = vunpack.c.l.s8.bf16 %v1335_v26  ;;  %v1383_v26 = vld [vmem:[%s12126_s0 + $0x238] sm:$0xff] }
 0x4fc   : > { %2311 = vmatprep.subr.bf16.mxu1 %v2021_v37  ;;  %v1863_v37 = vunpack.c.l.s8.bf16 %v1463_v27  ;;  %v1511_v27 = vld [vmem:[%s12126_s0 + $0x638] sm:$0xff] }
 0x4fe   : > { %2271 = vmatpush2.bf16.msra.mxu0 %v1764_v40  ;;  %v1606_v40 = vunpack.c.l.s8.bf16 %v1334_v32  ;;  %v1382_v32 = vld [vmem:[%s12126_s0 + $0x230] sm:$0xff] }
 0x4ff   : > { %2312 = vmatpush2.bf16.msra.mxu1 %v2020_v41  ;;  %2272 = vmatprep.subr.bf16.mxu0 %v1749_v42  ;;  %v1862_v41 = vunpack.c.l.s8.bf16 %v1462_v33  ;;  %v1591_v42 = vunpack.c.h.s8.bf16 %v1319_v38  ;;  %v1510_v33 = vld [vmem:[%s12126_s0 + $0x630] sm:$0xff] }
 0x500   : > { %2313 = vmatprep.subr.bf16.mxu1 %v2005_v43  ;;  %v1847_v43 = vunpack.c.h.s8.bf16 %v1447_v39 }
 0x502   : > { %2273 = vmatpush2.bf16.msra.mxu0 %v1748_v46  ;;  %v1590_v46 = vunpack.c.h.s8.bf16 %v1318_v44 }
 0x503   : > { %2314 = vmatpush2.bf16.msra.mxu1 %v2004_v47  ;;  %2274 = vmatprep.subr.bf16.mxu0 %v1733_v48  ;;  %v1846_v47 = vunpack.c.h.s8.bf16 %v1446_v45  ;;  %v1575_v48 = vunpack.c.l.s8.bf16 %v1319_v38  ;;  %v1369_v38 = vld [vmem:[%s12126_s0 + $0x1c8] sm:$0xff] }
 0x504   : > { %2315 = vmatprep.subr.bf16.mxu1 %v1989_v49  ;;  %v1831_v49 = vunpack.c.l.s8.bf16 %v1447_v39  ;;  %v1497_v39 = vld [vmem:[%s12126_s0 + $0x5c8] sm:$0xff] }
 0x506   : > { %2275 = vmatpush2.bf16.msra.mxu0 %v1732_v54  ;;  %v1574_v54 = vunpack.c.l.s8.bf16 %v1318_v44  ;;  %v1368_v44 = vld [vmem:[%s12126_s0 + $0x1c0] sm:$0xff] }
 0x507   : > { %2316 = vmatpush2.bf16.msra.mxu1 %v1988_v55  ;;  %2276 = vmatprep.subr.bf16.mxu0 %v1717_v56  ;;  %v1830_v55 = vunpack.c.l.s8.bf16 %v1446_v45  ;;  %v1815_v56 = vunpack.c.h.s8.bf16 %v1431_v52  ;;  %v1496_v45 = vld [vmem:[%s12126_s0 + $0x5c0] sm:$0xff] }
 0x508   : > { %2317 = vmatprep.subr.bf16.mxu1 %v1973_v57  ;;  %v2071_v57 = vunpack.c.h.s8.bf16 %v1559_v53 }
 0x50a   : > { %2277 = vmatpush2.bf16.msra.mxu0 %v1716_v62  ;;  %v1814_v62 = vunpack.c.h.s8.bf16 %v1430_v58 }
 0x50b   : > { %2318 = vmatpush2.bf16.msra.mxu1 %v1972_v63  ;;  %2278 = vmatprep.subr.bf16.mxu0 %v1701_v0  ;;  %v2070_v63 = vunpack.c.h.s8.bf16 %v1558_v59  ;;  %v1799_v0 = vunpack.c.l.s8.bf16 %v1431_v52  ;;  %v1353_v52 = vld [vmem:[%s12126_s0 + $0x148] sm:$0xff] }
 0x50c   : > { %2319 = vmatprep.subr.bf16.mxu1 %v1957_v1  ;;  %v2055_v1 = vunpack.c.l.s8.bf16 %v1559_v53  ;;  %v1481_v53 = vld [vmem:[%s12126_s0 + $0x548] sm:$0xff] }
 0x50e   : > { %2279 = vmatpush2.bf16.msra.mxu0 %v1700_v4  ;;  %v1798_v4 = vunpack.c.l.s8.bf16 %v1430_v58  ;;  %v1928_v58 = vunpack.c.l.s8.bf16 %v1496_v45 }
 0x50f   : > { %2320 = vmatpush2.bf16.msra.mxu1 %v1956_v5  ;;  %2330 = vmatprep.subr.bf16.mxu0 %v1687_v6  ;;  %v2054_v5 = vunpack.c.l.s8.bf16 %v1558_v59  ;;  %v1783_v6 = vunpack.c.h.s8.bf16 %v1415_v2 }
 0x510   : > { %2371 = vmatprep.subr.bf16.mxu1 %v1943_v7  ;;  %v2039_v7 = vunpack.c.h.s8.bf16 %v1543_v3 }
 0x511   : > { %2281 = vmatmul.mubr.bf16.vlgmr.msra.gmra.mxu0 %v12246_v60 }
 0x512   : > { %2322 = vmatmul.mubr.bf16.vlgmr.msra.gmra.mxu1 %v12248_v61  ;;  %2331 = vmatpush1.bf16.msra.mxu0 %v1686_v10  ;;  %v1782_v10 = vunpack.c.h.s8.bf16 %v1414_v8 }
 0x513   : > { %2372 = vmatpush1.bf16.msra.mxu1 %v1942_v11  ;;  %2332 = vmatprep.subr.bf16.mxu0 %v1671_v12  ;;  %v2038_v11 = vunpack.c.h.s8.bf16 %v1542_v9  ;;  %v1767_v12 = vunpack.c.l.s8.bf16 %v1415_v2  ;;  %v1480_v2 = vld [vmem:[%s12126_s0 + $0x540] sm:$0xff] }
 0x514   : > { %2373 = vmatprep.subr.bf16.mxu1 %v1927_v13  ;;  %2362 = vmatprep.mubr.bf16.mxu0 %v12216_v50  ;;  %v2023_v13 = vunpack.c.l.s8.bf16 %v1543_v3 }
 0x515   : > { %2403 = vmatprep.mubr.bf16.mxu1 %v12218_v51 }
 0x516   : > { %2333 = vmatpush1.bf16.msra.mxu0 %v1670_v16  ;;  %v1766_v16 = vunpack.c.l.s8.bf16 %v1414_v8 }
 0x517   : > { %2374 = vmatpush1.bf16.msra.mxu1 %v1926_v17  ;;  %2334 = vmatprep.subr.bf16.mxu0 %v1655_v18  ;;  %v2022_v17 = vunpack.c.l.s8.bf16 %v1542_v9  ;;  %v1751_v18 = vunpack.c.h.s8.bf16 %v1399_v14 }
 0x518   : > { %2375 = vmatprep.subr.bf16.mxu1 %v1911_v19  ;;  %v2007_v19 = vunpack.c.h.s8.bf16 %v1527_v15 }
 0x51a   : > { %2335 = vmatpush1.bf16.msra.mxu0 %v1654_v22  ;;  %v1750_v22 = vunpack.c.h.s8.bf16 %v1398_v20 }
 0x51b   : > { %2376 = vmatpush1.bf16.msra.mxu1 %v1910_v23  ;;  %2336 = vmatprep.subr.bf16.mxu0 %v1639_v24  ;;  %v2006_v23 = vunpack.c.h.s8.bf16 %v1526_v21  ;;  %v1735_v24 = vunpack.c.l.s8.bf16 %v1399_v14 }
 0x51c   : > { %2377 = vmatprep.subr.bf16.mxu1 %v1895_v25  ;;  %v1991_v25 = vunpack.c.l.s8.bf16 %v1527_v15  ;;  %v1896_v15 = vunpack.c.l.s8.bf16 %v1480_v2 }
 0x51e   : > { %2337 = vmatpush1.bf16.msra.mxu0 %v1638_v28  ;;  %v1734_v28 = vunpack.c.l.s8.bf16 %v1398_v20 }
 0x51f   : > { %2378 = vmatpush1.bf16.msra.mxu1 %v1894_v29  ;;  %2338 = vmatprep.subr.bf16.mxu0 %v1623_v30  ;;  %v1990_v29 = vunpack.c.l.s8.bf16 %v1526_v21  ;;  %v1719_v30 = vunpack.c.h.s8.bf16 %v1383_v26 }
 0x520   : > { %2379 = vmatprep.subr.bf16.mxu1 %v1879_v31  ;;  %v1975_v31 = vunpack.c.h.s8.bf16 %v1511_v27 }
 0x522   : > { %2339 = vmatpush1.bf16.msra.mxu0 %v1622_v34  ;;  %v1718_v34 = vunpack.c.h.s8.bf16 %v1382_v32 }
 0x523   : > { %2380 = vmatpush1.bf16.msra.mxu1 %v1878_v35  ;;  %2340 = vmatprep.subr.bf16.mxu0 %v1607_v36  ;;  %v1974_v35 = vunpack.c.h.s8.bf16 %v1510_v33  ;;  %v1703_v36 = vunpack.c.l.s8.bf16 %v1383_v26 }
 0x524   : > { %2381 = vmatprep.subr.bf16.mxu1 %v1863_v37  ;;  %v1959_v37 = vunpack.c.l.s8.bf16 %v1511_v27 }
 0x526   : > { %2341 = vmatpush1.bf16.msra.mxu0 %v1606_v40  ;;  %v1702_v40 = vunpack.c.l.s8.bf16 %v1382_v32 }
 0x527   : > { %2382 = vmatpush1.bf16.msra.mxu1 %v1862_v41  ;;  %2342 = vmatprep.subr.bf16.mxu0 %v1591_v42  ;;  %v1958_v41 = vunpack.c.l.s8.bf16 %v1510_v33  ;;  %v1689_v42 = vunpack.c.h.s8.bf16 %v1369_v38 }
 0x528   : > { %2383 = vmatprep.subr.bf16.mxu1 %v1847_v43  ;;  %v1945_v43 = vunpack.c.h.s8.bf16 %v1497_v39 }
 0x52a   : > { %2343 = vmatpush1.bf16.msra.mxu0 %v1590_v46  ;;  %v1688_v46 = vunpack.c.h.s8.bf16 %v1368_v44 }
 0x52b   : > { %2384 = vmatpush1.bf16.msra.mxu1 %v1846_v47  ;;  %2344 = vmatprep.subr.bf16.mxu0 %v1575_v48  ;;  %v1944_v47 = vunpack.c.h.s8.bf16 %v1496_v45  ;;  %v1673_v48 = vunpack.c.l.s8.bf16 %v1369_v38 }
 0x52c   : > { %2385 = vmatprep.subr.bf16.mxu1 %v1831_v49  ;;  %v1929_v49 = vunpack.c.l.s8.bf16 %v1497_v39 }
 0x52e   : > { %2345 = vmatpush1.bf16.msra.mxu0 %v1574_v54 }
 0x52f   : > { %2386 = vmatpush1.bf16.msra.mxu1 %v1830_v55  ;;  %2346 = vmatprep.subr.bf16.mxu0 %v1815_v56 }
 0x530   : > { %2387 = vmatprep.subr.bf16.mxu1 %v2071_v57  ;;  %v1672_v57 = vunpack.c.l.s8.bf16 %v1368_v44 }
 0x532   : > { %2347 = vmatpush2.bf16.msra.mxu0 %v1814_v62 }
 0x533   : > { %2388 = vmatpush2.bf16.msra.mxu1 %v2070_v63  ;;  %2348 = vmatprep.subr.bf16.mxu0 %v1799_v0  ;;  %v1657_v63 = vunpack.c.h.s8.bf16 %v1353_v52  ;;  %v1913_v0 = vunpack.c.h.s8.bf16 %v1481_v53 }
 0x534   : > { %2389 = vmatprep.subr.bf16.mxu1 %v2055_v1  ;;  %v1352_v1 = vld [vmem:[%s12126_s0 + $0x140] sm:$0xff] }
 0x535   : > { %v1640_v14 = vunpack.c.l.s8.bf16 %v1352_v1 }
 0x536   : > { %2349 = vmatpush2.bf16.msra.mxu0 %v1798_v4 }
 0x537   : > { %2390 = vmatpush2.bf16.msra.mxu1 %v2054_v5  ;;  %2350 = vmatprep.subr.bf16.mxu0 %v1783_v6  ;;  %v1656_v6 = vunpack.c.h.s8.bf16 %v1352_v1  ;;  %v1401_v1 = vld [vmem:[%s12126_s0 + $0x2c8] sm:$0xff] }
 0x538   : > { %2391 = vmatprep.subr.bf16.mxu1 %v2039_v7  ;;  %v1912_v7 = vunpack.c.h.s8.bf16 %v1480_v2  ;;  %v1529_v2 = vld [vmem:[%s12126_s0 + $0x6c8] sm:$0xff] }
 0x53a   : > { %2351 = vmatpush2.bf16.msra.mxu0 %v1782_v10  ;;  %v1641_v10 = vunpack.c.l.s8.bf16 %v1353_v52 }
 0x53b   : > { %2392 = vmatpush2.bf16.msra.mxu1 %v2038_v11  ;;  %2352 = vmatprep.subr.bf16.mxu0 %v1767_v12  ;;  %v1897_v11 = vunpack.c.l.s8.bf16 %v1481_v53  ;;  %v1337_v12 = vld [vmem:[%s12126_s0 + $0xc8] sm:$0xff] }
 0x53c   : > { %2393 = vmatprep.subr.bf16.mxu1 %v2023_v13  ;;  %v1465_v13 = vld [vmem:[%s12126_s0 + $0x4c8] sm:$0xff] }
 0x53e   : > { %2353 = vmatpush2.bf16.msra.mxu0 %v1766_v16  ;;  %v1625_v16 = vunpack.c.h.s8.bf16 %v1337_v12 }
 0x53f   : > { %2394 = vmatpush2.bf16.msra.mxu1 %v2022_v17  ;;  %2354 = vmatprep.subr.bf16.mxu0 %v1751_v18  ;;  %v1881_v17 = vunpack.c.h.s8.bf16 %v1465_v13  ;;  %v1336_v18 = vld [vmem:[%s12126_s0 + $0xc0] sm:$0xff] }
 0x540   : > { %2395 = vmatprep.subr.bf16.mxu1 %v2007_v19  ;;  %v1464_v19 = vld [vmem:[%s12126_s0 + $0x4c0] sm:$0xff]  ;;  %v1624_v20 = vunpack.c.h.s8.bf16 %v1336_v18  ;;  %v1608_v26 = vunpack.c.l.s8.bf16 %v1336_v18 }
 0x541   : > { %v1880_v21 = vunpack.c.h.s8.bf16 %v1464_v19  ;;  %v1864_v27 = vunpack.c.l.s8.bf16 %v1464_v19 }
 0x542   : > { %2355 = vmatpush2.bf16.msra.mxu0 %v1750_v22  ;;  %v1609_v22 = vunpack.c.l.s8.bf16 %v1337_v12  ;;  %v1737_v12 = vunpack.c.l.s8.bf16 %v1401_v1 }
 0x543   : > { %2396 = vmatpush2.bf16.msra.mxu1 %v2006_v23  ;;  %2356 = vmatprep.subr.bf16.mxu0 %v1735_v24  ;;  %v1865_v23 = vunpack.c.l.s8.bf16 %v1465_v13  ;;  %v1321_v24 = vld [vmem:[%s12126_s0 + $0x48] sm:$0xff]  ;;  %v1993_v13 = vunpack.c.l.s8.bf16 %v1529_v2 }
 0x544   : > { %2397 = vmatprep.subr.bf16.mxu1 %v1991_v25  ;;  %v1449_v25 = vld [vmem:[%s12126_s0 + $0x448] sm:$0xff] }
 0x546   : > { %2357 = vmatpush2.bf16.msra.mxu0 %v1734_v28  ;;  %v1593_v28 = vunpack.c.h.s8.bf16 %v1321_v24 }
 0x547   : > { %2398 = vmatpush2.bf16.msra.mxu1 %v1990_v29  ;;  %2358 = vmatprep.subr.bf16.mxu0 %v1719_v30  ;;  %v1849_v29 = vunpack.c.h.s8.bf16 %v1449_v25  ;;  %v1320_v30 = vld [vmem:[%s12126_s0 + $0x40] sm:$0xff] }
 0x548   : > { %2399 = vmatprep.subr.bf16.mxu1 %v1975_v31  ;;  %v1448_v31 = vld [vmem:[%s12126_s0 + $0x440] sm:$0xff]  ;;  %v1592_v32 = vunpack.c.h.s8.bf16 %v1320_v30  ;;  %v1576_v38 = vunpack.c.l.s8.bf16 %v1320_v30 }
 0x549   : > { %v1848_v33 = vunpack.c.h.s8.bf16 %v1448_v31  ;;  %v1832_v39 = vunpack.c.l.s8.bf16 %v1448_v31 }
 0x54a   : > { %2359 = vmatpush2.bf16.msra.mxu0 %v1718_v34  ;;  %v1577_v34 = vunpack.c.l.s8.bf16 %v1321_v24 }
 0x54b   : > { %2400 = vmatpush2.bf16.msra.mxu1 %v1974_v35  ;;  %2360 = vmatprep.subr.bf16.mxu0 %v1703_v36  ;;  %v1833_v35 = vunpack.c.l.s8.bf16 %v1449_v25  ;;  %v1433_v36 = vld [vmem:[%s12126_s0 + $0x3c8] sm:$0xff] }
 0x54c   : > { %2401 = vmatprep.subr.bf16.mxu1 %v1959_v37  ;;  %v1561_v37 = vld [vmem:[%s12126_s0 + $0x7c8] sm:$0xff] }
 0x54e   : > { %2361 = vmatpush2.bf16.msra.mxu0 %v1702_v40  ;;  %v1817_v40 = vunpack.c.h.s8.bf16 %v1433_v36 }
 0x54f   : > { %2402 = vmatpush2.bf16.msra.mxu1 %v1958_v41  ;;  %2412 = vmatprep.subr.bf16.mxu0 %v1689_v42  ;;  %v2073_v41 = vunpack.c.h.s8.bf16 %v1561_v37  ;;  %v1432_v42 = vld [vmem:[%s12126_s0 + $0x3c0] sm:$0xff] }
 0x550   : > { %2453 = vmatprep.subr.bf16.mxu1 %v1945_v43  ;;  %v1560_v43 = vld [vmem:[%s12126_s0 + $0x7c0] sm:$0xff]  ;;  %v1816_v44 = vunpack.c.h.s8.bf16 %v1432_v42  ;;  %v1800_v52 = vunpack.c.l.s8.bf16 %v1432_v42 }
 0x551   : > { %v2118_v54 = vpop.f32.mrf.mxu0  ;;  %2363 = vmatmul.mubr.bf16.vlgmr.msra.gmra.mxu0 %v12246_v60  ;;  %v2072_v45 = vunpack.c.h.s8.bf16 %v1560_v43  ;;  %v2056_v53 = vunpack.c.l.s8.bf16 %v1560_v43 }
 0x552   : > { %v2159_v55 = vpop.f32.mrf.mxu1  ;;  %2404 = vmatmul.mubr.bf16.vlgmr.msra.gmra.mxu1 %v12248_v61  ;;  %2413 = vmatpush1.bf16.msra.mxu0 %v1688_v46  ;;  %v1801_v46 = vunpack.c.l.s8.bf16 %v1433_v36 }
 0x553   : > { %v12362_v56 = vadd.f32 %v2159_v55, %v2118_v54  ;;  %2454 = vmatpush1.bf16.msra.mxu1 %v1944_v47  ;;  %v2120_v59 = vpop.f32.mrf.mxu0  ;;  %2414 = vmatprep.subr.bf16.mxu0 %v1673_v48  ;;  %v2057_v47 = vunpack.c.l.s8.bf16 %v1561_v37  ;;  %v1417_v48 = vld [vmem:[%s12126_s0 + $0x348] sm:$0xff] }
 0x554   : > { %v2161_v62 = vpop.f32.mrf.mxu1  ;;  %2455 = vmatprep.subr.bf16.mxu1 %v1929_v49  ;;  %2444 = vmatprep.mubr.bf16.mxu0 %v12216_v50  ;;  %v1545_v49 = vld [vmem:[%s12126_s0 + $0x748] sm:$0xff]  ;;  %v1785_v54 = vunpack.c.h.s8.bf16 %v1417_v48 }
 0x555   : > { %v12366_v3 = vadd.f32 %v2161_v62, %v2120_v59  ;;  %2485 = vmatprep.mubr.bf16.mxu1 %v12218_v51  ;;  %v2122_v4 = vpop.f32.mrf.mxu0  ;;  %v2041_v55 = vunpack.c.h.s8.bf16 %v1545_v49 }
 0x556   : > { %v2163_v5 = vpop.f32.mrf.mxu1  ;;  %2415 = vmatpush1.bf16.msra.mxu0 %v1672_v57  ;;  %v1416_v57 = vld [vmem:[%s12126_s0 + $0x340] sm:$0xff] }
 0x557   : > { %2456 = vmatpush1.bf16.msra.mxu1 %v1928_v58  ;;  %v2123_v8 = vpop.f32.mrf.mxu0  ;;  %2416 = vmatprep.subr.bf16.mxu0 %v1657_v63  ;;  %v1544_v58 = vld [vmem:[%s12126_s0 + $0x740] sm:$0xff]  ;;  %v1784_v59 = vunpack.c.h.s8.bf16 %v1416_v57  ;;  %v1769_v63 = vunpack.c.l.s8.bf16 %v1417_v48  ;;  %v1768_v4 = vunpack.c.l.s8.bf16 %v1416_v57 }
 0x558   : > { %v2164_v9 = vpop.f32.mrf.mxu1  ;;  %2457 = vmatprep.subr.bf16.mxu1 %v1913_v0  ;;  %v2040_v62 = vunpack.c.h.s8.bf16 %v1544_v58  ;;  %v2025_v0 = vunpack.c.l.s8.bf16 %v1545_v49  ;;  %v2024_v5 = vunpack.c.l.s8.bf16 %v1544_v58  ;;  %v1400_v8 = vld [vmem:[%s12126_s0 + $0x2c0] sm:$0xff]  ;;  %v1354_v49 = vld [vmem:[%s12126_s0 + $0x150] sm:$0xff] }
 0x559   : > { %v1528_v9 = vld [vmem:[%s12126_s0 + $0x6c0] sm:$0xff]  ;;  %v1658_v57 = vunpack.c.h.s8.bf16 %v1354_v49 }
 0x55a   : > { %2417 = vmatpush1.bf16.msra.mxu0 %v1656_v6  ;;  %v1753_v6 = vunpack.c.h.s8.bf16 %v1401_v1  ;;  %v1339_v1 = vld [vmem:[%s12126_s0 + $0xd8] sm:$0xff] }
 0x55b   : > { %2458 = vmatpush1.bf16.msra.mxu1 %v1912_v7  ;;  %2418 = vmatprep.subr.bf16.mxu0 %v1641_v10  ;;  %v2009_v7 = vunpack.c.h.s8.bf16 %v1529_v2  ;;  %v1752_v10 = vunpack.c.h.s8.bf16 %v1400_v8  ;;  %v1467_v2 = vld [vmem:[%s12126_s0 + $0x4d8] sm:$0xff] }
 0x55c   : > { %2459 = vmatprep.subr.bf16.mxu1 %v1897_v11  ;;  %v2008_v11 = vunpack.c.h.s8.bf16 %v1528_v9 }
 0x55e   : > { %2419 = vmatpush1.bf16.msra.mxu0 %v1640_v14  ;;  %v1385_v14 = vld [vmem:[%s12126_s0 + $0x248] sm:$0xff] }
 0x55f   : > { %2460 = vmatpush1.bf16.msra.mxu1 %v1896_v15  ;;  %2420 = vmatprep.subr.bf16.mxu0 %v1625_v16  ;;  %v1513_v15 = vld [vmem:[%s12126_s0 + $0x648] sm:$0xff]  ;;  %v1736_v16 = vunpack.c.l.s8.bf16 %v1400_v8  ;;  %v1721_v18 = vunpack.c.h.s8.bf16 %v1385_v14  ;;  %v1705_v24 = vunpack.c.l.s8.bf16 %v1385_v14  ;;  %v1338_v8 = vld [vmem:[%s12126_s0 + $0xd0] sm:$0xff]  ;;  %v1323_v14 = vld [vmem:[%s12126_s0 + $0x58] sm:$0xff] }
 0x560   : > { %2461 = vmatprep.subr.bf16.mxu1 %v1881_v17  ;;  %v1992_v17 = vunpack.c.l.s8.bf16 %v1528_v9  ;;  %v1977_v19 = vunpack.c.h.s8.bf16 %v1513_v15  ;;  %v1961_v25 = vunpack.c.l.s8.bf16 %v1513_v15  ;;  %v1466_v9 = vld [vmem:[%s12126_s0 + $0x4d0] sm:$0xff]  ;;  %v1451_v15 = vld [vmem:[%s12126_s0 + $0x458] sm:$0xff] }
 0x562   : > { %2421 = vmatpush1.bf16.msra.mxu0 %v1624_v20  ;;  %v1384_v20 = vld [vmem:[%s12126_s0 + $0x240] sm:$0xff] }
 0x563   : > { %2462 = vmatpush1.bf16.msra.mxu1 %v1880_v21  ;;  %2422 = vmatprep.subr.bf16.mxu0 %v1609_v22  ;;  %v1512_v21 = vld [vmem:[%s12126_s0 + $0x640] sm:$0xff]  ;;  %v1720_v22 = vunpack.c.h.s8.bf16 %v1384_v20 }
 0x564   : > { %2463 = vmatprep.subr.bf16.mxu1 %v1865_v23  ;;  %v1976_v23 = vunpack.c.h.s8.bf16 %v1512_v21 }
 0x566   : > { %2423 = vmatpush1.bf16.msra.mxu0 %v1608_v26  ;;  %v1371_v26 = vld [vmem:[%s12126_s0 + $0x1d8] sm:$0xff] }
 0x567   : > { %2464 = vmatpush1.bf16.msra.mxu1 %v1864_v27  ;;  %2424 = vmatprep.subr.bf16.mxu0 %v1593_v28  ;;  %v1499_v27 = vld [vmem:[%s12126_s0 + $0x5d8] sm:$0xff]  ;;  %v1704_v28 = vunpack.c.l.s8.bf16 %v1384_v20  ;;  %v1691_v30 = vunpack.c.h.s8.bf16 %v1371_v26  ;;  %v1675_v36 = vunpack.c.l.s8.bf16 %v1371_v26  ;;  %v1322_v20 = vld [vmem:[%s12126_s0 + $0x50] sm:$0xff] }
 0x568   : > { %2465 = vmatprep.subr.bf16.mxu1 %v1849_v29  ;;  %v1960_v29 = vunpack.c.l.s8.bf16 %v1512_v21  ;;  %v1947_v31 = vunpack.c.h.s8.bf16 %v1499_v27  ;;  %v1931_v37 = vunpack.c.l.s8.bf16 %v1499_v27  ;;  %v1450_v21 = vld [vmem:[%s12126_s0 + $0x450] sm:$0xff]  ;;  %v1435_v26 = vld [vmem:[%s12126_s0 + $0x3d8] sm:$0xff] }
 0x569   : > { %v1563_v27 = vld [vmem:[%s12126_s0 + $0x7d8] sm:$0xff] }
 0x56a   : > { %2425 = vmatpush1.bf16.msra.mxu0 %v1592_v32  ;;  %v1370_v32 = vld [vmem:[%s12126_s0 + $0x1d0] sm:$0xff] }
 0x56b   : > { %2466 = vmatpush1.bf16.msra.mxu1 %v1848_v33  ;;  %2426 = vmatprep.subr.bf16.mxu0 %v1577_v34  ;;  %v1498_v33 = vld [vmem:[%s12126_s0 + $0x5d0] sm:$0xff]  ;;  %v1690_v34 = vunpack.c.h.s8.bf16 %v1370_v32  ;;  %v1674_v43 = vunpack.c.l.s8.bf16 %v1370_v32 }
 0x56c   : > { %2467 = vmatprep.subr.bf16.mxu1 %v1833_v35  ;;  %v1946_v35 = vunpack.c.h.s8.bf16 %v1498_v33  ;;  %v1434_v32 = vld [vmem:[%s12126_s0 + $0x3d0] sm:$0xff] }
 0x56e   : > { %2427 = vmatpush1.bf16.msra.mxu0 %v1576_v38  ;;  %v1355_v38 = vld [vmem:[%s12126_s0 + $0x158] sm:$0xff] }
 0x56f   : > { %2468 = vmatpush1.bf16.msra.mxu1 %v1832_v39  ;;  %2428 = vmatprep.subr.bf16.mxu0 %v1817_v40  ;;  %v1483_v39 = vld [vmem:[%s12126_s0 + $0x558] sm:$0xff] }
 0x570   : > { %2469 = vmatprep.subr.bf16.mxu1 %v2073_v41  ;;  %v1915_v48 = vunpack.c.h.s8.bf16 %v1483_v39 }
 0x572   : > { %2429 = vmatpush2.bf16.msra.mxu0 %v1816_v44  ;;  %v1930_v44 = vunpack.c.l.s8.bf16 %v1498_v33  ;;  %v1562_v33 = vld [vmem:[%s12126_s0 + $0x7d0] sm:$0xff] }
 0x573   : > { %2470 = vmatpush2.bf16.msra.mxu1 %v2072_v45  ;;  %2430 = vmatprep.subr.bf16.mxu0 %v1801_v46 }
 0x574   : > { %2471 = vmatprep.subr.bf16.mxu1 %v2057_v47  ;;  %v1659_v47 = vunpack.c.h.s8.bf16 %v1355_v38 }
 0x576   : > { %2431 = vmatpush2.bf16.msra.mxu0 %v1800_v52  ;;  %v1482_v52 = vld [vmem:[%s12126_s0 + $0x550] sm:$0xff] }
 0x577   : > { %2472 = vmatpush2.bf16.msra.mxu1 %v2056_v53  ;;  %2432 = vmatprep.subr.bf16.mxu0 %v1785_v54  ;;  %v1914_v58 = vunpack.c.h.s8.bf16 %v1482_v52 }
 0x578   : > { %2473 = vmatprep.subr.bf16.mxu1 %v2041_v55 }
 0x57a   : > { %2433 = vmatpush2.bf16.msra.mxu0 %v1784_v59 }
 0x57b   : > { %2474 = vmatpush2.bf16.msra.mxu1 %v2040_v62  ;;  %2434 = vmatprep.subr.bf16.mxu0 %v1769_v63  ;;  %v1643_v63 = vunpack.c.l.s8.bf16 %v1355_v38  ;;  %v1419_v38 = vld [vmem:[%s12126_s0 + $0x358] sm:$0xff] }
 0x57c   : > { %2475 = vmatprep.subr.bf16.mxu1 %v2025_v0  ;;  %v1899_v0 = vunpack.c.l.s8.bf16 %v1483_v39  ;;  %v1547_v39 = vld [vmem:[%s12126_s0 + $0x758] sm:$0xff] }
 0x57e   : > { %2435 = vmatpush2.bf16.msra.mxu0 %v1768_v4  ;;  %v1642_v4 = vunpack.c.l.s8.bf16 %v1354_v49  ;;  %v1771_v49 = vunpack.c.l.s8.bf16 %v1419_v38 }
 0x57f   : > { %2476 = vmatpush2.bf16.msra.mxu1 %v2024_v5  ;;  %2436 = vmatprep.subr.bf16.mxu0 %v1753_v6  ;;  %v1898_v5 = vunpack.c.l.s8.bf16 %v1482_v52  ;;  %v1627_v6 = vunpack.c.h.s8.bf16 %v1339_v1  ;;  %v2027_v52 = vunpack.c.l.s8.bf16 %v1547_v39 }
 0x580   : > { %2477 = vmatprep.subr.bf16.mxu1 %v2009_v7  ;;  %v1883_v7 = vunpack.c.h.s8.bf16 %v1467_v2 }
 0x582   : > { %2437 = vmatpush2.bf16.msra.mxu0 %v1752_v10  ;;  %v1626_v10 = vunpack.c.h.s8.bf16 %v1338_v8 }
 0x583   : > { %2478 = vmatpush2.bf16.msra.mxu1 %v2008_v11  ;;  %2438 = vmatprep.subr.bf16.mxu0 %v1737_v12  ;;  %v1882_v11 = vunpack.c.h.s8.bf16 %v1466_v9  ;;  %v1611_v12 = vunpack.c.l.s8.bf16 %v1339_v1 }
 0x584   : > { %2479 = vmatprep.subr.bf16.mxu1 %v1993_v13  ;;  %v1867_v13 = vunpack.c.l.s8.bf16 %v1467_v2 }
 0x586   : > { %2439 = vmatpush2.bf16.msra.mxu0 %v1736_v16  ;;  %v1610_v16 = vunpack.c.l.s8.bf16 %v1338_v8 }
 0x587   : > { %2480 = vmatpush2.bf16.msra.mxu1 %v1992_v17  ;;  %2440 = vmatprep.subr.bf16.mxu0 %v1721_v18  ;;  %v1866_v17 = vunpack.c.l.s8.bf16 %v1466_v9  ;;  %v1595_v18 = vunpack.c.h.s8.bf16 %v1323_v14 }
 0x588   : > { %2481 = vmatprep.subr.bf16.mxu1 %v1977_v19  ;;  %v1851_v19 = vunpack.c.h.s8.bf16 %v1451_v15 }
 0x58a   : > { %2441 = vmatpush2.bf16.msra.mxu0 %v1720_v22  ;;  %v1594_v22 = vunpack.c.h.s8.bf16 %v1322_v20 }
 0x58b   : > { %2482 = vmatpush2.bf16.msra.mxu1 %v1976_v23  ;;  %2442 = vmatprep.subr.bf16.mxu0 %v1705_v24  ;;  %v1850_v23 = vunpack.c.h.s8.bf16 %v1450_v21  ;;  %v1579_v24 = vunpack.c.l.s8.bf16 %v1323_v14 }
 0x58c   : > { %2483 = vmatprep.subr.bf16.mxu1 %v1961_v25  ;;  %v1835_v25 = vunpack.c.l.s8.bf16 %v1451_v15 }
 0x58e   : > { %2443 = vmatpush2.bf16.msra.mxu0 %v1704_v28  ;;  %v1578_v28 = vunpack.c.l.s8.bf16 %v1322_v20 }
 0x58f   : > { %2484 = vmatpush2.bf16.msra.mxu1 %v1960_v29  ;;  %2494 = vmatprep.subr.bf16.mxu0 %v1691_v30  ;;  %v1834_v29 = vunpack.c.l.s8.bf16 %v1450_v21  ;;  %v1819_v30 = vunpack.c.h.s8.bf16 %v1435_v26 }
 0x590   : > { %2535 = vmatprep.subr.bf16.mxu1 %v1947_v31  ;;  %v2075_v31 = vunpack.c.h.s8.bf16 %v1563_v27 }
 0x591   : > { %v2200_v40 = vpop.f32.mrf.mxu0  ;;  %2445 = vmatmul.mubr.bf16.vlgmr.msra.gmra.mxu0 %v12246_v60 }
 0x592   : > { %v2241_v41 = vpop.f32.mrf.mxu1  ;;  %2486 = vmatmul.mubr.bf16.vlgmr.msra.gmra.mxu1 %v12248_v61  ;;  %2495 = vmatpush1.bf16.msra.mxu0 %v1690_v34  ;;  %v1818_v34 = vunpack.c.h.s8.bf16 %v1434_v32 }
 0x593   : > { %v12402_v42 = vadd.f32 %v2241_v41, %v2200_v40  ;;  %2536 = vmatpush1.bf16.msra.mxu1 %v1946_v35  ;;  %v2202_v45 = vpop.f32.mrf.mxu0  ;;  %2496 = vmatprep.subr.bf16.mxu0 %v1675_v36  ;;  %v2074_v35 = vunpack.c.h.s8.bf16 %v1562_v33  ;;  %v1803_v36 = vunpack.c.l.s8.bf16 %v1435_v26  ;;  %v1802_v40 = vunpack.c.l.s8.bf16 %v1434_v32 }
 0x594   : > { %v2243_v46 = vpop.f32.mrf.mxu1  ;;  %2537 = vmatprep.subr.bf16.mxu1 %v1931_v37  ;;  %2526 = vmatprep.mubr.bf16.mxu0 %v12216_v50  ;;  %v2059_v37 = vunpack.c.l.s8.bf16 %v1563_v27  ;;  %v2058_v41 = vunpack.c.l.s8.bf16 %v1562_v33 }
 0x595   : > { %v12406_v53 = vadd.f32 %v2243_v46, %v2202_v45  ;;  %2567 = vmatprep.mubr.bf16.mxu1 %v12218_v51  ;;  %v2204_v54 = vpop.f32.mrf.mxu0  ;;  %v1418_v45 = vld [vmem:[%s12126_s0 + $0x350] sm:$0xff] }
 0x596   : > { %v2245_v55 = vpop.f32.mrf.mxu1  ;;  %2497 = vmatpush1.bf16.msra.mxu0 %v1674_v43  ;;  %v1787_v43 = vunpack.c.h.s8.bf16 %v1419_v38  ;;  %v1546_v46 = vld [vmem:[%s12126_s0 + $0x750] sm:$0xff]  ;;  %v1403_v54 = vld [vmem:[%s12126_s0 + $0x2d8] sm:$0xff] }
 0x597   : > { %2538 = vmatpush1.bf16.msra.mxu1 %v1930_v44  ;;  %v2205_v59 = vpop.f32.mrf.mxu0  ;;  %2498 = vmatprep.subr.bf16.mxu0 %v1659_v47  ;;  %v2043_v44 = vunpack.c.h.s8.bf16 %v1547_v39  ;;  %v1786_v47 = vunpack.c.h.s8.bf16 %v1418_v45  ;;  %v1531_v55 = vld [vmem:[%s12126_s0 + $0x6d8] sm:$0xff] }
 0x598   : > { %v2246_v62 = vpop.f32.mrf.mxu1  ;;  %2539 = vmatprep.subr.bf16.mxu1 %v1915_v48  ;;  %v2042_v48 = vunpack.c.h.s8.bf16 %v1546_v46  ;;  %v1755_v59 = vunpack.c.h.s8.bf16 %v1403_v54 }
 0x599   : > { %v2011_v62 = vunpack.c.h.s8.bf16 %v1531_v55 }
 0x59a   : > { %2499 = vmatpush1.bf16.msra.mxu0 %v1658_v57  ;;  %v1770_v57 = vunpack.c.l.s8.bf16 %v1418_v45 }
 0x59b   : > { %2540 = vmatpush1.bf16.msra.mxu1 %v1914_v58  ;;  %2500 = vmatprep.subr.bf16.mxu0 %v1643_v63  ;;  %v2026_v58 = vunpack.c.l.s8.bf16 %v1546_v46  ;;  %v1402_v63 = vld [vmem:[%s12126_s0 + $0x2d0] sm:$0xff] }
 0x59c   : > { %2541 = vmatprep.subr.bf16.mxu1 %v1899_v0  ;;  %v1530_v0 = vld [vmem:[%s12126_s0 + $0x6d0] sm:$0xff]  ;;  %v1754_v1 = vunpack.c.h.s8.bf16 %v1402_v63  ;;  %v1738_v8 = vunpack.c.l.s8.bf16 %v1402_v63 }
 0x59d   : > { %v2010_v2 = vunpack.c.h.s8.bf16 %v1530_v0  ;;  %v1994_v9 = vunpack.c.l.s8.bf16 %v1530_v0 }
 0x59e   : > { %2501 = vmatpush1.bf16.msra.mxu0 %v1642_v4  ;;  %v1739_v4 = vunpack.c.l.s8.bf16 %v1403_v54 }
 0x59f   : > { %2542 = vmatpush1.bf16.msra.mxu1 %v1898_v5  ;;  %2502 = vmatprep.subr.bf16.mxu0 %v1627_v6  ;;  %v1995_v5 = vunpack.c.l.s8.bf16 %v1531_v55  ;;  %v1387_v6 = vld [vmem:[%s12126_s0 + $0x258] sm:$0xff] }
 0x5a0   : > { %2543 = vmatprep.subr.bf16.mxu1 %v1883_v7  ;;  %v1515_v7 = vld [vmem:[%s12126_s0 + $0x658] sm:$0xff] }
 0x5a2   : > { %2503 = vmatpush1.bf16.msra.mxu0 %v1626_v10  ;;  %v1723_v10 = vunpack.c.h.s8.bf16 %v1387_v6 }
 0x5a3   : > { %2544 = vmatpush1.bf16.msra.mxu1 %v1882_v11  ;;  %2504 = vmatprep.subr.bf16.mxu0 %v1611_v12  ;;  %v1979_v11 = vunpack.c.h.s8.bf16 %v1515_v7  ;;  %v1386_v12 = vld [vmem:[%s12126_s0 + $0x250] sm:$0xff] }
 0x5a4   : > { %2545 = vmatprep.subr.bf16.mxu1 %v1867_v13  ;;  %v1514_v13 = vld [vmem:[%s12126_s0 + $0x650] sm:$0xff]  ;;  %v1722_v14 = vunpack.c.h.s8.bf16 %v1386_v12  ;;  %v1706_v20 = vunpack.c.l.s8.bf16 %v1386_v12 }
 0x5a5   : > { %v1978_v15 = vunpack.c.h.s8.bf16 %v1514_v13  ;;  %v1962_v21 = vunpack.c.l.s8.bf16 %v1514_v13 }
 0x5a6   : > { %2505 = vmatpush1.bf16.msra.mxu0 %v1610_v16  ;;  %v1707_v16 = vunpack.c.l.s8.bf16 %v1387_v6 }
 0x5a7   : > { %2546 = vmatpush1.bf16.msra.mxu1 %v1866_v17  ;;  %2506 = vmatprep.subr.bf16.mxu0 %v1595_v18  ;;  %v1963_v17 = vunpack.c.l.s8.bf16 %v1515_v7  ;;  %v1373_v18 = vld [vmem:[%s12126_s0 + $0x1e8] sm:$0xff] }
 0x5a8   : > { %2547 = vmatprep.subr.bf16.mxu1 %v1851_v19  ;;  %v1501_v19 = vld [vmem:[%s12126_s0 + $0x5e8] sm:$0xff] }
 0x5aa   : > { %2507 = vmatpush1.bf16.msra.mxu0 %v1594_v22  ;;  %v1693_v22 = vunpack.c.h.s8.bf16 %v1373_v18 }
 0x5ab   : > { %2548 = vmatpush1.bf16.msra.mxu1 %v1850_v23  ;;  %2508 = vmatprep.subr.bf16.mxu0 %v1579_v24  ;;  %v1949_v23 = vunpack.c.h.s8.bf16 %v1501_v19  ;;  %v1372_v24 = vld [vmem:[%s12126_s0 + $0x1e0] sm:$0xff] }
 0x5ac   : > { %2549 = vmatprep.subr.bf16.mxu1 %v1835_v25  ;;  %v1500_v25 = vld [vmem:[%s12126_s0 + $0x5e0] sm:$0xff]  ;;  %v1692_v26 = vunpack.c.h.s8.bf16 %v1372_v24 }
 0x5ad   : > { %v1948_v27 = vunpack.c.h.s8.bf16 %v1500_v25 }
 0x5ae   : > { %2509 = vmatpush1.bf16.msra.mxu0 %v1578_v28  ;;  %v1677_v28 = vunpack.c.l.s8.bf16 %v1373_v18 }
 0x5af   : > { %2550 = vmatpush1.bf16.msra.mxu1 %v1834_v29  ;;  %2510 = vmatprep.subr.bf16.mxu0 %v1819_v30  ;;  %v1933_v29 = vunpack.c.l.s8.bf16 %v1501_v19  ;;  %v1357_v30 = vld [vmem:[%s12126_s0 + $0x168] sm:$0xff] }
 0x5b0   : > { %2551 = vmatprep.subr.bf16.mxu1 %v2075_v31  ;;  %v1485_v31 = vld [vmem:[%s12126_s0 + $0x568] sm:$0xff]  ;;  %v1661_v39 = vunpack.c.h.s8.bf16 %v1357_v30  ;;  %v1645_v54 = vunpack.c.l.s8.bf16 %v1357_v30  ;;  %v14839_v30 = vlaneseq }
 0x5b1   : > { %v1901_v55 = vunpack.c.l.s8.bf16 %v1485_v31 }
 0x5b2   : > { %2511 = vmatpush2.bf16.msra.mxu0 %v1818_v34 }
 0x5b3   : > { %2552 = vmatpush2.bf16.msra.mxu1 %v2074_v35  ;;  %2512 = vmatprep.subr.bf16.mxu0 %v1803_v36  ;;  %v1676_v35 = vunpack.c.l.s8.bf16 %v1372_v24  ;;  %v1932_v36 = vunpack.c.l.s8.bf16 %v1500_v25 }
 0x5b4   : > { %2553 = vmatprep.subr.bf16.mxu1 %v2059_v37 }
 0x5b6   : > { %2513 = vmatpush2.bf16.msra.mxu0 %v1802_v40  ;;  %v1917_v40 = vunpack.c.h.s8.bf16 %v1485_v31 }
 0x5b7   : > { %2554 = vmatpush2.bf16.msra.mxu1 %v2058_v41  ;;  %2514 = vmatprep.subr.bf16.mxu0 %v1787_v43  ;;  %v1356_v41 = vld [vmem:[%s12126_s0 + $0x160] sm:$0xff] }
 0x5b8   : > { %2555 = vmatprep.subr.bf16.mxu1 %v2043_v44  ;;  %v1484_v43 = vld [vmem:[%s12126_s0 + $0x560] sm:$0xff] }
 0x5ba   : > { %2515 = vmatpush2.bf16.msra.mxu0 %v1786_v47  ;;  %v1660_v47 = vunpack.c.h.s8.bf16 %v1356_v41 }
 0x5bb   : > { %2556 = vmatpush2.bf16.msra.mxu1 %v2042_v48  ;;  %2516 = vmatprep.subr.bf16.mxu0 %v1771_v49  ;;  %v1916_v48 = vunpack.c.h.s8.bf16 %v1484_v43 }
 0x5bc   : > { %2557 = vmatprep.subr.bf16.mxu1 %v2027_v52 }
 0x5be   : > { %2517 = vmatpush2.bf16.msra.mxu0 %v1770_v57  ;;  %v1341_v57 = vld [vmem:[%s12126_s0 + $0xe8] sm:$0xff] }
 0x5bf   : > { %2558 = vmatpush2.bf16.msra.mxu1 %v2026_v58  ;;  %2518 = vmatprep.subr.bf16.mxu0 %v1755_v59  ;;  %v1469_v58 = vld [vmem:[%s12126_s0 + $0x4e8] sm:$0xff]  ;;  %v1644_v59 = vunpack.c.l.s8.bf16 %v1356_v41  ;;  %v1629_v63 = vunpack.c.h.s8.bf16 %v1341_v57  ;;  %v1613_v6 = vunpack.c.l.s8.bf16 %v1341_v57  ;;  %v1420_v41 = vld [vmem:[%s12126_s0 + $0x360] sm:$0xff] }
 0x5c0   : > { %2559 = vmatprep.subr.bf16.mxu1 %v2011_v62  ;;  %v1900_v62 = vunpack.c.l.s8.bf16 %v1484_v43  ;;  %v1885_v0 = vunpack.c.h.s8.bf16 %v1469_v58  ;;  %v1869_v7 = vunpack.c.l.s8.bf16 %v1469_v58  ;;  %v1548_v43 = vld [vmem:[%s12126_s0 + $0x760] sm:$0xff]  ;;  %v1533_v57 = vld [vmem:[%s12126_s0 + $0x6e8] sm:$0xff] }
 0x5c2   : > { %2519 = vmatpush2.bf16.msra.mxu0 %v1754_v1  ;;  %v1340_v1 = vld [vmem:[%s12126_s0 + $0xe0] sm:$0xff] }
 0x5c3   : > { %2560 = vmatpush2.bf16.msra.mxu1 %v2010_v2  ;;  %2520 = vmatprep.subr.bf16.mxu0 %v1739_v4  ;;  %v1468_v2 = vld [vmem:[%s12126_s0 + $0x4e0] sm:$0xff]  ;;  %v1628_v4 = vunpack.c.h.s8.bf16 %v1340_v1 }
 0x5c4   : > { %2561 = vmatprep.subr.bf16.mxu1 %v1995_v5  ;;  %v1884_v5 = vunpack.c.h.s8.bf16 %v1468_v2 }
 0x5c6   : > { %2521 = vmatpush2.bf16.msra.mxu0 %v1738_v8  ;;  %v1325_v8 = vld [vmem:[%s12126_s0 + $0x68] sm:$0xff] }
 0x5c7   : > { %2562 = vmatpush2.bf16.msra.mxu1 %v1994_v9  ;;  %2522 = vmatprep.subr.bf16.mxu0 %v1723_v10  ;;  %v1453_v9 = vld [vmem:[%s12126_s0 + $0x468] sm:$0xff]  ;;  %v1612_v10 = vunpack.c.l.s8.bf16 %v1340_v1  ;;  %v1597_v12 = vunpack.c.h.s8.bf16 %v1325_v8  ;;  %v1581_v18 = vunpack.c.l.s8.bf16 %v1325_v8 }
 0x5c8   : > { %2563 = vmatprep.subr.bf16.mxu1 %v1979_v11  ;;  %v1868_v11 = vunpack.c.l.s8.bf16 %v1468_v2  ;;  %v1853_v13 = vunpack.c.h.s8.bf16 %v1453_v9  ;;  %v1837_v19 = vunpack.c.l.s8.bf16 %v1453_v9  ;;  %v2013_v2 = vunpack.c.h.s8.bf16 %v1533_v57 }
 0x5ca   : > { %2523 = vmatpush2.bf16.msra.mxu0 %v1722_v14  ;;  %v1324_v14 = vld [vmem:[%s12126_s0 + $0x60] sm:$0xff] }
 0x5cb   : > { %2564 = vmatpush2.bf16.msra.mxu1 %v1978_v15  ;;  %2524 = vmatprep.subr.bf16.mxu0 %v1707_v16  ;;  %v1452_v15 = vld [vmem:[%s12126_s0 + $0x460] sm:$0xff]  ;;  %v1596_v16 = vunpack.c.h.s8.bf16 %v1324_v14 }
 0x5cc   : > { %2565 = vmatprep.subr.bf16.mxu1 %v1963_v17  ;;  %v1852_v17 = vunpack.c.h.s8.bf16 %v1452_v15 }
 0x5ce   : > { %2525 = vmatpush2.bf16.msra.mxu0 %v1706_v20  ;;  %v1437_v20 = vld [vmem:[%s12126_s0 + $0x3e8] sm:$0xff] }
 0x5cf   : > { %2566 = vmatpush2.bf16.msra.mxu1 %v1962_v21  ;;  %2576 = vmatprep.subr.bf16.mxu0 %v1693_v22  ;;  %v1565_v21 = vld [vmem:[%s12126_s0 + $0x7e8] sm:$0xff]  ;;  %v1580_v22 = vunpack.c.l.s8.bf16 %v1324_v14  ;;  %v1821_v24 = vunpack.c.h.s8.bf16 %v1437_v20  ;;  %v1805_v31 = vunpack.c.l.s8.bf16 %v1437_v20  ;;  %v1997_v20 = vunpack.c.l.s8.bf16 %v1533_v57 }
 0x5d0   : > { %2617 = vmatprep.subr.bf16.mxu1 %v1949_v23  ;;  %v1836_v23 = vunpack.c.l.s8.bf16 %v1452_v15  ;;  %v2077_v25 = vunpack.c.h.s8.bf16 %v1565_v21 }
 0x5d1   : > { %v2282_v32 = vpop.f32.mrf.mxu0  ;;  %2527 = vmatmul.mubr.bf16.vlgmr.msra.gmra.mxu0 %v12246_v60 }
 0x5d2   : > { %v2323_v33 = vpop.f32.mrf.mxu1  ;;  %2568 = vmatmul.mubr.bf16.vlgmr.msra.gmra.mxu1 %v12248_v61  ;;  %2577 = vmatpush1.bf16.msra.mxu0 %v1692_v26  ;;  %v1436_v26 = vld [vmem:[%s12126_s0 + $0x3e0] sm:$0xff] }
 0x5d3   : > { %v12442_v34 = vadd.f32 %v2323_v33, %v2282_v32  ;;  %2618 = vmatpush1.bf16.msra.mxu1 %v1948_v27  ;;  %v2284_v37 = vpop.f32.mrf.mxu0  ;;  %2578 = vmatprep.subr.bf16.mxu0 %v1677_v28  ;;  %v1564_v27 = vld [vmem:[%s12126_s0 + $0x7e0] sm:$0xff]  ;;  %v1820_v28 = vunpack.c.h.s8.bf16 %v1436_v26  ;;  %v2061_v32 = vunpack.c.l.s8.bf16 %v1565_v21  ;;  %v1421_v33 = vld [vmem:[%s12126_s0 + $0x368] sm:$0xff] }
 0x5d4   : > { %v2325_v38 = vpop.f32.mrf.mxu1  ;;  %2619 = vmatprep.subr.bf16.mxu1 %v1933_v29  ;;  %2608 = vmatprep.mubr.bf16.mxu0 %v12216_v50  ;;  %v2076_v29 = vunpack.c.h.s8.bf16 %v1564_v27 }
 0x5d5   : > { %v12446_v44 = vadd.f32 %v2325_v38, %v2284_v37  ;;  %2649 = vmatprep.mubr.bf16.mxu1 %v12218_v51  ;;  %v2286_v45 = vpop.f32.mrf.mxu0  ;;  %v2060_v37 = vunpack.c.l.s8.bf16 %v1564_v27  ;;  %v12465_v38 = vshrl.u32 %v14839_v30, 7 }
 0x5d6   : > { %v2327_v46 = vpop.f32.mrf.mxu1  ;;  %2579 = vmatpush1.bf16.msra.mxu0 %v1676_v35  ;;  %v1549_v35 = vld [vmem:[%s12126_s0 + $0x768] sm:$0xff]  ;;  %v1788_v45 = vunpack.c.h.s8.bf16 %v1420_v41 }
 0x5d7   : > { %2620 = vmatpush1.bf16.msra.mxu1 %v1932_v36  ;;  %v2287_v49 = vpop.f32.mrf.mxu0  ;;  %2580 = vmatprep.subr.bf16.mxu0 %v1661_v39  ;;  %v1804_v36 = vunpack.c.l.s8.bf16 %v1436_v26  ;;  %15024 = vst [vmem:[#allocation44_spill] sm:$0xff] %v12465_v38  ;;  %v1789_v39 = vunpack.c.h.s8.bf16 %v1421_v33  ;;  %v2044_v46 = vunpack.c.h.s8.bf16 %v1548_v43  ;;  %v12481_v58 = vsub.s32 0, %v12465_v38  ;;  %v1517_v26 = vld [vmem:[%s12126_s0 + $0x668] sm:$0xff] }
 0x5d8   : > { %v2328_v52 = vpop.f32.mrf.mxu1  ;;  %2621 = vmatprep.subr.bf16.mxu1 %v1917_v40  ;;  %v2045_v40 = vunpack.c.h.s8.bf16 %v1549_v35  ;;  %v2029_v49 = vunpack.c.l.s8.bf16 %v1549_v35  ;;  %v12496_v8 = vsub.s32 4, %v12465_v38  ;;  %v12499_v9 = vsub.s32 7, %v12465_v38 }
 0x5d9   : > { %v12473_v52 = vsub.s32 1, %v12465_v38  ;;  %15027 = vst [vmem:[#allocation47_spill] sm:$0xff] %v12481_v58  ;;  %vm2938_vm1 = vcmp.ge.s32.totalorder %v12465_v38, 3  ;;  %vm3043_vm2 = vcmp.ge.s32.totalorder %v12465_v38, 2  ;;  %vm3148_vm3 = vcmp.ge.s32.totalorder %v12465_v38, 1 }
 0x5da   : > { %2581 = vmatpush1.bf16.msra.mxu0 %v1660_v47  ;;  %v12470_v47 = vsub.s32 3, %v12465_v38  ;;  %15029 = vst [vmem:[#allocation49_spill] sm:$0xff] %v12496_v8  ;;  %15030 = vst [vmem:[#allocation50_spill] sm:$0xff] %v12499_v9 }
 0x5db   : > { %2622 = vmatpush1.bf16.msra.mxu1 %v1916_v48  ;;  %2582 = vmatprep.subr.bf16.mxu0 %v1645_v54  ;;  %v1773_v48 = vunpack.c.l.s8.bf16 %v1421_v33  ;;  %15026 = vst [vmem:[#allocation46_spill] sm:$0xff] %v12473_v52  ;;  %v12476_v54 = vld [vmem:[%s12137_s28] sm:$0xff] }
 0x5dc   : > { %2623 = vmatprep.subr.bf16.mxu1 %v1901_v55  ;;  %15025 = vst [vmem:[#allocation45_spill] sm:$0xff] %v12470_v47  ;;  %v1405_v55 = vld [vmem:[%s12126_s0 + $0x2e8] sm:$0xff] }
 0x5dd   : > { %v1757_v1 = vunpack.c.h.s8.bf16 %v1405_v55 }
 0x5de   : > { %2583 = vmatpush1.bf16.msra.mxu0 %v1644_v59  ;;  %v12484_v59 = vld [vmem:[%s12134_s1] sm:$0xff] }
 0x5df   : > { %2624 = vmatpush1.bf16.msra.mxu1 %v1900_v62  ;;  %2584 = vmatprep.subr.bf16.mxu0 %v1629_v63  ;;  %v1772_v62 = vunpack.c.l.s8.bf16 %v1420_v41  ;;  %v2028_v63 = vunpack.c.l.s8.bf16 %v1548_v43  ;;  %v2759_v14 = vrot.slane %v12484_v59, %v12470_v47 }
 0x5e0   : > { %2625 = vmatprep.subr.bf16.mxu1 %v1885_v0  ;;  %v2853_v0 = vrot.slane %v12476_v54, %v12470_v47 }
 0x5e2   : > { %2585 = vmatpush1.bf16.msra.mxu0 %v1628_v4  ;;  %v1404_v4 = vld [vmem:[%s12126_s0 + $0x2e0] sm:$0xff] }
 0x5e3   : > { %2626 = vmatpush1.bf16.msra.mxu1 %v1884_v5  ;;  %2586 = vmatprep.subr.bf16.mxu0 %v1613_v6  ;;  %v1532_v5 = vld [vmem:[%s12126_s0 + $0x6e0] sm:$0xff]  ;;  %v12491_v6 = vsub.s32 2, %v12465_v38  ;;  %v1756_v15 = vunpack.c.h.s8.bf16 %v1404_v4 }
 0x5e4   : > { %2627 = vmatprep.subr.bf16.mxu1 %v1869_v7  ;;  %v2751_v7 = vrot.slane %v12484_v59, %v12473_v52  ;;  %v1996_v33 = vunpack.c.l.s8.bf16 %v1532_v5 }
 0x5e5   : > { %15028 = vst [vmem:[#allocation48_spill] sm:$0xff] %v12491_v6  ;;  %v3160_v21 = vrot.slane %v12476_v54, %v12491_v6 }
 0x5e6   : > { %2587 = vmatpush1.bf16.msra.mxu0 %v1612_v10  ;;  %v2747_v10 = vrot.slane %v12484_v59, %v12481_v58 }
 0x5e7   : > { %2628 = vmatpush1.bf16.msra.mxu1 %v1868_v11  ;;  %2588 = vmatprep.subr.bf16.mxu0 %v1597_v12  ;;  %v2950_v11 = vrot.slane %v12476_v54, %v12481_v58  ;;  %v12506_v12 = vsub.s32 5, %v12465_v38  ;;  %v12551_v41 = vrot.slane %v3160_v21, %v12491_v6 }
 0x5e8   : > { %2629 = vmatprep.subr.bf16.mxu1 %v1853_v13  ;;  %v12509_v13 = vsub.s32 6, %v12465_v38  ;;  %v4415_v38 = vld [vmem:[%s12157_s30 + $0x28] sm:$0xff] }
 0x5e9   : > { %15031 = vst [vmem:[#allocation51_spill] sm:$0xff] %v12506_v12  ;;  %v12531_v27 = vrot.slane %v2950_v11, %v12481_v58  ;;  %v2755_v11 = vrot.slane %v12484_v59, %v12491_v6 }
 0x5ea   : > { %2589 = vmatpush1.bf16.msra.mxu0 %v1596_v16  ;;  %15032 = vst [vmem:[#allocation52_spill] sm:$0xff] %v12509_v13  ;;  %v2012_v16 = vunpack.c.h.s8.bf16 %v1532_v5 }
 0x5eb   : > { %2630 = vmatpush1.bf16.msra.mxu1 %v1852_v17  ;;  %2590 = vmatprep.subr.bf16.mxu0 %v1581_v18  ;;  %v12514_v17 = vrot.slane %v2853_v0, %v12470_v47  ;;  %v3055_v18 = vrot.slane %v12476_v54, %v12473_v52  ;;  %v12569_v0 = vld [vmem:[%s744_s21] sm:$0xff] }
 0x5ec   : > { %2631 = vmatprep.subr.bf16.mxu1 %v1837_v19  ;;  %v1741_v19 = vunpack.c.l.s8.bf16 %v1405_v55  ;;  %v3254_v5 = vrot.slane %v12569_v0, %v12473_v52 }
 0x5ed   : > { %v12545_v35 = vrot.slane %v3055_v18, %v12473_v52  ;;  %v12586_v18 = vld [vmem:[%s12126_s0 + $0x5f8] sm:$0xff] }
 0x5ee   : > { %2591 = vmatpush1.bf16.msra.mxu0 %v1580_v22  ;;  %v12521_v22 = vmul.f32 %v2751_v7, %v12366_v3  ;;  %v3059_v3 = vrot.slane %v12476_v54, %v12506_v12 }
 0x5ef   : > { %2632 = vmatpush1.bf16.msra.mxu1 %v1836_v23  ;;  %2592 = vmatprep.subr.bf16.mxu0 %v1821_v24  ;;  %v2857_v23 = vrot.slane %v12476_v54, %v12499_v9  ;;  %v2954_v24 = vrot.slane %v12476_v54, %v12496_v8 }
 0x5f0   : > { %2633 = vmatprep.subr.bf16.mxu1 %v2077_v25  ;;  %v1389_v25 = vld [vmem:[%s12126_s0 + $0x268] sm:$0xff]  ;;  %v2931_v43 = vrot.slane %v12521_v22, 5 }
 0x5f2   : > { %2593 = vmatpush2.bf16.msra.mxu0 %v1820_v28  ;;  %v3164_v28 = vrot.slane %v12476_v54, %v12509_v13  ;;  %v2940_v7 = vsel %vm2938_vm1, %v2931_v43, 0.0  ;;  %v12606_v43 = vld [vmem:[%s12126_s0 + $0x5f0] sm:$0xff] }
 0x5f3   : > { %2634 = vmatpush2.bf16.msra.mxu1 %v2076_v29  ;;  %2594 = vmatprep.subr.bf16.mxu0 %v1805_v31  ;;  %v12539_v29 = vld [vmem:[%s12137_s28 + $0x8] sm:$0xff]  ;;  %v12542_v31 = vmul.f32 %v2759_v14, %v12406_v53  ;;  %v2897_v53 = vrot.slane %v2857_v23, %v12470_v47 }
 0x5f4   : > { %2635 = vmatprep.subr.bf16.mxu1 %v2061_v32  ;;  %v1740_v32 = vunpack.c.l.s8.bf16 %v1404_v4  ;;  %v2962_v54 = vrot.slane %v12539_v29, %v12496_v8  ;;  %v12564_v55 = vrot.slane %v3164_v28, %v12491_v6  ;;  %v1965_v4 = vunpack.c.l.s8.bf16 %v1517_v26 }
 0x5f5   : > { %v2933_v57 = vrot.slane %v12542_v31, 5  ;;  %v3067_v14 = vrot.slane %v12539_v29, %v12506_v12 }
 0x5f6   : > { %2595 = vmatpush2.bf16.msra.mxu0 %v1804_v36  ;;  %v1725_v36 = vunpack.c.h.s8.bf16 %v1389_v25  ;;  %v3002_v23 = vrot.slane %v2962_v54, %v12481_v58  ;;  %v2923_v54 = vmul.f32 %v2897_v53, %v12521_v22 }
 0x5f7   : > { %2636 = vmatpush2.bf16.msra.mxu1 %v2060_v37  ;;  %2596 = vmatprep.subr.bf16.mxu0 %v1789_v39  ;;  %v1981_v37 = vunpack.c.h.s8.bf16 %v1517_v26  ;;  %v1388_v39 = vld [vmem:[%s12126_s0 + $0x260] sm:$0xff] }
 0x5f8   : > { %2637 = vmatprep.subr.bf16.mxu1 %v2045_v40  ;;  %v1516_v40 = vld [vmem:[%s12126_s0 + $0x660] sm:$0xff]  ;;  %v1708_v26 = vunpack.c.l.s8.bf16 %v1388_v39 }
 0x5fa   : > { %2597 = vmatpush2.bf16.msra.mxu0 %v1788_v45  ;;  %v2994_v45 = vrot.slane %v2954_v24, %v12481_v58  ;;  %v3141_v24 = vrot.slane %v12521_v22, 7 }
 0x5fb   : > { %2638 = vmatpush2.bf16.msra.mxu1 %v2044_v46  ;;  %2598 = vmatprep.subr.bf16.mxu0 %v1773_v48  ;;  %v3099_v46 = vrot.slane %v3059_v3, %v12473_v52  ;;  %v2861_v48 = vrot.slane %v12539_v29, %v12470_v47  ;;  %v1964_v3 = vunpack.c.l.s8.bf16 %v1516_v40 }
 0x5fc   : > { %2639 = vmatprep.subr.bf16.mxu1 %v2029_v49  ;;  %v2865_v49 = vrot.slane %v12539_v29, %v12499_v9  ;;  %v3020_v28 = vmul.f32 %v2994_v45, %v2940_v7 }
 0x5fe   : > { %2599 = vmatpush2.bf16.msra.mxu0 %v1772_v62  ;;  %v1724_v62 = vunpack.c.h.s8.bf16 %v1388_v39  ;;  %v2905_v21 = vrot.slane %v2865_v49, %v12470_v47  ;;  %v3038_v39 = vrot.slane %v12542_v31, 6  ;;  %v12619_v49 = vmul.f32 %v2747_v10, %v12362_v56 }
 0x5ff   : > { %2640 = vmatpush2.bf16.msra.mxu1 %v2028_v63  ;;  %2600 = vmatprep.subr.bf16.mxu0 %v1757_v1  ;;  %v1980_v63 = vunpack.c.h.s8.bf16 %v1516_v40  ;;  %v3036_v1 = vrot.slane %v12521_v22, 6  ;;  %v3107_v40 = vrot.slane %v3067_v14, %v12473_v52  ;;  %v1950_v56 = vunpack.c.h.s8.bf16 %v12606_v43 }
 0x600   : > { %2641 = vmatprep.subr.bf16.mxu1 %v2013_v2  ;;  %v1709_v2 = vunpack.c.l.s8.bf16 %v1389_v25  ;;  %v2942_v25 = vsel %vm2938_vm1, %v2933_v57, 0.0  ;;  %v3028_v10 = vadd.f32 %v3020_v28, %v2923_v54  ;;  %v2925_v22 = vmul.f32 %v2905_v21, %v12542_v31  ;;  %v12645_v21 = vld [vmem:[%s12126_s0 + $0x578] sm:$0xff] }
 0x601   : > { %v3022_v57 = vmul.f32 %v3002_v23, %v2942_v25  ;;  %v3047_v7 = vsel %vm3043_vm2, %v3038_v39, 0.0  ;;  %v3143_v14 = vrot.slane %v12542_v31, 7  ;;  %v12658_v39 = vld [vmem:[%s12126_s0 + $0x170] sm:$0xff] }
 0x602   : > { %2601 = vmatpush2.bf16.msra.mxu0 %v1756_v15  ;;  %v3172_v15 = vrot.slane %v12539_v29, %v12509_v13  ;;  %v3127_v54 = vmul.f32 %v3107_v40, %v3047_v7 }
 0x603   : > { %2642 = vmatpush2.bf16.msra.mxu1 %v2012_v16  ;;  %2602 = vmatprep.subr.bf16.mxu0 %v1741_v19  ;;  %v12583_v16 = vld [vmem:[%s12126_s0 + $0x1f8] sm:$0xff]  ;;  %v12589_v19 = vrot.slane %v2861_v48, %v12470_v47  ;;  %v3063_v48 = vrot.slane %v12539_v29, %v12473_v52  ;;  %v3030_v25 = vadd.f32 %v3022_v57, %v2925_v22 }
 0x604   : > { %2643 = vmatprep.subr.bf16.mxu1 %v1997_v20  ;;  %v2958_v20 = vrot.slane %v12539_v29, %v12481_v58  ;;  %v12613_v45 = vrot.slane %v3172_v15, %v12491_v6  ;;  %v1679_v53 = vunpack.c.l.s8.bf16 %v12583_v16  ;;  %v2771_v15 = vrot.slane %v12484_v59, %v12509_v13 }
 0x606   : > { %2603 = vmatpush2.bf16.msra.mxu0 %v1740_v32  ;;  %v3045_v32 = vsel %vm3043_vm2, %v3036_v1, 0.0 }
 0x607   : > { %2644 = vmatpush2.bf16.msra.mxu1 %v1996_v33  ;;  %2604 = vmatprep.subr.bf16.mxu0 %v1725_v36  ;;  %v1695_v33 = vunpack.c.h.s8.bf16 %v12583_v16  ;;  %v1951_v36 = vunpack.c.h.s8.bf16 %v12586_v18  ;;  %v3125_v1 = vmul.f32 %v3099_v46, %v3045_v32  ;;  %v1935_v46 = vunpack.c.l.s8.bf16 %v12586_v18 }
 0x608   : > { %2645 = vmatprep.subr.bf16.mxu1 %v1981_v37  ;;  %v12603_v37 = vld [vmem:[%s12126_s0 + $0x1f0] sm:$0xff]  ;;  %v2930_v16 = vrot.slane %v12619_v49, 5 }
 0x60a   : > { %2605 = vmatpush2.bf16.msra.mxu0 %v1724_v62  ;;  %v12623_v62 = vld [vmem:[%s12137_s28 + $0x18] sm:$0xff] }
 0x60b   : > { %2646 = vmatpush2.bf16.msra.mxu1 %v1980_v63  ;;  %2606 = vmatprep.subr.bf16.mxu0 %v1709_v2  ;;  %v3262_v63 = vrot.slane %v12569_v0, %v12470_v47  ;;  %v3150_v2 = vsel %vm3148_vm3, %v3141_v24, 0.0  ;;  %v2877_v23 = vrot.slane %v12623_v62, %v12470_v47  ;;  %v12642_v24 = vld [vmem:[%s12126_s0 + $0x178] sm:$0xff]  ;;  %v3079_v31 = vrot.slane %v12623_v62, %v12473_v52 }
 0x60c   : > { %2647 = vmatprep.subr.bf16.mxu1 %v1965_v4  ;;  %v1694_v4 = vunpack.c.h.s8.bf16 %v12603_v37  ;;  %v3230_v28 = vmul.f32 %v12564_v55, %v3150_v2  ;;  %v1663_v30 = vunpack.c.h.s8.bf16 %v12642_v24  ;;  %v1919_v55 = vunpack.c.h.s8.bf16 %v12645_v21  ;;  %v12667_v2 = vld [vmem:[%s12126_s0 + $0x570] sm:$0xff] }
 0x60d   : > { %v3184_v40 = vrot.slane %v12623_v62, %v12491_v6 }
 0x60e   : > { %2607 = vmatpush2.bf16.msra.mxu0 %v1708_v26 }
 0x60f   : > { %2648 = vmatpush2.bf16.msra.mxu1 %v1964_v3  ;;  %2658 = vmatprep.subr.bf16.mxu0 %v1695_v33  ;;  %v2974_v3 = vrot.slane %v12623_v62, %v12481_v58  ;;  %v1678_v33 = vunpack.c.l.s8.bf16 %v12603_v37  ;;  %v3152_v37 = vsel %vm3148_vm3, %v3143_v14, 0.0 }
 0x610   : > { %2699 = vmatprep.subr.bf16.mxu1 %v1951_v36  ;;  %v1934_v36 = vunpack.c.l.s8.bf16 %v12606_v43 }
 0x611   : > { %v2364_v18 = vpop.f32.mrf.mxu0  ;;  %2609 = vmatmul.mubr.bf16.vlgmr.msra.gmra.mxu0 %v12246_v60 }
 0x612   : > { %v2405_v26 = vpop.f32.mrf.mxu1  ;;  %2650 = vmatmul.mubr.bf16.vlgmr.msra.gmra.mxu1 %v12248_v61  ;;  %2659 = vmatpush1.bf16.msra.mxu0 %v1694_v4  ;;  %v3133_v4 = vadd.f32 %v3125_v1, %v3028_v10  ;;  %v1662_v1 = vunpack.c.h.s8.bf16 %v12658_v39  ;;  %v3135_v10 = vadd.f32 %v3127_v54, %v3030_v25 }
 0x613   : > { %v2406_v32 = vadd.f32 %v2405_v26, %v2364_v18  ;;  %2700 = vmatpush1.bf16.msra.mxu1 %v1950_v56  ;;  %v12660_v57 = vpop.f32.mrf.mxu0  ;;  %2660 = vmatprep.subr.bf16.mxu0 %v1679_v53  ;;  %v2917_v56 = vrot.slane %v2877_v23, %v12470_v47  ;;  %v3014_v53 = vrot.slane %v2974_v3, %v12481_v58 }
 0x614   : > { %v12662_v22 = vpop.f32.mrf.mxu1  ;;  %2701 = vmatprep.subr.bf16.mxu1 %v1935_v46  ;;  %2690 = vmatprep.mubr.bf16.mxu0 %v12216_v50  ;;  %v3119_v46 = vrot.slane %v3079_v31, %v12473_v52  ;;  %v1918_v50 = vunpack.c.h.s8.bf16 %v12667_v2  ;;  %v1647_v31 = vunpack.c.l.s8.bf16 %v12642_v24  ;;  %v3238_v25 = vadd.f32 %v3230_v28, %v3133_v4 }
 0x615   : > { %v2830_v43 = vmul.f32 %v2771_v15, %v2406_v32  ;;  %2731 = vmatprep.mubr.bf16.mxu1 %v12218_v51  ;;  %v2368_v7 = vpop.f32.mrf.mxu0  ;;  %v3232_v51 = vmul.f32 %v12613_v45, %v3152_v37  ;;  %v1903_v32 = vunpack.c.l.s8.bf16 %v12645_v21  ;;  %v3224_v45 = vrot.slane %v3184_v40, %v12491_v6  ;;  %v1343_v37 = vld [vmem:[%s12126_s0 + $0xf8] sm:$0xff] }
 0x616   : > { %v2409_v18 = vpop.f32.mrf.mxu1  ;;  %2661 = vmatpush1.bf16.msra.mxu0 %v1678_v33  ;;  %v1471_v7 = vld [vmem:[%s12126_s0 + $0x4f8] sm:$0xff]  ;;  %v12696_v28 = vrot.slane %v2958_v20, %v12481_v58  ;;  %v3168_v4 = vrot.slane %v12539_v29, %v12491_v6  ;;  %v1646_v40 = vunpack.c.l.s8.bf16 %v12658_v39  ;;  %v2939_v20 = vsel %vm2938_vm1, %v2930_v16, 0.0 }
 0x617   : > { %v2936_v14 = vrot.slane %v2830_v43, 5  ;;  %v3041_v15 = vrot.slane %v2830_v43, 6  ;;  %v3146_v26 = vrot.slane %v2830_v43, 7  ;;  %2702 = vmatpush1.bf16.msra.mxu1 %v1934_v36  ;;  %v2369_v23 = vpop.f32.mrf.mxu0  ;;  %2662 = vmatprep.subr.bf16.mxu0 %v1663_v30  ;;  %v2928_v30 = vmul.f32 %v2917_v56, %v2830_v43 }
 0x618   : > { %v2410_v3 = vpop.f32.mrf.mxu1  ;;  %2703 = vmatprep.subr.bf16.mxu1 %v1919_v55  ;;  %v3240_v21 = vadd.f32 %v3232_v51, %v3135_v10  ;;  %v1902_v43 = vunpack.c.l.s8.bf16 %v12667_v2  ;;  %v3035_v56 = vrot.slane %v12619_v49, 6  ;;  %v1887_v18 = vunpack.c.h.s8.bf16 %v1471_v7  ;;  %v1342_v10 = vld [vmem:[%s12126_s0 + $0xf0] sm:$0xff] }
 0x619   : > { %v2945_v54 = vsel %vm2938_vm1, %v2936_v14, 0.0  ;;  %v3050_v33 = vsel %vm3043_vm2, %v3041_v15, 0.0  ;;  %v3155_v36 = vsel %vm3148_vm3, %v3146_v26, 0.0  ;;  %v1470_v14 = vld [vmem:[%s12126_s0 + $0x4f0] sm:$0xff]  ;;  %v12714_v39 = vmul.f32 %v2755_v11, %v12402_v42 }
 0x61a   : > { %v3025_v55 = vmul.f32 %v3014_v53, %v2945_v54  ;;  %v3130_v24 = vmul.f32 %v3119_v46, %v3050_v33  ;;  %2663 = vmatpush1.bf16.msra.mxu0 %v1662_v1  ;;  %v1631_v46 = vunpack.c.h.s8.bf16 %v1343_v37  ;;  %v3140_v1 = vrot.slane %v12619_v49, 7  ;;  %v1327_v33 = vld [vmem:[%s12126_s0 + $0x78] sm:$0xff] }
 0x61b   : > { %2704 = vmatpush1.bf16.msra.mxu1 %v1918_v50  ;;  %2664 = vmatprep.subr.bf16.mxu0 %v1647_v31  ;;  %v12719_v2 = vadd.f32 %v3254_v5, %v3238_v25  ;;  %v3235_v26 = vmul.f32 %v3224_v45, %v3155_v36  ;;  %v12724_v50 = vadd.f32 %v3262_v63, %v3240_v21  ;;  %v1630_v5 = vunpack.c.h.s8.bf16 %v1342_v10  ;;  %v1455_v36 = vld [vmem:[%s12126_s0 + $0x478] sm:$0xff] }
 0x61c   : > { %v3033_v53 = vadd.f32 %v3025_v55, %v2928_v30  ;;  %2705 = vmatprep.subr.bf16.mxu1 %v1903_v32  ;;  %v3274_v16 = vrot.slane %v12569_v0, %v12509_v13  ;;  %v2767_v42 = vrot.slane %v12484_v59, %v12506_v12  ;;  %v2775_v11 = vrot.slane %v12484_v59, %v12499_v9 }
 0x61d   : > { %v1886_v51 = vunpack.c.h.s8.bf16 %v1470_v14  ;;  %v2408_v63 = vadd.f32 %v12662_v22, %v12660_v57  ;;  %v1615_v3 = vunpack.c.l.s8.bf16 %v1343_v37  ;;  %v1871_v31 = vunpack.c.l.s8.bf16 %v1471_v7  ;;  %v12751_v37 = vld [vmem:[%s12137_s28 + $0x10] sm:$0xff]  ;;  %s11627_s28 = smov 80  }
 0x61e   : > { %v3138_v15 = vadd.f32 %v3130_v24, %v3033_v53  ;;  %2665 = vmatpush1.bf16.msra.mxu0 %v1646_v40  ;;  %v3044_v32 = vsel %vm3043_vm2, %v3035_v56, 0.0  ;;  %v12740_v25 = vrot.slane %v3063_v48, %v12473_v52  ;;  %v12743_v54 = vrot.slane %v3168_v4, %v12491_v6  ;;  %v1454_v56 = vld [vmem:[%s12126_s0 + $0x470] sm:$0xff] }
 0x61f   : > { %2706 = vmatpush1.bf16.msra.mxu1 %v1902_v43  ;;  %2666 = vmatprep.subr.bf16.mxu0 %v1631_v46  ;;  %v3296_v57 = vsub.f32 0.0, %v12719_v2  ;;  %v3019_v22 = vmul.f32 %v12531_v27, %v2939_v20  ;;  %v2932_v45 = vrot.slane %v12714_v39, 5  ;;  %v3298_v7 = vsub.f32 0.0, %v12724_v50  ;;  %v1326_v43 = vld [vmem:[%s12126_s0 + $0x70] sm:$0xff] }
 0x620   : > { %v3243_v23 = vadd.f32 %v3235_v26, %v3138_v15  ;;  %2707 = vmatprep.subr.bf16.mxu1 %v1887_v18  ;;  %v2922_v48 = vmul.f32 %v12514_v17, %v12619_v49  ;;  %v12759_v30 = vmul.f32 %v2767_v42, %v12446_v44  ;;  %v1614_v55 = vunpack.c.l.s8.bf16 %v1342_v10 }
 0x621   : > { %v1870_v27 = vunpack.c.l.s8.bf16 %v1470_v14  ;;  %v12763_v24 = vsel %vm3148_vm3, %v3140_v1, 0.0  ;;  %v12765_v21 = vmul.f32 %v2775_v11, %v2408_v63  ;;  %v1599_v4 = vunpack.c.h.s8.bf16 %v1327_v33  ;;  %v1439_v63 = vld [vmem:[%s12126_s0 + $0x3f8] sm:$0xff] }
 0x622   : > { %v12754_v29 = vadd.f32 %v3274_v16, %v3243_v23  ;;  %2667 = vmatpush1.bf16.msra.mxu0 %v1630_v5  ;;  %v1855_v40 = vunpack.c.h.s8.bf16 %v1455_v36  ;;  %v12770_v17 = vmul.f32 %v12545_v35, %v3044_v32  ;;  %v2873_v44 = vrot.slane %v12751_v37, %v12499_v9 }
 0x623   : > { %2708 = vmatpush1.bf16.msra.mxu1 %v1886_v51  ;;  %2668 = vmatprep.subr.bf16.mxu0 %v1615_v3  ;;  %v2970_v49 = vrot.slane %v12751_v37, %v12496_v8  ;;  %v3305_v53 = vmul.f32 1.442695, %v3296_v57  ;;  %v12776_v46 = vadd.f32 %v3019_v22, %v2922_v48  ;;  %v2941_v18 = vsel %vm2938_vm1, %v2932_v45, 0.0  ;;  %v1567_v3 = vld [vmem:[%s12126_s0 + $0x7f8] sm:$0xff] }
 0x624   : > { %2709 = vmatprep.subr.bf16.mxu1 %v1871_v31  ;;  %v3037_v10 = vrot.slane %v12714_v39, 6  ;;  %v3309_v14 = vmul.f32 1.442695, %v3298_v7  ;;  %v2935_v20 = vrot.slane %v12759_v30, 5  ;;  %v2978_v35 = vrot.slane %v12623_v62, %v12496_v8 }
 0x625   : > { %v1598_v1 = vunpack.c.h.s8.bf16 %v1326_v43  ;;  %v1854_v15 = vunpack.c.h.s8.bf16 %v1454_v56  ;;  %v3075_v26 = vrot.slane %v12751_v37, %v12506_v12  ;;  %v2937_v16 = vrot.slane %v12765_v21, 5 }
 0x626   : > { %2669 = vmatpush1.bf16.msra.mxu0 %v1614_v55  ;;  %v1583_v42 = vunpack.c.l.s8.bf16 %v1327_v33  ;;  %v1839_v11 = vunpack.c.l.s8.bf16 %v1455_v36  ;;  %v2913_v5 = vrot.slane %v2873_v44, %v12470_v47  ;;  %v3010_v51 = vrot.slane %v2970_v49, %v12481_v58 }
 0x627   : > { %2710 = vmatpush1.bf16.msra.mxu1 %v1870_v27  ;;  %2670 = vmatprep.subr.bf16.mxu0 %v1599_v4  ;;  %v2881_v23 = vrot.slane %v12623_v62, %v12499_v9  ;;  %10743 = vpow2.f32 %v3305_v53  ;;  %v3021_v31 = vmul.f32 %v12696_v28, %v2941_v18  ;;  %v3046_v32 = vsel %vm3043_vm2, %v3037_v10, 0.0  ;;  %v1438_v27 = vld [vmem:[%s12126_s0 + $0x3f0] sm:$0xff] }
 0x628   : > { %2711 = vmatprep.subr.bf16.mxu1 %v1855_v40  ;;  %v3180_v33 = vrot.slane %v12751_v37, %v12509_v13  ;;  %10745 = vpow2.f32 %v3309_v14  ;;  %v2944_v36 = vsel %vm2938_vm1, %v2935_v20, 0.0  ;;  %v3018_v57 = vrot.slane %v2978_v35, %v12481_v58  ;;  %v1566_v4 = vld [vmem:[%s12126_s0 + $0x7f0] sm:$0xff] }
 0x629   : > { %v1582_v22 = vunpack.c.l.s8.bf16 %v1326_v43  ;;  %v1838_v45 = vunpack.c.l.s8.bf16 %v1454_v56  ;;  %v3115_v28 = vrot.slane %v3075_v26, %v12473_v52  ;;  %v2946_v7 = vsel %vm2938_vm1, %v2937_v16, 0.0 }
 0x62a   : > { %2671 = vmatpush1.bf16.msra.mxu0 %v1598_v1  ;;  %v1823_v48 = vunpack.c.h.s8.bf16 %v1439_v63  ;;  %v2079_v55 = vunpack.c.h.s8.bf16 %v1567_v3  ;;  %v2924_v40 = vmul.f32 %v12589_v19, %v12714_v39  ;;  %v3040_v44 = vrot.slane %v12759_v30, 6 }
 0x62b   : > { %2712 = vmatpush1.bf16.msra.mxu1 %v1854_v15  ;;  %2672 = vmatprep.subr.bf16.mxu0 %v1583_v42  ;;  %v2921_v49 = vrot.slane %v2881_v23, %v12470_v47  ;;  %v3083_v43 = vrot.slane %v12623_v62, %v12506_v12  ;;  %v3126_v56 = vmul.f32 %v12740_v25, %v3046_v32  ;;  %v3142_v53 = vrot.slane %v12714_v39, 7  ;;  %v1551_v23 = vld [vmem:[%s12126_s0 + $0x778] sm:$0xff] }
 0x62c   : > { %2713 = vmatprep.subr.bf16.mxu1 %v1839_v11  ;;  %v3024_v18 = vmul.f32 %v3010_v51, %v2944_v36  ;;  %v3042_v10 = vrot.slane %v12765_v21, 6  ;;  %v3029_v14 = vadd.f32 %v3021_v31, %v2924_v40  ;;  %v3026_v20 = vmul.f32 %v3018_v57, %v2946_v7  ;;  %v1423_v51 = vld [vmem:[%s12126_s0 + $0x378] sm:$0xff]  ;;  %v1550_v7 = vld [vmem:[%s12126_s0 + $0x770] sm:$0xff] }
 0x62d   : > { %v1822_v19 = vunpack.c.h.s8.bf16 %v1438_v27  ;;  %v2078_v35 = vunpack.c.h.s8.bf16 %v1566_v4  ;;  %v2927_v1 = vmul.f32 %v2913_v5, %v12759_v30  ;;  %v3188_v15 = vrot.slane %v12623_v62, %v12509_v13 }
 0x62e   : > { %2673 = vmatpush1.bf16.msra.mxu0 %v1582_v22  ;;  %v1807_v25 = vunpack.c.l.s8.bf16 %v1439_v63  ;;  %v2063_v39 = vunpack.c.l.s8.bf16 %v1567_v3  ;;  %v3049_v26 = vsel %vm3043_vm2, %v3040_v44, 0.0  ;;  %v3145_v16 = vrot.slane %v12759_v30, 7 }
 0x62f   : > { %2714 = vmatpush1.bf16.msra.mxu1 %v1838_v45  ;;  %2674 = vmatprep.subr.bf16.mxu0 %v1823_v48  ;;  %v2929_v42 = vmul.f32 %v2921_v49, %v12765_v21  ;;  %v3123_v11 = vrot.slane %v3083_v43, %v12473_v52  ;;  %v3132_v5 = vadd.f32 %v12770_v17, %v12776_v46  ;;  %v3051_v63 = vsel %vm3043_vm2, %v3042_v10, 0.0  ;;  %v1422_v45 = vld [vmem:[%s12126_s0 + $0x370] sm:$0xff] }
 0x630   : > { %2715 = vmatprep.subr.bf16.mxu1 %v2079_v55  ;;  %v3032_v62 = vadd.f32 %v3024_v18, %v2927_v1  ;;  %v3147_v3 = vrot.slane %v12765_v21, 7  ;;  %v3220_v31 = vrot.slane %v3180_v33, %v12491_v6  ;;  %v1806_v32 = vunpack.c.l.s8.bf16 %v1438_v27  ;;  %v1535_v1 = vld [vmem:[%s12126_s0 + $0x6f8] sm:$0xff] }
 0x631   : > { %v3034_v30 = vadd.f32 %v3026_v20, %v2929_v42  ;;  %v2062_v36 = vunpack.c.l.s8.bf16 %v1566_v4  ;;  %v3151_v57 = vsel %vm3148_vm3, %v3142_v53, 0.0  ;;  %v3129_v22 = vmul.f32 %v3115_v28, %v3049_v26 }
 0x632   : > { %2675 = vmatpush2.bf16.msra.mxu0 %v1822_v19  ;;  %v1791_v17 = vunpack.c.h.s8.bf16 %v1423_v51  ;;  %v2047_v46 = vunpack.c.h.s8.bf16 %v1551_v23  ;;  %v3134_v48 = vadd.f32 %v3126_v56, %v3029_v14  ;;  %v3154_v21 = vsel %vm3148_vm3, %v3145_v16, 0.0 }
 0x633   : > { %2716 = vmatpush2.bf16.msra.mxu1 %v2078_v35  ;;  %2676 = vmatprep.subr.bf16.mxu0 %v1807_v25  ;;  %v3131_v33 = vmul.f32 %v3123_v11, %v3051_v63  ;;  %v3228_v55 = vrot.slane %v3188_v15, %v12491_v6  ;;  %v3229_v27 = vmul.f32 %v12551_v41, %v12763_v24  ;;  %v3156_v28 = vsel %vm3148_vm3, %v3147_v3, 0.0  ;;  %v1407_v35 = vld [vmem:[%s12126_s0 + $0x2f8] sm:$0xff]  ;;  %v1534_v63 = vld [vmem:[%s12126_s0 + $0x6f0] sm:$0xff] }
 0x634   : > { %2717 = vmatprep.subr.bf16.mxu1 %v2063_v39  ;;  %v10744_v40 = vpop.eup %10743  ;;  %v3250_v4 = vrot.slane %v12569_v0, %v12481_v58  ;;  %v3137_v44 = vadd.f32 %v3129_v22, %v3032_v62  ;;  %v3231_v43 = vmul.f32 %v12743_v54, %v3151_v57  ;;  %v1790_v56 = vunpack.c.h.s8.bf16 %v1422_v45  ;;  %v1406_v62 = vld [vmem:[%s12126_s0 + $0x2f0] sm:$0xff] }
 0x635   : > { %v10746_v49 = vpop.eup %10745  ;;  %v2046_v53 = vunpack.c.h.s8.bf16 %v1550_v7  ;;  %v3139_v18 = vadd.f32 %v3131_v33, %v3034_v30  ;;  %v3237_v10 = vadd.f32 %v3229_v27, %v3132_v5  ;;  %v3234_v14 = vmul.f32 %v3220_v31, %v3154_v21 }
 0x636   : > { %2677 = vmatpush2.bf16.msra.mxu0 %v1806_v32  ;;  %v1775_v41 = vunpack.c.l.s8.bf16 %v1423_v51  ;;  %v2031_v24 = vunpack.c.l.s8.bf16 %v1551_v23  ;;  %v3239_v20 = vadd.f32 %v3231_v43, %v3134_v48  ;;  %v3236_v19 = vmul.f32 %v3228_v55, %v3156_v28  ;;  %v1519_v48 = vld [vmem:[%s12126_s0 + $0x678] sm:$0xff] }
 0x637   : > { %2718 = vmatpush2.bf16.msra.mxu1 %v2062_v36  ;;  %2678 = vmatprep.subr.bf16.mxu0 %v1791_v17  ;;  %v3320_v15 = vadd.f32 1.0, %v10744_v40  ;;  %v3258_v54 = vrot.slane %v12569_v0, %v12491_v6  ;;  %v3322_v25 = vadd.f32 1.0, %v10746_v49  ;;  %v3242_v39 = vadd.f32 %v3234_v14, %v3137_v44  ;;  %v1390_v44 = vld [vmem:[%s12126_s0 + $0x270] sm:$0xff] }
 0x638   : > { %2719 = vmatprep.subr.bf16.mxu1 %v2047_v46  ;;  %v3270_v26 = vrot.slane %v12569_v0, %v12506_v12  ;;  %v1774_v16 = vunpack.c.l.s8.bf16 %v1422_v45  ;;  %v2030_v42 = vunpack.c.l.s8.bf16 %v1550_v7  ;;  %v3244_v11 = vadd.f32 %v3236_v19, %v3139_v18  ;;  %v1391_v7 = vld [vmem:[%s12126_s0 + $0x278] sm:$0xff]  ;;  %v1518_v49 = vld [vmem:[%s12126_s0 + $0x670] sm:$0xff]  ;;  %s11626_s0 = smov 96  }
 0x639   : > { %v3278_v51 = vrot.slane %v12569_v0, %v12499_v9  ;;  %v1759_v23 = vunpack.c.h.s8.bf16 %v1407_v35  ;;  %v2015_v5 = vunpack.c.h.s8.bf16 %v1535_v1  ;;  %v12855_v3 = vadd.f32 %v3250_v4, %v3237_v10 }
 0x63a   : > { %2679 = vmatpush2.bf16.msra.mxu0 %v1790_v56  ;;  %v2763_v31 = vrot.slane %v12484_v59, %v12496_v8  ;;  %10747 = vrcp.f32 %v3320_v15  ;;  %v12859_v30 = vadd.f32 %v3258_v54, %v3239_v20  ;;  %v12861_v32 = vadd.f32 %v3270_v26, %v3242_v39 }
 0x63b   : > { %2720 = vmatpush2.bf16.msra.mxu1 %v2046_v53  ;;  %2680 = vmatprep.subr.bf16.mxu0 %v1775_v41  ;;  %10749 = vrcp.f32 %v3322_v25  ;;  %v1758_v36 = vunpack.c.h.s8.bf16 %v1406_v62  ;;  %v2014_v57 = vunpack.c.h.s8.bf16 %v1534_v63  ;;  %v12863_v22 = vadd.f32 %v3278_v51, %v3244_v11 }
 0x63c   : > { %2721 = vmatprep.subr.bf16.mxu1 %v2031_v24  ;;  %v1743_v17 = vunpack.c.l.s8.bf16 %v1407_v35  ;;  %v1999_v46 = vunpack.c.l.s8.bf16 %v1535_v1  ;;  %v3295_v59 = vsub.f32 0.0, %v12855_v3  ;;  %v12867_v45 = vmul.f32 %v2763_v31, %v12442_v34 }
 0x63d   : > { %v3297_v21 = vsub.f32 0.0, %v12859_v30  ;;  %v3300_v33 = vsub.f32 0.0, %v12861_v32  ;;  %v1742_v55 = vunpack.c.l.s8.bf16 %v1406_v62  ;;  %v1998_v40 = vunpack.c.l.s8.bf16 %v1534_v63 }
 0x63e   : > { %2681 = vmatpush2.bf16.msra.mxu0 %v1774_v16  ;;  %v3302_v27 = vsub.f32 0.0, %v12863_v22  ;;  %v2966_v28 = vrot.slane %v12751_v37, %v12481_v58  ;;  %v1727_v34 = vunpack.c.h.s8.bf16 %v1391_v7  ;;  %v1983_v4 = vunpack.c.h.s8.bf16 %v1519_v48 }
 0x63f   : > { %2722 = vmatpush2.bf16.msra.mxu1 %v2030_v42  ;;  %2682 = vmatprep.subr.bf16.mxu0 %v1759_v23  ;;  %v3303_v43 = vmul.f32 1.442695, %v3295_v59  ;;  %v2934_v56 = vrot.slane %v12867_v45, 5  ;;  %v3307_v53 = vmul.f32 1.442695, %v3297_v21  ;;  %v2869_v18 = vrot.slane %v12751_v37, %v12470_v47  ;;  %v10679_v23 = vld [vmem:[%s12188_s23 + $0x78] sm:$0xff]  }
 0x640   : > { %2723 = vmatprep.subr.bf16.mxu1 %v2015_v5  ;;  %v3313_v10 = vmul.f32 1.442695, %v3300_v33  ;;  %v3071_v14 = vrot.slane %v12751_v37, %v12473_v52  ;;  %v1726_v41 = vunpack.c.h.s8.bf16 %v1390_v44  ;;  %v1982_v24 = vunpack.c.h.s8.bf16 %v1518_v49  ;;  %v10680_v5 = vld [vmem:[%s12188_s23 + $0xf8] sm:$0xff]   ;;  %v10683_v21 = vld [vmem:[%s12188_s23 + $0x70] sm:$0xff]  }
 0x641   : > { %v3317_v20 = vmul.f32 1.442695, %v3302_v27  ;;  %v3006_v19 = vrot.slane %v2966_v28, %v12481_v58  ;;  %v1711_v35 = vunpack.c.l.s8.bf16 %v1391_v7  ;;  %v1967_v1 = vunpack.c.l.s8.bf16 %v1519_v48  ;;  %v10684_v33 = vld [vmem:[%s12188_s23 + $0xf0] sm:$0xff]  }
 0x642   : > { %2683 = vmatpush2.bf16.msra.mxu0 %v1758_v36  ;;  %10751 = vpow2.f32 %v3303_v43  ;;  %v2943_v15 = vsel %vm2938_vm1, %v2934_v56, 0.0  ;;  %v3039_v54 = vrot.slane %v12867_v45, 6  ;;  %v2909_v39 = vrot.slane %v2869_v18, %v12470_v47  ;;  %v10685_v28 = vld [vmem:[%s12188_s23 + $0x30] sm:$0xff]   ;;  %v10688_v56 = vld [vmem:[%s12188_s23 + $0xe8] sm:$0xff]  }
 0x643   : > { %2724 = vmatpush2.bf16.msra.mxu1 %v2014_v57  ;;  %2684 = vmatprep.subr.bf16.mxu0 %v1743_v17  ;;  %10753 = vpow2.f32 %v3307_v53  ;;  %v1710_v16 = vunpack.c.l.s8.bf16 %v1390_v44  ;;  %v1966_v42 = vunpack.c.l.s8.bf16 %v1518_v49  ;;  %v3023_v11 = vmul.f32 %v3006_v19, %v2943_v15  ;;  %v10686_v44 = vld [vmem:[%s12188_s23 + $0xb0] sm:$0xff]   ;;  %v10690_v15 = vld [vmem:[%s12188_s23 + $0xa8] sm:$0xff]  }
 0x644   : > { %2725 = vmatprep.subr.bf16.mxu1 %v1999_v46  ;;  %10755 = vpow2.f32 %v3313_v10  ;;  %v3111_v51 = vrot.slane %v3071_v14, %v12473_v52  ;;  %v3048_v62 = vsel %vm3043_vm2, %v3039_v54, 0.0  ;;  %v2926_v31 = vmul.f32 %v2909_v39, %v12867_v45  ;;  %v10681_v46 = vld [vmem:[%s12188_s23 + $0x38] sm:$0xff]   ;;  %v10691_v54 = vld [vmem:[%s12188_s23 + $0x60] sm:$0xff]  }
 0x645   : > { %10757 = vpow2.f32 %v3317_v20  ;;  %v3176_v36 = vrot.slane %v12751_v37, %v12491_v6  ;;  %v3144_v17 = vrot.slane %v12867_v45, 7  ;;  %v3266_v39 = vrot.slane %v12569_v0, %v12496_v8  ;;  %v10696_v0 = vld [vmem:[%s12188_s23 + $0xd8] sm:$0xff]  }
 0x646   : > { %2685 = vmatpush2.bf16.msra.mxu0 %v1742_v55  ;;  %v3031_v59 = vadd.f32 %v3023_v11, %v2926_v31  ;;  %v3128_v7 = vmul.f32 %v3111_v51, %v3048_v62  ;;  %v10693_v11 = vld [vmem:[%s12188_s23 + $0x20] sm:$0xff]   ;;  %v10697_v31 = vld [vmem:[%s12188_s23 + $0x18] sm:$0xff]  }
 0x647   : > { %2726 = vmatpush2.bf16.msra.mxu1 %v1998_v40  ;;  %2686 = vmatprep.subr.bf16.mxu0 %v1727_v34  ;;  %v10748_v25 = vpop.eup %10747  ;;  %v3216_v37 = vrot.slane %v3176_v36, %v12491_v6  ;;  %v3153_v40 = vsel %vm3148_vm3, %v3144_v17, 0.0  ;;  %v10698_v36 = vld [vmem:[%s12188_s23 + $0x98] sm:$0xff]   ;;  %v10699_v17 = vld [vmem:[%s12188_s23 + $0x50] sm:$0xff]  }
 0x648   : > { %2727 = vmatprep.subr.bf16.mxu1 %v1983_v4  ;;  %v10750_v26 = vpop.eup %10749  ;;  %v12894_v63 = vmul.f32 %v10748_v25, %v12719_v2  ;;  %v10682_v2 = vld [vmem:[%s12188_s23 + $0xb8] sm:$0xff]   ;;  %v3136_v34 = vadd.f32 %v3128_v7, %v3031_v59  ;;  %v10700_v59 = vld [vmem:[%s12188_s23 + $0xd0] sm:$0xff]   ;;  %v3301_v7 = vsub.f32 0.0, %v12754_v29 }
 0x649   : > { %v12900_v57 = vmul.f32 %v10750_v26, %v12724_v50  ;;  %v3233_v18 = vmul.f32 %v3216_v37, %v3153_v40  ;;  %v10692_v26 = vld [vmem:[%s12188_s23 + $0xe0] sm:$0xff]   ;;  %v10704_v37 = vld [vmem:[%s12188_s23 + $0xc8] sm:$0xff]  }
 0x64a   : > { %2687 = vmatpush2.bf16.msra.mxu0 %v1726_v41  ;;  %15033 = vst [vmem:[#allocation53_spill] sm:$0xff] %v12894_v63  ;;  %v3352_v48 = vpack.c.bf16 %v12894_v63, %v12894_v63  ;;  %v10707_v40 = vld [vmem:[%s12188_s23 + $0x40] sm:$0xff]  }
 0x64b   : > { %2728 = vmatpush2.bf16.msra.mxu1 %v1982_v24  ;;  %2688 = vmatprep.subr.bf16.mxu0 %v1711_v35  ;;  %15034 = vst [vmem:[#allocation54_spill] sm:$0xff] %v12900_v57  ;;  %v3354_v55 = vpack.c.bf16 %v12900_v57, %v12900_v57  ;;  %v10689_v24 = vld [vmem:[%s12188_s23 + $0x28] sm:$0xff]   ;;  %v3241_v19 = vadd.f32 %v3233_v18, %v3136_v34  ;;  %v10708_v34 = vld [vmem:[%s12188_s23 + $0xc0] sm:$0xff]  }
 0x64c   : > { %2729 = vmatprep.subr.bf16.mxu1 %v1967_v1 }
 0x64d   : > { %v12933_v62 = vadd.f32 %v3266_v39, %v3241_v19  ;;  %v10720_v39 = vld [vmem:[%s12188_s23 + $0x1e8] sm:$0xff]  }
 0x64e   : > { %2689 = vmatpush2.bf16.msra.mxu0 %v1710_v16 }
 0x64f   : > { %2730 = vmatpush2.bf16.msra.mxu1 %v1966_v42  ;;  %10405 = vmatprep.subr.bf16.mxu0 %v10679_v23  ;;  %v10752_v49 = vpop.eup %10751  ;;  %v10694_v23 = vld [vmem:[%s12188_s23 + $0xa0] sm:$0xff]  }
 0x650   : > { %10427 = vmatprep.subr.bf16.mxu1 %v10680_v5  ;;  %v10754_v53 = vpop.eup %10753  ;;  %v3319_v25 = vadd.f32 1.0, %v10752_v49  ;;  %v10695_v5 = vld [vmem:[%s12188_s23 + $0x58] sm:$0xff]   ;;  %v10710_v49 = vld [vmem:[%s12188_s23 + $0x80] sm:$0xff]  }
 0x651   : > { %v2446_v50 = vpop.f32.mrf.mxu0  ;;  %2691 = vmatmul.mubr.bf16.vlgmr.msra.gmra.mxu0 %v12246_v60  ;;  %v10756_v41 = vpop.eup %10755  ;;  %v3321_v16 = vadd.f32 1.0, %v10754_v53  ;;  %v10711_v53 = vld [vmem:[%s12188_s23 + $0x178] sm:$0xff]  }
 0x652   : > { %v2487_v45 = vpop.f32.mrf.mxu1  ;;  %2732 = vmatmul.mubr.bf16.vlgmr.msra.gmra.mxu1 %v12248_v61  ;;  %10406 = vmatpush3.bf16.msra.mxu0 %v10681_v46  ;;  %v10687_v61 = vld [vmem:[%s12188_s23 + $0x68] sm:$0xff]   ;;  %v10758_v20 = vpop.eup %10757  ;;  %v3324_v42 = vadd.f32 1.0, %v10756_v41  ;;  %10759 = vrcp.f32 %v3319_v25  ;;  %v3299_v46 = vsub.f32 0.0, %v12933_v62  ;;  %v10713_v41 = vld [vmem:[%s12188_s23 + $0x138] sm:$0xff]  }
 0x653   : > { %v12916_v27 = vadd.f32 %v2487_v45, %v2446_v50  ;;  %3903 = vmatprep.mubr.bf16.mxu0 %v3352_v48  ;;  %10428 = vmatpush3.bf16.msra.mxu1 %v10682_v2  ;;  %v2448_v4 = vpop.f32.mrf.mxu0  ;;  %v3326_v51 = vadd.f32 1.0, %v10758_v20  ;;  %10761 = vrcp.f32 %v3321_v16  ;;  %v10701_v2 = vld [vmem:[%s12188_s23 + $0x10] sm:$0xff]   ;;  %v3315_v50 = vmul.f32 1.442695, %v3301_v7  ;;  %v10705_v45 = vld [vmem:[%s12188_s23 + $0x8] sm:$0xff]   ;;  %v10714_v20 = vld [vmem:[%s12188_s23 + $0x1b8] sm:$0xff]  }
 0x654   : > { %3943 = vmatprep.mubr.bf16.mxu1 %v3354_v55  ;;  %v2489_v60 = vpop.f32.mrf.mxu1  ;;  %10407 = vmatprep.subr.bf16.mxu0 %v10683_v21  ;;  %10763 = vrcp.f32 %v3324_v42  ;;  %v10702_v48 = vld [vmem:[%s12188_s23 + $0x90] sm:$0xff]   ;;  %v10703_v21 = vld [vmem:[%s12188_s23 + $0x48] sm:$0xff]  }
 0x655   : > { %15035 = vst [vmem:[#allocation55_spill] sm:$0xff] %v12916_v27  ;;  %v12921_v43 = vadd.f32 %v2489_v60, %v2448_v4  ;;  %10429 = vmatprep.subr.bf16.mxu1 %v10684_v33  ;;  %v2450_v10 = vpop.f32.mrf.mxu0  ;;  %10765 = vrcp.f32 %v3326_v51  ;;  %v3311_v33 = vmul.f32 1.442695, %v3299_v46  ;;  %v10706_v55 = vld [vmem:[%s12188_s23 + $0x88] sm:$0xff]   ;;  %v10729_v46 = vld [vmem:[%s12188_s23 + $0x118] sm:$0xff]   ;;  %v10731_v7 = vld [vmem:[%s12188_s23 + $0x150] sm:$0xff]  }
 0x656   : > { %v2491_v14 = vpop.f32.mrf.mxu1  ;;  %10408 = vmatpush3.bf16.msra.mxu0 %v10685_v28  ;;  %v10712_v10 = vld [vmem:[%s12188_s23 + $0x1f8] sm:$0xff]   ;;  %v10721_v16 = vld [vmem:[%s12188_s23 + $0x128] sm:$0xff]  }
 0x657   : > { %15036 = vst [vmem:[#allocation56_spill] sm:$0xff] %v12921_v43  ;;  %10430 = vmatpush3.bf16.msra.mxu1 %v10686_v44  ;;  %v2451_v35 = vpop.f32.mrf.mxu0  ;;  %10409 = vmatprep.subr.bf16.mxu0 %v10687_v61  ;;  %10767 = vpow2.f32 %v3311_v33  ;;  %v10709_v44 = vld [vmem:[%s12188_s23] sm:$0xff]   ;;  %v10722_v42 = vld [vmem:[%s12188_s23 + $0x1a8] sm:$0xff]  }
 0x658   : > { %v2492_v1 = vpop.f32.mrf.mxu1  ;;  %10431 = vmatprep.subr.bf16.mxu1 %v10688_v56  ;;  %10769 = vpow2.f32 %v3315_v50  ;;  %v10735_v33 = vld [vmem:[%s12188_s23 + $0x148] sm:$0xff]  }
 0x659   : > { %v10717_v1 = vld [vmem:[%s12188_s23 + $0x130] sm:$0xff]   ;;  %v10737_v50 = vld [vmem:[%s12188_s23 + $0x108] sm:$0xff]  }
 0x65a   : > { %10410 = vmatpush3.bf16.msra.mxu0 %v10689_v24 }
 0x65b   : > { %10432 = vmatpush3.bf16.msra.mxu1 %v10690_v15  ;;  %10411 = vmatprep.subr.bf16.mxu0 %v10691_v54  ;;  %v10718_v15 = vld [vmem:[%s12188_s23 + $0x1b0] sm:$0xff]   ;;  %v10719_v54 = vld [vmem:[%s12188_s23 + $0x168] sm:$0xff]  }
 0x65c   : > { %10433 = vmatprep.subr.bf16.mxu1 %v10692_v26 }
 0x65e   : > { %10412 = vmatpush3.bf16.msra.mxu0 %v10693_v11  ;;  %v10723_v11 = vld [vmem:[%s12188_s23 + $0x160] sm:$0xff]  }
 0x65f   : > { %10434 = vmatpush3.bf16.msra.mxu1 %v10694_v23  ;;  %10413 = vmatprep.subr.bf16.mxu0 %v10695_v5  ;;  %v10760_v28 = vpop.eup %10759  ;;  %v10724_v23 = vld [vmem:[%s12188_s23 + $0x1e0] sm:$0xff]  }
 0x660   : > { %10435 = vmatprep.subr.bf16.mxu1 %v10696_v0  ;;  %v10762_v4 = vpop.eup %10761  ;;  %v12953_v56 = vmul.f32 %v10760_v28, %v12855_v3  ;;  %v10725_v0 = vld [vmem:[%s12188_s23 + $0x120] sm:$0xff]  }
 0x661   : > { %v10764_v60 = vpop.eup %10763  ;;  %v12957_v18 = vmul.f32 %v10762_v4, %v12859_v30  ;;  %v10740_v28 = vld [vmem:[%s12188_s23 + $0x1c0] sm:$0xff]  }
 0x662   : > { %10414 = vmatpush3.bf16.msra.mxu0 %v10697_v31  ;;  %v10766_v61 = vpop.eup %10765  ;;  %15037 = vst [vmem:[#allocation57_spill] sm:$0xff] %v12953_v56  ;;  %v12961_v14 = vmul.f32 %v10764_v60, %v12861_v32  ;;  %v3351_v3 = vpack.c.bf16 %v12953_v56, %v12953_v56  ;;  %v10715_v32 = vld [vmem:[%s12188_s23 + $0x170] sm:$0xff]   ;;  %v10726_v31 = vld [vmem:[%s12188_s23 + $0x1a0] sm:$0xff]  }
 0x663   : > { %10436 = vmatpush3.bf16.msra.mxu1 %v10698_v36  ;;  %10415 = vmatprep.subr.bf16.mxu0 %v10699_v17  ;;  %15038 = vst [vmem:[#allocation58_spill] sm:$0xff] %v12957_v18  ;;  %v12965_v24 = vmul.f32 %v10766_v61, %v12863_v22  ;;  %v3353_v30 = vpack.c.bf16 %v12957_v18, %v12957_v18  ;;  %v10716_v22 = vld [vmem:[%s12188_s23 + $0x1f0] sm:$0xff]   ;;  %v10727_v36 = vld [vmem:[%s12188_s23 + $0x158] sm:$0xff]   ;;  %v10741_v4 = vld [vmem:[%s12188_s23 + $0x100] sm:$0xff]  }
 0x664   : > { %10437 = vmatprep.subr.bf16.mxu1 %v10700_v59  ;;  %15039 = vst [vmem:[#allocation59_spill] sm:$0xff] %v12961_v14  ;;  %v3356_v19 = vpack.c.bf16 %v12961_v14, %v12961_v14  ;;  %v10768_v25 = vpop.eup %10767  ;;  %v10728_v17 = vld [vmem:[%s12188_s23 + $0x1d8] sm:$0xff]   ;;  %v10742_v60 = vld [vmem:[%s12188_s23 + $0x180] sm:$0xff]  }
 0x665   : > { %15040 = vst [vmem:[#allocation60_spill] sm:$0xff] %v12965_v24  ;;  %v3358_v35 = vpack.c.bf16 %v12965_v24, %v12965_v24  ;;  %v10770_v26 = vpop.eup %10769  ;;  %v3323_v51 = vadd.f32 1.0, %v10768_v25  ;;  %v10730_v59 = vld [vmem:[%s12188_s23 + $0x198] sm:$0xff]  }
 0x666   : > { %10416 = vmatpush3.bf16.msra.mxu0 %v10701_v2  ;;  %v3325_v5 = vadd.f32 1.0, %v10770_v26  ;;  %v10732_v2 = vld [vmem:[%s12188_s23 + $0x1d0] sm:$0xff]  }
 0x667   : > { %10438 = vmatpush3.bf16.msra.mxu1 %v10702_v48  ;;  %10417 = vmatprep.subr.bf16.mxu0 %v10703_v21  ;;  %10771 = vrcp.f32 %v3323_v51  ;;  %v10733_v48 = vld [vmem:[%s12188_s23 + $0x110] sm:$0xff]   ;;  %v4041_v51 = vld [vmem:[%s12149_s3 + $0x48] sm:$0xff] }
 0x668   : > { %10439 = vmatprep.subr.bf16.mxu1 %v10704_v37  ;;  %10773 = vrcp.f32 %v3325_v5  ;;  %v10734_v21 = vld [vmem:[%s12188_s23 + $0x190] sm:$0xff]   ;;  %v10736_v37 = vld [vmem:[%s12188_s23 + $0x1c8] sm:$0xff]  }
 0x66a   : > { %10418 = vmatpush3.bf16.msra.mxu0 %v10705_v45  ;;  %v10738_v45 = vld [vmem:[%s12188_s23 + $0x188] sm:$0xff]  }
 0x66b   : > { %10440 = vmatpush3.bf16.msra.mxu1 %v10706_v55  ;;  %10419 = vmatprep.subr.bf16.mxu0 %v10707_v40  ;;  %v10739_v55 = vld [vmem:[%s12188_s23 + $0x140] sm:$0xff]  }
 0x66c   : > { %10441 = vmatprep.subr.bf16.mxu1 %v10708_v34 }
 0x66e   : > { %10420 = vmatpush3.bf16.msra.mxu0 %v10709_v44 }
 0x66f   : > { %10442 = vmatpush3.bf16.msra.mxu1 %v10710_v49  ;;  %10449 = vmatprep.subr.bf16.mxu0 %v10711_v53 }
 0x670   : > { %10471 = vmatprep.subr.bf16.mxu1 %v10712_v10 }
 0x671   : > { %3904 = vmatmul.mubr.bf16.vlgmr.msra.gmra.mxu0 %v3351_v3 }
 0x672   : > { %3944 = vmatmul.mubr.bf16.vlgmr.msra.gmra.mxu1 %v3353_v30  ;;  %10450 = vmatpush3.bf16.msra.mxu0 %v10713_v41 }
 0x673   : > { %3983 = vmatprep.mubr.bf16.mxu0 %v3356_v19  ;;  %10472 = vmatpush3.bf16.msra.mxu1 %v10714_v20 }
 0x674   : > { %4023 = vmatprep.mubr.bf16.mxu1 %v3358_v35  ;;  %10451 = vmatprep.subr.bf16.mxu0 %v10715_v32  ;;  %v10772_v40 = vpop.eup %10771 }
 0x675   : > { %10473 = vmatprep.subr.bf16.mxu1 %v10716_v22  ;;  %v10774_v34 = vpop.eup %10773  ;;  %v13005_v44 = vmul.f32 %v10772_v40, %v12933_v62 }
 0x676   : > { %10452 = vmatpush3.bf16.msra.mxu0 %v10717_v1  ;;  %v13008_v61 = vmul.f32 %v10774_v34, %v12754_v29  ;;  %v4043_v34 = vld [vmem:[%s12149_s3 + $0x58] sm:$0xff] }
 0x677   : > { %10474 = vmatpush3.bf16.msra.mxu1 %v10718_v15  ;;  %10453 = vmatprep.subr.bf16.mxu0 %v10719_v54  ;;  %15041 = vst [vmem:[#allocation61_spill] sm:$0xff] %v13005_v44  ;;  %v3355_v49 = vpack.c.bf16 %v13005_v44, %v13005_v44 }
 0x678   : > { %10475 = vmatprep.subr.bf16.mxu1 %v10720_v39  ;;  %15042 = vst [vmem:[#allocation62_spill] sm:$0xff] %v13008_v61  ;;  %v3357_v53 = vpack.c.bf16 %v13008_v61, %v13008_v61 }
 0x67a   : > { %10454 = vmatpush3.bf16.msra.mxu0 %v10721_v16 }
 0x67b   : > { %10476 = vmatpush3.bf16.msra.mxu1 %v10722_v42  ;;  %10455 = vmatprep.subr.bf16.mxu0 %v10723_v11  ;;  %v4040_v42 = vld [vmem:[%s12149_s3 + $0x40] sm:$0xff] }
 0x67c   : > { %10477 = vmatprep.subr.bf16.mxu1 %v10724_v23  ;;  %v4044_v11 = vld [vmem:[%s12149_s3 + $0x60] sm:$0xff] }
 0x67e   : > { %10456 = vmatpush3.bf16.msra.mxu0 %v10725_v0  ;;  %v10270_v0 = vcombine.high %v4040_v42, %v4044_v11 }
 0x67f   : > { %10478 = vmatpush3.bf16.msra.mxu1 %v10726_v31  ;;  %10457 = vmatprep.subr.bf16.mxu0 %v10727_v36  ;;  %v4045_v31 = vld [vmem:[%s12149_s3 + $0x68] sm:$0xff]  ;;  %v10269_v36 = vcombine.low %v4040_v42, %v4044_v11 }
 0x680   : > { %10479 = vmatprep.subr.bf16.mxu1 %v10728_v17  ;;  %v10271_v17 = vcombine.low %v4041_v51, %v4045_v31 }
 0x682   : > { %10458 = vmatpush3.bf16.msra.mxu0 %v10729_v46  ;;  %v10272_v46 = vcombine.high %v4041_v51, %v4045_v31 }
 0x683   : > { %10480 = vmatpush3.bf16.msra.mxu1 %v10730_v59  ;;  %10459 = vmatprep.subr.bf16.mxu0 %v10731_v7  ;;  %v4032_v59 = vld [vmem:[%s12149_s3] sm:$0xff] }
 0x684   : > { %10481 = vmatprep.subr.bf16.mxu1 %v10732_v2  ;;  %v4036_v7 = vld [vmem:[%s12149_s3 + $0x20] sm:$0xff]  ;;  %v4033_v2 = vld [vmem:[%s12149_s3 + $0x8] sm:$0xff] }
 0x686   : > { %10460 = vmatpush3.bf16.msra.mxu0 %v10733_v48  ;;  %v10261_v48 = vcombine.low %v4032_v59, %v4036_v7 }
 0x687   : > { %10482 = vmatpush3.bf16.msra.mxu1 %v10734_v21  ;;  %10461 = vmatprep.subr.bf16.mxu0 %v10735_v33  ;;  %v10262_v21 = vcombine.high %v4032_v59, %v4036_v7  ;;  %v4037_v33 = vld [vmem:[%s12149_s3 + $0x28] sm:$0xff] }
 0x688   : > { %10483 = vmatprep.subr.bf16.mxu1 %v10736_v37  ;;  %v14841_v37 = vmov 0   ;;  %v10264_v40 = vcombine.high %v4033_v2, %v4037_v33 }
 0x68a   : > { %10462 = vmatpush3.bf16.msra.mxu0 %v10737_v50  ;;  %v13032_v50 = vld [vmem:[%s12149_s3 + $0x50] sm:$0xff] }
 0x68b   : > { %10484 = vmatpush3.bf16.msra.mxu1 %v10738_v45  ;;  %10463 = vmatprep.subr.bf16.mxu0 %v10739_v55  ;;  %v13035_v45 = vld [vmem:[%s12149_s3 + $0x70] sm:$0xff]  ;;  %v10263_v55 = vcombine.low %v4033_v2, %v4037_v33 }
 0x68c   : > { %10485 = vmatprep.subr.bf16.mxu1 %v10740_v28  ;;  %v10273_v28 = vcombine.low %v13032_v50, %v13035_v45 }
 0x68e   : > { %10464 = vmatpush3.bf16.msra.mxu0 %v10741_v4  ;;  %v4047_v4 = vld [vmem:[%s12149_s3 + $0x78] sm:$0xff] }
 0x68f   : > { %10486 = vmatpush3.bf16.msra.mxu1 %v10742_v60  ;;  %4186 = vmatprep.subr.bf16.mxu0 %v10270_v0  ;;  %v10274_v60 = vcombine.high %v13032_v50, %v13035_v45  ;;  %v4034_v45 = vld [vmem:[%s12149_s3 + $0x10] sm:$0xff] }
 0x690   : > { %4227 = vmatprep.subr.bf16.mxu1 %v10272_v46 }
 0x691   : > { %v2528_v10 = vpop.f32.mrf.mxu0  ;;  %3984 = vmatmul.mubr.bf16.vlgmr.msra.gmra.mxu0 %v3355_v49  ;;  %v10275_v49 = vcombine.low %v4043_v34, %v4047_v4 }
 0x692   : > { %v2569_v41 = vpop.f32.mrf.mxu1  ;;  %4024 = vmatmul.mubr.bf16.vlgmr.msra.gmra.mxu1 %v3357_v53  ;;  %4187 = vmatpush1.bf16.msra.mxu0 %v10269_v36  ;;  %v10276_v53 = vcombine.high %v4043_v34, %v4047_v4  ;;  %v4038_v34 = vld [vmem:[%s12149_s3 + $0x30] sm:$0xff]  ;;  %v4035_v4 = vld [vmem:[%s12149_s3 + $0x18] sm:$0xff] }
 0x693   : > { %v13014_v3 = vadd.f32 %v2569_v41, %v2528_v10  ;;  %v2530_v62 = vpop.f32.mrf.mxu0  ;;  %4206 = vmatprep.mubr.bf16.mxu0 %v14841_v37  ;;  %4228 = vmatpush1.bf16.msra.mxu1 %v10271_v17 }
 0x694   : > { %v2571_v20 = vpop.f32.mrf.mxu1  ;;  %4247 = vmatprep.mubr.bf16.mxu1 %v14841_v37  ;;  %4188 = vmatprep.subr.bf16.mxu0 %v10262_v21 }
 0x695   : > { %15043 = vst [vmem:[#allocation63_spill] sm:$0xff] %v13014_v3  ;;  %v13016_v29 = vadd.f32 %v2571_v20, %v2530_v62  ;;  %v2532_v30 = vpop.f32.mrf.mxu0  ;;  %4229 = vmatprep.subr.bf16.mxu1 %v10264_v40 }
 0x696   : > { %v2573_v32 = vpop.f32.mrf.mxu1  ;;  %4189 = vmatpush1.bf16.msra.mxu0 %v10261_v48 }
 0x697   : > { %15044 = vst [vmem:[#allocation64_spill] sm:$0xff] %v13016_v29  ;;  %v2533_v19 = vpop.f32.mrf.mxu0  ;;  %4268 = vmatprep.subr.bf16.mxu0 %v10274_v60  ;;  %4230 = vmatpush1.bf16.msra.mxu1 %v10263_v55  ;;  %v4039_v60 = vld [vmem:[%s12149_s3 + $0x38] sm:$0xff] }
 0x698   : > { %v2574_v22 = vpop.f32.mrf.mxu1  ;;  %4309 = vmatprep.subr.bf16.mxu1 %v10276_v53 }
 0x6d1   : > { %v2610_v35 = vpop.f32.mrf.mxu0 }
 0x6d2   : > { %v2651_v1 = vpop.f32.mrf.mxu1 }
 0x6d3   : > { %v13018_v15 = vadd.f32 %v2651_v1, %v2610_v35  ;;  %v2612_v54 = vpop.f32.mrf.mxu0 }
 0x6d4   : > { %v2653_v25 = vpop.f32.mrf.mxu1 }
 0x6d5   : > { %15045 = vst [vmem:[#allocation65_spill] sm:$0xff] %v13018_v15  ;;  %v13020_v39 = vadd.f32 %v2653_v25, %v2612_v54  ;;  %v2614_v26 = vpop.f32.mrf.mxu0 }
 0x6d6   : > { %v2655_v16 = vpop.f32.mrf.mxu1 }
 0x6d7   : > { %15046 = vst [vmem:[#allocation66_spill] sm:$0xff] %v13020_v39  ;;  %v2615_v23 = vpop.f32.mrf.mxu0 }
 0x6d8   : > { %v2656_v5 = vpop.f32.mrf.mxu1 }
 0x711   : > { %v2692_v10 = vpop.f32.mrf.mxu0 }
 0x712   : > { %v2733_v41 = vpop.f32.mrf.mxu1 }
 0x713   : > { %v13044_v62 = vadd.f32 %v2733_v41, %v2692_v10  ;;  %v2694_v20 = vpop.f32.mrf.mxu0  ;;  %v10266_v10 = vcombine.high %v4034_v45, %v4038_v34  ;;  %v10268_v41 = vcombine.high %v4035_v4, %v4039_v60 }
 0x714   : > { %v2735_v30 = vpop.f32.mrf.mxu1 }
 0x715   : > { %15047 = vst [vmem:[#allocation67_spill] sm:$0xff] %v13044_v62  ;;  %v13046_v32 = vadd.f32 %v2735_v30, %v2694_v20  ;;  %v2696_v19 = vpop.f32.mrf.mxu0  ;;  %v10265_v30 = vcombine.low %v4034_v45, %v4038_v34 }
 0x716   : > { %v2737_v22 = vpop.f32.mrf.mxu1  ;;  %v10267_v19 = vcombine.low %v4035_v4, %v4039_v60 }
 0x717   : > { %15048 = vst [vmem:[#allocation68_spill] sm:$0xff] %v13046_v32  ;;  %v2697_v35 = vpop.f32.mrf.mxu0 }
 0x718   : > { %v2738_v1 = vpop.f32.mrf.mxu1 }
 0x719   : > { %v4048_v1 = vld [vmem:[%s762_s15] sm:$0xff] }
 0x71a   : > { %v4073_v60 = vrot.slane %v4048_v1, %v12506_v12 }
 0x731   : > { %v10421_v54 = vpop.f32.mrf.mxu0 }
 0x732   : > { %v10443_v25 = vpop.f32.mrf.mxu1 }
 0x733   : > { %v10422_v26 = vpop.f32.mrf.mxu0 }
 0x734   : > { %v10444_v16 = vpop.f32.mrf.mxu1  ;;  %v10423_v5 = vadd.f32 %v10422_v26, %v10421_v54  ;;  %v4053_v54 = vrot.slane %v4048_v1, %v12481_v58  ;;  %v4057_v26 = vrot.slane %v4048_v1, %v12473_v52 }
 0x735   : > { %v10424_v42 = vpop.f32.mrf.mxu0  ;;  %v10445_v0 = vadd.f32 %v10444_v16, %v10443_v25  ;;  %v4061_v25 = vrot.slane %v4048_v1, %v12491_v6 }
 0x736   : > { %v10446_v11 = vpop.f32.mrf.mxu1  ;;  %v4065_v42 = vrot.slane %v4048_v1, %v12470_v47 }
 0x737   : > { %v10425_v51 = vpop.f32.mrf.mxu0  ;;  %v3946_v46 = vadd.f32 %v10445_v0, %v10423_v5 }
 0x738   : > { %v10447_v23 = vpop.f32.mrf.mxu1 }
 0x751   : > { %v10465_v31 = vpop.f32.mrf.mxu0 }
 0x752   : > { %v10487_v36 = vpop.f32.mrf.mxu1 }
 0x753   : > { %v10466_v17 = vpop.f32.mrf.mxu0 }
 0x754   : > { %v10467_v59 = vadd.f32 %v10466_v17, %v10465_v31  ;;  %v10488_v7 = vpop.f32.mrf.mxu1 }
 0x755   : > { %v10468_v2 = vpop.f32.mrf.mxu0  ;;  %v10489_v21 = vadd.f32 %v10488_v7, %v10487_v36 }
 0x756   : > { %v3986_v48 = vadd.f32 %v10467_v59, %v3946_v46  ;;  %v10490_v33 = vpop.f32.mrf.mxu1 }
 0x757   : > { %v10469_v50 = vpop.f32.mrf.mxu0 }
 0x758   : > { %v4026_v55 = vadd.f32 %v10489_v21, %v3986_v48  ;;  %v10491_v40 = vpop.f32.mrf.mxu1  ;;  %v4069_v21 = vrot.slane %v4048_v1, %v12496_v8 }
 0x75a   : > { %v13052_v53 = vpack.c.bf16 %v4026_v55, %v4026_v55  ;;  %v4077_v55 = vrot.slane %v4048_v1, %v12509_v13 }
 0x75c   : > { %4571 = vrot.lane.b32.xlu0 %v13052_v53, %s11626_s0  ;;  %10277 = vmatmul.mubr.msk.bf16.vlgmr.msra.gmra.mxu0 %vm4170_vm4, %v13052_v53  ;;  %v13059_v20 = vshrl.u32 %v13052_v53, 16  ;;  %v5608_v22 = vrot.slane %v13052_v53, 1 }
 0x75d   : > { %10278 = vmatmul.mubr.msk.bf16.vlgmr.msra.gmra.mxu1 %vm4170_vm4, %v13052_v53  ;;  %4269 = vmatpush1.bf16.msra.mxu0 %v10273_v28 }
 0x75e   : > { %4310 = vmatpush1.bf16.msra.mxu1 %v10275_v49  ;;  %5085 = vrot.lane.b32.xlu1 %v13059_v20, %s11626_s0  ;;  %v6132_v35 = vrot.slane %v13059_v20, 1 }
 0x75f   : > { %4270 = vmatprep.subr.bf16.mxu0 %v10266_v10  ;;  %4311 = vmatprep.subr.bf16.mxu1 %v10268_v41 }
 0x760   : > { %4288 = vmatprep.mubr.bf16.mxu0 %v14841_v37  ;;  %4329 = vmatprep.mubr.bf16.mxu1 %v14841_v37 }
 0x761   : > { %4271 = vmatpush1.bf16.msra.mxu0 %v10265_v30 }
 0x762   : > { %4312 = vmatpush1.bf16.msra.mxu1 %v10267_v19  ;;  %4833 = vrot.lane.b32.xlu1 %v13052_v53, %s11627_s28  ;;  %v4081_v19 = vrot.slane %v4048_v1, %v12499_v9 }
 0x764   : > { %10279 = vmatmul.mubr.msk.bf16.vlgmr.msra.gmra.mxu0 %vm4170_vm4, %v13052_v53 }
 0x765   : > { %10280 = vmatmul.mubr.msk.bf16.vlgmr.msra.gmra.mxu1 %vm4170_vm4, %v13052_v53  ;;  %4653 = vmatprep.mubr.bf16.mxu0 %v14841_v37 }
 0x766   : > { %4696 = vmatprep.mubr.bf16.mxu1 %v14841_v37 }
 0x7ce   : > { %v4572_v28 = vpop.permute.xlu0 %4571 }
 0x7cf   : > { %4574 = vxpose.xlu0.c.b16.start.end [1/1] (short) (narrow) %v4572_v28, 16 }
 0x7d0   : > { %v5086_v49 = vpop.permute.xlu1 %5085 }
 0x7d1   : > { %5088 = vxpose.xlu1.c.b16.start.end [1/1] (short) (narrow) %v5086_v49, 16 }
 0x7d8   : > { %5609 = vrot.lane.b32.xlu0 %v5608_v22, %s11626_s0 }
 0x7dc   : > { %5359 = vrot.lane.b32.xlu0 %v13059_v20, %s11627_s28 }
 0x7e0   : > { %6133 = vrot.lane.b32.xlu0 %v6132_v35, %s11626_s0 }
 0x81c   : > { %v4208_v16 = vpop.f32.mrf.mxu0 }
 0x81d   : > { %v13091_v11 = vadd.f32 %v4208_v16, %v4053_v54  ;;  %v4249_v51 = vpop.f32.mrf.mxu1 }
 0x81e   : > { %v13093_v23 = vadd.f32 %v4249_v51, %v4061_v25  ;;  %v4210_v5 = vpop.f32.mrf.mxu0 }
 0x81f   : > { %v4346_v0 = vand.u32 2147483647, %v13091_v11  ;;  %v13096_v31 = vadd.f32 %v4210_v5, %v4057_v26  ;;  %v4251_v36 = vpop.f32.mrf.mxu1 }
 0x820   : > { %v4348_v17 = vand.u32 2147483647, %v13093_v23  ;;  %v13099_v46 = vadd.f32 %v4251_v36, %v4065_v42  ;;  %v4212_v59 = vpop.f32.mrf.mxu0 }
 0x821   : > { %v4354_v7 = vsub.f32 0.0, %v4346_v0  ;;  %v4347_v2 = vand.u32 2147483647, %v13096_v31  ;;  %v4253_v48 = vpop.f32.mrf.mxu1 }
 0x822   : > { %v4356_v33 = vsub.f32 0.0, %v4348_v17  ;;  %v4349_v50 = vand.u32 2147483647, %v13099_v46  ;;  %v4213_v45 = vpop.f32.mrf.mxu0 }
 0x823   : > { %v4362_v40 = vmul.f32 1.442695, %v4354_v7  ;;  %v4355_v34 = vsub.f32 0.0, %v4347_v2  ;;  %v4254_v4 = vpop.f32.mrf.mxu1 }
 0x824   : > { %v4366_v10 = vmul.f32 1.442695, %v4356_v33  ;;  %v4357_v41 = vsub.f32 0.0, %v4349_v50  ;;  %v4290_v30 = vpop.f32.mrf.mxu0 }
 0x825   : > { %10775 = vpow2.f32 %v4362_v40  ;;  %v4364_v28 = vmul.f32 1.442695, %v4355_v34  ;;  %v13107_v49 = vadd.f32 %v4290_v30, %v4069_v21  ;;  %v4331_v54 = vpop.f32.mrf.mxu1 }
 0x826   : > { %10777 = vpow2.f32 %v4366_v10  ;;  %v4368_v25 = vmul.f32 1.442695, %v4357_v41  ;;  %v13109_v26 = vadd.f32 %v4331_v54, %v4077_v55  ;;  %v4292_v16 = vpop.f32.mrf.mxu0 }
 0x827   : > { %10779 = vpow2.f32 %v4364_v28  ;;  %v4350_v42 = vand.u32 2147483647, %v13107_v49  ;;  %v13112_v51 = vadd.f32 %v4292_v16, %v4073_v60  ;;  %v4333_v5 = vpop.f32.mrf.mxu1 }
 0x828   : > { %10781 = vpow2.f32 %v4368_v25  ;;  %v4352_v0 = vand.u32 2147483647, %v13109_v26  ;;  %v13115_v1 = vadd.f32 %v4333_v5, %v4081_v19  ;;  %v4294_v36 = vpop.f32.mrf.mxu0 }
 0x829   : > { %v4358_v17 = vsub.f32 0.0, %v4350_v42  ;;  %v4351_v59 = vand.u32 2147483647, %v13112_v51  ;;  %v4335_v7 = vpop.f32.mrf.mxu1 }
 0x82a   : > { %v4360_v2 = vsub.f32 0.0, %v4352_v0  ;;  %v4353_v48 = vand.u32 2147483647, %v13115_v1  ;;  %v4295_v21 = vpop.f32.mrf.mxu0 }
 0x82b   : > { %v4370_v33 = vmul.f32 1.442695, %v4358_v17  ;;  %v4359_v50 = vsub.f32 0.0, %v4351_v59  ;;  %v4336_v45 = vpop.f32.mrf.mxu1  ;;  %v4338_v21 = vmax.f32 %v13091_v11, 0.0 }
 0x82c   : > { %v4374_v55 = vmul.f32 1.442695, %v4360_v2  ;;  %v4361_v40 = vsub.f32 0.0, %v4353_v48  ;;  %v4340_v45 = vmax.f32 %v13093_v23, 0.0 }
 0x82d   : > { %10783 = vpow2.f32 %v4370_v33  ;;  %v4372_v34 = vmul.f32 1.442695, %v4359_v50 }
 0x82e   : > { %10785 = vpow2.f32 %v4374_v55  ;;  %v4376_v4 = vmul.f32 1.442695, %v4361_v40 }
 0x82f   : > { %10787 = vpow2.f32 %v4372_v34 }
 0x830   : > { %10789 = vpow2.f32 %v4376_v4 }
 0x831   : > { %v13121_v40 = vpop.trf.xlu0 }
 0x832   : > { %v10776_v60 = vpop.eup %10775 }
 0x833   : > { %v10778_v10 = vpop.eup %10777  ;;  %v4378_v41 = vadd.f32 1.0, %v10776_v60  ;;  %v4339_v60 = vmax.f32 %v13096_v31, 0.0 }
 0x834   : > { %v10780_v30 = vpop.eup %10779  ;;  %v4380_v19 = vadd.f32 1.0, %v10778_v10 }
 0x835   : > { %v10782_v28 = vpop.eup %10781  ;;  %10791 = vlog2.f32 %v4378_v41  ;;  %v4379_v54 = vadd.f32 1.0, %v10780_v30  ;;  %v4341_v30 = vmax.f32 %v13099_v46, 0.0  ;;  %v13141_v46 = vsel %vm4594_vm5, 65535, %v14841_v37 }
 0x836   : > { %10793 = vlog2.f32 %v4380_v19  ;;  %v4381_v25 = vadd.f32 1.0, %v10782_v28 }
 0x837   : > { %10795 = vlog2.f32 %v4379_v54 }
 0x838   : > { %10797 = vlog2.f32 %v4381_v25 }
 0x83a   : > { %v10784_v16 = vpop.eup %10783 }
 0x83b   : > { %v10786_v42 = vpop.eup %10785  ;;  %v4382_v5 = vadd.f32 1.0, %v10784_v16 }
 0x83c   : > { %v10788_v0 = vpop.eup %10787  ;;  %v4384_v36 = vadd.f32 1.0, %v10786_v42 }
 0x83d   : > { %v10790_v17 = vpop.eup %10789  ;;  %10799 = vlog2.f32 %v4382_v5  ;;  %v4383_v59 = vadd.f32 1.0, %v10788_v0 }
 0x83e   : > { %10801 = vlog2.f32 %v4384_v36  ;;  %v4385_v7 = vadd.f32 1.0, %v10790_v17  ;;  %v4342_v36 = vmax.f32 %v13107_v49, 0.0  ;;  %v4345_v49 = vmax.f32 %v13115_v1, 0.0 }
 0x83f   : > { %10803 = vlog2.f32 %v4383_v59 }
 0x840   : > { %10805 = vlog2.f32 %v4385_v7 }
 0x842   : > { %v10792_v2 = vpop.eup %10791 }
 0x843   : > { %v10794_v48 = vpop.eup %10793  ;;  %v4387_v33 = vmul.f32 0.6931472, %v10792_v2 }
 0x844   : > { %v10796_v50 = vpop.eup %10795  ;;  %v4391_v55 = vmul.f32 0.6931472, %v10794_v48  ;;  %v4344_v48 = vmax.f32 %v13109_v26, 0.0 }
 0x845   : > { %v10798_v34 = vpop.eup %10797  ;;  %v13123_v4 = vadd.f32 %v4387_v33, %v4338_v21  ;;  %v4389_v10 = vmul.f32 0.6931472, %v10796_v50  ;;  %v4343_v33 = vmax.f32 %v13112_v51, 0.0 }
 0x846   : > { %v13126_v41 = vadd.f32 %v4391_v55, %v4340_v45  ;;  %v4393_v19 = vmul.f32 0.6931472, %v10798_v34 }
 0x847   : > { %v13129_v28 = vadd.f32 %v4389_v10, %v4339_v60  ;;  %v4474_v11 = vmul.f32 %v13123_v4, %v12953_v56 }
 0x848   : > { %v13133_v23 = vadd.f32 %v4393_v19, %v4341_v30  ;;  %v4476_v54 = vmul.f32 %v13126_v41, %v12957_v18 }
 0x849   : > { %v4475_v31 = vmul.f32 %v13129_v28, %v12894_v63  ;;  %v13145_v5 = vpack.c.bf16 %v4474_v11, %v4474_v11 }
 0x84a   : > { %v10800_v25 = vpop.eup %10799  ;;  %v5610_v16 = vpop.permute.xlu0 %5609  ;;  %v4477_v42 = vmul.f32 %v13133_v23, %v12900_v57  ;;  %v13150_v7 = vpack.c.bf16 %v4476_v54, %v4476_v54 }
 0x84b   : > { %15049 = vst [vmem:[#allocation69_spill] sm:$0xff] %v13145_v5  ;;  %v10802_v0 = vpop.eup %10801  ;;  %v4395_v17 = vmul.f32 0.6931472, %v10800_v25  ;;  %5612 = vxpose.xlu1.c.b16.start.end [1/1] (short) (narrow) %v5610_v16, 16  ;;  %v13148_v59 = vpack.c.bf16 %v4475_v31, %v4475_v31  ;;  %v4598_v51 = vand.u32 %v13141_v46, %v13145_v5  ;;  %v6648_v16 = vrot.slane %v13052_v53, 2 }
 0x84c   : > { %15051 = vst [vmem:[#allocation71_spill] sm:$0xff] %v13150_v7  ;;  %v10804_v2 = vpop.eup %10803  ;;  %v4399_v21 = vmul.f32 0.6931472, %v10802_v0  ;;  %v13154_v50 = vpack.c.bf16 %v4477_v42, %v4477_v42  ;;  %v4604_v1 = vand.u32 %v13141_v46, %v13150_v7 }
 0x84d   : > { %15050 = vst [vmem:[#allocation70_spill] sm:$0xff] %v13148_v59  ;;  %v10806_v45 = vpop.eup %10805  ;;  %v13156_v55 = vadd.f32 %v4395_v17, %v4342_v36  ;;  %v4397_v34 = vmul.f32 0.6931472, %v10804_v2  ;;  %v4601_v60 = vand.u32 %v13141_v46, %v13148_v59 }
 0x84e   : > { %15052 = vst [vmem:[#allocation72_spill] sm:$0xff] %v13154_v50  ;;  %v13161_v10 = vadd.f32 %v4399_v21, %v4344_v48  ;;  %v4401_v30 = vmul.f32 0.6931472, %v10806_v45  ;;  %v13163_v19 = vpop.permute.xlu0 %5359  ;;  %v4607_v26 = vand.u32 %v13141_v46, %v13154_v50 }
 0x84f   : > { %15053 = vst [vmem:[#allocation73_spill] sm:$0xff] %v13156_v55  ;;  %15055 = vst [vmem:[#allocation75_spill] sm:$0xff] %v13163_v19  ;;  %v13169_v11 = vadd.f32 %v4397_v34, %v4343_v33  ;;  %5883 = vrot.lane.b32.xlu1 %v5608_v22, %s11627_s28  ;;  %4635 = vmatprep.subr.bf16.mxu0 %v4601_v60  ;;  %v4478_v54 = vmul.f32 %v13156_v55, %v13005_v44 }
 0x850   : > { %15054 = vst [vmem:[#allocation74_spill] sm:$0xff] %v13161_v10  ;;  %v13178_v31 = vadd.f32 %v4401_v30, %v4345_v49  ;;  %4678 = vmatprep.subr.bf16.mxu1 %v4607_v26  ;;  %4636 = vmatpush1.bf16.msra.mxu0 %v4598_v51  ;;  %v4480_v25 = vmul.f32 %v13161_v10, %v13008_v61  ;;  %v7164_v49 = vrot.slane %v13059_v20, 2  ;;  %v7680_v51 = vrot.slane %v13052_v53, 3  ;;  %v4410_v53 = vld [vmem:[%s12157_s30] sm:$0xff] }
 0x851   : > { %15056 = vst [vmem:[#allocation76_spill] sm:$0xff] %v13169_v11  ;;  %4679 = vmatpush1.bf16.msra.mxu1 %v4604_v1  ;;  %v4479_v22 = vmul.f32 %v13169_v11, %v12961_v14  ;;  %v13187_v36 = vpack.c.bf16 %v4478_v54, %v4478_v54  ;;  %v4416_v14 = vld [vmem:[%s12157_s30 + $0x30] sm:$0xff] }
 0x852   : > { %15057 = vst [vmem:[#allocation77_spill] sm:$0xff] %v13178_v31  ;;  %v6134_v42 = vpop.permute.xlu0 %6133  ;;  %v4481_v0 = vmul.f32 %v13178_v31, %v12965_v24  ;;  %v13192_v2 = vpack.c.bf16 %v4480_v25, %v4480_v25  ;;  %v14840_v25 = vrot.slane %v13059_v20, 3  ;;  %v4422_v24 = vld [vmem:[%s12157_s30 + $0x60] sm:$0xff] }
 0x853   : > { %15058 = vst [vmem:[#allocation78_spill] sm:$0xff] %v13187_v36  ;;  %6649 = vrot.lane.b32.xlu1 %v6648_v16, %s11626_s0  ;;  %6136 = vxpose.xlu0.c.b16.start.end [1/1] (short) (narrow) %v6134_v42, 16  ;;  %v13190_v17 = vpack.c.bf16 %v4479_v22, %v4479_v22  ;;  %v4610_v45 = vand.u32 %v13141_v46, %v13187_v36  ;;  %v4411_v22 = vld [vmem:[%s12157_s30 + $0x8] sm:$0xff]  ;;  %v4426_v42 = vmul.f32 1.442695, %v4410_v53 }
 0x854   : > { %15060 = vst [vmem:[#allocation80_spill] sm:$0xff] %v13192_v2  ;;  %10281 = vmatmul.mubr.msk.bf16.vlgmr.msra.gmra.mxu0 %vm4590_vm6, %v13121_v40  ;;  %10282 = vmatmul.mubr.msk.bf16.vlgmr.msra.gmra.mxu1 %vm4590_vm6, %v13121_v40  ;;  %v13198_v48 = vpack.c.bf16 %v4481_v0, %v4481_v0  ;;  %v4616_v34 = vand.u32 %v13141_v46, %v13192_v2  ;;  %v4413_v0 = vld [vmem:[%s12157_s30 + $0x18] sm:$0xff] }
 0x855   : > { %15059 = vst [vmem:[#allocation79_spill] sm:$0xff] %v13190_v17  ;;  %v4613_v21 = vand.u32 %v13141_v46, %v13190_v17  ;;  %4739 = vmatprep.mubr.bf16.mxu0 %v14841_v37  ;;  %4782 = vmatprep.mubr.bf16.mxu1 %v14841_v37  ;;  %10807 = vpow2.f32 %v4426_v42  ;;  %v4436_v42 = vmul.f32 1.442695, %v4415_v38 }
 0x856   : > { %15061 = vst [vmem:[#allocation81_spill] sm:$0xff] %v13198_v48  ;;  %v4619_v33 = vand.u32 %v13141_v46, %v13198_v48 }
 0x857   : > { %6399 = vrot.lane.b32.xlu1 %v6132_v35, %s11627_s28  ;;  %4721 = vmatprep.subr.bf16.mxu0 %v4613_v21  ;;  %v13222_v35 = vpop.permute.xlu1 %4833 }
 0x858   : > { %4764 = vmatprep.subr.bf16.mxu1 %v4619_v33  ;;  %4722 = vmatpush1.bf16.msra.mxu0 %v4610_v45  ;;  %v4418_v33 = vld [vmem:[%s12157_s30 + $0x40] sm:$0xff]  ;;  %v4428_v45 = vmul.f32 1.442695, %v4411_v22  ;;  %v4417_v22 = vld [vmem:[%s12157_s30 + $0x38] sm:$0xff] }
 0x859   : > { %4765 = vmatpush1.bf16.msra.mxu1 %v4616_v34  ;;  %v4420_v34 = vld [vmem:[%s12157_s30 + $0x50] sm:$0xff]  ;;  %v4440_v61 = vmul.f32 1.442695, %v4417_v22  ;;  %v4493_v22 = vrot.slane %v13123_v4, %v12481_v58 }
 0x85b   : > { %v13224_v60 = vpop.trf.xlu1 }
 0x85c   : > { %10283 = vmatmul.mubr.msk.bf16.vlgmr.msra.gmra.mxu0 %vm4590_vm6, %v13121_v40  ;;  %10284 = vmatmul.mubr.msk.bf16.vlgmr.msra.gmra.mxu1 %vm4590_vm6, %v13121_v40 }
 0x85d   : > { %7165 = vrot.lane.b32.xlu0 %v7164_v49, %s11626_s0  ;;  %4871 = vmatprep.mubr.bf16.mxu0 %v14841_v37 }
 0x85e   : > { %4912 = vmatprep.mubr.bf16.mxu1 %v14841_v37  ;;  %v4414_v37 = vld [vmem:[%s12157_s30 + $0x20] sm:$0xff] }
 0x861   : > { %6915 = vrot.lane.b32.xlu0 %v6648_v16, %s11627_s28  ;;  %v4412_v16 = vld [vmem:[%s12157_s30 + $0x10] sm:$0xff] }
 0x862   : > { %v4430_v21 = vmul.f32 1.442695, %v4412_v16 }
 0x864   : > { %10809 = vpow2.f32 %v4430_v21  ;;  %v4450_v21 = vmul.f32 1.442695, %v4422_v24 }
 0x865   : > { %10811 = vpow2.f32 %v4428_v45 }
 0x8ad   : > { %v13226_v30 = vpop.trf.xlu1 }
 0x8ae   : > { %15062 = vst [vmem:[#allocation82_spill] sm:$0xff] %v13226_v30 }
 0x8b5   : > { %v13231_v1 = vpop.trf.xlu0 }
 0x8b6   : > { %15064 = vst [vmem:[#allocation84_spill] sm:$0xff] %v13231_v1 }
 0x8c1   : > { %v13228_v26 = vpop.permute.xlu1 %5883 }
 0x8c2   : > { %15063 = vst [vmem:[#allocation83_spill] sm:$0xff] %v13228_v26 }
 0x8c5   : > { %v6650_v40 = vpop.permute.xlu1 %6649 }
 0x8c6   : > { %6652 = vxpose.xlu1.c.b16.start.end [1/1] (short) (narrow) %v6650_v40, 16  ;;  %v4419_v40 = vld [vmem:[%s12157_s30 + $0x48] sm:$0xff] }
 0x8c7   : > { %v4444_v53 = vmul.f32 1.442695, %v4419_v40  ;;  %v4425_v40 = vld [vmem:[%s12157_s30 + $0x78] sm:$0xff] }
 0x8ca   : > { %7681 = vrot.lane.b32.xlu1 %v7680_v51, %s11626_s0 }
 0x8ce   : > { %7431 = vrot.lane.b32.xlu1 %v7164_v49, %s11627_s28  ;;  %v4432_v49 = vmul.f32 1.442695, %v4413_v0  ;;  %v4434_v0 = vmul.f32 1.442695, %v4414_v37  ;;  %v10808_v37 = vpop.eup %10807 }
 0x8cf   : > { %v7166_v54 = vpop.permute.xlu0 %7165 }
 0x8d0   : > { %7168 = vxpose.xlu0.c.b16.start.end [1/1] (short) (narrow) %v7166_v54, 16  ;;  %v4442_v54 = vmul.f32 1.442695, %v4418_v33  ;;  %10813 = vpow2.f32 %v4432_v49  ;;  %v4424_v33 = vld [vmem:[%s12157_s30 + $0x70] sm:$0xff]  ;;  %v4456_v49 = vmul.f32 1.442695, %v4425_v40 }
 0x8d1   : > { %v4454_v45 = vmul.f32 1.442695, %v4424_v33 }
 0x8d2   : > { %10815 = vpow2.f32 %v4442_v54  ;;  %v4438_v54 = vmul.f32 1.442695, %v4416_v14  ;;  %v4497_v14 = vrot.slane %v13129_v28, %v12481_v58 }
 0x8d9   : > { %8197 = vrot.lane.b32.xlu0 %v14840_v25, %s11626_s0  ;;  %v4421_v25 = vld [vmem:[%s12157_s30 + $0x58] sm:$0xff] }
 0x8da   : > { %v4448_v16 = vmul.f32 1.442695, %v4421_v25 }
 0x8dd   : > { %7947 = vrot.lane.b32.xlu0 %v7680_v51, %s11627_s28  ;;  %v4446_v51 = vmul.f32 1.442695, %v4420_v34  ;;  %v4423_v34 = vld [vmem:[%s12157_s30 + $0x68] sm:$0xff] }
 0x8de   : > { %v4452_v25 = vmul.f32 1.442695, %v4423_v34 }
 0x8df   : > { %10817 = vpow2.f32 %v4446_v51  ;;  %v10810_v51 = vpop.eup %10809 }
 0x8e0   : > { %10819 = vpow2.f32 %v4444_v53  ;;  %v10812_v38 = vpop.eup %10811  ;;  %v13281_v63 = vsub.f32 0.0, %v10810_v51  ;;  %v4513_v51 = vrot.slane %v13169_v11, %v12481_v58 }
 0x8e1   : > { %10821 = vpow2.f32 %v4448_v16  ;;  %v10814_v53 = vpop.eup %10813  ;;  %v13256_v16 = vsub.f32 0.0, %v10808_v37 }
 0x8e2   : > { %10823 = vpow2.f32 %v4434_v0  ;;  %v10816_v24 = vpop.eup %10815  ;;  %v13264_v33 = vsub.f32 0.0, %v10814_v53 }
 0x8e3   : > { %10825 = vpow2.f32 %v4436_v42 }
 0x8e4   : > { %10827 = vpow2.f32 %v4440_v61  ;;  %v13260_v61 = vsub.f32 0.0, %v10812_v38  ;;  %15066 = vst [vmem:[#allocation86_spill] sm:$0xff] %v13264_v33 }
 0x8e5   : > { %10829 = vpow2.f32 %v4450_v21  ;;  %v4505_v21 = vrot.slane %v13133_v23, %v12481_v58 }
 0x8e6   : > { %10831 = vpow2.f32 %v4454_v45  ;;  %15065 = vst [vmem:[#allocation85_spill] sm:$0xff] %v13260_v61  ;;  %v13268_v45 = vsub.f32 0.0, %v10816_v24  ;;  %v4523_v38 = vmul.f32 %v4497_v14, %v13260_v61 }
 0x8e7   : > { %10833 = vpow2.f32 %v4452_v25  ;;  %v4522_v25 = vmul.f32 %v4493_v22, %v13256_v16  ;;  %v4525_v57 = vmul.f32 %v4505_v21, %v13264_v33 }
 0x8e8   : > { %10835 = vpow2.f32 %v4456_v49  ;;  %v4501_v49 = vrot.slane %v13126_v41, %v12481_v58  ;;  %v4530_v56 = vmul.f32 %v4493_v22, %v13268_v45  ;;  %v4540_v15 = vmul.f32 1.442695, %v4523_v38 }
 0x8e9   : > { %10837 = vpow2.f32 %v4438_v54  ;;  %v4538_v62 = vmul.f32 1.442695, %v4522_v25  ;;  %v4544_v43 = vmul.f32 1.442695, %v4525_v57 }
 0x8ea   : > { %v4524_v9 = vmul.f32 %v4501_v49, %v13281_v63  ;;  %v4554_v38 = vmul.f32 1.442695, %v4530_v56 }
 0x8eb   : > { %10839 = vpow2.f32 %v4538_v62 }
 0x8ec   : > { %v10818_v0 = vpop.eup %10817  ;;  %10841 = vpow2.f32 %v4540_v15 }
 0x8ed   : > { %v10820_v42 = vpop.eup %10819  ;;  %v13273_v54 = vsub.f32 0.0, %v10818_v0  ;;  %10843 = vpow2.f32 %v4544_v43 }
 0x8ee   : > { %v10822_v34 = vpop.eup %10821  ;;  %v13276_v44 = vsub.f32 0.0, %v10820_v42  ;;  %v4509_v42 = vrot.slane %v13156_v55, %v12481_v58  ;;  %10845 = vpow2.f32 %v4554_v38 }
 0x8ef   : > { %v10824_v40 = vpop.eup %10823  ;;  %15067 = vst [vmem:[#allocation87_spill] sm:$0xff] %v13273_v54  ;;  %v13279_v18 = vsub.f32 0.0, %v10822_v34  ;;  %v4532_v0 = vmul.f32 %v4501_v49, %v13273_v54 }
 0x8f0   : > { %v10826_v37 = vpop.eup %10825  ;;  %15068 = vst [vmem:[#allocation88_spill] sm:$0xff] %v13276_v44  ;;  %v13285_v39 = vsub.f32 0.0, %v10824_v40  ;;  %v4531_v29 = vmul.f32 %v4497_v14, %v13276_v44  ;;  %v4521_v40 = vrot.slane %v13178_v31, %v12481_v58 }
 0x8f1   : > { %v10828_v53 = vpop.eup %10827  ;;  %15069 = vst [vmem:[#allocation89_spill] sm:$0xff] %v13279_v18  ;;  %v13290_v3 = vsub.f32 0.0, %v10826_v37  ;;  %v4533_v22 = vmul.f32 %v4505_v21, %v13279_v18  ;;  %v4558_v12 = vmul.f32 1.442695, %v4532_v0  ;;  %v4517_v21 = vrot.slane %v13161_v10, %v12481_v58 }
 0x8f2   : > { %v10830_v24 = vpop.eup %10829  ;;  %15070 = vst [vmem:[#allocation90_spill] sm:$0xff] %v13285_v39  ;;  %v13295_v25 = vsub.f32 0.0, %v10828_v53  ;;  %v4526_v57 = vmul.f32 %v4509_v42, %v13285_v39  ;;  %v4556_v53 = vmul.f32 1.442695, %v4531_v29 }
 0x8f3   : > { %v10832_v32 = vpop.eup %10831  ;;  %15071 = vst [vmem:[#allocation91_spill] sm:$0xff] %v13290_v3  ;;  %v13300_v13 = vsub.f32 0.0, %v10830_v24  ;;  %v4527_v8 = vmul.f32 %v4513_v51, %v13290_v3  ;;  %v4560_v56 = vmul.f32 1.442695, %v4533_v22  ;;  %v4542_v24 = vmul.f32 1.442695, %v4524_v9 }
 0x8f4   : > { %v10834_v34 = vpop.eup %10833  ;;  %15072 = vst [vmem:[#allocation92_spill] sm:$0xff] %v13295_v25  ;;  %v13302_v14 = vsub.f32 0.0, %v10832_v32  ;;  %v4529_v49 = vmul.f32 %v4521_v40, %v13295_v25  ;;  %10847 = vpow2.f32 %v4558_v12  ;;  %v4546_v58 = vmul.f32 1.442695, %v4526_v57 }
 0x8f5   : > { %v10836_v27 = vpop.eup %10835  ;;  %15073 = vst [vmem:[#allocation93_spill] sm:$0xff] %v13300_v13  ;;  %v13308_v47 = vsub.f32 0.0, %v10834_v34  ;;  %v4534_v0 = vmul.f32 %v4509_v42, %v13300_v13  ;;  %10849 = vpow2.f32 %v4556_v53  ;;  %v4548_v15 = vmul.f32 1.442695, %v4527_v8 }
 0x8f6   : > { %15074 = vst [vmem:[#allocation94_spill] sm:$0xff] %v13302_v14  ;;  %v10838_v37 = vpop.eup %10837  ;;  %v13311_v32 = vsub.f32 0.0, %v10836_v27  ;;  %v4536_v29 = vmul.f32 %v4517_v21, %v13302_v14  ;;  %10851 = vpow2.f32 %v4560_v56  ;;  %v4552_v43 = vmul.f32 1.442695, %v4529_v49 }
 0x8f7   : > { %15075 = vst [vmem:[#allocation95_spill] sm:$0xff] %v13308_v47  ;;  %v13313_v62 = vsub.f32 0.0, %v10838_v37  ;;  %v4535_v34 = vmul.f32 %v4513_v51, %v13308_v47  ;;  %10853 = vpow2.f32 %v4542_v24  ;;  %v4562_v27 = vmul.f32 1.442695, %v4534_v0 }
 0x8f8   : > { %15076 = vst [vmem:[#allocation96_spill] sm:$0xff] %v13311_v32  ;;  %v4537_v22 = vmul.f32 %v4521_v40, %v13311_v32  ;;  %10855 = vpow2.f32 %v4546_v58  ;;  %v4566_v38 = vmul.f32 1.442695, %v4536_v29  ;;  %v10840_v8 = vpop.eup %10839 }
 0x8f9   : > { %15077 = vst [vmem:[#allocation97_spill] sm:$0xff] %v13313_v62  ;;  %v4528_v9 = vmul.f32 %v4517_v21, %v13313_v62  ;;  %10857 = vpow2.f32 %v4548_v15  ;;  %v4564_v42 = vmul.f32 1.442695, %v4535_v34  ;;  %v10842_v51 = vpop.eup %10841  ;;  %v4793_v26 = vmul.f32 0.0, %v10840_v8 }
 0x8fa   : > { %10859 = vpow2.f32 %v4552_v43  ;;  %v4568_v12 = vmul.f32 1.442695, %v4537_v22  ;;  %v10844_v57 = vpop.eup %10843 }
 0x8fb   : > { %v4550_v37 = vmul.f32 1.442695, %v4528_v9  ;;  %10861 = vpow2.f32 %v4562_v27  ;;  %v10846_v40 = vpop.eup %10845 }
 0x8fc   : > { %10863 = vpow2.f32 %v4566_v38  ;;  %v4801_v43 = vmul.f32 0.0, %v10846_v40  ;;  %v4794_v38 = vmul.f32 0.0, %v10842_v51 }
 0x8fd   : > { %10865 = vpow2.f32 %v4564_v42  ;;  %v4796_v42 = vmul.f32 0.0, %v10844_v57 }
 0x8fe   : > { %10867 = vpow2.f32 %v4568_v12 }
 0x8ff   : > { %10869 = vpow2.f32 %v4550_v37 }
 0x901   : > { %v10848_v53 = vpop.eup %10847 }
 0x902   : > { %v10850_v49 = vpop.eup %10849  ;;  %v4803_v9 = vmul.f32 0.0, %v10848_v53 }
 0x903   : > { %v10852_v58 = vpop.eup %10851  ;;  %v4802_v12 = vmul.f32 0.0, %v10850_v49 }
 0x904   : > { %v10854_v29 = vpop.eup %10853  ;;  %v4804_v1 = vmul.f32 0.0, %v10852_v58 }
 0x905   : > { %v10856_v15 = vpop.eup %10855  ;;  %v4795_v6 = vmul.f32 0.0, %v10854_v29 }
 0x906   : > { %v10858_v27 = vpop.eup %10857 }
 0x907   : > { %v10860_v37 = vpop.eup %10859 }
 0x908   : > { %v10862_v14 = vpop.eup %10861 }
 0x909   : > { %v10864_v57 = vpop.eup %10863 }
 0x914   : > { %v4655_v56 = vpop.f32.mrf.mxu0  ;;  %v4698_v21 = vpop.f32.mrf.mxu1 }
 0x915   : > { %v13332_v49 = vadd.f32 %v4793_v26, %v4655_v56  ;;  %v13334_v8 = vadd.f32 %v4795_v6, %v4698_v21  ;;  %v13345_v56 = vshrl.u32 %v13148_v59, 16 }
 0x916   : > { %v4657_v24 = vpop.f32.mrf.mxu0  ;;  %v4700_v0 = vpop.f32.mrf.mxu1 }
 0x917   : > { %v13324_v13 = vadd.f32 %v4794_v38, %v4657_v24  ;;  %v13326_v40 = vadd.f32 %v4796_v42, %v4700_v0  ;;  %15083 = vst [vmem:[#allocation103_spill] sm:$0xff] %v13334_v8  ;;  %15084 = vst [vmem:[#allocation104_spill] sm:$0xff] %v13345_v56  ;;  %v4807_v38 = vmul.f32 0.0, %v10864_v57  ;;  %v13348_v42 = vshrl.u32 %v13154_v50, 16 }
 0x918   : > { %v4659_v34 = vpop.f32.mrf.mxu0  ;;  %v4702_v22 = vpop.f32.mrf.mxu1 }
 0x919   : > { %v13320_v30 = vadd.f32 %v4801_v43, %v4659_v34  ;;  %v13322_v19 = vadd.f32 %v4803_v9, %v4702_v22  ;;  %15079 = vst [vmem:[#allocation99_spill] sm:$0xff] %v13324_v13  ;;  %15080 = vst [vmem:[#allocation100_spill] sm:$0xff] %v13326_v40  ;;  %v10866_v34 = vpop.eup %10865  ;;  %v4805_v22 = vmul.f32 0.0, %v10862_v14 }
 0x91a   : > { %v4661_v32 = vpop.f32.mrf.mxu0  ;;  %v4704_v47 = vpop.f32.mrf.mxu1  ;;  %15085 = vst [vmem:[#allocation105_spill] sm:$0xff] %v13348_v42 }
 0x91b   : > { %15078 = vst [vmem:[#allocation98_spill] sm:$0xff] %v13322_v19  ;;  %v13328_v53 = vadd.f32 %v4802_v12, %v4661_v32  ;;  %v13330_v51 = vadd.f32 %v4804_v1, %v4704_v47  ;;  %v10868_v0 = vpop.eup %10867  ;;  %v4825_v32 = vpack.c.bf16 %v13320_v30, %v13332_v49  ;;  %v4827_v47 = vpack.c.bf16 %v13322_v19, %v13334_v8 }
 0x91c   : > { %v4741_v58 = vpop.f32.mrf.mxu0  ;;  %v4784_v29 = vpop.f32.mrf.mxu1  ;;  %v4798_v12 = vmul.f32 0.0, %v10858_v27 }
 0x91d   : > { %15081 = vst [vmem:[#allocation101_spill] sm:$0xff] %v13328_v53  ;;  %15082 = vst [vmem:[#allocation102_spill] sm:$0xff] %v13330_v51  ;;  %v4826_v43 = vpack.c.bf16 %v13328_v53, %v13324_v13  ;;  %v4828_v24 = vpack.c.bf16 %v13330_v51, %v13326_v40  ;;  %v10870_v6 = vpop.eup %10869  ;;  %v4800_v51 = vmul.f32 0.0, %v10860_v37  ;;  %v4806_v40 = vmul.f32 0.0, %v10866_v34 }
 0x91e   : > { %v4743_v26 = vpop.f32.mrf.mxu0  ;;  %v4786_v1 = vpop.f32.mrf.mxu1  ;;  %v4808_v53 = vmul.f32 0.0, %v10868_v0  ;;  %v4797_v13 = vmul.f32 0.0, %v10856_v15  ;;  %v15086_v37 = vmov 0   ;;  %v13388_v34 = vshrl.u32 %v13150_v7, 16 }
 0x91f   : > { %4853 = vmatprep.subr.bf16.mxu0 %v4826_v43  ;;  %4894 = vmatprep.subr.bf16.mxu1 %v4828_v24  ;;  %v4799_v43 = vmul.f32 0.0, %v10870_v6  ;;  %v13354_v8 = vadd.f32 %v4798_v12, %v4743_v26  ;;  %v13356_v57 = vadd.f32 %v4800_v51, %v4786_v1  ;;  %v13391_v0 = vshrl.u32 %v13190_v17, 16  ;;  %v13416_v12 = vpop.permute.xlu1 %6399 }
 0x920   : > { %v4745_v21 = vpop.f32.mrf.mxu0  ;;  %v4788_v9 = vpop.f32.mrf.mxu1  ;;  %4854 = vmatpush1.bf16.msra.mxu0 %v4825_v32  ;;  %4895 = vmatpush1.bf16.msra.mxu1 %v4827_v47  ;;  %v13364_v27 = vadd.f32 %v4797_v13, %v4741_v58  ;;  %v5127_v58 = vand.u32 %v13345_v56, %v13141_v46  ;;  %15088 = vst [vmem:[#allocation107_spill] sm:$0xff] %v13388_v34  ;;  %v13394_v26 = vshrl.u32 %v13198_v48, 16  ;;  %15093 = vst [vmem:[#allocation112_spill] sm:$0xff] %v13416_v12  ;;  %v15103_v56 = vld [vmem:[#allocation94_spill] sm:$0xff] }
 0x921   : > { %v13350_v24 = vadd.f32 %v4805_v22, %v4745_v21  ;;  %v13352_v59 = vadd.f32 %v4807_v38, %v4788_v9  ;;  %v13366_v15 = vadd.f32 %v4799_v43, %v4784_v29  ;;  %v5133_v29 = vand.u32 %v13348_v42, %v13141_v46  ;;  %15089 = vst [vmem:[#allocation108_spill] sm:$0xff] %v13391_v0  ;;  %v15102_v42 = vld [vmem:[#allocation93_spill] sm:$0xff] }
 0x922   : > { %v4747_v19 = vpop.f32.mrf.mxu0  ;;  %v4790_v14 = vpop.f32.mrf.mxu1  ;;  %15090 = vst [vmem:[#allocation109_spill] sm:$0xff] %v13394_v26  ;;  %v5130_v6 = vand.u32 %v13388_v34, %v13141_v46  ;;  %v5139_v21 = vand.u32 %v13391_v0, %v13141_v46  ;;  %v5145_v22 = vand.u32 %v13394_v26, %v13141_v46  ;;  %v13410_v9 = vshrl.u32 %v13187_v36, 16 }
 0x923   : > { %v13358_v32 = vadd.f32 %v4806_v40, %v4747_v19  ;;  %v13360_v47 = vadd.f32 %v4808_v53, %v4790_v14  ;;  %10285 = vmatmul.mubr.msk.bf16.vlgmr.msra.gmra.mxu0 %vm4835_vm7, %v13222_v35  ;;  %10286 = vmatmul.mubr.msk.bf16.vlgmr.msra.gmra.mxu1 %vm4835_vm7, %v13222_v35  ;;  %v4829_v40 = vpack.c.bf16 %v13350_v24, %v13364_v27  ;;  %v13381_v53 = vshrl.u32 %v13145_v5, 16 }
 0x924   : > { %4953 = vmatprep.mubr.bf16.mxu0 %v15086_v37  ;;  %4994 = vmatprep.mubr.bf16.mxu1 %v15086_v37  ;;  %v4831_v13 = vpack.c.bf16 %v13352_v59, %v13366_v15  ;;  %15091 = vst [vmem:[#allocation110_spill] sm:$0xff] %v13410_v9  ;;  %v13414_v38 = vshrl.u32 %v13192_v2, 16 }
 0x925   : > { %v4830_v51 = vpack.c.bf16 %v13358_v32, %v13354_v8  ;;  %v4832_v19 = vpack.c.bf16 %v13360_v47, %v13356_v57  ;;  %15087 = vst [vmem:[#allocation106_spill] sm:$0xff] %v13381_v53  ;;  %v5124_v1 = vand.u32 %v13381_v53, %v13141_v46 }
 0x926   : > { %15092 = vst [vmem:[#allocation111_spill] sm:$0xff] %v13414_v38  ;;  %v5142_v43 = vand.u32 %v13414_v38, %v13141_v46 }
 0x927   : > { %4935 = vmatprep.subr.bf16.mxu0 %v4830_v51  ;;  %4976 = vmatprep.subr.bf16.mxu1 %v4832_v19  ;;  %v13436_v19 = vpop.permute.xlu0 %6915 }
 0x928   : > { %4936 = vmatpush1.bf16.msra.mxu0 %v4829_v40  ;;  %4977 = vmatpush1.bf16.msra.mxu1 %v4831_v13  ;;  %v13427_v14 = vpop.trf.xlu1  ;;  %15095 = vst [vmem:[#allocation114_spill] sm:$0xff] %v13436_v19  ;;  %v15096_v40 = vrot.slane %v13059_v20, 3  ;;  %v5018_v20 = vrot.slane %v13133_v23, %v12473_v52  ;;  %v5030_v19 = vrot.slane %v13161_v10, %v12473_v52 }
 0x929   : > { %5161 = vmatprep.subr.bf16.mxu0 %v5127_v58  ;;  %5204 = vmatprep.subr.bf16.mxu1 %v5133_v29  ;;  %15094 = vst [vmem:[#allocation113_spill] sm:$0xff] %v13427_v14  ;;  %v5006_v29 = vrot.slane %v13123_v4, %v12473_v52 }
 0x92a   : > { %v5041_v34 = vmul.f32 %v5030_v19, %v13313_v62  ;;  %v5049_v62 = vmul.f32 %v5030_v19, %v15103_v56 }
 0x92b   : > { %10287 = vmatmul.mubr.msk.bf16.vlgmr.msra.gmra.mxu0 %vm4835_vm7, %v13222_v35  ;;  %10288 = vmatmul.mubr.msk.bf16.vlgmr.msra.gmra.mxu1 %vm4835_vm7, %v13222_v35  ;;  %v5136_v35 = vand.u32 %v13410_v9, %v13141_v46  ;;  %v5034_v9 = vrot.slane %v13178_v31, %v12473_v52 }
 0x92c   : > { %5162 = vmatpush1.bf16.msra.mxu0 %v5124_v1  ;;  %5205 = vmatpush1.bf16.msra.mxu1 %v5130_v6  ;;  %v5035_v1 = vmul.f32 %v5006_v29, %v13256_v16  ;;  %v5010_v6 = vrot.slane %v13129_v28, %v12473_v52 }
 0x92d   : > { %5247 = vmatprep.subr.bf16.mxu0 %v5139_v21  ;;  %5290 = vmatprep.subr.bf16.mxu1 %v5145_v22  ;;  %v5043_v22 = vmul.f32 %v5006_v29, %v13268_v45  ;;  %v5026_v29 = vrot.slane %v13169_v11, %v12473_v52 }
 0x92e   : > { %5179 = vmatprep.mubr.bf16.mxu0 %v15086_v37  ;;  %5222 = vmatprep.mubr.bf16.mxu1 %v15086_v37  ;;  %v5044_v12 = vmul.f32 %v5010_v6, %v13276_v44 }
 0x92f   : > { %v5067_v14 = vmul.f32 1.442695, %v5043_v22 }
 0x932   : > { %v13441_v13 = vpop.trf.xlu0 }
 0x933   : > { %10289 = vmatmul.mubr.msk.bf16.vlgmr.msra.gmra.mxu0 %vm4590_vm6, %v13224_v60  ;;  %10290 = vmatmul.mubr.msk.bf16.vlgmr.msra.gmra.mxu1 %vm4590_vm6, %v13224_v60  ;;  %15097 = vst [vmem:[#allocation115_spill] sm:$0xff] %v13441_v13  ;;  %v5038_v13 = vmul.f32 %v5018_v20, %v13264_v33 }
 0x934   : > { %5248 = vmatpush1.bf16.msra.mxu0 %v5136_v35  ;;  %5291 = vmatpush1.bf16.msra.mxu1 %v5142_v43  ;;  %v5051_v43 = vmul.f32 1.442695, %v5035_v1  ;;  %v5046_v1 = vmul.f32 %v5018_v20, %v13279_v18  ;;  %v5040_v20 = vmul.f32 %v5026_v29, %v13290_v3 }
 0x935   : > { %5265 = vmatprep.mubr.bf16.mxu0 %v15086_v37  ;;  %5308 = vmatprep.mubr.bf16.mxu1 %v15086_v37 }
 0x936   : > { %10871 = vpow2.f32 %v5051_v43  ;;  %v5042_v43 = vmul.f32 %v5034_v9, %v13295_v25 }
 0x93b   : > { %10291 = vmatmul.mubr.msk.bf16.vlgmr.msra.gmra.mxu0 %vm4590_vm6, %v13224_v60  ;;  %10292 = vmatmul.mubr.msk.bf16.vlgmr.msra.gmra.mxu1 %vm4590_vm6, %v13224_v60  ;;  %v5014_v60 = vrot.slane %v13126_v41, %v12473_v52 }
 0x93c   : > { %v7682_v51 = vpop.permute.xlu1 %7681  ;;  %5396 = vmatprep.mubr.bf16.mxu0 %v15086_v37  ;;  %5437 = vmatprep.mubr.bf16.mxu1 %v15086_v37 }
 0x93d   : > { %7684 = vxpose.xlu1.c.b16.start.end [1/1] (short) (narrow) %v7682_v51, 16  ;;  %v5037_v21 = vmul.f32 %v5014_v60, %v13281_v63  ;;  %v5045_v35 = vmul.f32 %v5014_v60, %v13273_v54  ;;  %v5036_v51 = vmul.f32 %v5010_v6, %v13260_v61  ;;  %v5057_v6 = vmul.f32 1.442695, %v5038_v13 }
 0x93e   : > { %v5063_v13 = vmul.f32 1.442695, %v5041_v34  ;;  %v5079_v34 = vmul.f32 1.442695, %v5049_v62 }
 0x93f   : > { %v5071_v60 = vmul.f32 1.442695, %v5045_v35  ;;  %v5053_v26 = vmul.f32 1.442695, %v5036_v51  ;;  %v5069_v35 = vmul.f32 1.442695, %v5044_v12 }
 0x940   : > { %v5061_v12 = vmul.f32 1.442695, %v5040_v20 }
 0x941   : > { %8463 = vrot.lane.b32.xlu1 %v15096_v40, %s11627_s28  ;;  %v5022_v40 = vrot.slane %v13156_v55, %v12473_v52  ;;  %v5073_v52 = vmul.f32 1.442695, %v5046_v1  ;;  %v15106_v1 = vld [vmem:[#allocation96_spill] sm:$0xff] }
 0x943   : > { %v5039_v0 = vmul.f32 %v5022_v40, %v13285_v39 }
 0x94b   : > { %v8198_v58 = vpop.permute.xlu0 %8197 }
 0x94c   : > { %8200 = vxpose.xlu0.c.b16.start.end [1/1] (short) (narrow) %v8198_v58, 16  ;;  %v5055_v58 = vmul.f32 1.442695, %v5037_v21 }
 0x94e   : > { %10873 = vpow2.f32 %v5055_v58 }
 0x94f   : > { %10875 = vpow2.f32 %v5067_v14  ;;  %v15104_v14 = vld [vmem:[#allocation95_spill] sm:$0xff] }
 0x950   : > { %10877 = vpow2.f32 %v5071_v60  ;;  %v5048_v3 = vmul.f32 %v5026_v29, %v15104_v14  ;;  %v5065_v60 = vmul.f32 1.442695, %v5042_v43  ;;  %v15113_v14 = vld [vmem:[#allocation101_spill] sm:$0xff] }
 0x951   : > { %10879 = vpow2.f32 %v5053_v26 }
 0x952   : > { %10881 = vpow2.f32 %v5057_v6 }
 0x953   : > { %10883 = vpow2.f32 %v5069_v35 }
 0x954   : > { %10885 = vpow2.f32 %v5073_v52  ;;  %v10872_v52 = vpop.eup %10871 }
 0x9e3   : > { %v13464_v38 = vpop.f32.mrf.mxu0  ;;  %v13469_v21 = vpop.f32.mrf.mxu1 }
 0x9e4   : > { %15098 = vst [vmem:[#allocation116_spill] sm:$0xff] %v13464_v38  ;;  %15099 = vst [vmem:[#allocation117_spill] sm:$0xff] %v13469_v21  ;;  %v5059_v21 = vmul.f32 1.442695, %v5039_v0 }
 0x9e5   : > { %v13472_v22 = vpop.f32.mrf.mxu0  ;;  %v13475_v53 = vpop.f32.mrf.mxu1 }
 0x9e6   : > { %15100 = vst [vmem:[#allocation118_spill] sm:$0xff] %v13472_v22  ;;  %15101 = vst [vmem:[#allocation119_spill] sm:$0xff] %v13475_v53  ;;  %v5047_v22 = vmul.f32 %v5022_v40, %v15102_v42  ;;  %10887 = vpow2.f32 %v5059_v21 }
 0x9e7   : > { %v4877_v38 = vpop.f32.mrf.mxu0  ;;  %v4918_v51 = vpop.f32.mrf.mxu1  ;;  %10889 = vpow2.f32 %v5063_v13 }
 0x9e8   : > { %v5050_v51 = vmul.f32 %v5034_v9, %v15106_v1  ;;  %v5075_v0 = vmul.f32 1.442695, %v5047_v22  ;;  %10891 = vpow2.f32 %v5061_v12  ;;  %v10874_v9 = vpop.eup %10873 }
 0x9e9   : > { %v4878_v58 = vpop.f32.mrf.mxu0  ;;  %v4919_v53 = vpop.f32.mrf.mxu1  ;;  %10893 = vpow2.f32 %v5065_v60 }
 0x9ea   : > { %v5077_v53 = vmul.f32 1.442695, %v5048_v3  ;;  %v5081_v29 = vmul.f32 1.442695, %v5050_v51  ;;  %10895 = vpow2.f32 %v5075_v0  ;;  %v10876_v21 = vpop.eup %10875  ;;  %v5319_v3 = vmul.f32 %v10872_v52, %v13332_v49 }
 0x9eb   : > { %v13482_v38 = vpop.f32.mrf.mxu0  ;;  %v13485_v26 = vpop.f32.mrf.mxu1  ;;  %10897 = vpow2.f32 %v5079_v34  ;;  %v5327_v51 = vmul.f32 %v10876_v21, %v13320_v30  ;;  %v15114_v30 = vld [vmem:[#allocation100_spill] sm:$0xff] }
 0x9ec   : > { %15105 = vst [vmem:[#allocation120_spill] sm:$0xff] %v13482_v38  ;;  %15107 = vst [vmem:[#allocation121_spill] sm:$0xff] %v13485_v26  ;;  %10899 = vpow2.f32 %v5077_v53  ;;  %v10878_v58 = vpop.eup %10877 }
 0x9ed   : > { %v13487_v40 = vpop.f32.mrf.mxu0  ;;  %v13489_v19 = vpop.f32.mrf.mxu1  ;;  %10901 = vpow2.f32 %v5081_v29  ;;  %v15112_v29 = vld [vmem:[#allocation99_spill] sm:$0xff] }
 0x9ee   : > { %15108 = vst [vmem:[#allocation122_spill] sm:$0xff] %v13487_v40  ;;  %15109 = vst [vmem:[#allocation123_spill] sm:$0xff] %v13489_v19  ;;  %v10880_v13 = vpop.eup %10879 }
 0x9ef   : > { %v4959_v6 = vpop.f32.mrf.mxu0  ;;  %v5000_v35 = vpop.f32.mrf.mxu1  ;;  %v5320_v26 = vmul.f32 %v10880_v13, %v15112_v29 }
 0x9f0   : > { %v10882_v12 = vpop.eup %10881  ;;  %v15110_v6 = vld [vmem:[#allocation103_spill] sm:$0xff] }
 0x9f1   : > { %v4960_v20 = vpop.f32.mrf.mxu0  ;;  %v5001_v43 = vpop.f32.mrf.mxu1  ;;  %v5321_v35 = vmul.f32 %v10874_v9, %v15110_v6  ;;  %v5322_v21 = vmul.f32 %v10882_v12, %v15114_v30  ;;  %v15115_v6 = vld [vmem:[#allocation102_spill] sm:$0xff] }
 0x9f2   : > { %v10884_v0 = vpop.eup %10883  ;;  %v15111_v20 = vld [vmem:[#allocation98_spill] sm:$0xff] }
 0x9f3   : > { %v5181_v22 = vpop.f32.mrf.mxu0  ;;  %v5224_v62 = vpop.f32.mrf.mxu1  ;;  %v5329_v43 = vmul.f32 %v10878_v58, %v15111_v20  ;;  %v5328_v56 = vmul.f32 %v10884_v0, %v15113_v14 }
 0x9f4   : > { %v10886_v53 = vpop.eup %10885  ;;  %v13495_v40 = vadd.f32 %v5319_v3, %v5181_v22  ;;  %v13501_v52 = vadd.f32 %v5321_v35, %v5224_v62 }
 0x9f5   : > { %v5183_v19 = vpop.f32.mrf.mxu0  ;;  %v5226_v60 = vpop.f32.mrf.mxu1  ;;  %v5330_v58 = vmul.f32 %v10886_v53, %v15115_v6 }
 0x9f6   : > { %v10888_v49 = vpop.eup %10887  ;;  %v13507_v22 = vadd.f32 %v5320_v26, %v5183_v19  ;;  %v13513_v0 = vadd.f32 %v5322_v21, %v5226_v60 }
 0x9f7   : > { %v5185_v34 = vpop.f32.mrf.mxu0  ;;  %v5228_v1 = vpop.f32.mrf.mxu1  ;;  %v5323_v60 = vmul.f32 %v10888_v49, %v13364_v27 }
 0x9f8   : > { %v13498_v38 = vadd.f32 %v5327_v51, %v5185_v34  ;;  %v13504_v42 = vadd.f32 %v5329_v43, %v5228_v1  ;;  %v10890_v20 = vpop.eup %10889  ;;  %15117 = vst [vmem:[#allocation98_spill] sm:$0xff] %v13513_v0 }
 0x9f9   : > { %v5187_v9 = vpop.f32.mrf.mxu0  ;;  %v5230_v51 = vpop.f32.mrf.mxu1 }
 0x9fa   : > { %v5351_v13 = vpack.c.bf16 %v13498_v38, %v13495_v40  ;;  %v13511_v3 = vadd.f32 %v5328_v56, %v5187_v9  ;;  %v10892_v14 = vpop.eup %10891  ;;  %v5353_v62 = vpack.c.bf16 %v13504_v42, %v13501_v52  ;;  %v13517_v1 = vadd.f32 %v5330_v58, %v5230_v51 }
 0x9fb   : > { %v5267_v12 = vpop.f32.mrf.mxu0  ;;  %v10894_v35 = vpop.eup %10893  ;;  %v5325_v9 = vmul.f32 %v10890_v20, %v13366_v15 }
 0x9fc   : > { %15116 = vst [vmem:[#allocation103_spill] sm:$0xff] %v13511_v3  ;;  %15118 = vst [vmem:[#allocation99_spill] sm:$0xff] %v13517_v1  ;;  %v5352_v26 = vpack.c.bf16 %v13511_v3, %v13507_v22  ;;  %v5310_v19 = vpop.f32.mrf.mxu1  ;;  %v10896_v34 = vpop.eup %10895  ;;  %v5354_v56 = vpack.c.bf16 %v13517_v1, %v13513_v0  ;;  %v13527_v3 = vadd.f32 %v5323_v60, %v5267_v12  ;;  %v5638_v60 = vrot.slane %v13150_v7, 1  ;;  %v15126_v7 = vld [vmem:[#allocation93_spill] sm:$0xff] }
 0x9fd   : > { %v5269_v43 = vpop.f32.mrf.mxu0  ;;  %v10898_v53 = vpop.eup %10897  ;;  %v5331_v30 = vmul.f32 %v10896_v34, %v13350_v24  ;;  %v5324_v1 = vmul.f32 %v10892_v14, %v13354_v8  ;;  %v13533_v24 = vadd.f32 %v5325_v9, %v5310_v19  ;;  %v5326_v15 = vmul.f32 %v10894_v35, %v13356_v57 }
 0x9fe   : > { %v5312_v29 = vpop.f32.mrf.mxu1  ;;  %5378 = vmatprep.subr.bf16.mxu0 %v5352_v26  ;;  %v10900_v21 = vpop.eup %10899  ;;  %5419 = vmatprep.subr.bf16.mxu1 %v5354_v56  ;;  %v5333_v58 = vmul.f32 %v10898_v53, %v13352_v59 }
 0x9ff   : > { %v5271_v6 = vpop.f32.mrf.mxu0  ;;  %5379 = vmatpush1.bf16.msra.mxu0 %v5351_v13  ;;  %v10902_v51 = vpop.eup %10901  ;;  %5420 = vmatpush1.bf16.msra.mxu1 %v5353_v62  ;;  %v5332_v49 = vmul.f32 %v10900_v21, %v13358_v32  ;;  %v13539_v13 = vadd.f32 %v5324_v1, %v5269_v43  ;;  %v15119_v62 = vld [vmem:[#allocation75_spill] sm:$0xff]  ;;  %v15120_v32 = vld [vmem:[#allocation70_spill] sm:$0xff]  ;;  %v13548_v34 = vadd.f32 %v5326_v15, %v5312_v29  ;;  %v5636_v43 = vrot.slane %v13145_v5, 1 }
 0xa00   : > { %v13530_v0 = vadd.f32 %v5331_v30, %v5271_v6  ;;  %v5314_v27 = vpop.f32.mrf.mxu1  ;;  %v5334_v59 = vmul.f32 %v10902_v51, %v13360_v47  ;;  %v5637_v19 = vrot.slane %v15120_v32, 1  ;;  %v5639_v47 = vrot.slane %v13154_v50, 1  ;;  %v15127_v50 = vld [vmem:[#allocation94_spill] sm:$0xff] }
 0xa01   : > { %v13536_v20 = vadd.f32 %v5333_v58, %v5314_v27  ;;  %v5273_v26 = vpop.f32.mrf.mxu0  ;;  %v5641_v29 = vrot.slane %v13190_v17, 1  ;;  %v5643_v21 = vrot.slane %v13198_v48, 1  ;;  %v5648_v9 = vand.u32 %v5636_v43, %v13141_v46 }
 0xa02   : > { %v5355_v8 = vpack.c.bf16 %v13530_v0, %v13527_v3  ;;  %v13543_v14 = vadd.f32 %v5332_v49, %v5273_v26  ;;  %v5316_v12 = vpop.f32.mrf.mxu1  ;;  %10293 = vmatmul.mubr.msk.bf16.vlgmr.msra.gmra.mxu0 %vm4835_vm7, %v15119_v62  ;;  %10294 = vmatmul.mubr.msk.bf16.vlgmr.msra.gmra.mxu1 %vm4835_vm7, %v15119_v62  ;;  %v5651_v53 = vand.u32 %v5637_v19, %v13141_v46  ;;  %v5640_v27 = vrot.slane %v13187_v36, 1  ;;  %v15121_v26 = vld [vmem:[#allocation82_spill] sm:$0xff] }
 0xa03   : > { %v5357_v57 = vpack.c.bf16 %v13536_v20, %v13533_v24  ;;  %v13552_v35 = vadd.f32 %v5334_v59, %v5316_v12  ;;  %5478 = vmatprep.mubr.bf16.mxu0 %v15086_v37  ;;  %5519 = vmatprep.mubr.bf16.mxu1 %v15086_v37  ;;  %v5657_v30 = vand.u32 %v5639_v47, %v13141_v46  ;;  %v5642_v49 = vrot.slane %v13192_v2, 1 }
 0xa04   : > { %v5356_v1 = vpack.c.bf16 %v13543_v14, %v13539_v13  ;;  %v5654_v6 = vand.u32 %v5638_v60, %v13141_v46  ;;  %v5663_v58 = vand.u32 %v5641_v29, %v13141_v46  ;;  %v5669_v51 = vand.u32 %v5643_v21, %v13141_v46 }
 0xa05   : > { %v5358_v56 = vpack.c.bf16 %v13552_v35, %v13548_v34  ;;  %v5660_v15 = vand.u32 %v5640_v27, %v13141_v46  ;;  %v5666_v59 = vand.u32 %v5642_v49, %v13141_v46 }
 0xa06   : > { %5460 = vmatprep.subr.bf16.mxu0 %v5356_v1 }
 0xa07   : > { %5501 = vmatprep.subr.bf16.mxu1 %v5358_v56  ;;  %5461 = vmatpush1.bf16.msra.mxu0 %v5355_v8  ;;  %v15122_v8 = vld [vmem:[#allocation48_spill] sm:$0xff] }
 0xa08   : > { %5502 = vmatpush1.bf16.msra.mxu1 %v5357_v57  ;;  %5685 = vmatprep.subr.bf16.mxu0 %v5651_v53  ;;  %v5531_v12 = vrot.slane %v13123_v4, %v15122_v8  ;;  %v5535_v19 = vrot.slane %v13129_v28, %v15122_v8  ;;  %v5543_v57 = vrot.slane %v13133_v23, %v15122_v8 }
 0xa09   : > { %5728 = vmatprep.subr.bf16.mxu1 %v5657_v30  ;;  %v5547_v29 = vrot.slane %v13156_v55, %v15122_v8 }
 0xa0a   : > { %10295 = vmatmul.mubr.msk.bf16.vlgmr.msra.gmra.mxu0 %vm4835_vm7, %v15119_v62  ;;  %v5560_v47 = vmul.f32 %v5531_v12, %v13256_v16  ;;  %v5561_v56 = vmul.f32 %v5535_v19, %v13260_v61  ;;  %v5563_v43 = vmul.f32 %v5543_v57, %v13264_v33  ;;  %v5568_v60 = vmul.f32 %v5531_v12, %v13268_v45 }
 0xa0b   : > { %10296 = vmatmul.mubr.msk.bf16.vlgmr.msra.gmra.mxu1 %vm4835_vm7, %v15119_v62  ;;  %5686 = vmatpush1.bf16.msra.mxu0 %v5648_v9  ;;  %v5539_v62 = vrot.slane %v13126_v41, %v15122_v8  ;;  %v5555_v9 = vrot.slane %v13161_v10, %v15122_v8  ;;  %v5572_v5 = vmul.f32 %v5547_v29, %v15126_v7 }
 0xa0c   : > { %5729 = vmatpush1.bf16.msra.mxu1 %v5654_v6  ;;  %5771 = vmatprep.subr.bf16.mxu0 %v5663_v58  ;;  %v5576_v53 = vmul.f32 1.442695, %v5560_v47  ;;  %v5578_v6 = vmul.f32 1.442695, %v5561_v56  ;;  %v5569_v58 = vmul.f32 %v5535_v19, %v13276_v44  ;;  %v5582_v49 = vmul.f32 1.442695, %v5563_v43 }
 0xa0d   : > { %5814 = vmatprep.subr.bf16.mxu1 %v5669_v51  ;;  %5703 = vmatprep.mubr.bf16.mxu0 %v15086_v37  ;;  %v5562_v1 = vmul.f32 %v5539_v62, %v13281_v63  ;;  %v5570_v21 = vmul.f32 %v5539_v62, %v13273_v54  ;;  %v5551_v51 = vrot.slane %v13169_v11, %v15122_v8  ;;  %v5592_v12 = vmul.f32 1.442695, %v5568_v60 }
 0xa0e   : > { %5746 = vmatprep.mubr.bf16.mxu1 %v15086_v37  ;;  %10903 = vpow2.f32 %v5576_v53  ;;  %v5564_v62 = vmul.f32 %v5547_v29, %v13285_v39  ;;  %v5594_v43 = vmul.f32 1.442695, %v5569_v58  ;;  %v5574_v32 = vmul.f32 %v5555_v9, %v15127_v50  ;;  %v15128_v58 = vld [vmem:[#allocation95_spill] sm:$0xff] }
 0xa0f   : > { %v5580_v30 = vmul.f32 1.442695, %v5562_v1  ;;  %v5596_v19 = vmul.f32 1.442695, %v5570_v21  ;;  %v15123_v1 = vld [vmem:[#allocation97_spill] sm:$0xff] }
 0xa10   : > { %v5566_v56 = vmul.f32 %v5555_v9, %v15123_v1  ;;  %v5584_v17 = vmul.f32 1.442695, %v5564_v62  ;;  %v5600_v29 = vmul.f32 1.442695, %v5572_v5 }
 0xa11   : > { %10905 = vpow2.f32 %v5580_v30 }
 0xa12   : > { %10297 = vmatmul.mubr.msk.bf16.vlgmr.msra.gmra.mxu0 %vm4590_vm6, %v15121_v26  ;;  %10907 = vpow2.f32 %v5578_v6  ;;  %v5588_v21 = vmul.f32 1.442695, %v5566_v56 }
 0xa13   : > { %10298 = vmatmul.mubr.msk.bf16.vlgmr.msra.gmra.mxu1 %vm4590_vm6, %v15121_v26  ;;  %5772 = vmatpush1.bf16.msra.mxu0 %v5660_v15  ;;  %v5571_v15 = vmul.f32 %v5543_v57, %v13279_v18  ;;  %v15125_v57 = vld [vmem:[#allocation91_spill] sm:$0xff]  ;;  %10909 = vpow2.f32 %v5582_v49 }
 0xa14   : > { %5815 = vmatpush1.bf16.msra.mxu1 %v5666_v59  ;;  %5789 = vmatprep.mubr.bf16.mxu0 %v15086_v37  ;;  %v5565_v36 = vmul.f32 %v5551_v51, %v15125_v57  ;;  %10911 = vpow2.f32 %v5592_v12  ;;  %v5573_v57 = vmul.f32 %v5551_v51, %v15128_v58 }
 0xa15   : > { %5832 = vmatprep.mubr.bf16.mxu1 %v15086_v37  ;;  %10913 = vpow2.f32 %v5596_v19  ;;  %v5604_v19 = vmul.f32 1.442695, %v5574_v32 }
 0xa16   : > { %10915 = vpow2.f32 %v5594_v43  ;;  %v5586_v6 = vmul.f32 1.442695, %v5565_v36  ;;  %v5602_v36 = vmul.f32 1.442695, %v5573_v57 }
 0xa1a   : > { %10299 = vmatmul.mubr.msk.bf16.vlgmr.msra.gmra.mxu0 %vm4590_vm6, %v15121_v26 }
 0xa1b   : > { %10300 = vmatmul.mubr.msk.bf16.vlgmr.msra.gmra.mxu1 %vm4590_vm6, %v15121_v26  ;;  %5920 = vmatprep.mubr.bf16.mxu0 %v15086_v37  ;;  %v5559_v26 = vrot.slane %v13178_v31, %v15122_v8  ;;  %v5598_v8 = vmul.f32 1.442695, %v5571_v15  ;;  %v15130_v15 = vld [vmem:[#allocation96_spill] sm:$0xff] }
 0xa1c   : > { %5961 = vmatprep.mubr.bf16.mxu1 %v15086_v37 }
 0xa1d   : > { %v5567_v53 = vmul.f32 %v5559_v26, %v13295_v25  ;;  %10917 = vpow2.f32 %v5598_v8  ;;  %v10904_v8 = vpop.eup %10903 }
 0xa1e   : > { %10919 = vpow2.f32 %v5584_v17  ;;  %v5843_v57 = vmul.f32 %v10904_v8, %v13495_v40 }
 0xa1f   : > { %v5590_v49 = vmul.f32 1.442695, %v5567_v53  ;;  %10921 = vpow2.f32 %v5588_v21 }
 0xa20   : > { %10923 = vpow2.f32 %v5586_v6 }
 0xa21   : > { %10925 = vpow2.f32 %v5590_v49 }
 0xa22   : > { %10927 = vpow2.f32 %v5600_v29 }
 0xa23   : > { %10929 = vpow2.f32 %v5604_v19 }
 0xa24   : > { %10931 = vpow2.f32 %v5602_v36 }
 0xac2   : > { %v13616_v27 = vpop.f32.mrf.mxu0  ;;  %v13621_v59 = vpop.f32.mrf.mxu1 }
 0xac4   : > { %v13624_v47 = vpop.f32.mrf.mxu0  ;;  %v13627_v2 = vpop.f32.mrf.mxu1 }
 0xac5   : > { %15124 = vst [vmem:[#allocation101_spill] sm:$0xff] %v13627_v2 }
 0xac6   : > { %v5402_v48 = vpop.f32.mrf.mxu0  ;;  %v5443_v60 = vpop.f32.mrf.mxu1 }
 0xac7   : > { %v5575_v60 = vmul.f32 %v5559_v26, %v15130_v15  ;;  %v10906_v26 = vpop.eup %10905 }
 0xac8   : > { %v5403_v30 = vpop.f32.mrf.mxu0  ;;  %v5444_v2 = vpop.f32.mrf.mxu1 }
 0xac9   : > { %v5606_v51 = vmul.f32 1.442695, %v5575_v60  ;;  %v10908_v5 = vpop.eup %10907 }
 0xaca   : > { %v13634_v48 = vpop.f32.mrf.mxu0  ;;  %v10910_v30 = vpop.eup %10909 }
 0xacb   : > { %15129 = vst [vmem:[#allocation100_spill] sm:$0xff] %v13634_v48  ;;  %v13637_v12 = vpop.f32.mrf.mxu1  ;;  %10933 = vpow2.f32 %v5606_v51  ;;  %v10912_v21 = vpop.eup %10911  ;;  %v5844_v51 = vmul.f32 %v10908_v5, %v13507_v22 }
 0xacc   : > { %15131 = vst [vmem:[#allocation102_spill] sm:$0xff] %v13637_v12  ;;  %v13639_v62 = vpop.f32.mrf.mxu0  ;;  %v10914_v6 = vpop.eup %10913  ;;  %v5851_v60 = vmul.f32 %v10912_v21, %v13498_v38  ;;  %v15134_v12 = vld [vmem:[#allocation103_spill] sm:$0xff]  ;;  %v15135_v38 = vld [vmem:[#allocation98_spill] sm:$0xff] }
 0xacd   : > { %15132 = vst [vmem:[#allocation75_spill] sm:$0xff] %v13639_v62  ;;  %v13641_v9 = vpop.f32.mrf.mxu1  ;;  %v10916_v29 = vpop.eup %10915  ;;  %v5846_v21 = vmul.f32 %v10910_v30, %v15135_v38 }
 0xace   : > { %15133 = vst [vmem:[#allocation82_spill] sm:$0xff] %v13641_v9  ;;  %v5484_v2 = vpop.f32.mrf.mxu0  ;;  %v10918_v36 = vpop.eup %10917  ;;  %v5852_v15 = vmul.f32 %v10916_v29, %v15134_v12 }
 0xacf   : > { %v5525_v56 = vpop.f32.mrf.mxu1  ;;  %v5845_v2 = vmul.f32 %v10906_v26, %v13501_v52  ;;  %v10920_v40 = vpop.eup %10919  ;;  %v15136_v26 = vld [vmem:[#allocation99_spill] sm:$0xff] }
 0xad0   : > { %v5485_v43 = vpop.f32.mrf.mxu0  ;;  %v5853_v56 = vmul.f32 %v10914_v6, %v13504_v42  ;;  %v5854_v42 = vmul.f32 %v10918_v36, %v15136_v26  ;;  %v10922_v6 = vpop.eup %10921 }
 0xad1   : > { %v5526_v53 = vpop.f32.mrf.mxu1  ;;  %v10924_v12 = vpop.eup %10923 }
 0xad2   : > { %v5705_v17 = vpop.f32.mrf.mxu0  ;;  %v10926_v29 = vpop.eup %10925 }
 0xad3   : > { %v5748_v32 = vpop.f32.mrf.mxu1  ;;  %v13647_v43 = vadd.f32 %v5843_v57, %v5705_v17 }
 0xad4   : > { %v5707_v9 = vpop.f32.mrf.mxu0  ;;  %v13653_v8 = vadd.f32 %v5845_v2, %v5748_v32 }
 0xad5   : > { %v5750_v49 = vpop.f32.mrf.mxu1  ;;  %v13659_v17 = vadd.f32 %v5844_v51, %v5707_v9 }
 0xad6   : > { %v5709_v19 = vpop.f32.mrf.mxu0 }
 0xad7   : > { %v13650_v53 = vadd.f32 %v5851_v60, %v5709_v19  ;;  %v5752_v62 = vpop.f32.mrf.mxu1  ;;  %v13665_v60 = vadd.f32 %v5846_v21, %v5750_v49  ;;  %v10928_v19 = vpop.eup %10927  ;;  %v5847_v49 = vmul.f32 %v10920_v40, %v13527_v3 }
 0xad8   : > { %v13656_v48 = vadd.f32 %v5853_v56, %v5752_v62  ;;  %v5711_v52 = vpop.f32.mrf.mxu0  ;;  %v10930_v36 = vpop.eup %10929  ;;  %v5855_v38 = vmul.f32 %v10928_v19, %v13530_v0 }
 0xad9   : > { %v5875_v22 = vpack.c.bf16 %v13650_v53, %v13647_v43  ;;  %v13663_v5 = vadd.f32 %v5852_v15, %v5711_v52  ;;  %v5754_v57 = vpop.f32.mrf.mxu1  ;;  %15138 = vst [vmem:[#allocation103_spill] sm:$0xff] %v13665_v60  ;;  %v10932_v21 = vpop.eup %10931  ;;  %v5849_v52 = vmul.f32 %v10922_v6, %v13533_v24  ;;  %v5850_v24 = vmul.f32 %v10926_v29, %v13548_v34 }
 0xada   : > { %v5877_v30 = vpack.c.bf16 %v13656_v48, %v13653_v8  ;;  %v13669_v62 = vadd.f32 %v5854_v42, %v5754_v57  ;;  %v5791_v32 = vpop.f32.mrf.mxu0  ;;  %v5857_v42 = vmul.f32 %v10930_v36, %v13536_v20  ;;  %v10934_v57 = vpop.eup %10933  ;;  %v5856_v40 = vmul.f32 %v10932_v21, %v13543_v14  ;;  %v15141_v14 = vld [vmem:[#allocation104_spill] sm:$0xff]  ;;  %v15143_v36 = vld [vmem:[#allocation106_spill] sm:$0xff] }
 0xadb   : > { %15137 = vst [vmem:[#allocation94_spill] sm:$0xff] %v13663_v5  ;;  %v5876_v9 = vpack.c.bf16 %v13663_v5, %v13659_v17  ;;  %v5834_v2 = vpop.f32.mrf.mxu1  ;;  %v13679_v5 = vadd.f32 %v5847_v49, %v5791_v32  ;;  %v5858_v20 = vmul.f32 %v10934_v57, %v13552_v35  ;;  %v15142_v35 = vld [vmem:[#allocation105_spill] sm:$0xff]  ;;  %v6152_v49 = vrot.slane %v15143_v36, 1 }
 0xadc   : > { %15139 = vst [vmem:[#allocation98_spill] sm:$0xff] %v13669_v62  ;;  %v5878_v15 = vpack.c.bf16 %v13669_v62, %v13665_v60  ;;  %v5793_v56 = vpop.f32.mrf.mxu0  ;;  %v5848_v62 = vmul.f32 %v10924_v12, %v13539_v13  ;;  %v13685_v0 = vadd.f32 %v5849_v52, %v5834_v2  ;;  %v6153_v2 = vrot.slane %v15141_v14, 1  ;;  %v15145_v52 = vld [vmem:[#allocation108_spill] sm:$0xff]  ;;  %v15146_v57 = vld [vmem:[#allocation109_spill] sm:$0xff] }
 0xadd   : > { %v5836_v51 = vpop.f32.mrf.mxu1  ;;  %5902 = vmatprep.subr.bf16.mxu0 %v5876_v9  ;;  %v8641_v36 = vrot.slane %v13624_v47, 7 }
 0xade   : > { %5943 = vmatprep.subr.bf16.mxu1 %v5878_v15  ;;  %v5795_v26 = vpop.f32.mrf.mxu0  ;;  %5903 = vmatpush1.bf16.msra.mxu0 %v5875_v22  ;;  %v13691_v22 = vadd.f32 %v5848_v62, %v5793_v56  ;;  %v13700_v19 = vadd.f32 %v5850_v24, %v5836_v51  ;;  %v6155_v62 = vrot.slane %v15142_v35, 1  ;;  %v6167_v51 = vand.u32 %v6153_v2, %v13141_v46  ;;  %v15148_v2 = vld [vmem:[#allocation111_spill] sm:$0xff]  ;;  %v15151_v35 = vld [vmem:[#allocation101_spill] sm:$0xff] }
 0xadf   : > { %v13682_v60 = vadd.f32 %v5855_v38, %v5795_v26  ;;  %v5838_v3 = vpop.f32.mrf.mxu1  ;;  %5944 = vmatpush1.bf16.msra.mxu1 %v5877_v30  ;;  %v15140_v30 = vld [vmem:[#allocation83_spill] sm:$0xff]  ;;  %v6157_v26 = vrot.slane %v15145_v52, 1  ;;  %v8643_v14 = vrot.slane %v15151_v35, 7 }
 0xae0   : > { %v13688_v6 = vadd.f32 %v5857_v42, %v5838_v3  ;;  %v5797_v9 = vpop.f32.mrf.mxu0  ;;  %v15144_v38 = vld [vmem:[#allocation107_spill] sm:$0xff]  ;;  %v6173_v42 = vand.u32 %v6155_v62, %v13141_v46  ;;  %v6159_v3 = vrot.slane %v15146_v57, 1 }
 0xae1   : > { %v5879_v13 = vpack.c.bf16 %v13682_v60, %v13679_v5  ;;  %v13695_v12 = vadd.f32 %v5856_v40, %v5797_v9  ;;  %v5840_v32 = vpop.f32.mrf.mxu1  ;;  %10301 = vmatmul.mubr.msk.bf16.vlgmr.msra.gmra.mxu0 %vm4835_vm7, %v15140_v30  ;;  %v6154_v21 = vrot.slane %v15144_v38, 1  ;;  %v6164_v40 = vand.u32 %v6152_v49, %v13141_v46 }
 0xae2   : > { %v5881_v34 = vpack.c.bf16 %v13688_v6, %v13685_v0  ;;  %v13704_v29 = vadd.f32 %v5858_v20, %v5840_v32  ;;  %10302 = vmatmul.mubr.msk.bf16.vlgmr.msra.gmra.mxu1 %vm4835_vm7, %v15140_v30  ;;  %6002 = vmatprep.mubr.bf16.mxu0 %v15086_v37  ;;  %v6179_v9 = vand.u32 %v6157_v26, %v13141_v46 }
 0xae3   : > { %v5880_v15 = vpack.c.bf16 %v13695_v12, %v13691_v22  ;;  %6043 = vmatprep.mubr.bf16.mxu1 %v15086_v37  ;;  %v6170_v24 = vand.u32 %v6154_v21, %v13141_v46  ;;  %v6185_v20 = vand.u32 %v6159_v3, %v13141_v46 }
 0xae4   : > { %v5882_v56 = vpack.c.bf16 %v13704_v29, %v13700_v19 }
 0xae5   : > { %5984 = vmatprep.subr.bf16.mxu0 %v5880_v15  ;;  %v15149_v15 = vld [vmem:[#allocation84_spill] sm:$0xff] }
 0xae6   : > { %6025 = vmatprep.subr.bf16.mxu1 %v5882_v56  ;;  %5985 = vmatpush1.bf16.msra.mxu0 %v5879_v13  ;;  %v15147_v13 = vld [vmem:[#allocation110_spill] sm:$0xff]  ;;  %v15150_v56 = vld [vmem:[#allocation45_spill] sm:$0xff] }
 0xae7   : > { %6026 = vmatpush1.bf16.msra.mxu1 %v5881_v34  ;;  %6201 = vmatprep.subr.bf16.mxu0 %v6167_v51  ;;  %v6156_v32 = vrot.slane %v15147_v13, 1  ;;  %v6158_v34 = vrot.slane %v15148_v2, 1  ;;  %v6055_v49 = vrot.slane %v13123_v4, %v15150_v56  ;;  %v6063_v51 = vrot.slane %v13126_v41, %v15150_v56 }
 0xae8   : > { %6244 = vmatprep.subr.bf16.mxu1 %v6173_v42  ;;  %v6059_v21 = vrot.slane %v13129_v28, %v15150_v56  ;;  %v6067_v42 = vrot.slane %v13133_v23, %v15150_v56  ;;  %v6079_v57 = vrot.slane %v13161_v10, %v15150_v56  ;;  %v6075_v38 = vrot.slane %v13169_v11, %v15150_v56 }
 0xae9   : > { %10303 = vmatmul.mubr.msk.bf16.vlgmr.msra.gmra.mxu0 %vm4835_vm7, %v15140_v30  ;;  %v6176_v62 = vand.u32 %v6156_v32, %v13141_v46  ;;  %v6084_v26 = vmul.f32 %v6055_v49, %v13256_v16  ;;  %v6086_v3 = vmul.f32 %v6063_v51, %v13281_v63  ;;  %v6092_v32 = vmul.f32 %v6055_v49, %v13268_v45 }
 0xaea   : > { %10304 = vmatmul.mubr.msk.bf16.vlgmr.msra.gmra.mxu1 %vm4835_vm7, %v15140_v30  ;;  %6202 = vmatpush1.bf16.msra.mxu0 %v6164_v40  ;;  %v6182_v30 = vand.u32 %v6158_v34, %v13141_v46  ;;  %v6085_v40 = vmul.f32 %v6059_v21, %v13260_v61  ;;  %v6095_v2 = vmul.f32 %v6067_v42, %v13279_v18  ;;  %v8640_v49 = vrot.slane %v13616_v27, 7 }
 0xaeb   : > { %6245 = vmatpush1.bf16.msra.mxu1 %v6170_v24  ;;  %6287 = vmatprep.subr.bf16.mxu0 %v6179_v9  ;;  %v6071_v24 = vrot.slane %v13156_v55, %v15150_v56  ;;  %v6100_v9 = vmul.f32 1.442695, %v6084_v26  ;;  %v6104_v34 = vmul.f32 1.442695, %v6086_v3  ;;  %v6116_v26 = vmul.f32 1.442695, %v6092_v32 }
 0xaec   : > { %6330 = vmatprep.subr.bf16.mxu1 %v6185_v20  ;;  %6219 = vmatprep.mubr.bf16.mxu0 %v15086_v37  ;;  %v6087_v20 = vmul.f32 %v6067_v42, %v13264_v33  ;;  %v8642_v42 = vrot.slane %v13621_v59, 7  ;;  %v6090_v32 = vmul.f32 %v6079_v57, %v15123_v1 }
 0xaed   : > { %6262 = vmatprep.mubr.bf16.mxu1 %v15086_v37  ;;  %v6088_v13 = vmul.f32 %v6071_v24, %v13285_v39  ;;  %10935 = vpow2.f32 %v6100_v9  ;;  %v6096_v47 = vmul.f32 %v6071_v24, %v15126_v7  ;;  %v15156_v24 = vld [vmem:[#allocation119_spill] sm:$0xff] }
 0xaee   : > { %v6106_v52 = vmul.f32 1.442695, %v6087_v20  ;;  %10937 = vpow2.f32 %v6104_v34  ;;  %v8803_v7 = vsel %vm4594_vm5, %v15156_v24, %v8643_v14 }
 0xaef   : > { %v6108_v20 = vmul.f32 1.442695, %v6088_v13 }
 0xaf1   : > { %10305 = vmatmul.mubr.msk.bf16.vlgmr.msra.gmra.mxu0 %vm4590_vm6, %v15149_v15 }
 0xaf2   : > { %10306 = vmatmul.mubr.msk.bf16.vlgmr.msra.gmra.mxu1 %vm4590_vm6, %v15149_v15  ;;  %6288 = vmatpush1.bf16.msra.mxu0 %v6176_v62  ;;  %v6094_v62 = vmul.f32 %v6063_v51, %v13273_v54 }
 0xaf3   : > { %6331 = vmatpush1.bf16.msra.mxu1 %v6182_v30  ;;  %6305 = vmatprep.mubr.bf16.mxu0 %v15086_v37  ;;  %v6093_v30 = vmul.f32 %v6059_v21, %v13276_v44  ;;  %v6083_v21 = vrot.slane %v13178_v31, %v15150_v56  ;;  %v15153_v56 = vld [vmem:[#allocation116_spill] sm:$0xff]  ;;  %v15154_v31 = vld [vmem:[#allocation117_spill] sm:$0xff] }
 0xaf4   : > { %6348 = vmatprep.mubr.bf16.mxu1 %v15086_v37  ;;  %v6120_v51 = vmul.f32 1.442695, %v6094_v62  ;;  %v15152_v62 = vld [vmem:[#allocation91_spill] sm:$0xff]  ;;  %v8800_v59 = vsel %vm4594_vm5, %v15153_v56, %v8640_v49  ;;  %v8802_v13 = vsel %vm4594_vm5, %v15154_v31, %v8642_v42 }
 0xaf5   : > { %v6118_v3 = vmul.f32 1.442695, %v6093_v30  ;;  %v6089_v39 = vmul.f32 %v6075_v38, %v15152_v62 }
 0xaf7   : > { %v6110_v14 = vmul.f32 1.442695, %v6089_v39 }
 0xaf9   : > { %10307 = vmatmul.mubr.msk.bf16.vlgmr.msra.gmra.mxu0 %vm4590_vm6, %v15149_v15 }
 0xafa   : > { %10308 = vmatmul.mubr.msk.bf16.vlgmr.msra.gmra.mxu1 %vm4590_vm6, %v15149_v15  ;;  %6436 = vmatprep.mubr.bf16.mxu0 %v15086_v37  ;;  %v6102_v15 = vmul.f32 1.442695, %v6085_v40  ;;  %v6122_v40 = vmul.f32 1.442695, %v6095_v2  ;;  %v6091_v2 = vmul.f32 %v6083_v21, %v13295_v25  ;;  %v6098_v25 = vmul.f32 %v6079_v57, %v15127_v50  ;;  %v15159_v57 = vld [vmem:[#allocation102_spill] sm:$0xff] }
 0xafb   : > { %6477 = vmatprep.mubr.bf16.mxu1 %v15086_v37 }
 0xafc   : > { %10939 = vpow2.f32 %v6102_v15 }
 0xafd   : > { %10941 = vpow2.f32 %v6106_v52  ;;  %v15155_v52 = vld [vmem:[#allocation118_spill] sm:$0xff] }
 0xafe   : > { %10943 = vpow2.f32 %v6116_v26  ;;  %v8801_v62 = vsel %vm4594_vm5, %v15155_v52, %v8641_v36  ;;  %v6097_v26 = vmul.f32 %v6075_v38, %v15128_v58  ;;  %v8646_v52 = vrot.slane %v15159_v57, 7 }
 0xaff   : > { %10945 = vpow2.f32 %v6120_v51  ;;  %v6124_v38 = vmul.f32 1.442695, %v6096_v47 }
 0xb00   : > { %10947 = vpow2.f32 %v6118_v3  ;;  %v6126_v51 = vmul.f32 1.442695, %v6097_v26  ;;  %v15164_v26 = vld [vmem:[#allocation122_spill] sm:$0xff] }
 0xb01   : > { %10949 = vpow2.f32 %v6122_v40 }
 0xb02   : > { %10951 = vpow2.f32 %v6108_v20 }
 0xba1   : > { %v5922_v9 = vpop.f32.mrf.mxu0 }
 0xba2   : > { %v8664_v27 = vrot.slane %v5922_v9, 6  ;;  %v5963_v34 = vpop.f32.mrf.mxu1 }
 0xba3   : > { %v8666_v15 = vrot.slane %v5963_v34, 6  ;;  %v5924_v30 = vpop.f32.mrf.mxu0 }
 0xba4   : > { %v13785_v1 = vsel %vm8808_vm8, %v8800_v59, %v8664_v27  ;;  %v8665_v35 = vrot.slane %v5924_v30, 6  ;;  %v5965_v9 = vpop.f32.mrf.mxu1  ;;  %v6112_v27 = vmul.f32 1.442695, %v6090_v32  ;;  %v15157_v59 = vld [vmem:[#allocation100_spill] sm:$0xff] }
 0xba5   : > { %v13790_v56 = vsel %vm8808_vm8, %v8802_v13, %v8666_v15  ;;  %v8667_v49 = vrot.slane %v5965_v9, 6  ;;  %v5926_v34 = vpop.f32.mrf.mxu0  ;;  %v8644_v30 = vrot.slane %v15157_v59, 7  ;;  %v15158_v13 = vld [vmem:[#allocation96_spill] sm:$0xff]  ;;  %v15161_v59 = vld [vmem:[#allocation82_spill] sm:$0xff] }
 0xba6   : > { %v13796_v31 = vsel %vm8808_vm8, %v8801_v62, %v8665_v35  ;;  %v5967_v42 = vpop.f32.mrf.mxu1  ;;  %v6099_v9 = vmul.f32 %v6083_v21, %v15158_v13  ;;  %v6114_v62 = vmul.f32 1.442695, %v6091_v2  ;;  %v15160_v35 = vld [vmem:[#allocation75_spill] sm:$0xff]  ;;  %v8647_v58 = vrot.slane %v15161_v59, 7  ;;  %v15162_v21 = vld [vmem:[#allocation120_spill] sm:$0xff] }
 0xba7   : > { %v13801_v36 = vsel %vm8808_vm8, %v8803_v7, %v8667_v49  ;;  %v5927_v15 = vpop.f32.mrf.mxu0  ;;  %v8645_v24 = vrot.slane %v15160_v35, 7  ;;  %v6128_v42 = vmul.f32 1.442695, %v6098_v25  ;;  %v8804_v57 = vsel %vm4594_vm5, %v15162_v21, %v8644_v30  ;;  %v15163_v35 = vld [vmem:[#allocation121_spill] sm:$0xff] }
 0xba8   : > { %v5968_v34 = vpop.f32.mrf.mxu1  ;;  %v10936_v15 = vpop.eup %10935  ;;  %10953 = vpow2.f32 %v6112_v27  ;;  %v6130_v39 = vmul.f32 1.442695, %v6099_v9  ;;  %v8806_v40 = vsel %vm4594_vm5, %v15163_v35, %v8646_v52  ;;  %v15165_v9 = vld [vmem:[#allocation123_spill] sm:$0xff] }
 0xba9   : > { %v6004_v32 = vpop.f32.mrf.mxu0  ;;  %v10938_v2 = vpop.eup %10937  ;;  %10955 = vpow2.f32 %v6110_v14  ;;  %v8805_v59 = vsel %vm4594_vm5, %v15164_v26, %v8645_v24  ;;  %v8807_v21 = vsel %vm4594_vm5, %v15165_v9, %v8647_v58  ;;  %v6359_v58 = vmul.f32 %v10936_v15, %v13647_v43 }
 0xbaa   : > { %v8668_v7 = vrot.slane %v6004_v32, 6  ;;  %v6045_v49 = vpop.f32.mrf.mxu1  ;;  %v10940_v20 = vpop.eup %10939  ;;  %10957 = vpow2.f32 %v6114_v62 }
 0xbab   : > { %v8670_v34 = vrot.slane %v6045_v49, 6  ;;  %v6006_v3 = vpop.f32.mrf.mxu0  ;;  %10959 = vpow2.f32 %v6124_v38 }
 0xbac   : > { %v13812_v25 = vsel %vm8808_vm8, %v8804_v57, %v8668_v7  ;;  %v8669_v47 = vrot.slane %v6006_v3, 6  ;;  %v6047_v32 = vpop.f32.mrf.mxu1  ;;  %v10942_v57 = vpop.eup %10941  ;;  %10961 = vpow2.f32 %v6128_v42 }
 0xbad   : > { %v13817_v30 = vsel %vm8808_vm8, %v8806_v40, %v8670_v34  ;;  %v8671_v49 = vrot.slane %v6047_v32, 6  ;;  %v6008_v27 = vpop.f32.mrf.mxu0  ;;  %10963 = vpow2.f32 %v6126_v51  ;;  %v10944_v34 = vpop.eup %10943  ;;  %v6360_v51 = vmul.f32 %v10940_v20, %v13659_v17 }
 0xbae   : > { %v13822_v52 = vsel %vm8808_vm8, %v8805_v59, %v8669_v47  ;;  %v6049_v7 = vpop.f32.mrf.mxu1  ;;  %10965 = vpow2.f32 %v6130_v39  ;;  %v10946_v32 = vpop.eup %10945  ;;  %v6367_v26 = vmul.f32 %v10944_v34, %v13650_v53  ;;  %v6361_v59 = vmul.f32 %v10938_v2, %v13653_v8  ;;  %v15167_v53 = vld [vmem:[#allocation103_spill] sm:$0xff]  ;;  %v15168_v2 = vld [vmem:[#allocation98_spill] sm:$0xff] }
 0xbaf   : > { %v13825_v14 = vsel %vm8808_vm8, %v8807_v21, %v8671_v49  ;;  %v6009_v3 = vpop.f32.mrf.mxu0  ;;  %v10948_v38 = vpop.eup %10947  ;;  %v6369_v27 = vmul.f32 %v10946_v32, %v13656_v48  ;;  %v15166_v7 = vld [vmem:[#allocation94_spill] sm:$0xff] }
 0xbb0   : > { %v6050_v24 = vpop.f32.mrf.mxu1  ;;  %v10950_v42 = vpop.eup %10949  ;;  %v6368_v3 = vmul.f32 %v10948_v38, %v15166_v7 }
 0xbb1   : > { %v6221_v35 = vpop.f32.mrf.mxu0  ;;  %v10952_v43 = vpop.eup %10951  ;;  %v6362_v24 = vmul.f32 %v10942_v57, %v15167_v53  ;;  %v6370_v48 = vmul.f32 %v10950_v42, %v15168_v2 }
 0xbb2   : > { %v6264_v62 = vpop.f32.mrf.mxu1  ;;  %v13831_v9 = vadd.f32 %v6359_v58, %v6221_v35 }
 0xbb3   : > { %v6223_v40 = vpop.f32.mrf.mxu0  ;;  %v13837_v15 = vadd.f32 %v6361_v59, %v6264_v62 }
 0xbb4   : > { %v6266_v47 = vpop.f32.mrf.mxu1  ;;  %v13843_v35 = vadd.f32 %v6360_v51, %v6223_v40 }
 0xbb5   : > { %v6225_v49 = vpop.f32.mrf.mxu0  ;;  %v10954_v32 = vpop.eup %10953  ;;  %v13849_v38 = vadd.f32 %v6362_v24, %v6266_v47  ;;  %v6363_v47 = vmul.f32 %v10952_v43, %v13679_v5 }
 0xbb6   : > { %v13834_v39 = vadd.f32 %v6367_v26, %v6225_v49  ;;  %v6268_v21 = vpop.f32.mrf.mxu1  ;;  %v10956_v26 = vpop.eup %10955 }
 0xbb7   : > { %v13840_v34 = vadd.f32 %v6369_v27, %v6268_v21  ;;  %v6227_v8 = vpop.f32.mrf.mxu0  ;;  %15170 = vst [vmem:[#allocation83_spill] sm:$0xff] %v13849_v38  ;;  %v10958_v49 = vpop.eup %10957 }
 0xbb8   : > { %v6391_v17 = vpack.c.bf16 %v13834_v39, %v13831_v9  ;;  %v13847_v20 = vadd.f32 %v6368_v3, %v6227_v8  ;;  %v6270_v58 = vpop.f32.mrf.mxu1  ;;  %v10960_v42 = vpop.eup %10959  ;;  %v6365_v8 = vmul.f32 %v10954_v32, %v13685_v0  ;;  %v6366_v0 = vmul.f32 %v10958_v49, %v13700_v19 }
 0xbb9   : > { %v6393_v57 = vpack.c.bf16 %v13840_v34, %v13837_v15  ;;  %v13853_v62 = vadd.f32 %v6370_v48, %v6270_v58  ;;  %v6307_v59 = vpop.f32.mrf.mxu0  ;;  %v10962_v7 = vpop.eup %10961  ;;  %v6371_v53 = vmul.f32 %v10960_v42, %v13682_v60 }
 0xbba   : > { %15169 = vst [vmem:[#allocation99_spill] sm:$0xff] %v13847_v20  ;;  %v6392_v40 = vpack.c.bf16 %v13847_v20, %v13843_v35  ;;  %v6350_v27 = vpop.f32.mrf.mxu1  ;;  %v10964_v24 = vpop.eup %10963  ;;  %v6373_v48 = vmul.f32 %v10962_v7, %v13688_v6  ;;  %v13863_v20 = vadd.f32 %v6363_v47, %v6307_v59  ;;  %v15175_v7 = vld [vmem:[#allocation69_spill] sm:$0xff] }
 0xbbb   : > { %15171 = vst [vmem:[#allocation84_spill] sm:$0xff] %v13853_v62  ;;  %v6394_v51 = vpack.c.bf16 %v13853_v62, %v13849_v38  ;;  %v6309_v21 = vpop.f32.mrf.mxu0  ;;  %v10966_v58 = vpop.eup %10965  ;;  %v6364_v62 = vmul.f32 %v10956_v26, %v13691_v22  ;;  %v6372_v43 = vmul.f32 %v10964_v24, %v13695_v12  ;;  %v13869_v60 = vadd.f32 %v6365_v8, %v6350_v27  ;;  %v15173_v12 = vld [vmem:[#allocation70_spill] sm:$0xff]  ;;  %v15177_v8 = vld [vmem:[#allocation79_spill] sm:$0xff] }
 0xbbc   : > { %v6352_v3 = vpop.f32.mrf.mxu1  ;;  %6418 = vmatprep.subr.bf16.mxu0 %v6392_v40  ;;  %v6374_v6 = vmul.f32 %v10966_v58, %v13704_v29  ;;  %v6669_v27 = vrot.slane %v15173_v12, 2  ;;  %v15174_v29 = vld [vmem:[#allocation72_spill] sm:$0xff]  ;;  %v6668_v47 = vrot.slane %v15175_v7, 2  ;;  %v15178_v58 = vld [vmem:[#allocation81_spill] sm:$0xff]  ;;  %v15184_v7 = vld [vmem:[#allocation90_spill] sm:$0xff] }
 0xbbd   : > { %6459 = vmatprep.subr.bf16.mxu1 %v6394_v51  ;;  %v6311_v2 = vpop.f32.mrf.mxu0  ;;  %6419 = vmatpush1.bf16.msra.mxu0 %v6391_v17  ;;  %v13875_v17 = vadd.f32 %v6364_v62, %v6309_v21  ;;  %v13884_v42 = vadd.f32 %v6366_v0, %v6352_v3  ;;  %v6671_v62 = vrot.slane %v15174_v29, 2 }
 0xbbe   : > { %v13866_v38 = vadd.f32 %v6371_v53, %v6311_v2  ;;  %v6354_v5 = vpop.f32.mrf.mxu1  ;;  %6460 = vmatpush1.bf16.msra.mxu1 %v6393_v57  ;;  %v15172_v57 = vld [vmem:[#allocation112_spill] sm:$0xff]  ;;  %v6683_v3 = vand.u32 %v6669_v27, %v13141_v46  ;;  %v15176_v53 = vld [vmem:[#allocation71_spill] sm:$0xff]  ;;  %v6673_v2 = vrot.slane %v15177_v8, 2 }
 0xbbf   : > { %v13872_v32 = vadd.f32 %v6373_v48, %v6354_v5  ;;  %v6313_v40 = vpop.f32.mrf.mxu0  ;;  %v6670_v24 = vrot.slane %v15176_v53, 2  ;;  %v6689_v48 = vand.u32 %v6671_v62, %v13141_v46  ;;  %v6675_v5 = vrot.slane %v15178_v58, 2  ;;  %v15180_v27 = vld [vmem:[#allocation80_spill] sm:$0xff] }
 0xbc0   : > { %v6395_v22 = vpack.c.bf16 %v13866_v38, %v13863_v20  ;;  %v13879_v26 = vadd.f32 %v6372_v43, %v6313_v40  ;;  %v6356_v59 = vpop.f32.mrf.mxu1  ;;  %10309 = vmatmul.mubr.msk.bf16.vlgmr.msra.gmra.mxu0 %vm4835_vm7, %v15172_v57  ;;  %v6680_v43 = vand.u32 %v6668_v47, %v13141_v46  ;;  %v6695_v40 = vand.u32 %v6673_v2, %v13141_v46 }
 0xbc1   : > { %v6397_v19 = vpack.c.bf16 %v13872_v32, %v13869_v60  ;;  %v13888_v49 = vadd.f32 %v6374_v6, %v6356_v59  ;;  %10310 = vmatmul.mubr.msk.bf16.vlgmr.msra.gmra.mxu1 %vm4835_vm7, %v15172_v57  ;;  %6518 = vmatprep.mubr.bf16.mxu0 %v15086_v37  ;;  %v6686_v0 = vand.u32 %v6670_v24, %v13141_v46 }
 0xbc2   : > { %v6396_v51 = vpack.c.bf16 %v13879_v26, %v13875_v17  ;;  %6559 = vmatprep.mubr.bf16.mxu1 %v15086_v37  ;;  %v6701_v6 = vand.u32 %v6675_v5, %v13141_v46 }
 0xbc3   : > { %v6398_v21 = vpack.c.bf16 %v13888_v49, %v13884_v42 }
 0xbc4   : > { %6500 = vmatprep.subr.bf16.mxu0 %v6396_v51  ;;  %v15181_v51 = vld [vmem:[#allocation113_spill] sm:$0xff] }
 0xbc5   : > { %6541 = vmatprep.subr.bf16.mxu1 %v6398_v21  ;;  %6501 = vmatpush1.bf16.msra.mxu0 %v6395_v22  ;;  %v15179_v22 = vld [vmem:[#allocation78_spill] sm:$0xff]  ;;  %v15182_v21 = vld [vmem:[#allocation49_spill] sm:$0xff] }
 0xbc6   : > { %6542 = vmatpush1.bf16.msra.mxu1 %v6397_v19  ;;  %6717 = vmatprep.subr.bf16.mxu0 %v6683_v3  ;;  %v6672_v59 = vrot.slane %v15179_v22, 2  ;;  %v6674_v19 = vrot.slane %v15180_v27, 2  ;;  %v6571_v47 = vrot.slane %v13123_v4, %v15182_v21  ;;  %v6579_v3 = vrot.slane %v13126_v41, %v15182_v21 }
 0xbc7   : > { %6760 = vmatprep.subr.bf16.mxu1 %v6689_v48  ;;  %v6575_v24 = vrot.slane %v13129_v28, %v15182_v21  ;;  %v6583_v48 = vrot.slane %v13133_v23, %v15182_v21  ;;  %v6595_v27 = vrot.slane %v13161_v10, %v15182_v21  ;;  %v15185_v10 = vld [vmem:[#allocation97_spill] sm:$0xff] }
 0xbc8   : > { %10311 = vmatmul.mubr.msk.bf16.vlgmr.msra.gmra.mxu0 %vm4835_vm7, %v15172_v57  ;;  %v6692_v62 = vand.u32 %v6672_v59, %v13141_v46  ;;  %v6600_v2 = vmul.f32 %v6571_v47, %v13256_v16  ;;  %v6602_v5 = vmul.f32 %v6579_v3, %v13281_v63 }
 0xbc9   : > { %10312 = vmatmul.mubr.msk.bf16.vlgmr.msra.gmra.mxu1 %vm4835_vm7, %v15172_v57  ;;  %6718 = vmatpush1.bf16.msra.mxu0 %v6680_v43  ;;  %v6698_v57 = vand.u32 %v6674_v19, %v13141_v46  ;;  %v6601_v43 = vmul.f32 %v6575_v24, %v13260_v61  ;;  %v6610_v19 = vmul.f32 %v6579_v3, %v13273_v54  ;;  %v15183_v3 = vld [vmem:[#allocation77_spill] sm:$0xff] }
 0xbca   : > { %6761 = vmatpush1.bf16.msra.mxu1 %v6686_v0  ;;  %6803 = vmatprep.subr.bf16.mxu0 %v6695_v40  ;;  %v6616_v0 = vmul.f32 1.442695, %v6600_v2  ;;  %v6603_v40 = vmul.f32 %v6583_v48, %v13264_v33  ;;  %v6620_v59 = vmul.f32 1.442695, %v6602_v5  ;;  %v6611_v22 = vmul.f32 %v6583_v48, %v13279_v18 }
 0xbcb   : > { %6846 = vmatprep.subr.bf16.mxu1 %v6701_v6  ;;  %6735 = vmatprep.mubr.bf16.mxu0 %v15086_v37  ;;  %v6608_v6 = vmul.f32 %v6571_v47, %v13268_v45  ;;  %v6591_v2 = vrot.slane %v13169_v11, %v15182_v21  ;;  %v6599_v8 = vrot.slane %v15183_v3, %v15182_v21 }
 0xbcc   : > { %6778 = vmatprep.mubr.bf16.mxu1 %v15086_v37  ;;  %10967 = vpow2.f32 %v6616_v0  ;;  %v6622_v47 = vmul.f32 1.442695, %v6603_v40  ;;  %v6606_v18 = vmul.f32 %v6595_v27, %v15185_v10 }
 0xbcd   : > { %v6632_v5 = vmul.f32 1.442695, %v6608_v6  ;;  %10969 = vpow2.f32 %v6620_v59 }
 0xbd0   : > { %10313 = vmatmul.mubr.msk.bf16.vlgmr.msra.gmra.mxu0 %vm4590_vm6, %v15181_v51 }
 0xbd1   : > { %10314 = vmatmul.mubr.msk.bf16.vlgmr.msra.gmra.mxu1 %vm4590_vm6, %v15181_v51  ;;  %6804 = vmatpush1.bf16.msra.mxu0 %v6692_v62  ;;  %v6587_v62 = vrot.slane %v13156_v55, %v15182_v21  ;;  %v6638_v55 = vmul.f32 1.442695, %v6611_v22  ;;  %v15186_v21 = vld [vmem:[#allocation91_spill] sm:$0xff] }
 0xbd2   : > { %6847 = vmatpush1.bf16.msra.mxu1 %v6698_v57  ;;  %6821 = vmatprep.mubr.bf16.mxu0 %v15086_v37  ;;  %v6609_v57 = vmul.f32 %v6575_v24, %v13276_v44  ;;  %v6636_v24 = vmul.f32 1.442695, %v6610_v19 }
 0xbd3   : > { %6864 = vmatprep.mubr.bf16.mxu1 %v15086_v37  ;;  %v6604_v29 = vmul.f32 %v6587_v62, %v15184_v7 }
 0xbd4   : > { %v6634_v48 = vmul.f32 1.442695, %v6609_v57 }
 0xbd8   : > { %10315 = vmatmul.mubr.msk.bf16.vlgmr.msra.gmra.mxu0 %vm4590_vm6, %v15181_v51 }
 0xbd9   : > { %10316 = vmatmul.mubr.msk.bf16.vlgmr.msra.gmra.mxu1 %vm4590_vm6, %v15181_v51  ;;  %6952 = vmatprep.mubr.bf16.mxu0 %v15086_v37  ;;  %v6618_v51 = vmul.f32 1.442695, %v6601_v43 }
 0xbda   : > { %6993 = vmatprep.mubr.bf16.mxu1 %v15086_v37 }
 0xbdb   : > { %10971 = vpow2.f32 %v6618_v51  ;;  %v15187_v51 = vld [vmem:[#allocation92_spill] sm:$0xff] }
 0xbdc   : > { %10973 = vpow2.f32 %v6622_v47  ;;  %v6607_v57 = vmul.f32 %v6599_v8, %v15187_v51  ;;  %v6614_v47 = vmul.f32 %v6595_v27, %v15127_v50  ;;  %v15189_v51 = vld [vmem:[#allocation95_spill] sm:$0xff] }
 0xbdd   : > { %10975 = vpow2.f32 %v6632_v5 }
 0xbde   : > { %10977 = vpow2.f32 %v6636_v24  ;;  %v6630_v5 = vmul.f32 1.442695, %v6607_v57 }
 0xbdf   : > { %10979 = vpow2.f32 %v6634_v48 }
 0xbe0   : > { %10981 = vpow2.f32 %v6638_v55  ;;  %v10968_v55 = vpop.eup %10967 }
 0xc80   : > { %v6438_v58 = vpop.f32.mrf.mxu0 }
 0xc81   : > { %v8688_v53 = vrot.slane %v6438_v58, 5  ;;  %v6479_v43 = vpop.f32.mrf.mxu1  ;;  %v6605_v58 = vmul.f32 %v6591_v2, %v15186_v21 }
 0xc82   : > { %v8690_v12 = vrot.slane %v6479_v43, 5  ;;  %v6440_v0 = vpop.f32.mrf.mxu0 }
 0xc83   : > { %v13959_v11 = vsel %vm8817_vm9, %v13785_v1, %v8688_v53  ;;  %v8689_v40 = vrot.slane %v6440_v0, 5  ;;  %v6481_v6 = vpop.f32.mrf.mxu1  ;;  %v6624_v53 = vmul.f32 1.442695, %v6604_v29  ;;  %v15188_v0 = vld [vmem:[#allocation93_spill] sm:$0xff]  ;;  %v6615_v29 = vmul.f32 %v6599_v8, %v15158_v13 }
 0xc84   : > { %v13964_v59 = vsel %vm8817_vm9, %v13790_v56, %v8690_v12  ;;  %v8691_v19 = vrot.slane %v6481_v6, 5  ;;  %v6442_v43 = vpop.f32.mrf.mxu0  ;;  %v6612_v22 = vmul.f32 %v6587_v62, %v15188_v0  ;;  %v6628_v12 = vmul.f32 1.442695, %v6606_v18 }
 0xc85   : > { %v13969_v10 = vsel %vm8817_vm9, %v13796_v31, %v8689_v40  ;;  %v6483_v1 = vpop.f32.mrf.mxu1  ;;  %v6626_v43 = vmul.f32 1.442695, %v6605_v58  ;;  %v6613_v31 = vmul.f32 %v6591_v2, %v15189_v51  ;;  %10983 = vpow2.f32 %v6624_v53 }
 0xc86   : > { %v13974_v21 = vsel %vm8817_vm9, %v13801_v36, %v8691_v19  ;;  %v6443_v56 = vpop.f32.mrf.mxu0  ;;  %v6640_v36 = vmul.f32 1.442695, %v6612_v22  ;;  %10985 = vpow2.f32 %v6628_v12  ;;  %v6644_v18 = vmul.f32 1.442695, %v6614_v47 }
 0xc87   : > { %v6484_v6 = vpop.f32.mrf.mxu1  ;;  %10987 = vpow2.f32 %v6626_v43  ;;  %v6642_v2 = vmul.f32 1.442695, %v6613_v31  ;;  %v6646_v53 = vmul.f32 1.442695, %v6615_v29 }
 0xc88   : > { %v6520_v40 = vpop.f32.mrf.mxu0  ;;  %10989 = vpow2.f32 %v6630_v5 }
 0xc89   : > { %v8692_v62 = vrot.slane %v6520_v40, 5  ;;  %v6561_v1 = vpop.f32.mrf.mxu1  ;;  %10991 = vpow2.f32 %v6640_v36 }
 0xc8a   : > { %v8694_v19 = vrot.slane %v6561_v1, 5  ;;  %v6522_v56 = vpop.f32.mrf.mxu0  ;;  %10993 = vpow2.f32 %v6644_v18  ;;  %v6875_v1 = vmul.f32 %v10968_v55, %v13831_v9 }
 0xc8b   : > { %v13981_v27 = vsel %vm8817_vm9, %v13812_v25, %v8692_v62  ;;  %v8693_v24 = vrot.slane %v6522_v56, 5  ;;  %v6563_v48 = vpop.f32.mrf.mxu1  ;;  %v10970_v25 = vpop.eup %10969  ;;  %10995 = vpow2.f32 %v6642_v2 }
 0xc8c   : > { %v13985_v8 = vsel %vm8817_vm9, %v13817_v30, %v8694_v19  ;;  %v8695_v58 = vrot.slane %v6563_v48, 5  ;;  %v6524_v57 = vpop.f32.mrf.mxu0  ;;  %v10972_v43 = vpop.eup %10971  ;;  %10997 = vpow2.f32 %v6646_v53 }
 0xc8d   : > { %v13989_v22 = vsel %vm8817_vm9, %v13822_v52, %v8693_v24  ;;  %v6565_v12 = vpop.f32.mrf.mxu1  ;;  %v10974_v40 = vpop.eup %10973 }
 0xc8e   : > { %v13993_v47 = vsel %vm8817_vm9, %v13825_v14, %v8695_v58  ;;  %v6525_v6 = vpop.f32.mrf.mxu0  ;;  %v10976_v29 = vpop.eup %10975  ;;  %v6877_v14 = vmul.f32 %v10970_v25, %v13837_v15  ;;  %v6876_v58 = vmul.f32 %v10972_v43, %v13843_v35  ;;  %v15190_v12 = vld [vmem:[#allocation99_spill] sm:$0xff]  ;;  %v15192_v25 = vld [vmem:[#allocation84_spill] sm:$0xff] }
 0xc8f   : > { %v6566_v30 = vpop.f32.mrf.mxu1  ;;  %v10978_v52 = vpop.eup %10977  ;;  %v6883_v19 = vmul.f32 %v10976_v29, %v13834_v39  ;;  %v15191_v39 = vld [vmem:[#allocation83_spill] sm:$0xff] }
 0xc90   : > { %v6737_v31 = vpop.f32.mrf.mxu0  ;;  %v10980_v56 = vpop.eup %10979  ;;  %v6885_v18 = vmul.f32 %v10978_v52, %v13840_v34  ;;  %v6878_v30 = vmul.f32 %v10974_v40, %v15191_v39 }
 0xc91   : > { %v6780_v5 = vpop.f32.mrf.mxu1  ;;  %v10982_v48 = vpop.eup %10981  ;;  %v13999_v2 = vadd.f32 %v6875_v1, %v6737_v31  ;;  %v6884_v6 = vmul.f32 %v10980_v56, %v15190_v12 }
 0xc92   : > { %v6739_v62 = vpop.f32.mrf.mxu0  ;;  %v10984_v9 = vpop.eup %10983  ;;  %v14005_v55 = vadd.f32 %v6877_v14, %v6780_v5  ;;  %v6886_v34 = vmul.f32 %v10982_v48, %v15192_v25 }
 0xc93   : > { %v6782_v36 = vpop.f32.mrf.mxu1  ;;  %v10986_v52 = vpop.eup %10985  ;;  %v14011_v31 = vadd.f32 %v6876_v58, %v6739_v62 }
 0xc94   : > { %v6741_v24 = vpop.f32.mrf.mxu0  ;;  %v14017_v56 = vadd.f32 %v6878_v30, %v6782_v36  ;;  %v6879_v36 = vmul.f32 %v10984_v9, %v13863_v20 }
 0xc95   : > { %v14002_v57 = vadd.f32 %v6883_v19, %v6741_v24  ;;  %v6784_v53 = vpop.f32.mrf.mxu1  ;;  %v10988_v19 = vpop.eup %10987 }
 0xc96   : > { %v14008_v29 = vadd.f32 %v6885_v18, %v6784_v53  ;;  %v6743_v15 = vpop.f32.mrf.mxu0  ;;  %15194 = vst [vmem:[#allocation116_spill] sm:$0xff] %v14017_v56  ;;  %v10990_v24 = vpop.eup %10989 }
 0xc97   : > { %v6907_v35 = vpack.c.bf16 %v14002_v57, %v13999_v2  ;;  %v14015_v43 = vadd.f32 %v6884_v6, %v6743_v15  ;;  %v6786_v1 = vpop.f32.mrf.mxu1  ;;  %v10992_v48 = vpop.eup %10991  ;;  %v6881_v15 = vmul.f32 %v10986_v52, %v13869_v60  ;;  %v6882_v60 = vmul.f32 %v10990_v24, %v13884_v42 }
 0xc98   : > { %v6909_v40 = vpack.c.bf16 %v14008_v29, %v14005_v55  ;;  %v14021_v5 = vadd.f32 %v6886_v34, %v6786_v1  ;;  %v6823_v14 = vpop.f32.mrf.mxu0  ;;  %v10994_v12 = vpop.eup %10993  ;;  %v6887_v39 = vmul.f32 %v10992_v48, %v13866_v38 }
 0xc99   : > { %15193 = vst [vmem:[#allocation101_spill] sm:$0xff] %v14015_v43  ;;  %v6908_v62 = vpack.c.bf16 %v14015_v43, %v14011_v31  ;;  %v6866_v18 = vpop.f32.mrf.mxu1  ;;  %v10996_v30 = vpop.eup %10995  ;;  %v6889_v34 = vmul.f32 %v10994_v12, %v13872_v32  ;;  %v14031_v43 = vadd.f32 %v6879_v36, %v6823_v14  ;;  %v15199_v12 = vld [vmem:[#allocation106_spill] sm:$0xff] }
 0xc9a   : > { %15195 = vst [vmem:[#allocation117_spill] sm:$0xff] %v14021_v5  ;;  %v6910_v58 = vpack.c.bf16 %v14021_v5, %v14017_v56  ;;  %v6825_v53 = vpop.f32.mrf.mxu0  ;;  %v10998_v1 = vpop.eup %10997  ;;  %v6880_v5 = vmul.f32 %v10988_v19, %v13875_v17  ;;  %v6888_v9 = vmul.f32 %v10996_v30, %v13879_v26  ;;  %v14037_v38 = vadd.f32 %v6881_v15, %v6866_v18  ;;  %v15197_v26 = vld [vmem:[#allocation104_spill] sm:$0xff] }
 0xc9b   : > { %v6868_v6 = vpop.f32.mrf.mxu1  ;;  %6934 = vmatprep.subr.bf16.mxu0 %v6908_v62  ;;  %v6890_v32 = vmul.f32 %v10998_v1, %v13888_v49  ;;  %v7185_v18 = vrot.slane %v15197_v26, 2  ;;  %v15198_v49 = vld [vmem:[#allocation105_spill] sm:$0xff]  ;;  %v7184_v36 = vrot.slane %v15199_v12, 2  ;;  %v15201_v15 = vld [vmem:[#allocation108_spill] sm:$0xff] }
 0xc9c   : > { %6975 = vmatprep.subr.bf16.mxu1 %v6910_v58  ;;  %v6827_v25 = vpop.f32.mrf.mxu0  ;;  %6935 = vmatpush1.bf16.msra.mxu0 %v6907_v35  ;;  %v14043_v35 = vadd.f32 %v6880_v5, %v6825_v53  ;;  %v14052_v48 = vadd.f32 %v6882_v60, %v6868_v6  ;;  %v7187_v5 = vrot.slane %v15198_v49, 2  ;;  %v15202_v1 = vld [vmem:[#allocation109_spill] sm:$0xff] }
 0xc9d   : > { %v14034_v56 = vadd.f32 %v6887_v39, %v6827_v25  ;;  %v6870_v20 = vpop.f32.mrf.mxu1  ;;  %6976 = vmatpush1.bf16.msra.mxu1 %v6909_v40  ;;  %v15196_v40 = vld [vmem:[#allocation114_spill] sm:$0xff]  ;;  %v7199_v6 = vand.u32 %v7185_v18, %v13141_v46  ;;  %v15200_v39 = vld [vmem:[#allocation107_spill] sm:$0xff]  ;;  %v7189_v25 = vrot.slane %v15201_v15, 2 }
 0xc9e   : > { %v14040_v52 = vadd.f32 %v6889_v34, %v6870_v20  ;;  %v6829_v62 = vpop.f32.mrf.mxu0  ;;  %v7186_v30 = vrot.slane %v15200_v39, 2  ;;  %v7205_v34 = vand.u32 %v7187_v5, %v13141_v46  ;;  %v7191_v20 = vrot.slane %v15202_v1, 2  ;;  %v15204_v18 = vld [vmem:[#allocation111_spill] sm:$0xff]  ;;  %v15209_v1 = vld [vmem:[#allocation74_spill] sm:$0xff] }
 0xc9f   : > { %v6911_v17 = vpack.c.bf16 %v14034_v56, %v14031_v43  ;;  %v14047_v19 = vadd.f32 %v6888_v9, %v6829_v62  ;;  %v6872_v14 = vpop.f32.mrf.mxu1  ;;  %10317 = vmatmul.mubr.msk.bf16.vlgmr.msra.gmra.mxu0 %vm4835_vm7, %v15196_v40  ;;  %v7196_v9 = vand.u32 %v7184_v36, %v13141_v46  ;;  %v7211_v62 = vand.u32 %v7189_v25, %v13141_v46 }
 0xca0   : > { %v6913_v42 = vpack.c.bf16 %v14040_v52, %v14037_v38  ;;  %v14056_v24 = vadd.f32 %v6890_v32, %v6872_v14  ;;  %10318 = vmatmul.mubr.msk.bf16.vlgmr.msra.gmra.mxu1 %vm4835_vm7, %v15196_v40  ;;  %7034 = vmatprep.mubr.bf16.mxu0 %v15086_v37  ;;  %v7202_v60 = vand.u32 %v7186_v30, %v13141_v46 }
 0xca1   : > { %v6912_v58 = vpack.c.bf16 %v14047_v19, %v14043_v35  ;;  %7075 = vmatprep.mubr.bf16.mxu1 %v15086_v37  ;;  %v7217_v32 = vand.u32 %v7191_v20, %v13141_v46 }
 0xca2   : > { %v6914_v53 = vpack.c.bf16 %v14056_v24, %v14052_v48 }
 0xca3   : > { %7016 = vmatprep.subr.bf16.mxu0 %v6912_v58  ;;  %v15205_v58 = vld [vmem:[#allocation115_spill] sm:$0xff] }
 0xca4   : > { %7057 = vmatprep.subr.bf16.mxu1 %v6914_v53  ;;  %7017 = vmatpush1.bf16.msra.mxu0 %v6911_v17  ;;  %v15203_v17 = vld [vmem:[#allocation110_spill] sm:$0xff]  ;;  %v15206_v53 = vld [vmem:[#allocation51_spill] sm:$0xff] }
 0xca5   : > { %7058 = vmatpush1.bf16.msra.mxu1 %v6913_v42  ;;  %7233 = vmatprep.subr.bf16.mxu0 %v7199_v6  ;;  %v7188_v14 = vrot.slane %v15203_v17, 2  ;;  %v7190_v42 = vrot.slane %v15204_v18, 2  ;;  %v7087_v36 = vrot.slane %v13123_v4, %v15206_v53  ;;  %v7095_v6 = vrot.slane %v13126_v41, %v15206_v53  ;;  %v15208_v18 = vld [vmem:[#allocation89_spill] sm:$0xff] }
 0xca6   : > { %7276 = vmatprep.subr.bf16.mxu1 %v7205_v34  ;;  %v7091_v30 = vrot.slane %v13129_v28, %v15206_v53  ;;  %v7099_v25 = vrot.slane %v13133_v23, %v15206_v53  ;;  %v7111_v15 = vrot.slane %v15209_v1, %v15206_v53 }
 0xca7   : > { %10319 = vmatmul.mubr.msk.bf16.vlgmr.msra.gmra.mxu0 %vm4835_vm7, %v15196_v40  ;;  %v7208_v5 = vand.u32 %v7188_v14, %v13141_v46  ;;  %v7116_v34 = vmul.f32 %v7087_v36, %v13256_v16  ;;  %v7118_v20 = vmul.f32 %v7095_v6, %v13281_v63 }
 0xca8   : > { %10320 = vmatmul.mubr.msk.bf16.vlgmr.msra.gmra.mxu1 %vm4835_vm7, %v15196_v40  ;;  %7234 = vmatpush1.bf16.msra.mxu0 %v7196_v9  ;;  %v7214_v40 = vand.u32 %v7190_v42, %v13141_v46  ;;  %v7117_v9 = vmul.f32 %v7091_v30, %v13260_v61  ;;  %v7125_v42 = vmul.f32 %v7091_v30, %v13276_v44 }
 0xca9   : > { %7277 = vmatpush1.bf16.msra.mxu1 %v7202_v60  ;;  %7319 = vmatprep.subr.bf16.mxu0 %v7211_v62  ;;  %v7124_v60 = vmul.f32 %v7087_v36, %v13268_v45  ;;  %v7119_v62 = vmul.f32 %v7099_v25, %v13264_v33  ;;  %v7132_v14 = vmul.f32 1.442695, %v7116_v34  ;;  %v7127_v17 = vmul.f32 %v7099_v25, %v15208_v18  ;;  %v15210_v36 = vld [vmem:[#allocation76_spill] sm:$0xff] }
 0xcaa   : > { %7362 = vmatprep.subr.bf16.mxu1 %v7217_v32  ;;  %7251 = vmatprep.mubr.bf16.mxu0 %v15086_v37  ;;  %v7126_v32 = vmul.f32 %v7095_v6, %v13273_v54  ;;  %v7134_v39 = vmul.f32 1.442695, %v7117_v9  ;;  %v7107_v49 = vrot.slane %v15210_v36, %v15206_v53  ;;  %v7115_v30 = vrot.slane %v15183_v3, %v15206_v53 }
 0xcab   : > { %7294 = vmatprep.mubr.bf16.mxu1 %v15086_v37  ;;  %v7148_v12 = vmul.f32 1.442695, %v7124_v60  ;;  %v7138_v6 = vmul.f32 1.442695, %v7119_v62  ;;  %10999 = vpow2.f32 %v7132_v14  ;;  %v7154_v9 = vmul.f32 1.442695, %v7127_v17 }
 0xcac   : > { %v7152_v34 = vmul.f32 1.442695, %v7126_v32  ;;  %v15211_v60 = vld [vmem:[#allocation97_spill] sm:$0xff] }
 0xcad   : > { %v7122_v54 = vmul.f32 %v7111_v15, %v15211_v60 }
 0xcaf   : > { %10321 = vmatmul.mubr.msk.bf16.vlgmr.msra.gmra.mxu0 %vm4590_vm6, %v15205_v58 }
 0xcb0   : > { %10322 = vmatmul.mubr.msk.bf16.vlgmr.msra.gmra.mxu1 %vm4590_vm6, %v15205_v58  ;;  %7320 = vmatpush1.bf16.msra.mxu0 %v7208_v5  ;;  %v15207_v5 = vld [vmem:[#allocation73_spill] sm:$0xff] }
 0xcb1   : > { %7363 = vmatpush1.bf16.msra.mxu1 %v7214_v40  ;;  %7337 = vmatprep.mubr.bf16.mxu0 %v15086_v37  ;;  %v7136_v40 = vmul.f32 1.442695, %v7118_v20  ;;  %v7150_v20 = vmul.f32 1.442695, %v7125_v42 }
 0xcb2   : > { %7380 = vmatprep.mubr.bf16.mxu1 %v15086_v37 }
 0xcb3   : > { %11001 = vpow2.f32 %v7136_v40  ;;  %v15213_v40 = vld [vmem:[#allocation92_spill] sm:$0xff] }
 0xcb4   : > { %11003 = vpow2.f32 %v7134_v39  ;;  %v7123_v17 = vmul.f32 %v7115_v30, %v15213_v40 }
 0xcb5   : > { %11005 = vpow2.f32 %v7138_v6  ;;  %v7130_v6 = vmul.f32 %v7111_v15, %v15127_v50 }
 0xcb6   : > { %11007 = vpow2.f32 %v7148_v12  ;;  %v7146_v12 = vmul.f32 1.442695, %v7123_v17 }
 0xcb7   : > { %10323 = vmatmul.mubr.msk.bf16.vlgmr.msra.gmra.mxu0 %vm4590_vm6, %v15205_v58  ;;  %11009 = vpow2.f32 %v7152_v34 }
 0xcb8   : > { %10324 = vmatmul.mubr.msk.bf16.vlgmr.msra.gmra.mxu1 %vm4590_vm6, %v15205_v58  ;;  %7468 = vmatprep.mubr.bf16.mxu0 %v15086_v37  ;;  %v7103_v58 = vrot.slane %v15207_v5, %v15206_v53  ;;  %v15212_v53 = vld [vmem:[#allocation91_spill] sm:$0xff]  ;;  %11011 = vpow2.f32 %v7150_v20 }
 0xcb9   : > { %7509 = vmatprep.mubr.bf16.mxu1 %v15086_v37  ;;  %11013 = vpow2.f32 %v7154_v9 }
 0xcba   : > { %v7120_v25 = vmul.f32 %v7103_v58, %v15184_v7  ;;  %v7128_v39 = vmul.f32 %v7103_v58, %v15188_v0 }
 0xd5f   : > { %v6954_v26 = vpop.f32.mrf.mxu0 }
 0xd60   : > { %v8712_v44 = vrot.slane %v6954_v26, 4  ;;  %v6995_v5 = vpop.f32.mrf.mxu1  ;;  %v7121_v26 = vmul.f32 %v7107_v49, %v15212_v53 }
 0xd61   : > { %v8714_v18 = vrot.slane %v6995_v5, 4  ;;  %v6956_v1 = vpop.f32.mrf.mxu0 }
 0xd62   : > { %v14127_v36 = vsel %vm8826_vm10, %v13959_v11, %v8712_v44  ;;  %v8713_v62 = vrot.slane %v6956_v1, 4  ;;  %v6997_v32 = vpop.f32.mrf.mxu1  ;;  %v7140_v11 = vmul.f32 1.442695, %v7120_v25  ;;  %v7131_v25 = vmul.f32 %v7115_v30, %v15158_v13 }
 0xd63   : > { %v14132_v14 = vsel %vm8826_vm10, %v13964_v59, %v8714_v18  ;;  %v8715_v42 = vrot.slane %v6997_v32, 4  ;;  %v6958_v5 = vpop.f32.mrf.mxu0  ;;  %v7144_v18 = vmul.f32 1.442695, %v7122_v54  ;;  %v7160_v54 = vmul.f32 1.442695, %v7130_v6 }
 0xd64   : > { %v14137_v60 = vsel %vm8826_vm10, %v13969_v10, %v8713_v62  ;;  %v6999_v44 = vpop.f32.mrf.mxu1  ;;  %v7142_v5 = vmul.f32 1.442695, %v7121_v26  ;;  %v7129_v10 = vmul.f32 %v7107_v49, %v15189_v51  ;;  %11015 = vpow2.f32 %v7140_v11 }
 0xd65   : > { %v14142_v1 = vsel %vm8826_vm10, %v13974_v21, %v8715_v42  ;;  %v6959_v59 = vpop.f32.mrf.mxu0  ;;  %v7156_v21 = vmul.f32 1.442695, %v7128_v39  ;;  %11017 = vpow2.f32 %v7144_v18  ;;  %v7162_v17 = vmul.f32 1.442695, %v7131_v25 }
 0xd66   : > { %v7000_v32 = vpop.f32.mrf.mxu1  ;;  %11019 = vpow2.f32 %v7142_v5  ;;  %v7158_v49 = vmul.f32 1.442695, %v7129_v10 }
 0xd67   : > { %v7036_v62 = vpop.f32.mrf.mxu0  ;;  %11021 = vpow2.f32 %v7146_v12 }
 0xd68   : > { %v8716_v58 = vrot.slane %v7036_v62, 4  ;;  %v7077_v44 = vpop.f32.mrf.mxu1  ;;  %11023 = vpow2.f32 %v7156_v21 }
 0xd69   : > { %v8718_v42 = vrot.slane %v7077_v44, 4  ;;  %v7038_v59 = vpop.f32.mrf.mxu0  ;;  %11025 = vpow2.f32 %v7160_v54 }
 0xd6a   : > { %v14149_v15 = vsel %vm8826_vm10, %v13981_v27, %v8716_v58  ;;  %v8717_v34 = vrot.slane %v7038_v59, 4  ;;  %v7079_v20 = vpop.f32.mrf.mxu1  ;;  %v11000_v27 = vpop.eup %10999  ;;  %11027 = vpow2.f32 %v7158_v49 }
 0xd6b   : > { %v14153_v9 = vsel %vm8826_vm10, %v13985_v8, %v8718_v42  ;;  %v8719_v30 = vrot.slane %v7079_v20, 4  ;;  %v7040_v26 = vpop.f32.mrf.mxu0  ;;  %v11002_v32 = vpop.eup %11001  ;;  %11029 = vpow2.f32 %v7162_v17  ;;  %v7391_v44 = vmul.f32 %v11000_v27, %v13999_v2 }
 0xd6c   : > { %v14157_v11 = vsel %vm8826_vm10, %v13989_v22, %v8717_v34  ;;  %v7081_v39 = vpop.f32.mrf.mxu1  ;;  %v11004_v5 = vpop.eup %11003  ;;  %v7393_v59 = vmul.f32 %v11002_v32, %v14005_v55  ;;  %v15216_v32 = vld [vmem:[#allocation117_spill] sm:$0xff] }
 0xd6d   : > { %v14161_v18 = vsel %vm8826_vm10, %v13993_v47, %v8719_v30  ;;  %v7041_v6 = vpop.f32.mrf.mxu0  ;;  %v11006_v62 = vpop.eup %11005  ;;  %v7392_v30 = vmul.f32 %v11004_v5, %v14011_v31  ;;  %v15214_v39 = vld [vmem:[#allocation101_spill] sm:$0xff] }
 0xd6e   : > { %v7082_v8 = vpop.f32.mrf.mxu1  ;;  %v11008_v25 = vpop.eup %11007 }
 0xd6f   : > { %v7253_v10 = vpop.f32.mrf.mxu0  ;;  %v11010_v58 = vpop.eup %11009  ;;  %v7399_v42 = vmul.f32 %v11008_v25, %v14002_v57  ;;  %v15215_v57 = vld [vmem:[#allocation116_spill] sm:$0xff] }
 0xd70   : > { %v7296_v12 = vpop.f32.mrf.mxu1  ;;  %v11012_v47 = vpop.eup %11011  ;;  %v7401_v34 = vmul.f32 %v11010_v58, %v14008_v29  ;;  %v14167_v49 = vadd.f32 %v7391_v44, %v7253_v10  ;;  %v7394_v8 = vmul.f32 %v11006_v62, %v15215_v57 }
 0xd71   : > { %v7255_v22 = vpop.f32.mrf.mxu0  ;;  %v11014_v20 = vpop.eup %11013  ;;  %v7400_v6 = vmul.f32 %v11012_v47, %v15214_v39  ;;  %v14173_v27 = vadd.f32 %v7393_v59, %v7296_v12 }
 0xd72   : > { %v7298_v21 = vpop.f32.mrf.mxu1  ;;  %v11016_v2 = vpop.eup %11015  ;;  %v7402_v29 = vmul.f32 %v11014_v20, %v15216_v32  ;;  %v14179_v10 = vadd.f32 %v7392_v30, %v7255_v22 }
 0xd73   : > { %v7257_v54 = vpop.f32.mrf.mxu0  ;;  %v11018_v58 = vpop.eup %11017  ;;  %v14185_v47 = vadd.f32 %v7394_v8, %v7298_v21  ;;  %v7395_v21 = vmul.f32 %v11016_v2, %v14031_v43 }
 0xd74   : > { %v14170_v26 = vadd.f32 %v7399_v42, %v7257_v54  ;;  %v7300_v17 = vpop.f32.mrf.mxu1  ;;  %v11020_v42 = vpop.eup %11019 }
 0xd75   : > { %v14176_v25 = vadd.f32 %v7401_v34, %v7300_v17  ;;  %v7259_v55 = vpop.f32.mrf.mxu0  ;;  %15218 = vst [vmem:[#allocation119_spill] sm:$0xff] %v14185_v47  ;;  %v11022_v54 = vpop.eup %11021 }
 0xd76   : > { %v7423_v31 = vpack.c.bf16 %v14170_v26, %v14167_v49  ;;  %v14183_v5 = vadd.f32 %v7400_v6, %v7259_v55  ;;  %v7302_v44 = vpop.f32.mrf.mxu1  ;;  %v11024_v20 = vpop.eup %11023  ;;  %v7397_v55 = vmul.f32 %v11018_v58, %v14037_v38  ;;  %v7398_v38 = vmul.f32 %v11022_v54, %v14052_v48 }
 0xd77   : > { %v7425_v62 = vpack.c.bf16 %v14176_v25, %v14173_v27  ;;  %v14189_v12 = vadd.f32 %v7402_v29, %v7302_v44  ;;  %v7339_v59 = vpop.f32.mrf.mxu0  ;;  %v11026_v39 = vpop.eup %11025  ;;  %v7403_v57 = vmul.f32 %v11024_v20, %v14034_v56 }
 0xd78   : > { %15217 = vst [vmem:[#allocation118_spill] sm:$0xff] %v14183_v5  ;;  %v7424_v22 = vpack.c.bf16 %v14183_v5, %v14179_v10  ;;  %v7382_v34 = vpop.f32.mrf.mxu1  ;;  %v11028_v8 = vpop.eup %11027  ;;  %v7405_v29 = vmul.f32 %v11026_v39, %v14040_v52  ;;  %v14199_v5 = vadd.f32 %v7395_v21, %v7339_v59  ;;  %v15222_v39 = vld [vmem:[#allocation69_spill] sm:$0xff] }
 0xd79   : > { %15219 = vst [vmem:[#allocation100_spill] sm:$0xff] %v14189_v12  ;;  %v7426_v30 = vpack.c.bf16 %v14189_v12, %v14185_v47  ;;  %v7341_v17 = vpop.f32.mrf.mxu0  ;;  %v11030_v44 = vpop.eup %11029  ;;  %v7396_v12 = vmul.f32 %v11020_v42, %v14043_v35  ;;  %v7404_v2 = vmul.f32 %v11028_v8, %v14047_v19  ;;  %v15220_v19 = vld [vmem:[#allocation70_spill] sm:$0xff]  ;;  %v7700_v21 = vrot.slane %v15222_v39, 3 }
 0xd7a   : > { %v7384_v6 = vpop.f32.mrf.mxu1  ;;  %7450 = vmatprep.subr.bf16.mxu0 %v7424_v22  ;;  %v7432_v56 = vpop.permute.xlu1 %7431  ;;  %v14205_v22 = vadd.f32 %v7397_v55, %v7382_v34  ;;  %v7701_v34 = vrot.slane %v15220_v19, 3  ;;  %v15224_v55 = vld [vmem:[#allocation79_spill] sm:$0xff]  ;;  %v15227_v19 = vld [vmem:[#allocation80_spill] sm:$0xff] }
 0xd7b   : > { %7491 = vmatprep.subr.bf16.mxu1 %v7426_v30  ;;  %v7343_v32 = vpop.f32.mrf.mxu0  ;;  %7451 = vmatpush1.bf16.msra.mxu0 %v7423_v31  ;;  %v7406_v31 = vmul.f32 %v11030_v44, %v14056_v24  ;;  %v14211_v59 = vadd.f32 %v7396_v12, %v7341_v17  ;;  %v14219_v20 = vadd.f32 %v7398_v38, %v7384_v6  ;;  %v15221_v24 = vld [vmem:[#allocation72_spill] sm:$0xff]  ;;  %v15225_v44 = vld [vmem:[#allocation81_spill] sm:$0xff] }
 0xd7c   : > { %v14202_v47 = vadd.f32 %v7403_v57, %v7343_v32  ;;  %v7386_v43 = vpop.f32.mrf.mxu1  ;;  %7492 = vmatpush1.bf16.msra.mxu1 %v7425_v62  ;;  %v7703_v12 = vrot.slane %v15221_v24, 3  ;;  %v7715_v6 = vand.u32 %v7701_v34, %v13141_v46  ;;  %v15223_v57 = vld [vmem:[#allocation71_spill] sm:$0xff]  ;;  %v7705_v32 = vrot.slane %v15224_v55, 3 }
 0xd7d   : > { %v14208_v58 = vadd.f32 %v7405_v29, %v7386_v43  ;;  %v7345_v52 = vpop.f32.mrf.mxu0  ;;  %v7702_v8 = vrot.slane %v15223_v57, 3  ;;  %v7707_v43 = vrot.slane %v15225_v44, 3  ;;  %v7706_v34 = vrot.slane %v15227_v19, 3 }
 0xd7e   : > { %v7427_v35 = vpack.c.bf16 %v14202_v47, %v14199_v5  ;;  %v14215_v42 = vadd.f32 %v7404_v2, %v7345_v52  ;;  %v7388_v62 = vpop.f32.mrf.mxu1  ;;  %10325 = vmatmul.mubr.msk.bf16.vlgmr.msra.gmra.mxu0 %vm4835_vm7, %v7432_v56  ;;  %v7721_v29 = vand.u32 %v7703_v12, %v13141_v46  ;;  %v7712_v2 = vand.u32 %v7700_v21, %v13141_v46  ;;  %v15228_v12 = vld [vmem:[#allocation52_spill] sm:$0xff] }
 0xd7f   : > { %v7429_v48 = vpack.c.bf16 %v14208_v58, %v14205_v22  ;;  %v14223_v54 = vadd.f32 %v7406_v31, %v7388_v62  ;;  %10326 = vmatmul.mubr.msk.bf16.vlgmr.msra.gmra.mxu1 %vm4835_vm7, %v7432_v56  ;;  %7550 = vmatprep.mubr.bf16.mxu0 %v15086_v37  ;;  %v7718_v38 = vand.u32 %v7702_v8, %v13141_v46 }
 0xd80   : > { %v7428_v30 = vpack.c.bf16 %v14215_v42, %v14211_v59  ;;  %7591 = vmatprep.mubr.bf16.mxu1 %v15086_v37  ;;  %v7727_v52 = vand.u32 %v7705_v32, %v13141_v46  ;;  %v7733_v31 = vand.u32 %v7707_v43, %v13141_v46  ;;  %v7607_v39 = vrot.slane %v13129_v28, %v15228_v12 }
 0xd81   : > { %v7430_v17 = vpack.c.bf16 %v14223_v54, %v14219_v20  ;;  %v7615_v21 = vrot.slane %v13133_v23, %v15228_v12 }
 0xd82   : > { %7532 = vmatprep.subr.bf16.mxu0 %v7428_v30  ;;  %v7603_v30 = vrot.slane %v13123_v4, %v15228_v12  ;;  %v7633_v8 = vmul.f32 %v7607_v39, %v13260_v61 }
 0xd83   : > { %7573 = vmatprep.subr.bf16.mxu1 %v7430_v17  ;;  %7533 = vmatpush1.bf16.msra.mxu0 %v7427_v35  ;;  %v15226_v35 = vld [vmem:[#allocation78_spill] sm:$0xff]  ;;  %v7611_v17 = vrot.slane %v13126_v41, %v15228_v12  ;;  %v7635_v32 = vmul.f32 %v7615_v21, %v13264_v33 }
 0xd84   : > { %7574 = vmatpush1.bf16.msra.mxu1 %v7429_v48  ;;  %7749 = vmatprep.subr.bf16.mxu0 %v7715_v6  ;;  %v7704_v62 = vrot.slane %v15226_v35, 3  ;;  %v7692_v48 = vpop.trf.xlu1  ;;  %v7632_v6 = vmul.f32 %v7603_v30, %v13256_v16  ;;  %v7640_v55 = vmul.f32 %v7603_v30, %v13268_v45  ;;  %v15234_v30 = vld [vmem:[#allocation76_spill] sm:$0xff] }
 0xd85   : > { %7792 = vmatprep.subr.bf16.mxu1 %v7721_v29  ;;  %v7634_v57 = vmul.f32 %v7611_v17, %v13281_v63  ;;  %v15229_v29 = vld [vmem:[#allocation87_spill] sm:$0xff]  ;;  %v7623_v61 = vrot.slane %v15234_v30, %v15228_v12 }
 0xd86   : > { %10327 = vmatmul.mubr.msk.bf16.vlgmr.msra.gmra.mxu0 %vm4835_vm7, %v7432_v56  ;;  %v7724_v24 = vand.u32 %v7704_v62, %v13141_v46  ;;  %v7642_v44 = vmul.f32 %v7611_v17, %v15229_v29  ;;  %v7648_v43 = vmul.f32 1.442695, %v7632_v6  ;;  %v15232_v62 = vld [vmem:[#allocation89_spill] sm:$0xff]  ;;  %v7654_v17 = vmul.f32 1.442695, %v7635_v32 }
 0xd87   : > { %10328 = vmatmul.mubr.msk.bf16.vlgmr.msra.gmra.mxu1 %vm4835_vm7, %v7432_v56  ;;  %7750 = vmatpush1.bf16.msra.mxu0 %v7712_v2  ;;  %v7730_v56 = vand.u32 %v7706_v34, %v13141_v46  ;;  %v15230_v2 = vld [vmem:[#allocation88_spill] sm:$0xff]  ;;  %v7652_v35 = vmul.f32 1.442695, %v7634_v57  ;;  %v7643_v19 = vmul.f32 %v7615_v21, %v15232_v62  ;;  %v15233_v34 = vld [vmem:[#allocation74_spill] sm:$0xff] }
 0xd88   : > { %7793 = vmatpush1.bf16.msra.mxu1 %v7718_v38  ;;  %7835 = vmatprep.subr.bf16.mxu0 %v7727_v52  ;;  %v7641_v38 = vmul.f32 %v7607_v39, %v15230_v2  ;;  %v15231_v52 = vld [vmem:[#allocation73_spill] sm:$0xff]  ;;  %v7668_v6 = vmul.f32 1.442695, %v7642_v44  ;;  %v7631_v39 = vrot.slane %v15183_v3, %v15228_v12  ;;  %11031 = vpow2.f32 %v7648_v43 }
 0xd89   : > { %7878 = vmatprep.subr.bf16.mxu1 %v7733_v31  ;;  %7767 = vmatprep.mubr.bf16.mxu0 %v15086_v37  ;;  %v7619_v31 = vrot.slane %v15231_v52, %v15228_v12  ;;  %11033 = vpow2.f32 %v7652_v35 }
 0xd8a   : > { %7810 = vmatprep.mubr.bf16.mxu1 %v15086_v37  ;;  %v7666_v57 = vmul.f32 1.442695, %v7641_v38  ;;  %v7639_v35 = vmul.f32 %v7631_v39, %v15213_v40 }
 0xd8b   : > { %v7636_v21 = vmul.f32 %v7619_v31, %v15184_v7 }
 0xd8e   : > { %10329 = vmatmul.mubr.msk.bf16.vlgmr.msra.gmra.mxu0 %vm4590_vm6, %v7692_v48 }
 0xd8f   : > { %10330 = vmatmul.mubr.msk.bf16.vlgmr.msra.gmra.mxu1 %vm4590_vm6, %v7692_v48  ;;  %7836 = vmatpush1.bf16.msra.mxu0 %v7724_v24  ;;  %v7650_v24 = vmul.f32 1.442695, %v7633_v8  ;;  %v7670_v8 = vmul.f32 1.442695, %v7643_v19 }
 0xd90   : > { %7879 = vmatpush1.bf16.msra.mxu1 %v7730_v56  ;;  %7853 = vmatprep.mubr.bf16.mxu0 %v15086_v37  ;;  %v7664_v56 = vmul.f32 1.442695, %v7640_v55  ;;  %v15235_v55 = vld [vmem:[#allocation97_spill] sm:$0xff] }
 0xd91   : > { %7896 = vmatprep.mubr.bf16.mxu1 %v15086_v37  ;;  %11035 = vpow2.f32 %v7650_v24 }
 0xd92   : > { %11037 = vpow2.f32 %v7654_v17 }
 0xd93   : > { %11039 = vpow2.f32 %v7664_v56  ;;  %v7662_v56 = vmul.f32 1.442695, %v7639_v35 }
 0xd94   : > { %11041 = vpow2.f32 %v7668_v6 }
 0xd95   : > { %11043 = vpow2.f32 %v7666_v57 }
 0xd96   : > { %10331 = vmatmul.mubr.msk.bf16.vlgmr.msra.gmra.mxu0 %vm4590_vm6, %v7692_v48  ;;  %11045 = vpow2.f32 %v7670_v8 }
 0xd97   : > { %10332 = vmatmul.mubr.msk.bf16.vlgmr.msra.gmra.mxu1 %vm4590_vm6, %v7692_v48  ;;  %7984 = vmatprep.mubr.bf16.mxu0 %v15086_v37  ;;  %v7627_v48 = vrot.slane %v15233_v34, %v15228_v12 }
 0xd98   : > { %8025 = vmatprep.mubr.bf16.mxu1 %v15086_v37 }
 0xd99   : > { %v7638_v29 = vmul.f32 %v7627_v48, %v15235_v55  ;;  %v7646_v17 = vmul.f32 %v7627_v48, %v15127_v50 }
 0xe3e   : > { %v7470_v33 = vpop.f32.mrf.mxu0 }
 0xe3f   : > { %v8736_v2 = vrot.slane %v7470_v33, 3  ;;  %v7511_v52 = vpop.f32.mrf.mxu1  ;;  %v7637_v33 = vmul.f32 %v7623_v61, %v15212_v53 }
 0xe40   : > { %v8738_v62 = vrot.slane %v7511_v52, 3  ;;  %v7472_v34 = vpop.f32.mrf.mxu0 }
 0xe41   : > { %v14287_v30 = vsel %vm8835_vm11, %v14127_v36, %v8736_v2  ;;  %v8737_v32 = vrot.slane %v7472_v34, 3  ;;  %v7513_v44 = vpop.f32.mrf.mxu1  ;;  %v7656_v2 = vmul.f32 1.442695, %v7636_v21  ;;  %v7644_v34 = vmul.f32 %v7619_v31, %v15188_v0 }
 0xe42   : > { %v14292_v43 = vsel %vm8835_vm11, %v14132_v14, %v8738_v62  ;;  %v8739_v38 = vrot.slane %v7513_v44, 3  ;;  %v7474_v52 = vpop.f32.mrf.mxu0  ;;  %v7660_v62 = vmul.f32 1.442695, %v7638_v29  ;;  %v7647_v21 = vmul.f32 %v7631_v39, %v15158_v13 }
 0xe43   : > { %v14297_v19 = vsel %vm8835_vm11, %v14137_v60, %v8737_v32  ;;  %v7515_v36 = vpop.f32.mrf.mxu1  ;;  %v7658_v52 = vmul.f32 1.442695, %v7637_v33  ;;  %v7645_v60 = vmul.f32 %v7623_v61, %v15189_v51  ;;  %11047 = vpow2.f32 %v7656_v2 }
 0xe44   : > { %v14302_v24 = vsel %vm8835_vm11, %v14142_v1, %v8739_v38  ;;  %v7475_v14 = vpop.f32.mrf.mxu0  ;;  %v7672_v1 = vmul.f32 1.442695, %v7644_v34  ;;  %11049 = vpow2.f32 %v7660_v62  ;;  %v7676_v29 = vmul.f32 1.442695, %v7646_v17 }
 0xe45   : > { %v7516_v44 = vpop.f32.mrf.mxu1  ;;  %11051 = vpow2.f32 %v7658_v52  ;;  %v7674_v61 = vmul.f32 1.442695, %v7645_v60  ;;  %v7678_v35 = vmul.f32 1.442695, %v7647_v21 }
 0xe46   : > { %v7552_v32 = vpop.f32.mrf.mxu0  ;;  %11053 = vpow2.f32 %v7662_v56 }
 0xe47   : > { %v8740_v31 = vrot.slane %v7552_v32, 3  ;;  %v7593_v36 = vpop.f32.mrf.mxu1  ;;  %11055 = vpow2.f32 %v7672_v1 }
 0xe48   : > { %v8742_v38 = vrot.slane %v7593_v36, 3  ;;  %v7554_v14 = vpop.f32.mrf.mxu0  ;;  %11057 = vpow2.f32 %v7676_v29 }
 0xe49   : > { %v14309_v48 = vsel %vm8835_vm11, %v14149_v15, %v8740_v31  ;;  %v8741_v6 = vrot.slane %v7554_v14, 3  ;;  %v7595_v57 = vpop.f32.mrf.mxu1  ;;  %v11032_v15 = vpop.eup %11031  ;;  %11059 = vpow2.f32 %v7674_v61 }
 0xe4a   : > { %v14313_v8 = vsel %vm8835_vm11, %v14153_v9, %v8742_v38  ;;  %v8743_v39 = vrot.slane %v7595_v57, 3  ;;  %v7556_v33 = vpop.f32.mrf.mxu0  ;;  %v11034_v44 = vpop.eup %11033  ;;  %11061 = vpow2.f32 %v7678_v35  ;;  %v7907_v36 = vmul.f32 %v11032_v15, %v14167_v49 }
 0xe4b   : > { %v14317_v2 = vsel %vm8835_vm11, %v14157_v11, %v8741_v6  ;;  %v7597_v34 = vpop.f32.mrf.mxu1  ;;  %v11036_v52 = vpop.eup %11035  ;;  %v7909_v14 = vmul.f32 %v11034_v44, %v14173_v27  ;;  %v15238_v44 = vld [vmem:[#allocation100_spill] sm:$0xff] }
 0xe4c   : > { %v14321_v62 = vsel %vm8835_vm11, %v14161_v18, %v8743_v39  ;;  %v7557_v17 = vpop.f32.mrf.mxu0  ;;  %v11038_v32 = vpop.eup %11037  ;;  %v7908_v39 = vmul.f32 %v11036_v52, %v14179_v10  ;;  %v15236_v34 = vld [vmem:[#allocation118_spill] sm:$0xff] }
 0xe4d   : > { %v7598_v9 = vpop.f32.mrf.mxu1  ;;  %v11040_v21 = vpop.eup %11039 }
 0xe4e   : > { %v7769_v60 = vpop.f32.mrf.mxu0  ;;  %v11042_v31 = vpop.eup %11041  ;;  %v7915_v38 = vmul.f32 %v11040_v21, %v14170_v26  ;;  %v15237_v26 = vld [vmem:[#allocation119_spill] sm:$0xff] }
 0xe4f   : > { %v7812_v56 = vpop.f32.mrf.mxu1  ;;  %v11044_v18 = vpop.eup %11043  ;;  %v7917_v6 = vmul.f32 %v11042_v31, %v14176_v25  ;;  %v14327_v61 = vadd.f32 %v7907_v36, %v7769_v60  ;;  %v7910_v9 = vmul.f32 %v11038_v32, %v15237_v26 }
 0xe50   : > { %v7771_v11 = vpop.f32.mrf.mxu0  ;;  %v11046_v57 = vpop.eup %11045  ;;  %v7916_v17 = vmul.f32 %v11044_v18, %v15236_v34  ;;  %v14333_v15 = vadd.f32 %v7909_v14, %v7812_v56 }
 0xe51   : > { %v7814_v1 = vpop.f32.mrf.mxu1  ;;  %v11048_v49 = vpop.eup %11047  ;;  %v7918_v25 = vmul.f32 %v11046_v57, %v15238_v44  ;;  %v14339_v60 = vadd.f32 %v7908_v39, %v7771_v11 }
 0xe52   : > { %v7773_v29 = vpop.f32.mrf.mxu0  ;;  %v11050_v31 = vpop.eup %11049  ;;  %v14345_v18 = vadd.f32 %v7910_v9, %v7814_v1  ;;  %v7911_v1 = vmul.f32 %v11048_v49, %v14199_v5 }
 0xe53   : > { %v14330_v33 = vadd.f32 %v7915_v38, %v7773_v29  ;;  %v7816_v35 = vpop.f32.mrf.mxu1  ;;  %v11052_v38 = vpop.eup %11051 }
 0xe54   : > { %v14336_v21 = vadd.f32 %v7917_v6, %v7816_v35  ;;  %v7775_v27 = vpop.f32.mrf.mxu0  ;;  %15239 = vst [vmem:[#allocation96_spill] sm:$0xff] %v14345_v18  ;;  %v11054_v29 = vpop.eup %11053 }
 0xe55   : > { %v7939_v10 = vpack.c.bf16 %v14330_v33, %v14327_v61  ;;  %v14343_v52 = vadd.f32 %v7916_v17, %v7775_v27  ;;  %v7818_v36 = vpop.f32.mrf.mxu1  ;;  %v11056_v57 = vpop.eup %11055  ;;  %v7913_v27 = vmul.f32 %v11050_v31, %v14205_v22  ;;  %v7914_v22 = vmul.f32 %v11054_v29, %v14219_v20 }
 0xe56   : > { %v7941_v32 = vpack.c.bf16 %v14336_v21, %v14333_v15  ;;  %v14349_v56 = vadd.f32 %v7918_v25, %v7818_v36  ;;  %v7855_v14 = vpop.f32.mrf.mxu0  ;;  %v11058_v34 = vpop.eup %11057  ;;  %v7919_v26 = vmul.f32 %v11056_v57, %v14202_v47 }
 0xe57   : > { %v7940_v11 = vpack.c.bf16 %v14343_v52, %v14339_v60  ;;  %v7898_v6 = vpop.f32.mrf.mxu1  ;;  %v11060_v9 = vpop.eup %11059  ;;  %v7921_v25 = vmul.f32 %v11058_v34, %v14208_v58  ;;  %v14359_v12 = vadd.f32 %v7911_v1, %v7855_v14  ;;  %v15243_v34 = vld [vmem:[#allocation106_spill] sm:$0xff] }
 0xe58   : > { %15240 = vst [vmem:[#allocation102_spill] sm:$0xff] %v14349_v56  ;;  %v7942_v39 = vpack.c.bf16 %v14349_v56, %v14345_v18  ;;  %v7857_v35 = vpop.f32.mrf.mxu0  ;;  %v11062_v36 = vpop.eup %11061  ;;  %v7912_v56 = vmul.f32 %v11052_v38, %v14211_v59  ;;  %v7920_v49 = vmul.f32 %v11060_v9, %v14215_v42  ;;  %v15241_v42 = vld [vmem:[#allocation104_spill] sm:$0xff]  ;;  %v8216_v1 = vrot.slane %v15243_v34, 3 }
 0xe59   : > { %v7900_v17 = vpop.f32.mrf.mxu1  ;;  %7966 = vmatprep.subr.bf16.mxu0 %v7940_v11  ;;  %v7948_v47 = vpop.permute.xlu0 %7947  ;;  %v14365_v11 = vadd.f32 %v7913_v27, %v7898_v6  ;;  %v8217_v6 = vrot.slane %v15241_v42, 3  ;;  %v15245_v27 = vld [vmem:[#allocation108_spill] sm:$0xff]  ;;  %v15248_v42 = vld [vmem:[#allocation111_spill] sm:$0xff] }
 0xe5a   : > { %8007 = vmatprep.subr.bf16.mxu1 %v7942_v39  ;;  %v7859_v44 = vpop.f32.mrf.mxu0  ;;  %7967 = vmatpush1.bf16.msra.mxu0 %v7939_v10  ;;  %v7922_v10 = vmul.f32 %v11062_v36, %v14223_v54  ;;  %v14371_v14 = vadd.f32 %v7912_v56, %v7857_v35  ;;  %v14379_v57 = vadd.f32 %v7914_v22, %v7900_v17  ;;  %v15242_v54 = vld [vmem:[#allocation105_spill] sm:$0xff] }
 0xe5b   : > { %v14362_v18 = vadd.f32 %v7919_v26, %v7859_v44  ;;  %v7902_v5 = vpop.f32.mrf.mxu1  ;;  %8008 = vmatpush1.bf16.msra.mxu1 %v7941_v32  ;;  %v8219_v56 = vrot.slane %v15242_v54, 3  ;;  %v8231_v17 = vand.u32 %v8217_v6, %v13141_v46  ;;  %v15244_v26 = vld [vmem:[#allocation107_spill] sm:$0xff]  ;;  %v8221_v44 = vrot.slane %v15245_v27, 3  ;;  %v15246_v36 = vld [vmem:[#allocation109_spill] sm:$0xff] }
 0xe5c   : > { %v14368_v31 = vadd.f32 %v7921_v25, %v7902_v5  ;;  %v7861_v58 = vpop.f32.mrf.mxu0  ;;  %v8218_v9 = vrot.slane %v15244_v26, 3  ;;  %v8223_v5 = vrot.slane %v15246_v36, 3  ;;  %v8222_v6 = vrot.slane %v15248_v42, 3  ;;  %v15250_v27 = vld [vmem:[#allocation85_spill] sm:$0xff] }
 0xe5d   : > { %v7943_v59 = vpack.c.bf16 %v14362_v18, %v14359_v12  ;;  %v14375_v38 = vadd.f32 %v7920_v49, %v7861_v58  ;;  %v7904_v32 = vpop.f32.mrf.mxu1  ;;  %10333 = vmatmul.mubr.msk.bf16.vlgmr.msra.gmra.mxu0 %vm4835_vm7, %v7948_v47  ;;  %v8237_v25 = vand.u32 %v8219_v56, %v13141_v46  ;;  %v8228_v49 = vand.u32 %v8216_v1, %v13141_v46  ;;  %v15249_v56 = vld [vmem:[#allocation50_spill] sm:$0xff] }
 0xe5e   : > { %v7945_v20 = vpack.c.bf16 %v14368_v31, %v14365_v11  ;;  %v14383_v29 = vadd.f32 %v7922_v10, %v7904_v32  ;;  %10334 = vmatmul.mubr.msk.bf16.vlgmr.msra.gmra.mxu1 %vm4835_vm7, %v7948_v47  ;;  %8066 = vmatprep.mubr.bf16.mxu0 %v15086_v37  ;;  %v8234_v22 = vand.u32 %v8218_v9, %v13141_v46 }
 0xe5f   : > { %v7944_v39 = vpack.c.bf16 %v14375_v38, %v14371_v14  ;;  %8107 = vmatprep.mubr.bf16.mxu1 %v15086_v37  ;;  %v8243_v58 = vand.u32 %v8221_v44, %v13141_v46  ;;  %v8249_v10 = vand.u32 %v8223_v5, %v13141_v46  ;;  %v8123_v34 = vrot.slane %v13129_v28, %v15249_v56  ;;  %v15252_v5 = vld [vmem:[#allocation86_spill] sm:$0xff]  ;;  %v15254_v28 = vld [vmem:[#allocation88_spill] sm:$0xff] }
 0xe60   : > { %v7946_v35 = vpack.c.bf16 %v14383_v29, %v14379_v57 }
 0xe61   : > { %8048 = vmatprep.subr.bf16.mxu0 %v7944_v39  ;;  %v8119_v39 = vrot.slane %v13123_v4, %v15249_v56  ;;  %v8149_v44 = vmul.f32 %v8123_v34, %v15250_v27 }
 0xe62   : > { %8089 = vmatprep.subr.bf16.mxu1 %v7946_v35  ;;  %8049 = vmatpush1.bf16.msra.mxu0 %v7943_v59  ;;  %v15247_v59 = vld [vmem:[#allocation110_spill] sm:$0xff] }
 0xe63   : > { %8090 = vmatpush1.bf16.msra.mxu1 %v7945_v20  ;;  %8265 = vmatprep.subr.bf16.mxu0 %v8231_v17  ;;  %v8220_v32 = vrot.slane %v15247_v59, 3  ;;  %v8208_v20 = vpop.trf.xlu0  ;;  %v8148_v35 = vmul.f32 %v8119_v39, %v13256_v16  ;;  %v8131_v17 = vrot.slane %v13133_v23, %v15249_v56  ;;  %v8156_v26 = vmul.f32 %v8119_v39, %v13268_v45  ;;  %v15253_v16 = vld [vmem:[#allocation73_spill] sm:$0xff]  ;;  %v15257_v59 = vld [vmem:[#allocation76_spill] sm:$0xff] }
 0xe64   : > { %8308 = vmatprep.subr.bf16.mxu1 %v8237_v25  ;;  %v15251_v25 = vld [vmem:[#allocation87_spill] sm:$0xff]  ;;  %v15256_v23 = vld [vmem:[#allocation89_spill] sm:$0xff] }
 0xe65   : > { %10335 = vmatmul.mubr.msk.bf16.vlgmr.msra.gmra.mxu0 %vm4835_vm7, %v7948_v47  ;;  %v8240_v54 = vand.u32 %v8220_v32, %v13141_v46  ;;  %v8164_v9 = vmul.f32 1.442695, %v8148_v35  ;;  %v8159_v45 = vmul.f32 %v8131_v17, %v15256_v23  ;;  %v8139_v32 = vrot.slane %v15257_v59, %v15249_v56 }
 0xe66   : > { %10336 = vmatmul.mubr.msk.bf16.vlgmr.msra.gmra.mxu1 %vm4835_vm7, %v7948_v47  ;;  %8266 = vmatpush1.bf16.msra.mxu0 %v8228_v49  ;;  %v8246_v47 = vand.u32 %v8222_v6, %v13141_v46  ;;  %v8127_v46 = vrot.slane %v13126_v41, %v15249_v56  ;;  %v8151_v41 = vmul.f32 %v8131_v17, %v15252_v5  ;;  %v8166_v6 = vmul.f32 1.442695, %v8149_v44 }
 0xe67   : > { %8309 = vmatpush1.bf16.msra.mxu1 %v8234_v22  ;;  %8351 = vmatprep.subr.bf16.mxu0 %v8243_v58  ;;  %v8135_v49 = vrot.slane %v15253_v16, %v15249_v56  ;;  %v8180_v22 = vmul.f32 1.442695, %v8156_v26  ;;  %v8157_v58 = vmul.f32 %v8123_v34, %v15254_v28  ;;  %11063 = vpow2.f32 %v8164_v9 }
 0xe68   : > { %8394 = vmatprep.subr.bf16.mxu1 %v8249_v10  ;;  %8283 = vmatprep.mubr.bf16.mxu0 %v15086_v37  ;;  %v8150_v1 = vmul.f32 %v8127_v46, %v13281_v63  ;;  %v8158_v4 = vmul.f32 %v8127_v46, %v15251_v25  ;;  %v15255_v63 = vld [vmem:[#allocation74_spill] sm:$0xff]  ;;  %v8170_v46 = vmul.f32 1.442695, %v8151_v41  ;;  %v8186_v25 = vmul.f32 1.442695, %v8159_v45 }
 0xe69   : > { %8326 = vmatprep.mubr.bf16.mxu1 %v15086_v37  ;;  %v8143_v10 = vrot.slane %v15255_v63, %v15249_v56  ;;  %v8152_v35 = vmul.f32 %v8135_v49, %v15184_v7  ;;  %v8182_v17 = vmul.f32 1.442695, %v8157_v58  ;;  %v8160_v16 = vmul.f32 %v8135_v49, %v15188_v0 }
 0xe6a   : > { %v8168_v36 = vmul.f32 1.442695, %v8150_v1 }
 0xe6b   : > { %v8154_v26 = vmul.f32 %v8143_v10, %v15235_v55  ;;  %v8172_v41 = vmul.f32 1.442695, %v8152_v35  ;;  %v8162_v28 = vmul.f32 %v8143_v10, %v15127_v50 }
 0xe6c   : > { %11065 = vpow2.f32 %v8168_v36 }
 0xe6d   : > { %10337 = vmatmul.mubr.msk.bf16.vlgmr.msra.gmra.mxu0 %vm4590_vm6, %v8208_v20  ;;  %11067 = vpow2.f32 %v8180_v22  ;;  %v8176_v22 = vmul.f32 1.442695, %v8154_v26 }
 0xe6e   : > { %10338 = vmatmul.mubr.msk.bf16.vlgmr.msra.gmra.mxu1 %vm4590_vm6, %v8208_v20  ;;  %8352 = vmatpush1.bf16.msra.mxu0 %v8240_v54  ;;  %v8147_v54 = vrot.slane %v15183_v3, %v15249_v56  ;;  %v8153_v3 = vmul.f32 %v8139_v32, %v15212_v53  ;;  %11069 = vpow2.f32 %v8166_v6  ;;  %v8192_v6 = vmul.f32 1.442695, %v8162_v28 }
 0xe6f   : > { %8395 = vmatpush1.bf16.msra.mxu1 %v8246_v47  ;;  %8369 = vmatprep.mubr.bf16.mxu0 %v15086_v37  ;;  %11071 = vpow2.f32 %v8170_v46 }
 0xe70   : > { %8412 = vmatprep.mubr.bf16.mxu1 %v15086_v37  ;;  %v8155_v5 = vmul.f32 %v8147_v54, %v15213_v40  ;;  %v8174_v40 = vmul.f32 1.442695, %v8153_v3  ;;  %v8163_v45 = vmul.f32 %v8147_v54, %v15158_v13 }
 0xe72   : > { %v8178_v23 = vmul.f32 1.442695, %v8155_v5 }
 0xe75   : > { %10339 = vmatmul.mubr.msk.bf16.vlgmr.msra.gmra.mxu0 %vm4590_vm6, %v8208_v20 }
 0xe76   : > { %10340 = vmatmul.mubr.msk.bf16.vlgmr.msra.gmra.mxu1 %vm4590_vm6, %v8208_v20  ;;  %8500 = vmatprep.mubr.bf16.mxu0 %v15086_v37  ;;  %v8184_v20 = vmul.f32 1.442695, %v8158_v4 }
 0xe77   : > { %8541 = vmatprep.mubr.bf16.mxu1 %v15086_v37 }
 0xe78   : > { %11073 = vpow2.f32 %v8184_v20 }
 0xe79   : > { %11075 = vpow2.f32 %v8182_v17 }
 0xe7a   : > { %11077 = vpow2.f32 %v8186_v25 }
 0xe7b   : > { %11079 = vpow2.f32 %v8172_v41 }
 0xe7c   : > { %11081 = vpow2.f32 %v8176_v22 }
 0xe7d   : > { %11083 = vpow2.f32 %v8174_v40 }
 0xe7e   : > { %11085 = vpow2.f32 %v8178_v23 }
 0xf1d   : > { %v7986_v42 = vpop.f32.mrf.mxu0 }
 0xf1e   : > { %v8760_v47 = vrot.slane %v7986_v42, 2  ;;  %v8027_v39 = vpop.f32.mrf.mxu1 }
 0xf1f   : > { %v8762_v34 = vrot.slane %v8027_v39, 2  ;;  %v7988_v1 = vpop.f32.mrf.mxu0  ;;  %v8194_v39 = vmul.f32 1.442695, %v8163_v45 }
 0xf20   : > { %v14447_v9 = vsel %vm8844_vm12, %v14287_v30, %v8760_v47  ;;  %v8761_v27 = vrot.slane %v7988_v1, 2  ;;  %v8029_v44 = vpop.f32.mrf.mxu1 }
 0xf21   : > { %v14452_v4 = vsel %vm8844_vm12, %v14292_v43, %v8762_v34  ;;  %v8763_v7 = vrot.slane %v8029_v44, 2  ;;  %v7990_v36 = vpop.f32.mrf.mxu0 }
 0xf22   : > { %v14457_v55 = vsel %vm8844_vm12, %v14297_v19, %v8761_v27  ;;  %v8031_v30 = vpop.f32.mrf.mxu1  ;;  %v8161_v19 = vmul.f32 %v8139_v32, %v15189_v51  ;;  %v11064_v32 = vpop.eup %11063 }
 0xf23   : > { %v14462_v53 = vsel %vm8844_vm12, %v14302_v24, %v8763_v7  ;;  %v7991_v43 = vpop.f32.mrf.mxu0  ;;  %v8188_v24 = vmul.f32 1.442695, %v8160_v16  ;;  %v8423_v7 = vmul.f32 %v11064_v32, %v14327_v61  ;;  %v15258_v61 = vld [vmem:[#allocation96_spill] sm:$0xff] }
 0xf24   : > { %v8032_v58 = vpop.f32.mrf.mxu1  ;;  %v8190_v51 = vmul.f32 1.442695, %v8161_v19 }
 0xf25   : > { %v8068_v63 = vpop.f32.mrf.mxu0  ;;  %11087 = vpow2.f32 %v8188_v24 }
 0xf26   : > { %v8764_v0 = vrot.slane %v8068_v63, 2  ;;  %v8109_v49 = vpop.f32.mrf.mxu1  ;;  %11089 = vpow2.f32 %v8192_v6 }
 0xf27   : > { %v8766_v59 = vrot.slane %v8109_v49, 2  ;;  %v8070_v42 = vpop.f32.mrf.mxu0  ;;  %11091 = vpow2.f32 %v8190_v51  ;;  %v15259_v49 = vld [vmem:[#allocation102_spill] sm:$0xff] }
 0xf28   : > { %v14469_v50 = vsel %vm8844_vm12, %v14309_v48, %v8764_v0  ;;  %v8765_v10 = vrot.slane %v8070_v42, 2  ;;  %v8111_v20 = vpop.f32.mrf.mxu1  ;;  %v11066_v48 = vpop.eup %11065  ;;  %11093 = vpow2.f32 %v8194_v39 }
 0xf29   : > { %v14473_v13 = vsel %vm8844_vm12, %v14313_v8, %v8766_v59  ;;  %v8767_v54 = vrot.slane %v8111_v20, 2  ;;  %v8072_v47 = vpop.f32.mrf.mxu0  ;;  %v11068_v17 = vpop.eup %11067 }
 0xf2a   : > { %v14477_v46 = vsel %vm8844_vm12, %v14317_v2, %v8765_v10  ;;  %v8113_v35 = vpop.f32.mrf.mxu1  ;;  %v11070_v27 = vpop.eup %11069  ;;  %v8431_v5 = vmul.f32 %v11068_v17, %v14330_v33 }
 0xf2b   : > { %v14481_v34 = vsel %vm8844_vm12, %v14321_v62, %v8767_v54  ;;  %v8073_v1 = vpop.f32.mrf.mxu0  ;;  %v11072_v25 = vpop.eup %11071  ;;  %v8425_v62 = vmul.f32 %v11066_v48, %v14333_v15  ;;  %v8424_v28 = vmul.f32 %v11070_v27, %v14339_v60 }
 0xf2c   : > { %v8114_v8 = vpop.f32.mrf.mxu1  ;;  %v11074_v2 = vpop.eup %11073  ;;  %v8426_v45 = vmul.f32 %v11072_v25, %v15258_v61 }
 0xf2d   : > { %v8285_v26 = vpop.f32.mrf.mxu0  ;;  %v11076_v30 = vpop.eup %11075  ;;  %v8433_v16 = vmul.f32 %v11074_v2, %v14336_v21 }
 0xf2e   : > { %v8328_v44 = vpop.f32.mrf.mxu1  ;;  %v11078_v43 = vpop.eup %11077  ;;  %v8439_v22 = vadd.f32 %v8423_v7, %v8285_v26  ;;  %v8432_v19 = vmul.f32 %v11076_v30, %v14343_v52 }
 0xf2f   : > { %v8287_v3 = vpop.f32.mrf.mxu0  ;;  %v11080_v63 = vpop.eup %11079  ;;  %v8441_v23 = vadd.f32 %v8425_v62, %v8328_v44  ;;  %v8434_v24 = vmul.f32 %v11078_v43, %v15259_v49 }
 0xf30   : > { %v8330_v36 = vpop.f32.mrf.mxu1  ;;  %v11082_v15 = vpop.eup %11081  ;;  %v8440_v59 = vadd.f32 %v8424_v28, %v8287_v3  ;;  %v8427_v17 = vmul.f32 %v11080_v63, %v14359_v12 }
 0xf31   : > { %v8289_v41 = vpop.f32.mrf.mxu0  ;;  %v11084_v10 = vpop.eup %11083  ;;  %v8442_v20 = vadd.f32 %v8426_v45, %v8330_v36  ;;  %v8429_v44 = vmul.f32 %v11082_v15, %v14365_v11 }
 0xf32   : > { %v8447_v58 = vadd.f32 %v8431_v5, %v8289_v41  ;;  %v8332_v40 = vpop.f32.mrf.mxu1  ;;  %v11086_v54 = vpop.eup %11085  ;;  %v8428_v36 = vmul.f32 %v11084_v10, %v14371_v14  ;;  %v8992_v10 = vld [vmem:[%s12166_s22 + $0x40] sm:$0xff] }
 0xf33   : > { %v8449_v0 = vadd.f32 %v8433_v16, %v8332_v40  ;;  %v8291_v33 = vpop.f32.mrf.mxu0  ;;  %v11088_v39 = vpop.eup %11087  ;;  %v8430_v11 = vmul.f32 %v11086_v54, %v14379_v57  ;;  %v9029_v40 = vld [vmem:[%s12166_s22 + $0x168] sm:$0xff] }
 0xf34   : > { %v8455_v42 = vpack.c.bf16 %v8447_v58, %v8439_v22  ;;  %v8448_v21 = vadd.f32 %v8432_v19, %v8291_v33  ;;  %v8334_v6 = vpop.f32.mrf.mxu1  ;;  %v11090_v1 = vpop.eup %11089  ;;  %v8435_v26 = vmul.f32 %v11088_v39, %v14362_v18  ;;  %v9205_v45 = vunpack.c.h.s8.bf16 %v9029_v40  ;;  %v9021_v39 = vld [vmem:[%s12166_s22 + $0x128] sm:$0xff] }
 0xf35   : > { %v8457_v60 = vpack.c.bf16 %v8449_v0, %v8441_v23  ;;  %v8450_v51 = vadd.f32 %v8434_v24, %v8334_v6  ;;  %v8371_v32 = vpop.f32.mrf.mxu0  ;;  %v11092_v27 = vpop.eup %11091  ;;  %v8437_v3 = vmul.f32 %v11090_v1, %v14368_v31  ;;  %v8997_v31 = vld [vmem:[%s12166_s22 + $0x68] sm:$0xff]  ;;  %v8996_v23 = vld [vmem:[%s12166_s22 + $0x60] sm:$0xff]  ;;  %v9201_v15 = vunpack.c.l.s8.bf16 %v9029_v40 }
 0xf36   : > { %v8456_v52 = vpack.c.bf16 %v8448_v21, %v8440_v59  ;;  %v8414_v47 = vpop.f32.mrf.mxu1  ;;  %v11094_v2 = vpop.eup %11093  ;;  %v8443_v7 = vadd.f32 %v8427_v17, %v8371_v32  ;;  %v8436_v30 = vmul.f32 %v11092_v27, %v14375_v38  ;;  %v9028_v0 = vld [vmem:[%s12166_s22 + $0x160] sm:$0xff]  ;;  %v9140_v33 = vunpack.c.h.s8.bf16 %v8996_v23  ;;  %v9025_v59 = vld [vmem:[%s12166_s22 + $0x148] sm:$0xff] }
 0xf37   : > { %v8458_v35 = vpack.c.bf16 %v8450_v51, %v8442_v20  ;;  %v8373_v48 = vpop.f32.mrf.mxu0  ;;  %v8464_v18 = vpop.permute.xlu1 %8463  ;;  %v8445_v62 = vadd.f32 %v8429_v44, %v8414_v47  ;;  %v8438_v43 = vmul.f32 %v11094_v2, %v14383_v29  ;;  %v9141_v29 = vunpack.c.h.s8.bf16 %v8997_v31  ;;  %v8989_v47 = vld [vmem:[%s12166_s22 + $0x28] sm:$0xff]  ;;  %v8988_v17 = vld [vmem:[%s12166_s22 + $0x20] sm:$0xff] }
 0xf38   : > { %v8416_v8 = vpop.f32.mrf.mxu1  ;;  %8482 = vmatprep.subr.bf16.mxu0 %v8456_v52  ;;  %v8444_v22 = vadd.f32 %v8428_v36, %v8373_v48  ;;  %v9204_v49 = vunpack.c.h.s8.bf16 %v9028_v0  ;;  %v9137_v24 = vunpack.c.l.s8.bf16 %v8997_v31  ;;  %v9200_v21 = vunpack.c.l.s8.bf16 %v9028_v0  ;;  %v8985_v2 = vld [vmem:[%s12166_s22 + $0x8] sm:$0xff]  ;;  %v9012_v40 = vld [vmem:[%s12166_s22 + $0xe0] sm:$0xff] }
 0xf39   : > { %8523 = vmatprep.subr.bf16.mxu1 %v8458_v35  ;;  %v8375_v25 = vpop.f32.mrf.mxu0  ;;  %8483 = vmatpush1.bf16.msra.mxu0 %v8455_v42  ;;  %v8446_v19 = vadd.f32 %v8430_v11, %v8416_v8  ;;  %v9136_v42 = vunpack.c.l.s8.bf16 %v8996_v23  ;;  %v9197_v20 = vunpack.c.h.s8.bf16 %v9025_v59  ;;  %v9132_v51 = vunpack.c.h.s8.bf16 %v8992_v10  ;;  %v9013_v31 = vld [vmem:[%s12166_s22 + $0xe8] sm:$0xff] }
 0xf3a   : > { %v8451_v5 = vadd.f32 %v8435_v26, %v8375_v25  ;;  %v8418_v12 = vpop.f32.mrf.mxu1  ;;  %8524 = vmatpush1.bf16.msra.mxu1 %v8457_v60  ;;  %v9024_v60 = vld [vmem:[%s12166_s22 + $0x140] sm:$0xff]  ;;  %v9193_v52 = vunpack.c.l.s8.bf16 %v9025_v59  ;;  %v9128_v35 = vunpack.c.l.s8.bf16 %v8992_v10  ;;  %v9125_v1 = vunpack.c.h.s8.bf16 %v8989_v47  ;;  %v9005_v10 = vld [vmem:[%s12166_s22 + $0xa8] sm:$0xff] }
 0xf3b   : > { %v8453_v41 = vadd.f32 %v8437_v3, %v8418_v12  ;;  %v8377_v16 = vpop.f32.mrf.mxu0  ;;  %v9196_v32 = vunpack.c.h.s8.bf16 %v9024_v60  ;;  %v9192_v48 = vunpack.c.l.s8.bf16 %v9024_v60  ;;  %v9189_v8 = vunpack.c.h.s8.bf16 %v9021_v39  ;;  %v9020_v26 = vld [vmem:[%s12166_s22 + $0x120] sm:$0xff] }
 0xf3c   : > { %v8459_v28 = vpack.c.bf16 %v8451_v5, %v8443_v7  ;;  %v8452_v14 = vadd.f32 %v8436_v30, %v8377_v16  ;;  %v8420_v58 = vpop.f32.mrf.mxu1  ;;  %10341 = vmatmul.mubr.msk.bf16.vlgmr.msra.gmra.mxu0 %vm4835_vm7, %v8464_v18  ;;  %v9124_v27 = vunpack.c.h.s8.bf16 %v8988_v17  ;;  %v9188_v44 = vunpack.c.h.s8.bf16 %v9020_v26  ;;  %v9017_v7 = vld [vmem:[%s12166_s22 + $0x108] sm:$0xff]  ;;  %v8984_v30 = vld [vmem:[%s12166_s22] sm:$0xff] }
 0xf3d   : > { %v8461_v38 = vpack.c.bf16 %v8453_v41, %v8445_v62  ;;  %v8454_v63 = vadd.f32 %v8438_v43, %v8420_v58  ;;  %10342 = vmatmul.mubr.msk.bf16.vlgmr.msra.gmra.mxu1 %vm4835_vm7, %v8464_v18  ;;  %8582 = vmatprep.mubr.bf16.mxu0 %v15086_v37  ;;  %v9121_v25 = vunpack.c.l.s8.bf16 %v8989_v47  ;;  %v9185_v3 = vunpack.c.l.s8.bf16 %v9021_v39  ;;  %v9016_v62 = vld [vmem:[%s12166_s22 + $0x100] sm:$0xff] }
 0xf3e   : > { %v8460_v57 = vpack.c.bf16 %v8452_v14, %v8444_v22  ;;  %8623 = vmatprep.mubr.bf16.mxu1 %v15086_v37  ;;  %v8993_v37 = vld [vmem:[%s12166_s22 + $0x48] sm:$0xff]  ;;  %v9120_v36 = vunpack.c.l.s8.bf16 %v8988_v17  ;;  %v9184_v5 = vunpack.c.l.s8.bf16 %v9020_v26  ;;  %v9117_v12 = vunpack.c.h.s8.bf16 %v8985_v2  ;;  %v9036_v47 = vld [vmem:[%s12166_s22 + $0x1a0] sm:$0xff] }
 0xf3f   : > { %v8462_v61 = vpack.c.bf16 %v8454_v63, %v8446_v19  ;;  %v9133_v6 = vunpack.c.h.s8.bf16 %v8993_v37  ;;  %v9129_v54 = vunpack.c.l.s8.bf16 %v8993_v37  ;;  %v9116_v11 = vunpack.c.h.s8.bf16 %v8984_v30  ;;  %v9045_v22 = vld [vmem:[%s12166_s22 + $0x1e8] sm:$0xff]  ;;  %v9040_v37 = vld [vmem:[%s12166_s22 + $0x1c0] sm:$0xff] }
 0xf40   : > { %8564 = vmatprep.subr.bf16.mxu0 %v8460_v57  ;;  %v9180_v41 = vunpack.c.h.s8.bf16 %v9016_v62  ;;  %v9113_v16 = vunpack.c.l.s8.bf16 %v8985_v2  ;;  %v9177_v43 = vunpack.c.l.s8.bf16 %v9017_v7  ;;  %v9176_v14 = vunpack.c.l.s8.bf16 %v9016_v62  ;;  %v9001_v26 = vld [vmem:[%s12166_s22 + $0x88] sm:$0xff]  ;;  %v9032_v2 = vld [vmem:[%s12166_s22 + $0x180] sm:$0xff] }
 0xf41   : > { %8605 = vmatprep.subr.bf16.mxu1 %v8462_v61  ;;  %8565 = vmatpush1.bf16.msra.mxu0 %v8459_v28  ;;  %v9112_v28 = vunpack.c.l.s8.bf16 %v8984_v30  ;;  %v9173_v58 = vunpack.c.h.s8.bf16 %v9013_v31  ;;  %v9237_v19 = vunpack.c.h.s8.bf16 %v9045_v22  ;;  %v9172_v63 = vunpack.c.h.s8.bf16 %v9012_v40  ;;  %v9009_v61 = vld [vmem:[%s12166_s22 + $0xc8] sm:$0xff] }
 0xf42   : > { %8606 = vmatpush1.bf16.msra.mxu1 %v8461_v38  ;;  %9376 = vmatprep.subr.bf16.mxu0 %v9141_v29  ;;  %v9044_v38 = vld [vmem:[%s12166_s22 + $0x1e0] sm:$0xff]  ;;  %v9169_v29 = vunpack.c.l.s8.bf16 %v9013_v31  ;;  %v9233_v23 = vunpack.c.l.s8.bf16 %v9045_v22  ;;  %v9168_v0 = vunpack.c.l.s8.bf16 %v9012_v40  ;;  %v14538_v62 = vld [vmem:[%s12166_s22 + $0x268] sm:$0xff] }
 0xf43   : > { %9417 = vmatprep.subr.bf16.mxu1 %v9205_v45  ;;  %v9236_v57 = vunpack.c.h.s8.bf16 %v9044_v38  ;;  %v9041_v45 = vld [vmem:[%s12166_s22 + $0x1c8] sm:$0xff] }
 0xf44   : > { %10343 = vmatmul.mubr.msk.bf16.vlgmr.msra.gmra.mxu0 %vm4835_vm7, %v8464_v18  ;;  %v15260_v31 = vld [vmem:[#allocation47_spill] sm:$0xff] }
 0xf45   : > { %10344 = vmatmul.mubr.msk.bf16.vlgmr.msra.gmra.mxu1 %vm4835_vm7, %v8464_v18  ;;  %9377 = vmatpush1.bf16.msra.mxu0 %v9140_v33  ;;  %v9181_v18 = vunpack.c.h.s8.bf16 %v9017_v7  ;;  %v9232_v33 = vunpack.c.l.s8.bf16 %v9044_v38 }
 0xf46   : > { %9418 = vmatpush1.bf16.msra.mxu1 %v9204_v49  ;;  %9378 = vmatprep.subr.bf16.mxu0 %v9137_v24  ;;  %v9165_v49 = vunpack.c.h.s8.bf16 %v9009_v61  ;;  %v9008_v24 = vld [vmem:[%s12166_s22 + $0xc0] sm:$0xff] }
 0xf47   : > { %9419 = vmatprep.subr.bf16.mxu1 %v9201_v15  ;;  %v9229_v15 = vunpack.c.h.s8.bf16 %v9041_v45  ;;  %v9164_v59 = vunpack.c.h.s8.bf16 %v9008_v24  ;;  %v9160_v60 = vunpack.c.l.s8.bf16 %v9008_v24 }
 0xf49   : > { %9379 = vmatpush1.bf16.msra.mxu0 %v9136_v42  ;;  %v9228_v42 = vunpack.c.h.s8.bf16 %v9040_v37 }
 0xf4a   : > { %9420 = vmatpush1.bf16.msra.mxu1 %v9200_v21  ;;  %9380 = vmatprep.subr.bf16.mxu0 %v9133_v6  ;;  %v9161_v21 = vunpack.c.l.s8.bf16 %v9009_v61  ;;  %v9225_v6 = vunpack.c.l.s8.bf16 %v9041_v45  ;;  %v15266_v61 = vld [vmem:[#allocation56_spill] sm:$0xff] }
 0xf4b   : > { %9421 = vmatprep.subr.bf16.mxu1 %v9197_v20  ;;  %v9037_v20 = vld [vmem:[%s12166_s22 + $0x1a8] sm:$0xff] }
 0xf4d   : > { %9381 = vmatpush1.bf16.msra.mxu0 %v9132_v51  ;;  %v9224_v51 = vunpack.c.l.s8.bf16 %v9040_v37 }
 0xf4e   : > { %9422 = vmatpush1.bf16.msra.mxu1 %v9196_v32  ;;  %9382 = vmatprep.subr.bf16.mxu0 %v9129_v54  ;;  %v9157_v32 = vunpack.c.h.s8.bf16 %v9005_v10  ;;  %v9004_v54 = vld [vmem:[%s12166_s22 + $0xa0] sm:$0xff] }
 0xf4f   : > { %9423 = vmatprep.subr.bf16.mxu1 %v9193_v52  ;;  %v9221_v52 = vunpack.c.h.s8.bf16 %v9037_v20  ;;  %v9156_v39 = vunpack.c.h.s8.bf16 %v9004_v54  ;;  %v9152_v17 = vunpack.c.l.s8.bf16 %v9004_v54  ;;  %v15273_v54 = vld [vmem:[#allocation67_spill] sm:$0xff] }
 0xf51   : > { %9383 = vmatpush1.bf16.msra.mxu0 %v9128_v35  ;;  %v9220_v35 = vunpack.c.h.s8.bf16 %v9036_v47 }
 0xf52   : > { %9424 = vmatpush1.bf16.msra.mxu1 %v9192_v48  ;;  %9384 = vmatprep.subr.bf16.mxu0 %v9125_v1  ;;  %v9153_v48 = vunpack.c.l.s8.bf16 %v9005_v10  ;;  %v9217_v1 = vunpack.c.l.s8.bf16 %v9037_v20 }
 0xf53   : > { %9425 = vmatprep.subr.bf16.mxu1 %v9189_v8  ;;  %v9216_v8 = vunpack.c.l.s8.bf16 %v9036_v47 }
 0xf55   : > { %9385 = vmatpush1.bf16.msra.mxu0 %v9124_v27  ;;  %v9033_v27 = vld [vmem:[%s12166_s22 + $0x188] sm:$0xff] }
 0xf56   : > { %9426 = vmatpush1.bf16.msra.mxu1 %v9188_v44  ;;  %9386 = vmatprep.subr.bf16.mxu0 %v9121_v25  ;;  %v9000_v44 = vld [vmem:[%s12166_s22 + $0x80] sm:$0xff]  ;;  %v9149_v25 = vunpack.c.h.s8.bf16 %v9001_v26 }
 0xf57   : > { %9427 = vmatprep.subr.bf16.mxu1 %v9185_v3  ;;  %v9213_v3 = vunpack.c.h.s8.bf16 %v9033_v27  ;;  %v9148_v7 = vunpack.c.h.s8.bf16 %v9000_v44  ;;  %v9144_v30 = vunpack.c.l.s8.bf16 %v9000_v44  ;;  %v15274_v44 = vld [vmem:[#allocation68_spill] sm:$0xff] }
 0xf59   : > { %9387 = vmatpush1.bf16.msra.mxu0 %v9120_v36  ;;  %v9212_v36 = vunpack.c.h.s8.bf16 %v9032_v2 }
 0xf5a   : > { %9428 = vmatpush1.bf16.msra.mxu1 %v9184_v5  ;;  %9388 = vmatprep.subr.bf16.mxu0 %v9117_v12  ;;  %v9145_v5 = vunpack.c.l.s8.bf16 %v9001_v26  ;;  %v9209_v12 = vunpack.c.l.s8.bf16 %v9033_v27 }
 0xf5b   : > { %9429 = vmatprep.subr.bf16.mxu1 %v9181_v18  ;;  %v9208_v18 = vunpack.c.l.s8.bf16 %v9032_v2 }
 0xf5d   : > { %9389 = vmatpush1.bf16.msra.mxu0 %v9116_v11  ;;  %v14541_v11 = vld [vmem:[%s12166_s22 + $0x368] sm:$0xff] }
 0xf5e   : > { %9430 = vmatpush1.bf16.msra.mxu1 %v9180_v41  ;;  %9390 = vmatprep.subr.bf16.mxu0 %v9113_v16  ;;  %v9269_v41 = vunpack.c.h.s8.bf16 %v14538_v62  ;;  %v9333_v16 = vunpack.c.h.s8.bf16 %v14541_v11 }
 0xf5f   : > { %9431 = vmatprep.subr.bf16.mxu1 %v9177_v43  ;;  %v2741_v43 = vld [vmem:[%s12134_s1 + $0x8] sm:$0xff]  ;;  %s15283_s1 = sld [smem:[#allocation39_spill]] }
 0xf60   : > { %v2779_v22 = vrot.slane %v2741_v43, %v15260_v31 }
 0xf61   : > { %9391 = vmatpush1.bf16.msra.mxu0 %v9112_v28  ;;  %v15261_v28 = vld [vmem:[#allocation46_spill] sm:$0xff] }
 0xf62   : > { %9432 = vmatpush1.bf16.msra.mxu1 %v9176_v14  ;;  %9392 = vmatprep.subr.bf16.mxu0 %v9173_v58  ;;  %v2783_v14 = vrot.slane %v2741_v43, %v15261_v28  ;;  %v15262_v58 = vld [vmem:[#allocation48_spill] sm:$0xff] }
 0xf63   : > { %9433 = vmatprep.subr.bf16.mxu1 %v9237_v19  ;;  %v2787_v40 = vrot.slane %v2741_v43, %v15262_v58  ;;  %v15263_v19 = vld [vmem:[#allocation45_spill] sm:$0xff] }
 0xf64   : > { %v2791_v38 = vrot.slane %v2741_v43, %v15263_v19  ;;  %v14555_v45 = vmul.f32 %v2783_v14, %v15266_v61 }
 0xf65   : > { %9393 = vmatpush2.bf16.msra.mxu0 %v9172_v63  ;;  %v15264_v63 = vld [vmem:[#allocation55_spill] sm:$0xff]  ;;  %p10345_p13 = scmp.ne.s32.totalorder %s15283_s1, 1 }
 0xf66   : > { %9434 = vmatpush2.bf16.msra.mxu1 %v9236_v57  ;;  %9394 = vmatprep.subr.bf16.mxu0 %v9169_v29  ;;  %v14551_v57 = vmul.f32 %v2779_v22, %v15264_v63  ;;  %v15265_v29 = vld [vmem:[#allocation49_spill] sm:$0xff]  ;;  %v8921_v20 = vsub.f32 0.0, %v14555_v45 }
 0xf67   : > { %9435 = vmatprep.subr.bf16.mxu1 %v9233_v23  ;;  %v2795_v23 = vrot.slane %v2741_v43, %v15265_v29 }
 0xf69   : > { %9395 = vmatpush2.bf16.msra.mxu0 %v9168_v0  ;;  %v15267_v0 = vld [vmem:[#allocation51_spill] sm:$0xff] }
 0xf6a   : > { %9436 = vmatpush2.bf16.msra.mxu1 %v9232_v33  ;;  %9396 = vmatprep.subr.bf16.mxu0 %v9165_v49  ;;  %v2799_v33 = vrot.slane %v2741_v43, %v15267_v0  ;;  %v15268_v49 = vld [vmem:[#allocation63_spill] sm:$0xff] }
 0xf6b   : > { %9437 = vmatprep.subr.bf16.mxu1 %v9229_v15  ;;  %v14559_v24 = vmul.f32 %v2787_v40, %v15268_v49  ;;  %v15269_v15 = vld [vmem:[#allocation52_spill] sm:$0xff] }
 0xf6c   : > { %v2803_v37 = vrot.slane %v2741_v43, %v15269_v15 }
 0xf6d   : > { %9397 = vmatpush2.bf16.msra.mxu0 %v9164_v59  ;;  %v15270_v59 = vld [vmem:[#allocation64_spill] sm:$0xff] }
 0xf6e   : > { %9438 = vmatpush2.bf16.msra.mxu1 %v9228_v42  ;;  %9398 = vmatprep.subr.bf16.mxu0 %v9161_v21  ;;  %v14563_v42 = vmul.f32 %v2791_v38, %v15270_v59  ;;  %v8920_v21 = vsub.f32 0.0, %v14551_v57  ;;  %v8862_v59 = vld [vmem:[%s780_s18] sm:$0xff] }
 0xf6f   : > { %9439 = vmatprep.subr.bf16.mxu1 %v9225_v6  ;;  %v15271_v6 = vld [vmem:[#allocation65_spill] sm:$0xff] }
 0xf70   : > { %v14567_v10 = vmul.f32 %v2795_v23, %v15271_v6  ;;  %v8923_v47 = vsub.f32 0.0, %v14563_v42  ;;  %v8871_v6 = vrot.slane %v8862_v59, %v15261_v28 }
 0xf71   : > { %9399 = vmatpush2.bf16.msra.mxu0 %v9160_v60  ;;  %v15272_v60 = vld [vmem:[#allocation66_spill] sm:$0xff] }
 0xf72   : > { %9440 = vmatpush2.bf16.msra.mxu1 %v9224_v51  ;;  %9400 = vmatprep.subr.bf16.mxu0 %v9157_v32  ;;  %v14571_v51 = vmul.f32 %v2799_v33, %v15272_v60  ;;  %v8922_v32 = vsub.f32 0.0, %v14559_v24  ;;  %v8934_v27 = vmul.f32 1.442695, %v8923_v47  ;;  %v8879_v60 = vrot.slane %v8862_v59, %v15263_v19 }
 0xf73   : > { %9441 = vmatprep.subr.bf16.mxu1 %v9221_v52  ;;  %v14575_v52 = vmul.f32 %v2803_v37, %v15273_v54  ;;  %v8887_v47 = vrot.slane %v8862_v59, %v15267_v0  ;;  %v15279_v0 = vld [vmem:[#allocation61_spill] sm:$0xff] }
 0xf75   : > { %9401 = vmatpush2.bf16.msra.mxu0 %v9156_v39  ;;  %v2807_v39 = vrot.slane %v2741_v43, %v15249_v56  ;;  %v8926_v26 = vsub.f32 0.0, %v14575_v52 }
 0xf76   : > { %9442 = vmatpush2.bf16.msra.mxu1 %v9220_v35  ;;  %9402 = vmatprep.subr.bf16.mxu0 %v9153_v48  ;;  %v8928_v35 = vmul.f32 1.442695, %v8920_v21  ;;  %v8924_v48 = vsub.f32 0.0, %v14567_v10  ;;  %v8867_v21 = vrot.slane %v8862_v59, %v15260_v31 }
 0xf77   : > { %9443 = vmatprep.subr.bf16.mxu1 %v9217_v1  ;;  %v8930_v1 = vmul.f32 1.442695, %v8921_v20  ;;  %v8875_v20 = vrot.slane %v8862_v59, %v15262_v58 }
 0xf78   : > { %11095 = vpow2.f32 %v8928_v35 }
 0xf79   : > { %9403 = vmatpush2.bf16.msra.mxu0 %v9152_v17  ;;  %v8925_v17 = vsub.f32 0.0, %v14571_v51  ;;  %11097 = vpow2.f32 %v8930_v1 }
 0xf7a   : > { %9444 = vmatpush2.bf16.msra.mxu1 %v9216_v8  ;;  %9404 = vmatprep.subr.bf16.mxu0 %v9149_v25  ;;  %v8932_v8 = vmul.f32 1.442695, %v8922_v32  ;;  %v14583_v25 = vmul.f32 %v2807_v39, %v15274_v44  ;;  %v8883_v32 = vrot.slane %v8862_v59, %v15265_v29 }
 0xf7b   : > { %9445 = vmatprep.subr.bf16.mxu1 %v9213_v3  ;;  %v8936_v3 = vmul.f32 1.442695, %v8924_v48  ;;  %v8938_v2 = vmul.f32 1.442695, %v8925_v17  ;;  %v15275_v17 = vld [vmem:[#allocation57_spill] sm:$0xff] }
 0xf7c   : > { %11099 = vpow2.f32 %v8932_v8  ;;  %v8904_v8 = vmul.f32 %v8867_v21, %v15275_v17  ;;  %v15282_v17 = vld [vmem:[#allocation60_spill] sm:$0xff] }
 0xf7d   : > { %9405 = vmatpush2.bf16.msra.mxu0 %v9148_v7  ;;  %v8940_v7 = vmul.f32 1.442695, %v8926_v26  ;;  %11101 = vpow2.f32 %v8934_v27  ;;  %v15276_v27 = vld [vmem:[#allocation53_spill] sm:$0xff] }
 0xf7e   : > { %9446 = vmatpush2.bf16.msra.mxu1 %v9212_v36  ;;  %9406 = vmatprep.subr.bf16.mxu0 %v9145_v5  ;;  %v8927_v36 = vsub.f32 0.0, %v14583_v25  ;;  %11103 = vpow2.f32 %v8936_v3  ;;  %v8905_v44 = vmul.f32 %v8871_v6, %v15276_v27  ;;  %v8891_v3 = vrot.slane %v8862_v59, %v15269_v15 }
 0xf7f   : > { %9447 = vmatprep.subr.bf16.mxu1 %v9209_v12  ;;  %11105 = vpow2.f32 %v8938_v2 }
 0xf80   : > { %11107 = vpow2.f32 %v8940_v7  ;;  %v8942_v5 = vmul.f32 1.442695, %v8927_v36  ;;  %v15277_v36 = vld [vmem:[#allocation58_spill] sm:$0xff] }
 0xf81   : > { %9407 = vmatpush2.bf16.msra.mxu0 %v9144_v30 }
 0xf82   : > { %9448 = vmatpush2.bf16.msra.mxu1 %v9208_v18  ;;  %9458 = vmatprep.subr.bf16.mxu0 %v9269_v41  ;;  %11109 = vpow2.f32 %v8942_v5  ;;  %v8906_v5 = vmul.f32 %v8875_v20, %v15277_v36 }
 0xf83   : > { %9499 = vmatprep.subr.bf16.mxu1 %v9333_v16 }
 0xf85   : > { %v11096_v12 = vpop.eup %11095 }
 0xf86   : > { %v11098_v30 = vpop.eup %11097  ;;  %v8944_v16 = vadd.f32 1.0, %v11096_v12  ;;  %v15278_v12 = vld [vmem:[#allocation54_spill] sm:$0xff] }
 0xf87   : > { %v8945_v22 = vadd.f32 1.0, %v11098_v30  ;;  %v8907_v30 = vmul.f32 %v8879_v60, %v15278_v12 }
 0xf88   : > { %11111 = vrcp.f32 %v8944_v16 }
 0xf89   : > { %v11100_v18 = vpop.eup %11099  ;;  %11113 = vrcp.f32 %v8945_v22 }
 0xf8a   : > { %v11102_v41 = vpop.eup %11101  ;;  %v8946_v40 = vadd.f32 1.0, %v11100_v18  ;;  %v8908_v18 = vmul.f32 %v8883_v32, %v15279_v0 }
 0xf8b   : > { %v11104_v43 = vpop.eup %11103  ;;  %v8947_v63 = vadd.f32 1.0, %v11102_v41 }
 0xf8c   : > { %v11106_v14 = vpop.eup %11105  ;;  %v8948_v23 = vadd.f32 1.0, %v11104_v43  ;;  %11115 = vrcp.f32 %v8946_v40 }
 0xf8d   : > { %v11108_v38 = vpop.eup %11107  ;;  %v8949_v61 = vadd.f32 1.0, %v11106_v14  ;;  %11117 = vrcp.f32 %v8947_v63  ;;  %v15280_v14 = vld [vmem:[#allocation59_spill] sm:$0xff] }
 0xf8e   : > { %v8950_v33 = vadd.f32 1.0, %v11108_v38  ;;  %11119 = vrcp.f32 %v8948_v23  ;;  %v8909_v40 = vmul.f32 %v8887_v47, %v15280_v14  ;;  %v8895_v38 = vrot.slane %v8862_v59, %v15249_v56  ;;  %v15281_v56 = vld [vmem:[#allocation62_spill] sm:$0xff] }
 0xf8f   : > { %v11110_v49 = vpop.eup %11109  ;;  %11121 = vrcp.f32 %v8949_v61  ;;  %v8910_v59 = vmul.f32 %v8891_v3, %v15281_v56  ;;  %v9060_v47 = vld [vmem:[%s12166_s22 + $0x260] sm:$0xff] }
 0xf90   : > { %11123 = vrcp.f32 %v8950_v33  ;;  %v8951_v37 = vadd.f32 1.0, %v11110_v49  ;;  %v9268_v36 = vunpack.c.h.s8.bf16 %v9060_v47 }
 0xf92   : > { %11125 = vrcp.f32 %v8951_v37 }
 0xf95   : > { %v11112_v54 = vpop.eup %11111 }
 0xf96   : > { %v11114_v39 = vpop.eup %11113  ;;  %v8968_v63 = vmul.f32 %v11112_v54, %v14551_v57 }
 0xf97   : > { %v8969_v57 = vmul.f32 %v11114_v39, %v14555_v45 }
 0xf99   : > { %v11116_v48 = vpop.eup %11115 }
 0xf9a   : > { %v11118_v2 = vpop.eup %11117  ;;  %v8970_v21 = vmul.f32 %v11116_v48, %v14559_v24 }
 0xf9b   : > { %v11120_v41 = vpop.eup %11119 }
 0xf9c   : > { %v11122_v15 = vpop.eup %11121 }
 0xf9d   : > { %v11124_v37 = vpop.eup %11123  ;;  %v8973_v27 = vmul.f32 %v11122_v15, %v14571_v51 }
 0xf9e   : > { %v8974_v45 = vmul.f32 %v11124_v37, %v14575_v52 }
 0xffc   : > { %v8502_v35 = vpop.f32.mrf.mxu0 }
 0xffd   : > { %v8784_v1 = vrot.slane %v8502_v35, 1  ;;  %v8543_v26 = vpop.f32.mrf.mxu1  ;;  %v8971_v35 = vmul.f32 %v11118_v2, %v14563_v42  ;;  %v9265_v42 = vunpack.c.l.s8.bf16 %v14538_v62  ;;  %v11126_v2 = vpop.eup %11125 }
 0xffe   : > { %v8786_v7 = vrot.slane %v8543_v26, 1  ;;  %v8504_v29 = vpop.f32.mrf.mxu0  ;;  %v8972_v26 = vmul.f32 %v11120_v41, %v14567_v10  ;;  %v9329_v10 = vunpack.c.l.s8.bf16 %v14541_v11  ;;  %v9057_v11 = vld [vmem:[%s12166_s22 + $0x248] sm:$0xff]  ;;  %v8975_v15 = vmul.f32 %v11126_v2, %v14583_v25  ;;  %v9048_v2 = vld [vmem:[%s12166_s22 + $0x200] sm:$0xff] }
 0xfff   : > { %v8854_v16 = vsel %vm8853_vm13, %v14447_v9, %v8784_v1  ;;  %v8785_v43 = vrot.slane %v8504_v29, 1  ;;  %v8545_v22 = vpop.f32.mrf.mxu1 }
0x1000   : > { %v8912_v23 = vadd.f32 %v8904_v8, %v8854_v16  ;;  %v8856_v61 = vsel %vm8853_vm13, %v14452_v4, %v8786_v7  ;;  %v8787_v33 = vrot.slane %v8545_v22, 1  ;;  %v8506_v49 = vpop.f32.mrf.mxu0  ;;  %v8911_v8 = vmul.f32 %v8895_v38, %v15282_v17 }
0x1001   : > { %v8914_v9 = vadd.f32 %v8906_v5, %v8856_v61  ;;  %v8855_v6 = vsel %vm8853_vm13, %v14457_v55, %v8785_v43  ;;  %v8547_v20 = vpop.f32.mrf.mxu1  ;;  %v9092_v55 = vld [vmem:[%s12166_s22 + $0x360] sm:$0xff]  ;;  %v9264_v49 = vunpack.c.l.s8.bf16 %v9060_v47 }
0x1002   : > { %v8976_v60 = vmul.f32 %v8968_v63, %v8912_v23  ;;  %v8913_v32 = vadd.f32 %v8905_v44, %v8855_v6  ;;  %v8857_v4 = vsel %vm8853_vm13, %v14462_v53, %v8787_v33  ;;  %v8507_v54 = vpop.f32.mrf.mxu0  ;;  %v9261_v6 = vunpack.c.h.s8.bf16 %v9057_v11  ;;  %v9056_v20 = vld [vmem:[%s12166_s22 + $0x240] sm:$0xff] }
0x1003   : > { %v8978_v24 = vmul.f32 %v8970_v21, %v8914_v9  ;;  %v8915_v48 = vadd.f32 %v8907_v30, %v8857_v4  ;;  %v8548_v1 = vpop.f32.mrf.mxu1  ;;  %v9332_v30 = vunpack.c.h.s8.bf16 %v9092_v55  ;;  %v9328_v9 = vunpack.c.l.s8.bf16 %v9092_v55 }
0x1004   : > { %v8584_v39 = vpop.f32.mrf.mxu0  ;;  %v8977_v44 = vmul.f32 %v8969_v57, %v8913_v32  ;;  %v14625_v51 = vpack.c.bf16 %v8976_v60, %v8976_v60  ;;  %v9260_v60 = vunpack.c.h.s8.bf16 %v9056_v20  ;;  %v9257_v54 = vunpack.c.l.s8.bf16 %v9057_v11  ;;  %v9076_v11 = vld [vmem:[%s12166_s22 + $0x2e0] sm:$0xff] }
0x1005   : > { %v8788_v3 = vrot.slane %v8584_v39, 1  ;;  %v8625_v53 = vpop.f32.mrf.mxu1  ;;  %v8979_v7 = vmul.f32 %v8971_v35, %v8915_v48  ;;  %v14631_v62 = vpack.c.bf16 %v8978_v24, %v8978_v24  ;;  %v9053_v35 = vld [vmem:[%s12166_s22 + $0x228] sm:$0xff]  ;;  %v9256_v48 = vunpack.c.l.s8.bf16 %v9056_v20  ;;  %v9104_v20 = vld [vmem:[%s12166_s22 + $0x3c0] sm:$0xff] }
0x1006   : > { %v8790_v5 = vrot.slane %v8625_v53, 1  ;;  %v8586_v29 = vpop.f32.mrf.mxu0  ;;  %v14622_v12 = vpack.c.bf16 %v8977_v44, %v8977_v44  ;;  %v9085_v24 = vld [vmem:[%s12166_s22 + $0x328] sm:$0xff]  ;;  %v9253_v17 = vunpack.c.h.s8.bf16 %v9053_v35  ;;  %v9249_v39 = vunpack.c.l.s8.bf16 %v9053_v35 }
0x1007   : > { %v8858_v52 = vsel %vm8853_vm13, %v14469_v50, %v8788_v3  ;;  %v8789_v0 = vrot.slane %v8586_v29, 1  ;;  %v8627_v41 = vpop.f32.mrf.mxu1  ;;  %v14629_v16 = vpack.c.bf16 %v8979_v7, %v8979_v7  ;;  %v9317_v55 = vunpack.c.h.s8.bf16 %v9085_v24  ;;  %v9049_v3 = vld [vmem:[%s12166_s22 + $0x208] sm:$0xff]  ;;  %v9080_v29 = vld [vmem:[%s12166_s22 + $0x300] sm:$0xff] }
0x1008   : > { %v8916_v43 = vadd.f32 %v8908_v18, %v8858_v52  ;;  %v8860_v22 = vsel %vm8853_vm13, %v14473_v13, %v8790_v5  ;;  %v8791_v14 = vrot.slane %v8627_v41, 1  ;;  %v8588_v38 = vpop.f32.mrf.mxu0  ;;  %9408 = vmatprep.mubr.bf16.mxu0 %v14622_v12  ;;  %v9089_v18 = vld [vmem:[%s12166_s22 + $0x348] sm:$0xff]  ;;  %v9313_v44 = vunpack.c.l.s8.bf16 %v9085_v24  ;;  %v9068_v24 = vld [vmem:[%s12166_s22 + $0x2a0] sm:$0xff] }
0x1009   : > { %v8918_v63 = vadd.f32 %v8910_v59, %v8860_v22  ;;  %v8859_v50 = vsel %vm8853_vm13, %v14477_v46, %v8789_v0  ;;  %v8629_v23 = vpop.f32.mrf.mxu1  ;;  %9449 = vmatprep.mubr.bf16.mxu1 %v14629_v16  ;;  %9409 = vmatmul.mubr.bf16.vlgmr.msra.gmra.mxu0 %v14625_v51  ;;  %v9325_v56 = vunpack.c.h.s8.bf16 %v9089_v18  ;;  %v9321_v47 = vunpack.c.l.s8.bf16 %v9089_v18  ;;  %v9081_v53 = vld [vmem:[%s12166_s22 + $0x308] sm:$0xff] }
0x100a   : > { %v14643_v61 = vmul.f32 %v8972_v26, %v8916_v43  ;;  %v8917_v13 = vadd.f32 %v8909_v40, %v8859_v50  ;;  %v8861_v33 = vsel %vm8853_vm13, %v14481_v34, %v8791_v14  ;;  %9450 = vmatmul.mubr.bf16.vlgmr.msra.gmra.mxu1 %v14631_v62  ;;  %9459 = vmatpush1.bf16.msra.mxu0 %v9268_v36  ;;  %v8589_v25 = vpop.f32.mrf.mxu0  ;;  %v9088_v34 = vld [vmem:[%s12166_s22 + $0x340] sm:$0xff]  ;;  %v9309_v5 = vunpack.c.h.s8.bf16 %v9081_v53  ;;  %v9077_v41 = vld [vmem:[%s12166_s22 + $0x2e8] sm:$0xff] }
0x100b   : > { %v14648_v46 = vmul.f32 %v8974_v45, %v8918_v63  ;;  %v8919_v37 = vadd.f32 %v8911_v8, %v8861_v33  ;;  %9500 = vmatpush1.bf16.msra.mxu1 %v9332_v30  ;;  %v8630_v21 = vpop.f32.mrf.mxu1  ;;  %9460 = vmatprep.subr.bf16.mxu0 %v9265_v42  ;;  %v9324_v4 = vunpack.c.h.s8.bf16 %v9088_v34  ;;  %v9320_v1 = vunpack.c.l.s8.bf16 %v9088_v34  ;;  %v9052_v8 = vld [vmem:[%s12166_s22 + $0x220] sm:$0xff]  ;;  %v9109_v43 = vld [vmem:[%s12166_s22 + $0x3e8] sm:$0xff] }
0x100c   : > { %9501 = vmatprep.subr.bf16.mxu1 %v9329_v10  ;;  %v8981_v40 = vmul.f32 %v8973_v27, %v8917_v13  ;;  %v9084_v26 = vld [vmem:[%s12166_s22 + $0x320] sm:$0xff]  ;;  %v9252_v27 = vunpack.c.h.s8.bf16 %v9052_v8  ;;  %v9248_v7 = vunpack.c.l.s8.bf16 %v9052_v8  ;;  %v9245_v42 = vunpack.c.h.s8.bf16 %v9049_v3  ;;  %v9073_v33 = vld [vmem:[%s12166_s22 + $0x2c8] sm:$0xff] }
0x100d   : > { %v8983_v59 = vmul.f32 %v8975_v15, %v8919_v37  ;;  %v9316_v45 = vunpack.c.h.s8.bf16 %v9084_v26  ;;  %v9312_v36 = vunpack.c.l.s8.bf16 %v9084_v26  ;;  %v9244_v30 = vunpack.c.h.s8.bf16 %v9048_v2  ;;  %v9108_v63 = vld [vmem:[%s12166_s22 + $0x3e0] sm:$0xff]  ;;  %v9105_v25 = vld [vmem:[%s12166_s22 + $0x3c8] sm:$0xff] }
0x100e   : > { %9461 = vmatpush1.bf16.msra.mxu0 %v9264_v49  ;;  %v14652_v57 = vpack.c.bf16 %v8981_v40, %v8981_v40  ;;  %v9308_v10 = vunpack.c.h.s8.bf16 %v9080_v29  ;;  %v9241_v52 = vunpack.c.l.s8.bf16 %v9049_v3  ;;  %v9305_v0 = vunpack.c.l.s8.bf16 %v9081_v53  ;;  %v9064_v53 = vld [vmem:[%s12166_s22 + $0x280] sm:$0xff] }
0x100f   : > { %9502 = vmatpush1.bf16.msra.mxu1 %v9328_v9  ;;  %9462 = vmatprep.subr.bf16.mxu0 %v9261_v6  ;;  %v14654_v32 = vpack.c.bf16 %v8983_v59, %v8983_v59  ;;  %v9240_v22 = vunpack.c.l.s8.bf16 %v9048_v2  ;;  %v9304_v14 = vunpack.c.l.s8.bf16 %v9080_v29  ;;  %v9301_v38 = vunpack.c.h.s8.bf16 %v9077_v41  ;;  %v9072_v9 = vld [vmem:[%s12166_s22 + $0x2c0] sm:$0xff] }
0x1010   : > { %9490 = vmatprep.mubr.bf16.mxu0 %v14652_v57  ;;  %9503 = vmatprep.subr.bf16.mxu1 %v9325_v56  ;;  %v9365_v15 = vunpack.c.h.s8.bf16 %v9109_v43  ;;  %v9300_v50 = vunpack.c.h.s8.bf16 %v9076_v11  ;;  %v9364_v23 = vunpack.c.h.s8.bf16 %v9108_v63  ;;  %v9297_v18 = vunpack.c.l.s8.bf16 %v9077_v41 }
0x1011   : > { %9531 = vmatprep.mubr.bf16.mxu1 %v14654_v32  ;;  %v9361_v13 = vunpack.c.l.s8.bf16 %v9109_v43  ;;  %v9296_v49 = vunpack.c.l.s8.bf16 %v9076_v11  ;;  %v9360_v37 = vunpack.c.l.s8.bf16 %v9108_v63  ;;  %v9293_v21 = vunpack.c.h.s8.bf16 %v9073_v33  ;;  %v8998_v43 = vld [vmem:[%s12166_s22 + $0x70] sm:$0xff] }
0x1012   : > { %9463 = vmatpush1.bf16.msra.mxu0 %v9260_v60  ;;  %v9357_v6 = vunpack.c.h.s8.bf16 %v9105_v25  ;;  %v9292_v40 = vunpack.c.h.s8.bf16 %v9072_v9  ;;  %v9356_v56 = vunpack.c.h.s8.bf16 %v9104_v20  ;;  %v9289_v34 = vunpack.c.l.s8.bf16 %v9073_v33  ;;  %v9069_v60 = vld [vmem:[%s12166_s22 + $0x2a8] sm:$0xff] }
0x1013   : > { %9504 = vmatpush1.bf16.msra.mxu1 %v9324_v4  ;;  %9464 = vmatprep.subr.bf16.mxu0 %v9257_v54  ;;  %v9353_v59 = vunpack.c.l.s8.bf16 %v9105_v25  ;;  %v9101_v4 = vld [vmem:[%s12166_s22 + $0x3a8] sm:$0xff]  ;;  %v9288_v54 = vunpack.c.l.s8.bf16 %v9072_v9  ;;  %v9285_v35 = vunpack.c.h.s8.bf16 %v9069_v60  ;;  %v14688_v11 = vpack.c.bf16 %v14643_v61, %v14643_v61 }
0x1014   : > { %9505 = vmatprep.subr.bf16.mxu1 %v9321_v47  ;;  %v9352_v47 = vunpack.c.l.s8.bf16 %v9104_v20  ;;  %v9345_v26 = vunpack.c.l.s8.bf16 %v9101_v4  ;;  %v14692_v63 = vpack.c.bf16 %v14648_v46, %v14648_v46  ;;  %v9138_v61 = vunpack.c.l.s8.bf16 %v8998_v43  ;;  %v8994_v46 = vld [vmem:[%s12166_s22 + $0x50] sm:$0xff]  ;;  %v8991_v20 = vld [vmem:[%s12166_s22 + $0x38] sm:$0xff] }
0x1016   : > { %9465 = vmatpush1.bf16.msra.mxu0 %v9256_v48  ;;  %v9349_v48 = vunpack.c.h.s8.bf16 %v9101_v4  ;;  %v9022_v4 = vld [vmem:[%s12166_s22 + $0x130] sm:$0xff] }
0x1017   : > { %9506 = vmatpush1.bf16.msra.mxu1 %v9320_v1  ;;  %9466 = vmatprep.subr.bf16.mxu0 %v9253_v17  ;;  %v9100_v1 = vld [vmem:[%s12166_s22 + $0x3a0] sm:$0xff]  ;;  %v9284_v17 = vunpack.c.h.s8.bf16 %v9068_v24 }
0x1018   : > { %9507 = vmatprep.subr.bf16.mxu1 %v9317_v55  ;;  %v9348_v8 = vunpack.c.h.s8.bf16 %v9100_v1  ;;  %v9281_v55 = vunpack.c.l.s8.bf16 %v9069_v60 }
0x101a   : > { %9467 = vmatpush1.bf16.msra.mxu0 %v9252_v27  ;;  %v9065_v27 = vld [vmem:[%s12166_s22 + $0x288] sm:$0xff] }
0x101b   : > { %9508 = vmatpush1.bf16.msra.mxu1 %v9316_v45  ;;  %9468 = vmatprep.subr.bf16.mxu0 %v9249_v39  ;;  %v9097_v45 = vld [vmem:[%s12166_s22 + $0x388] sm:$0xff]  ;;  %v9280_v39 = vunpack.c.l.s8.bf16 %v9068_v24  ;;  %v9277_v3 = vunpack.c.h.s8.bf16 %v9065_v27 }
0x101c   : > { %9509 = vmatprep.subr.bf16.mxu1 %v9313_v44  ;;  %v9344_v44 = vunpack.c.l.s8.bf16 %v9100_v1  ;;  %v9337_v29 = vunpack.c.l.s8.bf16 %v9097_v45  ;;  %v9019_v1 = vld [vmem:[%s12166_s22 + $0x118] sm:$0xff] }
0x101e   : > { %9469 = vmatpush1.bf16.msra.mxu0 %v9248_v7  ;;  %v9341_v7 = vunpack.c.h.s8.bf16 %v9097_v45  ;;  %v9018_v45 = vld [vmem:[%s12166_s22 + $0x110] sm:$0xff] }
0x101f   : > { %9510 = vmatpush1.bf16.msra.mxu1 %v9312_v36  ;;  %9470 = vmatprep.subr.bf16.mxu0 %v9245_v42  ;;  %v9096_v36 = vld [vmem:[%s12166_s22 + $0x380] sm:$0xff]  ;;  %v9276_v42 = vunpack.c.h.s8.bf16 %v9064_v53 }
0x1020   : > { %9511 = vmatprep.subr.bf16.mxu1 %v9309_v5  ;;  %v9340_v2 = vunpack.c.h.s8.bf16 %v9096_v36  ;;  %v9273_v5 = vunpack.c.l.s8.bf16 %v9065_v27  ;;  %v9183_v27 = vunpack.c.h.s8.bf16 %v9019_v1 }
0x1022   : > { %9471 = vmatpush1.bf16.msra.mxu0 %v9244_v30  ;;  %v8999_v30 = vld [vmem:[%s12166_s22 + $0x78] sm:$0xff] }
0x1023   : > { %9512 = vmatpush1.bf16.msra.mxu1 %v9308_v10  ;;  %9472 = vmatprep.subr.bf16.mxu0 %v9241_v52  ;;  %v9031_v10 = vld [vmem:[%s12166_s22 + $0x178] sm:$0xff]  ;;  %v9272_v52 = vunpack.c.l.s8.bf16 %v9064_v53  ;;  %v9143_v41 = vunpack.c.h.s8.bf16 %v8999_v30  ;;  %v9179_v53 = vunpack.c.l.s8.bf16 %v9019_v1  ;;  %v9034_v1 = vld [vmem:[%s12166_s22 + $0x190] sm:$0xff] }
0x1024   : > { %9513 = vmatprep.subr.bf16.mxu1 %v9305_v0  ;;  %v9336_v0 = vunpack.c.l.s8.bf16 %v9096_v36  ;;  %v9047_v36 = vld [vmem:[%s12166_s22 + $0x1f8] sm:$0xff] }
0x1026   : > { %9473 = vmatpush1.bf16.msra.mxu0 %v9240_v22  ;;  %v9207_v22 = vunpack.c.h.s8.bf16 %v9031_v10 }
0x1027   : > { %9514 = vmatpush1.bf16.msra.mxu1 %v9304_v14  ;;  %9474 = vmatprep.subr.bf16.mxu0 %v9301_v38  ;;  %v9030_v14 = vld [vmem:[%s12166_s22 + $0x170] sm:$0xff]  ;;  %v9142_v38 = vunpack.c.h.s8.bf16 %v8998_v43  ;;  %v9235_v43 = vunpack.c.l.s8.bf16 %v9047_v36 }
0x1028   : > { %9515 = vmatprep.subr.bf16.mxu1 %v9365_v15  ;;  %v9206_v15 = vunpack.c.h.s8.bf16 %v9030_v14  ;;  %v9202_v33 = vunpack.c.l.s8.bf16 %v9030_v14  ;;  %v9043_v14 = vld [vmem:[%s12166_s22 + $0x1d8] sm:$0xff] }
0x102a   : > { %9475 = vmatpush2.bf16.msra.mxu0 %v9300_v50  ;;  %v9139_v50 = vunpack.c.l.s8.bf16 %v8999_v30  ;;  %v9239_v30 = vunpack.c.h.s8.bf16 %v9047_v36  ;;  %v9094_v36 = vld [vmem:[%s12166_s22 + $0x370] sm:$0xff] }
0x102b   : > { %9516 = vmatpush2.bf16.msra.mxu1 %v9364_v23  ;;  %9476 = vmatprep.subr.bf16.mxu0 %v9297_v18  ;;  %v8995_v23 = vld [vmem:[%s12166_s22 + $0x58] sm:$0xff]  ;;  %v9203_v18 = vunpack.c.l.s8.bf16 %v9031_v10  ;;  %v9046_v10 = vld [vmem:[%s12166_s22 + $0x1f0] sm:$0xff] }
0x102c   : > { %9517 = vmatprep.subr.bf16.mxu1 %v9361_v13  ;;  %v9027_v13 = vld [vmem:[%s12166_s22 + $0x158] sm:$0xff]  ;;  %v9135_v25 = vunpack.c.h.s8.bf16 %v8995_v23 }
0x102e   : > { %9477 = vmatpush2.bf16.msra.mxu0 %v9296_v49  ;;  %v9199_v49 = vunpack.c.h.s8.bf16 %v9027_v13 }
0x102f   : > { %9518 = vmatpush2.bf16.msra.mxu1 %v9360_v37  ;;  %9478 = vmatprep.subr.bf16.mxu0 %v9293_v21  ;;  %v9026_v37 = vld [vmem:[%s12166_s22 + $0x150] sm:$0xff]  ;;  %v9134_v21 = vunpack.c.h.s8.bf16 %v8994_v46 }
0x1030   : > { %9519 = vmatprep.subr.bf16.mxu1 %v9357_v6  ;;  %v9198_v9 = vunpack.c.h.s8.bf16 %v9026_v37  ;;  %v9195_v6 = vunpack.c.l.s8.bf16 %v9027_v13  ;;  %v9042_v13 = vld [vmem:[%s12166_s22 + $0x1d0] sm:$0xff] }
0x1032   : > { %9479 = vmatpush2.bf16.msra.mxu0 %v9292_v40  ;;  %v9023_v40 = vld [vmem:[%s12166_s22 + $0x138] sm:$0xff] }
0x1033   : > { %9520 = vmatpush2.bf16.msra.mxu1 %v9356_v56  ;;  %9480 = vmatprep.subr.bf16.mxu0 %v9289_v34  ;;  %v9130_v56 = vunpack.c.l.s8.bf16 %v8994_v46  ;;  %v9127_v34 = vunpack.c.h.s8.bf16 %v8991_v20  ;;  %v9191_v60 = vunpack.c.h.s8.bf16 %v9023_v40  ;;  %v9187_v24 = vunpack.c.l.s8.bf16 %v9023_v40  ;;  %v9038_v40 = vld [vmem:[%s12166_s22 + $0x1b0] sm:$0xff] }
0x1034   : > { %9521 = vmatprep.subr.bf16.mxu1 %v9353_v59  ;;  %v8990_v59 = vld [vmem:[%s12166_s22 + $0x30] sm:$0xff]  ;;  %v9227_v46 = vunpack.c.l.s8.bf16 %v9043_v14 }
0x1036   : > { %9481 = vmatpush2.bf16.msra.mxu0 %v9288_v54  ;;  %v9126_v54 = vunpack.c.h.s8.bf16 %v8990_v59 }
0x1037   : > { %9522 = vmatpush2.bf16.msra.mxu1 %v9352_v47  ;;  %9482 = vmatprep.subr.bf16.mxu0 %v9285_v35  ;;  %v9190_v47 = vunpack.c.h.s8.bf16 %v9022_v4  ;;  %v9123_v35 = vunpack.c.l.s8.bf16 %v8991_v20 }
0x1038   : > { %9523 = vmatprep.subr.bf16.mxu1 %v9349_v48  ;;  %v8987_v48 = vld [vmem:[%s12166_s22 + $0x18] sm:$0xff] }
0x103a   : > { %9483 = vmatpush2.bf16.msra.mxu0 %v9284_v17  ;;  %v9122_v17 = vunpack.c.l.s8.bf16 %v8990_v59 }
0x103b   : > { %9524 = vmatpush2.bf16.msra.mxu1 %v9348_v8  ;;  %9484 = vmatprep.subr.bf16.mxu0 %v9281_v55  ;;  %v9186_v8 = vunpack.c.l.s8.bf16 %v9022_v4  ;;  %v9119_v55 = vunpack.c.h.s8.bf16 %v8987_v48  ;;  %v9035_v4 = vld [vmem:[%s12166_s22 + $0x198] sm:$0xff] }
0x103c   : > { %9525 = vmatprep.subr.bf16.mxu1 %v9345_v26  ;;  %v8986_v26 = vld [vmem:[%s12166_s22 + $0x10] sm:$0xff] }
0x103e   : > { %9485 = vmatpush2.bf16.msra.mxu0 %v9280_v39  ;;  %v9118_v39 = vunpack.c.h.s8.bf16 %v8986_v26 }
0x103f   : > { %9526 = vmatpush2.bf16.msra.mxu1 %v9344_v44  ;;  %9486 = vmatprep.subr.bf16.mxu0 %v9277_v3  ;;  %v9182_v44 = vunpack.c.h.s8.bf16 %v9018_v45  ;;  %v9115_v3 = vunpack.c.l.s8.bf16 %v8987_v48  ;;  %v9215_v48 = vunpack.c.h.s8.bf16 %v9035_v4 }
0x1040   : > { %9527 = vmatprep.subr.bf16.mxu1 %v9341_v7  ;;  %v9015_v7 = vld [vmem:[%s12166_s22 + $0xf8] sm:$0xff] }
0x1042   : > { %9487 = vmatpush2.bf16.msra.mxu0 %v9276_v42  ;;  %v9114_v42 = vunpack.c.l.s8.bf16 %v8986_v26  ;;  %v9211_v26 = vunpack.c.l.s8.bf16 %v9035_v4 }
0x1043   : > { %9528 = vmatpush2.bf16.msra.mxu1 %v9340_v2  ;;  %9488 = vmatprep.subr.bf16.mxu0 %v9273_v5  ;;  %v9178_v2 = vunpack.c.l.s8.bf16 %v9018_v45  ;;  %v9175_v5 = vunpack.c.h.s8.bf16 %v9015_v7  ;;  %v9095_v45 = vld [vmem:[%s12166_s22 + $0x378] sm:$0xff] }
0x1044   : > { %9529 = vmatprep.subr.bf16.mxu1 %v9337_v29  ;;  %v9014_v29 = vld [vmem:[%s12166_s22 + $0xf0] sm:$0xff] }
0x1046   : > { %9489 = vmatpush2.bf16.msra.mxu0 %v9272_v52  ;;  %v9174_v52 = vunpack.c.h.s8.bf16 %v9014_v29 }
0x1047   : > { %9530 = vmatpush2.bf16.msra.mxu1 %v9336_v0  ;;  %9540 = vmatprep.subr.bf16.mxu0 %v9143_v41  ;;  %v9238_v0 = vunpack.c.h.s8.bf16 %v9046_v10  ;;  %v9171_v41 = vunpack.c.l.s8.bf16 %v9015_v7  ;;  %v9335_v7 = vunpack.c.h.s8.bf16 %v9095_v45 }
0x1048   : > { %9581 = vmatprep.subr.bf16.mxu1 %v9207_v22  ;;  %v9011_v22 = vld [vmem:[%s12166_s22 + $0xd8] sm:$0xff] }
0x1049   : > { %9491 = vmatmul.mubr.bf16.vlgmr.msra.gmra.mxu0 %v14688_v11 }
0x104a   : > { %9532 = vmatmul.mubr.bf16.vlgmr.msra.gmra.mxu1 %v14692_v63  ;;  %9541 = vmatpush1.bf16.msra.mxu0 %v9142_v38  ;;  %v9170_v38 = vunpack.c.l.s8.bf16 %v9014_v29  ;;  %v9059_v29 = vld [vmem:[%s12166_s22 + $0x258] sm:$0xff] }
0x104b   : > { %9572 = vmatprep.mubr.bf16.mxu0 %v14622_v12  ;;  %9582 = vmatpush1.bf16.msra.mxu1 %v9206_v15  ;;  %v9131_v12 = vunpack.c.l.s8.bf16 %v8995_v23  ;;  %v9234_v15 = vunpack.c.l.s8.bf16 %v9046_v10  ;;  %v9010_v23 = vld [vmem:[%s12166_s22 + $0xd0] sm:$0xff]  ;;  %v9091_v10 = vld [vmem:[%s12166_s22 + $0x358] sm:$0xff] }
0x104c   : > { %9613 = vmatprep.mubr.bf16.mxu1 %v14629_v16  ;;  %9542 = vmatprep.subr.bf16.mxu0 %v9139_v50  ;;  %v9194_v16 = vunpack.c.l.s8.bf16 %v9026_v37  ;;  %v9167_v50 = vunpack.c.h.s8.bf16 %v9011_v22  ;;  %v9039_v37 = vld [vmem:[%s12166_s22 + $0x1b8] sm:$0xff] }
0x104d   : > { %9583 = vmatprep.subr.bf16.mxu1 %v9203_v18  ;;  %v9231_v18 = vunpack.c.h.s8.bf16 %v9043_v14  ;;  %v9223_v20 = vunpack.c.h.s8.bf16 %v9039_v37  ;;  %v9219_v59 = vunpack.c.l.s8.bf16 %v9039_v37  ;;  %v9090_v14 = vld [vmem:[%s12166_s22 + $0x350] sm:$0xff] }
0x104e   : > { %9543 = vmatpush1.bf16.msra.mxu0 %v9138_v61  ;;  %v9166_v61 = vunpack.c.h.s8.bf16 %v9010_v23 }
0x104f   : > { %9584 = vmatpush1.bf16.msra.mxu1 %v9202_v33  ;;  %9544 = vmatprep.subr.bf16.mxu0 %v9135_v25  ;;  %v9230_v33 = vunpack.c.h.s8.bf16 %v9042_v13  ;;  %v9163_v25 = vunpack.c.l.s8.bf16 %v9011_v22  ;;  %v9327_v22 = vunpack.c.h.s8.bf16 %v9091_v10 }
0x1050   : > { %9585 = vmatprep.subr.bf16.mxu1 %v9199_v49  ;;  %v9007_v49 = vld [vmem:[%s12166_s22 + $0xb8] sm:$0xff] }
0x1052   : > { %9545 = vmatpush1.bf16.msra.mxu0 %v9134_v21  ;;  %v9162_v21 = vunpack.c.l.s8.bf16 %v9010_v23 }
0x1053   : > { %9586 = vmatpush1.bf16.msra.mxu1 %v9198_v9  ;;  %9546 = vmatprep.subr.bf16.mxu0 %v9131_v12  ;;  %v9226_v9 = vunpack.c.l.s8.bf16 %v9042_v13  ;;  %v9159_v12 = vunpack.c.h.s8.bf16 %v9007_v49  ;;  %v9054_v13 = vld [vmem:[%s12166_s22 + $0x230] sm:$0xff] }
0x1054   : > { %9587 = vmatprep.subr.bf16.mxu1 %v9195_v6  ;;  %v9006_v6 = vld [vmem:[%s12166_s22 + $0xb0] sm:$0xff] }
0x1056   : > { %9547 = vmatpush1.bf16.msra.mxu0 %v9130_v56  ;;  %v9158_v56 = vunpack.c.h.s8.bf16 %v9006_v6 }
0x1057   : > { %9588 = vmatpush1.bf16.msra.mxu1 %v9194_v16  ;;  %9548 = vmatprep.subr.bf16.mxu0 %v9127_v34  ;;  %v9222_v16 = vunpack.c.h.s8.bf16 %v9038_v40  ;;  %v9155_v34 = vunpack.c.l.s8.bf16 %v9007_v49 }
0x1058   : > { %9589 = vmatprep.subr.bf16.mxu1 %v9191_v60  ;;  %v9003_v60 = vld [vmem:[%s12166_s22 + $0x98] sm:$0xff] }
0x105a   : > { %9549 = vmatpush1.bf16.msra.mxu0 %v9126_v54  ;;  %v9154_v54 = vunpack.c.l.s8.bf16 %v9006_v6 }
0x105b   : > { %9590 = vmatpush1.bf16.msra.mxu1 %v9190_v47  ;;  %9550 = vmatprep.subr.bf16.mxu0 %v9123_v35  ;;  %v9218_v47 = vunpack.c.l.s8.bf16 %v9038_v40  ;;  %v9151_v35 = vunpack.c.h.s8.bf16 %v9003_v60  ;;  %v9050_v40 = vld [vmem:[%s12166_s22 + $0x210] sm:$0xff] }
0x105c   : > { %9591 = vmatprep.subr.bf16.mxu1 %v9187_v24  ;;  %v9002_v24 = vld [vmem:[%s12166_s22 + $0x90] sm:$0xff] }
0x105e   : > { %9551 = vmatpush1.bf16.msra.mxu0 %v9122_v17  ;;  %v9150_v17 = vunpack.c.h.s8.bf16 %v9002_v24 }
0x105f   : > { %9592 = vmatpush1.bf16.msra.mxu1 %v9186_v8  ;;  %9552 = vmatprep.subr.bf16.mxu0 %v9119_v55  ;;  %v9214_v8 = vunpack.c.h.s8.bf16 %v9034_v1  ;;  %v9147_v55 = vunpack.c.l.s8.bf16 %v9003_v60 }
0x1060   : > { %9593 = vmatprep.subr.bf16.mxu1 %v9183_v27  ;;  %v9063_v27 = vld [vmem:[%s12166_s22 + $0x278] sm:$0xff] }
0x1062   : > { %9553 = vmatpush1.bf16.msra.mxu0 %v9118_v39  ;;  %v9146_v39 = vunpack.c.l.s8.bf16 %v9002_v24 }
0x1063   : > { %9594 = vmatpush1.bf16.msra.mxu1 %v9182_v44  ;;  %9554 = vmatprep.subr.bf16.mxu0 %v9115_v3  ;;  %v9210_v44 = vunpack.c.l.s8.bf16 %v9034_v1  ;;  %v9271_v3 = vunpack.c.h.s8.bf16 %v9063_v27  ;;  %v9078_v1 = vld [vmem:[%s12166_s22 + $0x2f0] sm:$0xff] }
0x1064   : > { %9595 = vmatprep.subr.bf16.mxu1 %v9179_v53  ;;  %v9062_v53 = vld [vmem:[%s12166_s22 + $0x270] sm:$0xff] }
0x1066   : > { %9555 = vmatpush1.bf16.msra.mxu0 %v9114_v42  ;;  %v9270_v42 = vunpack.c.h.s8.bf16 %v9062_v53 }
0x1067   : > { %9596 = vmatpush1.bf16.msra.mxu1 %v9178_v2  ;;  %9556 = vmatprep.subr.bf16.mxu0 %v9175_v5  ;;  %v9334_v2 = vunpack.c.h.s8.bf16 %v9094_v36  ;;  %v9267_v5 = vunpack.c.l.s8.bf16 %v9063_v27 }
0x1068   : > { %9597 = vmatprep.subr.bf16.mxu1 %v9239_v30  ;;  %v9331_v30 = vunpack.c.l.s8.bf16 %v9095_v45 }
0x106a   : > { %9557 = vmatpush2.bf16.msra.mxu0 %v9174_v52  ;;  %v9266_v52 = vunpack.c.l.s8.bf16 %v9062_v53 }
0x106b   : > { %9598 = vmatpush2.bf16.msra.mxu1 %v9238_v0  ;;  %9558 = vmatprep.subr.bf16.mxu0 %v9171_v41  ;;  %v9330_v0 = vunpack.c.l.s8.bf16 %v9094_v36  ;;  %v9263_v41 = vunpack.c.h.s8.bf16 %v9059_v29  ;;  %v9074_v36 = vld [vmem:[%s12166_s22 + $0x2d0] sm:$0xff] }
0x106c   : > { %9599 = vmatprep.subr.bf16.mxu1 %v9235_v43  ;;  %v9058_v43 = vld [vmem:[%s12166_s22 + $0x250] sm:$0xff] }
0x106d   : > { %v9258_v23 = vunpack.c.l.s8.bf16 %v9058_v43 }
0x106e   : > { %9559 = vmatpush2.bf16.msra.mxu0 %v9170_v38  ;;  %v9323_v38 = vunpack.c.l.s8.bf16 %v9091_v10 }
0x106f   : > { %9600 = vmatpush2.bf16.msra.mxu1 %v9234_v15  ;;  %9560 = vmatprep.subr.bf16.mxu0 %v9167_v50  ;;  %v9055_v15 = vld [vmem:[%s12166_s22 + $0x238] sm:$0xff] }
0x1070   : > { %9601 = vmatprep.subr.bf16.mxu1 %v9231_v18  ;;  %v9087_v50 = vld [vmem:[%s12166_s22 + $0x338] sm:$0xff]  ;;  %v9255_v18 = vunpack.c.h.s8.bf16 %v9055_v15  ;;  %v9251_v49 = vunpack.c.l.s8.bf16 %v9055_v15 }
0x1071   : > { %v9315_v37 = vunpack.c.l.s8.bf16 %v9087_v50 }
0x1072   : > { %9561 = vmatpush2.bf16.msra.mxu0 %v9166_v61  ;;  %v9319_v61 = vunpack.c.h.s8.bf16 %v9087_v50 }
0x1073   : > { %9602 = vmatpush2.bf16.msra.mxu1 %v9230_v33  ;;  %9562 = vmatprep.subr.bf16.mxu0 %v9163_v25  ;;  %v9086_v33 = vld [vmem:[%s12166_s22 + $0x330] sm:$0xff]  ;;  %v9254_v25 = vunpack.c.h.s8.bf16 %v9054_v13 }
0x1074   : > { %9603 = vmatprep.subr.bf16.mxu1 %v9227_v46  ;;  %v9318_v46 = vunpack.c.h.s8.bf16 %v9086_v33  ;;  %v9314_v6 = vunpack.c.l.s8.bf16 %v9086_v33  ;;  %v9066_v33 = vld [vmem:[%s12166_s22 + $0x290] sm:$0xff] }
0x1076   : > { %9563 = vmatpush2.bf16.msra.mxu0 %v9162_v21  ;;  %v9051_v21 = vld [vmem:[%s12166_s22 + $0x218] sm:$0xff] }
0x1077   : > { %9604 = vmatpush2.bf16.msra.mxu1 %v9226_v9  ;;  %9564 = vmatprep.subr.bf16.mxu0 %v9159_v12  ;;  %v9083_v9 = vld [vmem:[%s12166_s22 + $0x318] sm:$0xff]  ;;  %v9250_v12 = vunpack.c.l.s8.bf16 %v9054_v13  ;;  %v9243_v60 = vunpack.c.l.s8.bf16 %v9051_v21 }
0x1078   : > { %9605 = vmatprep.subr.bf16.mxu1 %v9223_v20  ;;  %v9247_v20 = vunpack.c.h.s8.bf16 %v9051_v21  ;;  %v9307_v4 = vunpack.c.l.s8.bf16 %v9083_v9 }
0x107a   : > { %9565 = vmatpush2.bf16.msra.mxu0 %v9158_v56  ;;  %v9311_v56 = vunpack.c.h.s8.bf16 %v9083_v9 }
0x107b   : > { %9606 = vmatpush2.bf16.msra.mxu1 %v9222_v16  ;;  %9566 = vmatprep.subr.bf16.mxu0 %v9155_v34  ;;  %v9082_v16 = vld [vmem:[%s12166_s22 + $0x310] sm:$0xff]  ;;  %v9246_v34 = vunpack.c.h.s8.bf16 %v9050_v40 }
0x107c   : > { %9607 = vmatprep.subr.bf16.mxu1 %v9219_v59  ;;  %v9310_v59 = vunpack.c.h.s8.bf16 %v9082_v16  ;;  %v9306_v24 = vunpack.c.l.s8.bf16 %v9082_v16 }
0x107e   : > { %9567 = vmatpush2.bf16.msra.mxu0 %v9154_v54  ;;  %v9079_v54 = vld [vmem:[%s12166_s22 + $0x2f8] sm:$0xff] }
0x107f   : > { %9608 = vmatpush2.bf16.msra.mxu1 %v9218_v47  ;;  %9568 = vmatprep.subr.bf16.mxu0 %v9151_v35  ;;  %v9111_v47 = vld [vmem:[%s12166_s22 + $0x3f8] sm:$0xff]  ;;  %v9242_v35 = vunpack.c.l.s8.bf16 %v9050_v40  ;;  %v9299_v27 = vunpack.c.l.s8.bf16 %v9079_v54 }
0x1080   : > { %9609 = vmatprep.subr.bf16.mxu1 %v9215_v48  ;;  %v9303_v48 = vunpack.c.h.s8.bf16 %v9079_v54  ;;  %v9363_v45 = vunpack.c.l.s8.bf16 %v9111_v47  ;;  %v9704_v54 = vld [vmem:[%s12173_s19] sm:$0xf] }
0x1082   : > { %9569 = vmatpush2.bf16.msra.mxu0 %v9150_v17  ;;  %v9367_v17 = vunpack.c.h.s8.bf16 %v9111_v47 }
0x1083   : > { %9610 = vmatpush2.bf16.msra.mxu1 %v9214_v8  ;;  %9570 = vmatprep.subr.bf16.mxu0 %v9147_v55  ;;  %v9110_v8 = vld [vmem:[%s12166_s22 + $0x3f0] sm:$0xff]  ;;  %v9302_v55 = vunpack.c.h.s8.bf16 %v9078_v1 }
0x1084   : > { %9611 = vmatprep.subr.bf16.mxu1 %v9211_v26  ;;  %v9366_v26 = vunpack.c.h.s8.bf16 %v9110_v8  ;;  %v9362_v53 = vunpack.c.l.s8.bf16 %v9110_v8 }
0x1086   : > { %9571 = vmatpush2.bf16.msra.mxu0 %v9146_v39  ;;  %v9075_v39 = vld [vmem:[%s12166_s22 + $0x2d8] sm:$0xff] }
0x1087   : > { %9612 = vmatpush2.bf16.msra.mxu1 %v9210_v44  ;;  %9622 = vmatprep.subr.bf16.mxu0 %v9271_v3  ;;  %v9107_v44 = vld [vmem:[%s12166_s22 + $0x3d8] sm:$0xff]  ;;  %v9298_v3 = vunpack.c.l.s8.bf16 %v9078_v1 }
0x1088   : > { %9663 = vmatprep.subr.bf16.mxu1 %v9335_v7  ;;  %v9295_v7 = vunpack.c.h.s8.bf16 %v9075_v39  ;;  %v9355_v10 = vunpack.c.l.s8.bf16 %v9107_v44 }
0x1089   : > { %9573 = vmatmul.mubr.bf16.vlgmr.msra.gmra.mxu0 %v14625_v51  ;;  %v9262_v51 = vunpack.c.h.s8.bf16 %v9058_v43 }
0x108a   : > { %9614 = vmatmul.mubr.bf16.vlgmr.msra.gmra.mxu1 %v14631_v62  ;;  %9623 = vmatpush1.bf16.msra.mxu0 %v9270_v42  ;;  %v9326_v62 = vunpack.c.h.s8.bf16 %v9090_v14  ;;  %v9359_v42 = vunpack.c.h.s8.bf16 %v9107_v44 }
0x108b   : > { %9654 = vmatprep.mubr.bf16.mxu0 %v14652_v57  ;;  %9664 = vmatpush1.bf16.msra.mxu1 %v9334_v2  ;;  %v9259_v57 = vunpack.c.l.s8.bf16 %v9059_v29  ;;  %v9106_v2 = vld [vmem:[%s12166_s22 + $0x3d0] sm:$0xff] }
0x108c   : > { %9695 = vmatprep.mubr.bf16.mxu1 %v14654_v32  ;;  %9624 = vmatprep.subr.bf16.mxu0 %v9267_v5  ;;  %v9322_v32 = vunpack.c.l.s8.bf16 %v9090_v14  ;;  %v9294_v5 = vunpack.c.h.s8.bf16 %v9074_v36  ;;  %v9358_v29 = vunpack.c.h.s8.bf16 %v9106_v2  ;;  %v9354_v43 = vunpack.c.l.s8.bf16 %v9106_v2  ;;  %v9070_v14 = vld [vmem:[%s12166_s22 + $0x2b0] sm:$0xff] }
0x108d   : > { %9665 = vmatprep.subr.bf16.mxu1 %v9331_v30  ;;  %v9291_v30 = vunpack.c.l.s8.bf16 %v9075_v39 }
0x108e   : > { %9625 = vmatpush1.bf16.msra.mxu0 %v9266_v52  ;;  %v9071_v52 = vld [vmem:[%s12166_s22 + $0x2b8] sm:$0xff] }
0x108f   : > { %9666 = vmatpush1.bf16.msra.mxu1 %v9330_v0  ;;  %9626 = vmatprep.subr.bf16.mxu0 %v9263_v41  ;;  %v9103_v0 = vld [vmem:[%s12166_s22 + $0x3b8] sm:$0xff]  ;;  %v9290_v41 = vunpack.c.l.s8.bf16 %v9074_v36  ;;  %v9283_v15 = vunpack.c.l.s8.bf16 %v9071_v52 }
0x1090   : > { %9667 = vmatprep.subr.bf16.mxu1 %v9327_v22  ;;  %v9287_v22 = vunpack.c.h.s8.bf16 %v9071_v52  ;;  %v9347_v50 = vunpack.c.l.s8.bf16 %v9103_v0 }
0x1092   : > { %9627 = vmatpush1.bf16.msra.mxu0 %v9262_v51  ;;  %v9351_v51 = vunpack.c.h.s8.bf16 %v9103_v0 }
0x1093   : > { %9668 = vmatpush1.bf16.msra.mxu1 %v9326_v62  ;;  %9628 = vmatprep.subr.bf16.mxu0 %v9259_v57  ;;  %v9102_v62 = vld [vmem:[%s12166_s22 + $0x3b0] sm:$0xff]  ;;  %v9286_v57 = vunpack.c.h.s8.bf16 %v9070_v14 }
0x1094   : > { %9669 = vmatprep.subr.bf16.mxu1 %v9323_v38  ;;  %v9350_v38 = vunpack.c.h.s8.bf16 %v9102_v62  ;;  %v9346_v13 = vunpack.c.l.s8.bf16 %v9102_v62 }
0x1096   : > { %9629 = vmatpush1.bf16.msra.mxu0 %v9258_v23  ;;  %v9067_v23 = vld [vmem:[%s12166_s22 + $0x298] sm:$0xff] }
0x1097   : > { %9670 = vmatpush1.bf16.msra.mxu1 %v9322_v32  ;;  %9630 = vmatprep.subr.bf16.mxu0 %v9255_v18  ;;  %v9099_v32 = vld [vmem:[%s12166_s22 + $0x398] sm:$0xff]  ;;  %v9282_v18 = vunpack.c.l.s8.bf16 %v9070_v14  ;;  %v9275_v21 = vunpack.c.l.s8.bf16 %v9067_v23 }
0x1098   : > { %9671 = vmatprep.subr.bf16.mxu1 %v9319_v61  ;;  %v9279_v61 = vunpack.c.h.s8.bf16 %v9067_v23  ;;  %v9339_v9 = vunpack.c.l.s8.bf16 %v9099_v32 }
0x109a   : > { %9631 = vmatpush1.bf16.msra.mxu0 %v9254_v25  ;;  %v9343_v25 = vunpack.c.h.s8.bf16 %v9099_v32 }
0x109b   : > { %9672 = vmatpush1.bf16.msra.mxu1 %v9318_v46  ;;  %9632 = vmatprep.subr.bf16.mxu0 %v9251_v49  ;;  %v9098_v46 = vld [vmem:[%s12166_s22 + $0x390] sm:$0xff]  ;;  %v9278_v49 = vunpack.c.h.s8.bf16 %v9066_v33 }
0x109c   : > { %9673 = vmatprep.subr.bf16.mxu1 %v9315_v37  ;;  %v9342_v37 = vunpack.c.h.s8.bf16 %v9098_v46 }
0x109e   : > { %9633 = vmatpush1.bf16.msra.mxu0 %v9250_v12  ;;  %v9274_v12 = vunpack.c.l.s8.bf16 %v9066_v33 }
0x109f   : > { %9674 = vmatpush1.bf16.msra.mxu1 %v9314_v6  ;;  %9634 = vmatprep.subr.bf16.mxu0 %v9247_v20  ;;  %v9338_v6 = vunpack.c.l.s8.bf16 %v9098_v46 }
0x10a0   : > { %9675 = vmatprep.subr.bf16.mxu1 %v9311_v56 }
0x10a2   : > { %9635 = vmatpush1.bf16.msra.mxu0 %v9246_v34 }
0x10a3   : > { %9676 = vmatpush1.bf16.msra.mxu1 %v9310_v59  ;;  %9636 = vmatprep.subr.bf16.mxu0 %v9243_v60 }
0x10a4   : > { %9677 = vmatprep.subr.bf16.mxu1 %v9307_v4 }
0x10a6   : > { %9637 = vmatpush1.bf16.msra.mxu0 %v9242_v35 }
0x10a7   : > { %9678 = vmatpush1.bf16.msra.mxu1 %v9306_v24  ;;  %9638 = vmatprep.subr.bf16.mxu0 %v9303_v48 }
0x10a8   : > { %9679 = vmatprep.subr.bf16.mxu1 %v9367_v17  ;;  %v9709_v17 = vrot.slane %v9704_v54, %v15260_v31 }
0x10aa   : > { %9639 = vmatpush2.bf16.msra.mxu0 %v9302_v55 }
0x10ab   : > { %9680 = vmatpush2.bf16.msra.mxu1 %v9366_v26  ;;  %9640 = vmatprep.subr.bf16.mxu0 %v9299_v27 }
0x10ac   : > { %9681 = vmatprep.subr.bf16.mxu1 %v9363_v45 }
0x10ae   : > { %9641 = vmatpush2.bf16.msra.mxu0 %v9298_v3 }
0x10af   : > { %9682 = vmatpush2.bf16.msra.mxu1 %v9362_v53  ;;  %9642 = vmatprep.subr.bf16.mxu0 %v9295_v7 }
0x10b0   : > { %9683 = vmatprep.subr.bf16.mxu1 %v9359_v42 }
0x10b2   : > { %9643 = vmatpush2.bf16.msra.mxu0 %v9294_v5 }
0x10b3   : > { %9684 = vmatpush2.bf16.msra.mxu1 %v9358_v29  ;;  %9644 = vmatprep.subr.bf16.mxu0 %v9291_v30 }
0x10b4   : > { %9685 = vmatprep.subr.bf16.mxu1 %v9355_v10 }
0x10b6   : > { %9645 = vmatpush2.bf16.msra.mxu0 %v9290_v41 }
0x10b7   : > { %9686 = vmatpush2.bf16.msra.mxu1 %v9354_v43  ;;  %9646 = vmatprep.subr.bf16.mxu0 %v9287_v22  ;;  %v9717_v22 = vrot.slane %v9704_v54, %v15262_v58 }
0x10b8   : > { %9687 = vmatprep.subr.bf16.mxu1 %v9351_v51 }
0x10ba   : > { %9647 = vmatpush2.bf16.msra.mxu0 %v9286_v57 }
0x10bb   : > { %9688 = vmatpush2.bf16.msra.mxu1 %v9350_v38  ;;  %9648 = vmatprep.subr.bf16.mxu0 %v9283_v15  ;;  %v9721_v38 = vrot.slane %v9704_v54, %v15263_v19 }
0x10bc   : > { %9689 = vmatprep.subr.bf16.mxu1 %v9347_v50 }
0x10be   : > { %9649 = vmatpush2.bf16.msra.mxu0 %v9282_v18 }
0x10bf   : > { %9690 = vmatpush2.bf16.msra.mxu1 %v9346_v13  ;;  %9650 = vmatprep.subr.bf16.mxu0 %v9279_v61 }
0x10c0   : > { %9691 = vmatprep.subr.bf16.mxu1 %v9343_v25 }
0x10c2   : > { %9651 = vmatpush2.bf16.msra.mxu0 %v9278_v49 }
0x10c3   : > { %9692 = vmatpush2.bf16.msra.mxu1 %v9342_v37  ;;  %9652 = vmatprep.subr.bf16.mxu0 %v9275_v21 }
0x10c4   : > { %9693 = vmatprep.subr.bf16.mxu1 %v9339_v9 }
0x10c6   : > { %9653 = vmatpush2.bf16.msra.mxu0 %v9274_v12 }
0x10c7   : > { %9694 = vmatpush2.bf16.msra.mxu1 %v9338_v6 }
0x10c9   : > { %9655 = vmatmul.mubr.bf16.vlgmr.msra.gmra.mxu0 %v14688_v11  ;;  %v9410_v20 = vpop.f32.mrf.mxu0 }
0x10ca   : > { %9696 = vmatmul.mubr.bf16.vlgmr.msra.gmra.mxu1 %v14692_v63  ;;  %v9451_v40 = vpop.f32.mrf.mxu1  ;;  %v9713_v63 = vrot.slane %v9704_v54, %v15261_v28 }
0x10cb   : > { %v9412_v56 = vpop.f32.mrf.mxu0  ;;  %v9452_v47 = vadd.f32 %v9451_v40, %v9410_v20 }
0x10cc   : > { %v9453_v16 = vpop.f32.mrf.mxu1 }
0x10cd   : > { %v9414_v34 = vpop.f32.mrf.mxu0  ;;  %v9454_v24 = vadd.f32 %v9453_v16, %v9412_v56 }
0x10ce   : > { %v9455_v59 = vpop.f32.mrf.mxu1 }
0x10cf   : > { %v9415_v60 = vpop.f32.mrf.mxu0 }
0x10d0   : > { %v9456_v4 = vpop.f32.mrf.mxu1 }
0x1109   : > { %v9492_v35 = vpop.f32.mrf.mxu0 }
0x110a   : > { %v9493_v48 = vadd.f32 %v9492_v35, %v9452_v47  ;;  %v9533_v1 = vpop.f32.mrf.mxu1 }
0x110b   : > { %v9494_v8 = vpop.f32.mrf.mxu0 }
0x110c   : > { %v9534_v11 = vadd.f32 %v9533_v1, %v9493_v48  ;;  %v9495_v55 = vadd.f32 %v9494_v8, %v9454_v24  ;;  %v9535_v26 = vpop.f32.mrf.mxu1 }
0x110d   : > { %v9496_v27 = vpop.f32.mrf.mxu0 }
0x110e   : > { %v9726_v45 = vmul.f32 %v9709_v17, %v9534_v11  ;;  %v9536_v39 = vadd.f32 %v9535_v26, %v9495_v55  ;;  %v9537_v44 = vpop.f32.mrf.mxu1 }
0x110f   : > { %v9497_v3 = vpop.f32.mrf.mxu0 }
0x1110   : > { %9730 = vst [vmem:[#allocation2 + $0x10] sm:$0xff] %v9726_v45  ;;  %v9727_v53 = vmul.f32 %v9713_v63, %v9536_v39  ;;  %v9538_v7 = vpop.f32.mrf.mxu1 }
0x1112   : > { %9731 = vst [vmem:[#allocation2] sm:$0xff] %v9727_v53 }
0x1149   : > { %v9574_v36 = vpop.f32.mrf.mxu0 }
0x114a   : > { %v9615_v42 = vpop.f32.mrf.mxu1 }
0x114b   : > { %v9576_v2 = vpop.f32.mrf.mxu0  ;;  %v9616_v52 = vadd.f32 %v9615_v42, %v9574_v36 }
0x114c   : > { %v9617_v5 = vpop.f32.mrf.mxu1 }
0x114d   : > { %v9578_v31 = vpop.f32.mrf.mxu0  ;;  %v9618_v28 = vadd.f32 %v9617_v5, %v9576_v2 }
0x114e   : > { %v9619_v29 = vpop.f32.mrf.mxu1 }
0x114f   : > { %v9579_v30 = vpop.f32.mrf.mxu0 }
0x1150   : > { %v9620_v10 = vpop.f32.mrf.mxu1 }
0x1189   : > { %v9656_v0 = vpop.f32.mrf.mxu0 }
0x118a   : > { %v9657_v41 = vadd.f32 %v9656_v0, %v9616_v52  ;;  %v9697_v43 = vpop.f32.mrf.mxu1 }
0x118b   : > { %v9658_v14 = vpop.f32.mrf.mxu0 }
0x118c   : > { %v9698_v51 = vadd.f32 %v9697_v43, %v9657_v41  ;;  %v9659_v62 = vadd.f32 %v9658_v14, %v9618_v28  ;;  %v9699_v57 = vpop.f32.mrf.mxu1 }
0x118d   : > { %v9660_v15 = vpop.f32.mrf.mxu0 }
0x118e   : > { %v9728_v50 = vmul.f32 %v9717_v22, %v9698_v51  ;;  %v9700_v23 = vadd.f32 %v9699_v57, %v9659_v62  ;;  %v9701_v32 = vpop.f32.mrf.mxu1  ;;  %9737 = sbr.rel (%p10345_p13) target bundleno = 4648 (0x1228), region = 144 }
0x118f   : > { %v9661_v18 = vpop.f32.mrf.mxu0 }
0x1190   : > { %9732 = vst [vmem:[#allocation2 + $0x18] sm:$0xff] %v9728_v50  ;;  %v9729_v13 = vmul.f32 %v9721_v38, %v9700_v23  ;;  %v9702_v61 = vpop.f32.mrf.mxu1 }
0x1192   : > { %9733 = vst [vmem:[#allocation2 + $0x8] sm:$0xff] %v9729_v13 }
0x1193   : > { %v9738_v33 = vld [vmem:[#allocation3] sm:$0xff]  ;;  %v11628_v58 = vmov 0   ;;  %v11629_v20 = vmov 1966171168   ;;  %v15284_v63 = vld [vmem:[#allocation44_spill] sm:$0xff]  ;;  %v15285_v5 = vlaneseq }
0x1194   : > { %11127 = vset.pattern.permute.xlu0 %v11628_v58  ;;  %v9779_v40 = vunpack.c.l.s4 %v11629_v20 }
0x1195   : > { %9741 = vperm.xlu0 %11127, %v9738_v33   ;;  %vm9803_vm14 = vcmp.lt.s32.totalorder %v15285_v5, 512 }
0x1196   : > { %v9780_v35 = vunpack.c.0.s8 %v9779_v40 }
0x1198   : > { %v9783_v27 = vsub.s32 %v9780_v35, %v15284_v63 }
0x1210   : > { %v9742_v25 = vpop.permute.xlu0 %9741 }
0x1211   : > { %v9744_v46 = vmul.f32 %v9742_v25, %v9726_v45  ;;  %v9745_v49 = vmul.f32 %v9742_v25, %v9727_v53  ;;  %v9746_v19 = vmul.f32 %v9742_v25, %v9728_v50  ;;  %v9747_v37 = vmul.f32 %v9742_v25, %v9729_v13 }
0x1213   : > { %v9748_v21 = vrot.slane %v9744_v46, 4  ;;  %v9754_v9 = vrot.slane %v9745_v49, 4  ;;  %v9760_v12 = vrot.slane %v9746_v19, 4  ;;  %v9766_v6 = vrot.slane %v9747_v37, 4 }
0x1215   : > { %v9749_v56 = vadd.f32 %v9748_v21, %v9744_v46  ;;  %v9755_v16 = vadd.f32 %v9754_v9, %v9745_v49  ;;  %v9761_v34 = vadd.f32 %v9760_v12, %v9746_v19  ;;  %v9767_v59 = vadd.f32 %v9766_v6, %v9747_v37 }
0x1217   : > { %v9750_v60 = vrot.slane %v9749_v56, 2  ;;  %v9756_v4 = vrot.slane %v9755_v16, 2  ;;  %v9762_v54 = vrot.slane %v9761_v34, 2  ;;  %v9768_v47 = vrot.slane %v9767_v59, 2 }
0x1219   : > { %v9751_v24 = vadd.f32 %v9750_v60, %v9749_v56  ;;  %v9757_v48 = vadd.f32 %v9756_v4, %v9755_v16  ;;  %v9763_v1 = vadd.f32 %v9762_v54, %v9761_v34  ;;  %v9769_v17 = vadd.f32 %v9768_v47, %v9767_v59 }
0x121b   : > { %v9752_v8 = vrot.slane %v9751_v24, 1  ;;  %v9758_v11 = vrot.slane %v9757_v48, 1  ;;  %v9764_v55 = vrot.slane %v9763_v1, 1  ;;  %v9770_v26 = vrot.slane %v9769_v17, 1 }
0x121d   : > { %v9753_v45 = vadd.f32 %v9752_v8, %v9751_v24  ;;  %v9759_v39 = vadd.f32 %v9758_v11, %v9757_v48  ;;  %v9765_v44 = vadd.f32 %v9764_v55, %v9763_v1  ;;  %v9771_v3 = vadd.f32 %v9770_v26, %v9769_v17 }
0x121f   : > { %v9776_v53 = vcombine.low %v9753_v45, %v9759_v39  ;;  %v9777_v7 = vcombine.low %v9765_v44, %v9771_v3 }
0x1221   : > { %v9784_v36 = vrot.slane %v9776_v53, %v9783_v27  ;;  %v9791_v42 = vrot.slane %v9777_v7, %v9783_v27 }
0x1223   : > { %v9792_v2 = vcombine.low %v9784_v36, %v9791_v42 }
0x1225   : > { %v9799_v31 = vrot.slane %v9792_v2, %v9783_v27 }
0x1227   : > { %9805 = vst.msk [vmem:[#allocation27] sm:$0xf] %vm9803_vm14, %v9799_v31 }
0x1228 PF: > { %s15286_s24 = sld [smem:[#allocation39_spill]]  ;;  %s11630_s21 = smov [#allocation27]  }
0x1229   : > { %s9813_s3 = sshll.u32 %s11630_s21, 4  ;;  %s9814_s3 = int_to_ptr.vmem [resolvable:$true] %s9813_s3 }
0x122a   : > { %s11512_s15 = scalar_lea.vmem %s9814_s3, 64  ;;  %p11519_p5 = scmp.lt.s32.totalorder %s9814_s3, %s9814_s3 }
0x122b   : > { %p11513_p3 = scmp.ne.s32.totalorder %s9814_s3, %s11512_s15  ;;  %p11520_p4 = scmp.lt.s32.totalorder %s11512_s15, %s11512_s15 }
0x122d   : > { %p11521_p0 = por %p11520_p4, %p11519_p5 }
0x122e   : > { %p10590_p2 = scmp.eq.s32.totalorder %s15286_s24, 1 }
0x1230   : > { %p11514_p6 = pnand %p11513_p3, %p10590_p2 }
0x1232   : > { %p11515_p7 = pneg %p11514_p6 }
0x1234   : > { %p11522_p9 = pnand %p11521_p0, %p11515_p7 }
0x1236   : > { %11525 = shalt.err (!%p11522_p9)
}
0x1237   : > { %s15287_s25 = sld [smem:[#allocation131_spill]] }
0x123d   : > { %10534 = dma.vmem_to_hbm [thread:$0]  (%p10590_p2), %s9814_s3, 64, %s15287_s25, [#allocation6]  }
0x123e   : > { %11585 = dma.done.wait (%p10590_p2), [#allocation6], 64  }
0x123f   : > { %11587 = vsyncadd (%p10590_p2), [#allocation6], 4294967232 }
0x1240 PF: > { %s15288_s21 = sld [smem:[#allocation40_spill]] }
0x1241   : > { %s15289_s18 = sld [smem:[#allocation37_spill]] }
0x1242   : > { %s15290_s19 = sld [smem:[#allocation38_spill]] }
0x1243   : > { %s15291_s20 = sld [smem:[#allocation41_spill]] }
0x1246   : > { %p41_p10 = scmp.ge.s32.totalorder %s15288_s21, 4  }
0x1248   :  { %43 = sbr.rel (!%p41_p10) target bundleno = 24 (0x18), region = 252 }
0x124d   :  { %9826 = vsyncpa [#allocation5], 1 }
0x124e   :  { %9828 = vsyncpa [#allocation5 + $0x1], 1 }
0x124f   :  { %9829 = vsyncpa [#allocation8], 1 }
0x1250   :  { %9831 = vsyncpa [#allocation8 + $0x1], 1 }
0x1251   :  { %9832 = vsyncpa [#allocation11], 1 }
0x1252   :  { %9834 = vsyncpa [#allocation11 + $0x1], 1 }
0x1253   :  { %9835 = vsyncpa [#allocation14], 1 }
0x1254   :  { %9837 = vsyncpa [#allocation14 + $0x1], 1 }
0x1255   :  { %9838 = vsyncpa [#allocation17], 1 }
0x1256   :  { %9840 = vsyncpa [#allocation17 + $0x1], 1 }
0x1257   :  { %9841 = vsyncpa [#allocation20], 1 }
0x1258   :  { %9843 = vsyncpa [#allocation20 + $0x1], 1 }
0x1259   :  { %9844 = vsyncpa [#allocation23], 1 }
0x125a   :  { %9845 = vsyncpa [#allocation26], 1 }
0x125b   :  { %9846 = vsyncpa [#allocation6], 1 }
0x125c   :  { %9848 = vsyncpa [#allocation6 + $0x1], 1 }

</bundles_post_ra>
